<compile_context>
chip_gen: v6e
topology: v6e:2x2x1
jax: 0.10.0
libtpu: 0.0.40
codegen_flags: <defaults>
</compile_context>

<pallas_src>
import numpy as np
import jax
import jax.numpy as jnp
from jax import lax
from jax.experimental import pallas as pl
from jax.experimental.pallas import tpu as pltpu

NUM_CLASSES = 6
NUM_DFBOXES = (4, 6, 4)          # default boxes per cell of fm1 / fm2 / fm3
FM_CHANNELS = (16, 16, 16)
IMG = 16                         # input spatial size (input is N, 3, 16, 16)


# ==========================================================================
# In-kernel building blocks (operate on VMEM refs / traced values)
# ==========================================================================
def _conv3x3(src_ref, H, W, cin, w_ref, b_ref, *, relu):
    """3x3 'same' convolution on a flattened activation held in VMEM.

    src_ref : (H*W + 2*(W+1), cin) f32 scratch.  Rows [W+1, W+1+H*W) hold the
              activation in row-major (h*W + w) order; the halo rows are zero.
    w_ref   : (9*cin, cout) bf16, tap-major rows ((kh*3 + kw)*cin + ci).
    b_ref   : (1, cout) f32.
    Returns : (H*W, cout) f32.

    Each tap is a shifted contiguous slice of the flattened activation (MXU dot
    per tap, f32 accumulate).  The out-of-row reads of the left/right taps are
    zeroed with a per-row mask; top/bottom taps are handled by the zero halo.
    """
    hw = H * W
    halo = W + 1
    cout = w_ref.shape[1]
    # wcol == r % W ; W is a power of two for every feature map in this config.
    r = lax.broadcasted_iota(jnp.int32, (hw, 1), 0)
    wcol = jnp.bitwise_and(r, W - 1)
    acc = jnp.zeros((hw, cout), jnp.float32)
    for di in range(3):
        for dj in range(3):
            shift = (di - 1) * W + (dj - 1)
            tap = src_ref[pl.ds(halo + shift, hw), :]
            if dj == 0:        # reads column w-1 -> mask rows with w == 0
                tap = jnp.where(wcol >= 1, tap, 0.0)
            elif dj == 2:      # reads column w+1 -> mask rows with w == W-1
                tap = jnp.where(wcol <= W - 2, tap, 0.0)
            w_tap = w_ref[pl.ds((di * 3 + dj) * cin, cin), :]
            acc += jnp.dot(tap.astype(jnp.bfloat16), w_tap,
                           preferred_element_type=jnp.float32)
    acc = acc + b_ref[...]
    if relu:
        acc = jnp.maximum(acc, 0.0)
    return acc


def _stage(dst_ref, offset, value):
    """Zero a halo scratch buffer and store `value` starting at row `offset`."""
    dst_ref[...] = jnp.zeros(dst_ref.shape, dst_ref.dtype)
    dst_ref[pl.ds(offset, value.shape[0]), :] = value


def _maxpool2x2(src_ref, src_off, H, W, dst_ref, dst_off):
    """2x2 / stride-2 max pool between flattened activations (both in VMEM)."""
    Ho, Wo = H // 2, W // 2
    for h in range(Ho):
        base = src_off + 2 * h * W
        row = src_ref[pl.ds(base, Wo, stride=2), :]
        for s in (1, W, W + 1):
            row = jnp.maximum(row, src_ref[pl.ds(base + s, Wo, stride=2), :])
        dst_ref[pl.ds(dst_off + h * Wo, Wo), :] = row


# ==========================================================================
# The fused kernel: whole SSD forward for one batch element per grid step
# ==========================================================================
def _ssd_fused_kernel(
    x_ref,
    w1, b1, w2, b2, w3, b3, w4, b4, w5, b5,
    hw1, hb1, hw2, hb2, hw3, hb3,
    o1_ref, o2_ref, o3_ref,
    s_c1, s_c2, s_p1, s_c3, s_fm1, s_c4, s_fm2, s_c5, s_fm3,
):
    # ---- neck -------------------------------------------------------------
    _stage(s_c1, 17, x_ref[0])                               # (256, 3), halo 17
    a = _conv3x3(s_c1, 16, 16, 3, w1, b1, relu=True)         # (256, 8)
    _stage(s_c2, 17, a)
    a = _conv3x3(s_c2, 16, 16, 8, w2, b2, relu=True)         # (256, 8)
    s_p1[...] = a                                            # pool source (no halo)

    s_c3[...] = jnp.zeros(s_c3.shape, s_c3.dtype)
    _maxpool2x2(s_p1, 0, 16, 16, s_c3, 9)                    # 16x16 -> 8x8
    fm1 = _conv3x3(s_c3, 8, 8, 8, w3, b3, relu=True)         # (64, 16)
    _stage(s_fm1, 9, fm1)

    s_c4[...] = jnp.zeros(s_c4.shape, s_c4.dtype)
    _maxpool2x2(s_fm1, 9, 8, 8, s_c4, 5)                     # 8x8 -> 4x4
    fm2 = _conv3x3(s_c4, 4, 4, 16, w4, b4, relu=True)        # (16, 16)
    _stage(s_fm2, 5, fm2)

    # conv5 is stride-2: compute the stride-1 conv and keep output positions
    # (0,0),(0,2),(2,0),(2,2)  ==  flattened rows 0, 2, 8, 10.
    s_c5[...] = _conv3x3(s_fm2, 4, 4, 16, w5, b5, relu=True)  # (16, 16)
    s_fm3[...] = jnp.zeros(s_fm3.shape, s_fm3.dtype)
    for i, rsel in enumerate((0, 2, 8, 10)):
        s_fm3[pl.ds(3 + i, 1), :] = s_c5[pl.ds(rsel, 1), :]

    # ---- head (loc & conf merged along Cout per feature map) ---------------
    o1_ref[0] = _conv3x3(s_fm1, 8, 8, 16, hw1, hb1, relu=False)  # (64, 40)
    o2_ref[0] = _conv3x3(s_fm2, 4, 4, 16, hw2, hb2, relu=False)  # (16, 60)
    o3_ref[0] = _conv3x3(s_fm3, 2, 2, 16, hw3, hb3, relu=False)  # (4, 40)


# ==========================================================================
# Parameters (deterministic synthetic init)
# ==========================================================================
def _conv_params(key, cin, cout, k=3):
    kw, kb = jax.random.split(key)
    w = 0.1 * jax.random.normal(kw, (k, k, cin, cout), dtype=jnp.float32)
    b = 0.01 * jax.random.normal(kb, (cout,), dtype=jnp.float32)
    return w, b


def init_params(key):
    keys = jax.random.split(key, 16)
    p = {}
    p["conv1"] = _conv_params(keys[0], 3, 8)
    p["conv2"] = _conv_params(keys[1], 8, 8)
    p["conv3"] = _conv_params(keys[2], 8, FM_CHANNELS[0])
    p["conv4"] = _conv_params(keys[3], FM_CHANNELS[0], FM_CHANNELS[1])
    p["conv5"] = _conv_params(keys[4], FM_CHANNELS[1], FM_CHANNELS[2])
    for i, (c, nb) in enumerate(zip(FM_CHANNELS, NUM_DFBOXES)):
        p[f"loc{i}"] = _conv_params(keys[5 + 2 * i], c, nb * 4)
        p[f"conf{i}"] = _conv_params(keys[6 + 2 * i], c, nb * NUM_CLASSES)
    return p


def pack_params(raw):
    """Flatten conv weights to (9*Cin, Cout) bf16, merge loc+conf per fm."""
    p = {}
    for name in ("conv1", "conv2", "conv3", "conv4", "conv5"):
        w, b = raw[name]
        k, _, cin, cout = w.shape
        p[name] = (w.reshape(k * k * cin, cout).astype(jnp.bfloat16),
                   b.reshape(1, cout).astype(jnp.float32))
    for i, nb in enumerate(NUM_DFBOXES):
        lw, lb = raw[f"loc{i}"]
        cw, cb = raw[f"conf{i}"]
        w = jnp.concatenate([lw, cw], axis=-1)          # (3, 3, 16, nb*(4+C))
        b = jnp.concatenate([lb, cb], axis=0)
        cout = w.shape[-1]
        p[f"head{i + 1}"] = (w.reshape(9 * w.shape[2], cout).astype(jnp.bfloat16),
                             b.reshape(1, cout).astype(jnp.float32))
    return p


# ==========================================================================
# Host-side wrapper
# ==========================================================================
_LAYERS = ("conv1", "conv2", "conv3", "conv4", "conv5", "head1", "head2", "head3")


def _split_head(h, nb):
    """(N, cells, nb*(4+C)) merged head output -> (locs, confs)."""
    N, cells, _ = h.shape
    loc = h[..., : nb * 4].reshape(N, cells * nb, 4)
    conf = h[..., nb * 4:].reshape(N, cells * nb, NUM_CLASSES)
    return loc, conf


def ssd_forward(params, x_nchw):
    """x_nchw: (N, 3, 16, 16) f32 -> (locs (N, 368, 4), confs (N, 368, 6))."""
    N = x_nchw.shape[0]
    x = jnp.transpose(x_nchw, (0, 2, 3, 1)).astype(jnp.float32)   # NCHW -> NHWC
    x = x.reshape(N, IMG * IMG, 3)                                # flattened spatial

    ins = [x]
    in_specs = [pl.BlockSpec((1, IMG * IMG, 3), lambda n: (n, 0, 0))]
    for name in _LAYERS:
        w, b = params[name]
        ins += [w, b]
        in_specs += [pl.BlockSpec(w.shape, lambda n: (0, 0)),
                     pl.BlockSpec(b.shape, lambda n: (0, 0))]

    head_shapes = ((64, NUM_DFBOXES[0] * (4 + NUM_CLASSES)),   # (64, 40)
                   (16, NUM_DFBOXES[1] * (4 + NUM_CLASSES)),   # (16, 60)
                   (4, NUM_DFBOXES[2] * (4 + NUM_CLASSES)))    # (4, 40)
    out_shape = tuple(jax.ShapeDtypeStruct((N,) + s, jnp.float32) for s in head_shapes)
    out_specs = [pl.BlockSpec((1,) + s, lambda n: (n, 0, 0)) for s in head_shapes]

    scratch_shapes = [
        pltpu.VMEM((290, 3), jnp.float32),    # conv1 input  (16x16, halo 17)
        pltpu.VMEM((290, 8), jnp.float32),    # conv2 input
        pltpu.VMEM((256, 8), jnp.float32),    # conv2 output / pool1 source
        pltpu.VMEM((82, 8), jnp.float32),     # conv3 input  (8x8,  halo 9)
        pltpu.VMEM((82, 16), jnp.float32),    # fm1          (pool2 + head1 source)
        pltpu.VMEM((26, 16), jnp.float32),    # conv4 input  (4x4,  halo 5)
        pltpu.VMEM((26, 16), jnp.float32),    # fm2          (conv5 + head2 source)
        pltpu.VMEM((16, 16), jnp.float32),    # conv5 stride-1 output
        pltpu.VMEM((10, 16), jnp.float32),    # fm3          (2x2,  halo 3)
    ]

    h1, h2, h3 = pl.pallas_call(
        _ssd_fused_kernel,
        out_shape=out_shape,
        grid_spec=pltpu.PrefetchScalarGridSpec(
            num_scalar_prefetch=0,
            grid=(N,),
            in_specs=in_specs,
            out_specs=out_specs,
            scratch_shapes=scratch_shapes,
        ),
        compiler_params=pltpu.CompilerParams(
            dimension_semantics=("parallel",)),   # v7x: split the batch over 2 TCs
    )(*ins)

    l1, c1 = _split_head(h1, NUM_DFBOXES[0])
    l2, c2 = _split_head(h2, NUM_DFBOXES[1])
    l3, c3 = _split_head(h3, NUM_DFBOXES[2])
    return (jnp.concatenate([l1, l2, l3], axis=1),
            jnp.concatenate([c1, c2, c3], axis=1))


# ==========================================================================
# Pure-JAX/XLA reference (same math: bf16 operands, f32 accumulate)
# ==========================================================================
def _ref_conv(x, w, b, stride=1, relu=True):
    y = lax.conv_general_dilated(
        x.astype(jnp.bfloat16), w.astype(jnp.bfloat16),
        window_strides=(stride, stride), padding=((1, 1), (1, 1)),
        dimension_numbers=("NHWC", "HWIO", "NHWC"),
        preferred_element_type=jnp.float32)
    y = y + b
    return jnp.maximum(y, 0.0) if relu else y


def _ref_pool(x):
    N, H, W, C = x.shape
    return jnp.max(x.reshape(N, H // 2, 2, W // 2, 2, C), axis=(2, 4))


def ssd_reference(raw, x_nchw):
    x = jnp.transpose(x_nchw, (0, 2, 3, 1)).astype(jnp.float32)
    a = _ref_conv(x, *raw["conv1"])
    a = _ref_conv(a, *raw["conv2"])
    a = _ref_pool(a)
    fm1 = _ref_conv(a, *raw["conv3"])
    a = _ref_pool(fm1)
    fm2 = _ref_conv(a, *raw["conv4"])
    fm3 = _ref_conv(fm2, *raw["conv5"], stride=2)
    locs, confs = [], []
    for i, (fm, nb) in enumerate(zip((fm1, fm2, fm3), NUM_DFBOXES)):
        lw, lb = raw[f"loc{i}"]
        cw, cb = raw[f"conf{i}"]
        mw = jnp.concatenate([lw, cw], axis=-1)
        mb = jnp.concatenate([lb, cb], axis=0)
        h = _ref_conv(fm, mw, mb, relu=False)
        N, H, W, _ = h.shape
        l, c = _split_head(h.reshape(N, H * W, -1), nb)
        locs.append(l)
        confs.append(c)
    return jnp.concatenate(locs, axis=1), jnp.concatenate(confs, axis=1)


# ==========================================================================
if __name__ == "__main__":
    key = jax.random.PRNGKey(0)
    pkey, xkey = jax.random.split(key)
    raw = init_params(pkey)
    params = pack_params(raw)

    x = jax.random.normal(xkey, (2, 3, 16, 16), dtype=jnp.float32)  # NCHW input

    locs, confs = jax.jit(ssd_forward)(params, x)
    jax.block_until_ready((locs, confs))

    total_anchors = 8 * 8 * 4 + 4 * 4 * 6 + 2 * 2 * 4  # 368
    assert locs.shape == (2, total_anchors, 4), locs.shape
    assert confs.shape == (2, total_anchors, NUM_CLASSES), confs.shape
    assert bool(jnp.all(jnp.isfinite(locs))) and bool(jnp.all(jnp.isfinite(confs)))

    # Correctness check against a plain XLA implementation of the same network.
    ref_locs, ref_confs = jax.jit(ssd_reference)(raw, x)
    np.testing.assert_allclose(np.asarray(locs), np.asarray(ref_locs),
                               rtol=2e-3, atol=2e-3)
    np.testing.assert_allclose(np.asarray(confs), np.asarray(ref_confs),
                               rtol=2e-3, atol=2e-3)

    print("KERNEL_OK")
</pallas_src>

<mosaic_0001>
module attributes {stable_mosaic.version = 11 : i64} {
  func.func @_ssd_fused_kernel(%arg0: i32, %arg1: memref<1x256x3xf32, #tpu.memory_space<vmem>>, %arg2: memref<27x8xbf16, #tpu.memory_space<vmem>>, %arg3: memref<1x8xf32, #tpu.memory_space<vmem>>, %arg4: memref<72x8xbf16, #tpu.memory_space<vmem>>, %arg5: memref<1x8xf32, #tpu.memory_space<vmem>>, %arg6: memref<72x16xbf16, #tpu.memory_space<vmem>>, %arg7: memref<1x16xf32, #tpu.memory_space<vmem>>, %arg8: memref<144x16xbf16, #tpu.memory_space<vmem>>, %arg9: memref<1x16xf32, #tpu.memory_space<vmem>>, %arg10: memref<144x16xbf16, #tpu.memory_space<vmem>>, %arg11: memref<1x16xf32, #tpu.memory_space<vmem>>, %arg12: memref<144x40xbf16, #tpu.memory_space<vmem>>, %arg13: memref<1x40xf32, #tpu.memory_space<vmem>>, %arg14: memref<144x60xbf16, #tpu.memory_space<vmem>>, %arg15: memref<1x60xf32, #tpu.memory_space<vmem>>, %arg16: memref<144x40xbf16, #tpu.memory_space<vmem>>, %arg17: memref<1x40xf32, #tpu.memory_space<vmem>>, %arg18: memref<1x64x40xf32, #tpu.memory_space<vmem>>, %arg19: memref<1x16x60xf32, #tpu.memory_space<vmem>>, %arg20: memref<1x4x40xf32, #tpu.memory_space<vmem>>, %arg21: memref<290x3xf32, #tpu.memory_space<vmem>>, %arg22: memref<290x8xf32, #tpu.memory_space<vmem>>, %arg23: memref<256x8xf32, #tpu.memory_space<vmem>>, %arg24: memref<82x8xf32, #tpu.memory_space<vmem>>, %arg25: memref<82x16xf32, #tpu.memory_space<vmem>>, %arg26: memref<26x16xf32, #tpu.memory_space<vmem>>, %arg27: memref<26x16xf32, #tpu.memory_space<vmem>>, %arg28: memref<16x16xf32, #tpu.memory_space<vmem>>, %arg29: memref<10x16xf32, #tpu.memory_space<vmem>>) attributes {dimension_semantics = [#tpu.dimension_semantics<parallel>], iteration_bounds = array<i64: 2>, scalar_prefetch = 0 : i64, scratch_operands = 9 : i64, tpu.core_type = #tpu.core_type<tc>, window_params = [{transform_indices = @transform_0, window_bounds = array<i64: 1, 256, 3>}, {pipeline_mode = #tpu.pipeline_mode<synchronous>, transform_indices = @transform_1, window_bounds = array<i64: 27, 8>}, {pipeline_mode = #tpu.pipeline_mode<synchronous>, transform_indices = @transform_2, window_bounds = array<i64: 1, 8>}, {pipeline_mode = #tpu.pipeline_mode<synchronous>, transform_indices = @transform_3, window_bounds = array<i64: 72, 8>}, {pipeline_mode = #tpu.pipeline_mode<synchronous>, transform_indices = @transform_4, window_bounds = array<i64: 1, 8>}, {pipeline_mode = #tpu.pipeline_mode<synchronous>, transform_indices = @transform_5, window_bounds = array<i64: 72, 16>}, {pipeline_mode = #tpu.pipeline_mode<synchronous>, transform_indices = @transform_6, window_bounds = array<i64: 1, 16>}, {pipeline_mode = #tpu.pipeline_mode<synchronous>, transform_indices = @transform_7, window_bounds = array<i64: 144, 16>}, {pipeline_mode = #tpu.pipeline_mode<synchronous>, transform_indices = @transform_8, window_bounds = array<i64: 1, 16>}, {pipeline_mode = #tpu.pipeline_mode<synchronous>, transform_indices = @transform_9, window_bounds = array<i64: 144, 16>}, {pipeline_mode = #tpu.pipeline_mode<synchronous>, transform_indices = @transform_10, window_bounds = array<i64: 1, 16>}, {pipeline_mode = #tpu.pipeline_mode<synchronous>, transform_indices = @transform_11, window_bounds = array<i64: 144, 40>}, {pipeline_mode = #tpu.pipeline_mode<synchronous>, transform_indices = @transform_12, window_bounds = array<i64: 1, 40>}, {pipeline_mode = #tpu.pipeline_mode<synchronous>, transform_indices = @transform_13, window_bounds = array<i64: 144, 60>}, {pipeline_mode = #tpu.pipeline_mode<synchronous>, transform_indices = @transform_14, window_bounds = array<i64: 1, 60>}, {pipeline_mode = #tpu.pipeline_mode<synchronous>, transform_indices = @transform_15, window_bounds = array<i64: 144, 40>}, {pipeline_mode = #tpu.pipeline_mode<synchronous>, transform_indices = @transform_16, window_bounds = array<i64: 1, 40>}, {transform_indices = @transform_17, window_bounds = array<i64: 1, 64, 40>}, {transform_indices = @transform_18, window_bounds = array<i64: 1, 16, 60>}, {transform_indices = @transform_19, window_bounds = array<i64: 1, 4, 40>}]} {
    %c0 = arith.constant 0 : index
    %c0_0 = arith.constant 0 : index
    %c0_1 = arith.constant 0 : index
    %0 = vector.load %arg1[%c0, %c0_0, %c0_1] : memref<1x256x3xf32, #tpu.memory_space<vmem>>, vector<1x256x3xf32>
    %1 = vector.shape_cast %0 : vector<1x256x3xf32> to vector<256x3xf32>
    %cst = arith.constant 0.000000e+00 : f32
    %2 = vector.broadcast %cst : f32 to vector<290x3xf32>
    %c0_2 = arith.constant 0 : index
    %c0_3 = arith.constant 0 : index
    %3 = vector.load %arg21[%c0_2, %c0_3] : memref<290x3xf32, #tpu.memory_space<vmem>>, vector<290x3xf32>
    tpu.vector_store %arg21[%c0_2, %c0_3], %2 {strides = array<i32>} : memref<290x3xf32, #tpu.memory_space<vmem>>, vector<290x3xf32>,
    %c17 = arith.constant 17 : index
    %c0_4 = arith.constant 0 : index
    %4 = vector.load %arg21[%c17, %c0_4] : memref<290x3xf32, #tpu.memory_space<vmem>>, vector<256x3xf32>
    tpu.vector_store %arg21[%c17, %c0_4], %1 {strides = array<i32>} : memref<290x3xf32, #tpu.memory_space<vmem>>, vector<256x3xf32>,
    %5 = tpu.iota {dimensions = array<i32: 0>} : vector<256x1xi32>
    %c15_i32 = arith.constant 15 : i32
    %6 = vector.broadcast %c15_i32 : i32 to vector<256x1xi32>
    %7 = arith.andi %5, %6 : vector<256x1xi32>
    %cst_5 = arith.constant 0.000000e+00 : f32
    %8 = vector.broadcast %cst_5 : f32 to vector<256x8xf32>
    %c0_6 = arith.constant 0 : index
    %c0_7 = arith.constant 0 : index
    %9 = vector.load %arg21[%c0_6, %c0_7] : memref<290x3xf32, #tpu.memory_space<vmem>>, vector<256x3xf32>
    %c1_i32 = arith.constant 1 : i32
    %10 = vector.broadcast %c1_i32 : i32 to vector<256x1xi32>
    %11 = arith.cmpi sge, %7, %10 : vector<256x1xi32>
    %cst_8 = arith.constant 0.000000e+00 : f32
    %12 = vector.shape_cast %11 : vector<256x1xi1> to vector<256x1xi1>
    %13 = vector.broadcast %12 : vector<256x1xi1> to vector<256x3xi1>
    %14 = vector.broadcast %cst_8 : f32 to vector<256x3xf32>
    %15 = arith.select %13, %9, %14 : vector<256x3xi1>, vector<256x3xf32>
    %c0_9 = arith.constant 0 : index
    %c0_10 = arith.constant 0 : index
    %16 = vector.load %arg2[%c0_9, %c0_10] : memref<27x8xbf16, #tpu.memory_space<vmem>>, vector<3x8xbf16>
    %17 = arith.truncf %15 : vector<256x3xf32> to vector<256x3xbf16>
    %cst_11 = arith.constant dense<0.000000e+00> : vector<256x8xf32>
    %18 = tpu.matmul %17, %16, %cst_11 {dimension_numbers = #tpu.dot_dimension_numbers<[1], [0], [0], [1], [0, 0, 1, 1], [], []>} : vector<256x3xbf16>, vector<3x8xbf16>, vector<256x8xf32> -> vector<256x8xf32>
    %19 = arith.addf %8, %18 : vector<256x8xf32>
    %c1 = arith.constant 1 : index
    %c0_12 = arith.constant 0 : index
    %20 = vector.load %arg21[%c1, %c0_12] : memref<290x3xf32, #tpu.memory_space<vmem>>, vector<256x3xf32>
    %c3 = arith.constant 3 : index
    %c0_13 = arith.constant 0 : index
    %21 = vector.load %arg2[%c3, %c0_13] : memref<27x8xbf16, #tpu.memory_space<vmem>>, vector<3x8xbf16>
    %22 = arith.truncf %20 : vector<256x3xf32> to vector<256x3xbf16>
    %cst_14 = arith.constant dense<0.000000e+00> : vector<256x8xf32>
    %23 = tpu.matmul %22, %21, %cst_14 {dimension_numbers = #tpu.dot_dimension_numbers<[1], [0], [0], [1], [0, 0, 1, 1], [], []>} : vector<256x3xbf16>, vector<3x8xbf16>, vector<256x8xf32> -> vector<256x8xf32>
    %24 = arith.addf %19, %23 : vector<256x8xf32>
    %c2 = arith.constant 2 : index
    %c0_15 = arith.constant 0 : index
    %25 = vector.load %arg21[%c2, %c0_15] : memref<290x3xf32, #tpu.memory_space<vmem>>, vector<256x3xf32>
    %c14_i32 = arith.constant 14 : i32
    %26 = vector.broadcast %c14_i32 : i32 to vector<256x1xi32>
    %27 = arith.cmpi sle, %7, %26 : vector<256x1xi32>
    %cst_16 = arith.constant 0.000000e+00 : f32
    %28 = vector.shape_cast %27 : vector<256x1xi1> to vector<256x1xi1>
    %29 = vector.broadcast %28 : vector<256x1xi1> to vector<256x3xi1>
    %30 = vector.broadcast %cst_16 : f32 to vector<256x3xf32>
    %31 = arith.select %29, %25, %30 : vector<256x3xi1>, vector<256x3xf32>
    %c6 = arith.constant 6 : index
    %c0_17 = arith.constant 0 : index
    %32 = vector.load %arg2[%c6, %c0_17] : memref<27x8xbf16, #tpu.memory_space<vmem>>, vector<3x8xbf16>
    %33 = arith.truncf %31 : vector<256x3xf32> to vector<256x3xbf16>
    %cst_18 = arith.constant dense<0.000000e+00> : vector<256x8xf32>
    %34 = tpu.matmul %33, %32, %cst_18 {dimension_numbers = #tpu.dot_dimension_numbers<[1], [0], [0], [1], [0, 0, 1, 1], [], []>} : vector<256x3xbf16>, vector<3x8xbf16>, vector<256x8xf32> -> vector<256x8xf32>
    %35 = arith.addf %24, %34 : vector<256x8xf32>
    %c16 = arith.constant 16 : index
    %c0_19 = arith.constant 0 : index
    %36 = vector.load %arg21[%c16, %c0_19] : memref<290x3xf32, #tpu.memory_space<vmem>>, vector<256x3xf32>
    %c1_i32_20 = arith.constant 1 : i32
    %37 = vector.broadcast %c1_i32_20 : i32 to vector<256x1xi32>
    %38 = arith.cmpi sge, %7, %37 : vector<256x1xi32>
    %cst_21 = arith.constant 0.000000e+00 : f32
    %39 = vector.shape_cast %38 : vector<256x1xi1> to vector<256x1xi1>
    %40 = vector.broadcast %39 : vector<256x1xi1> to vector<256x3xi1>
    %41 = vector.broadcast %cst_21 : f32 to vector<256x3xf32>
    %42 = arith.select %40, %36, %41 : vector<256x3xi1>, vector<256x3xf32>
    %c9 = arith.constant 9 : index
    %c0_22 = arith.constant 0 : index
    %43 = vector.load %arg2[%c9, %c0_22] : memref<27x8xbf16, #tpu.memory_space<vmem>>, vector<3x8xbf16>
    %44 = arith.truncf %42 : vector<256x3xf32> to vector<256x3xbf16>
    %cst_23 = arith.constant dense<0.000000e+00> : vector<256x8xf32>
    %45 = tpu.matmul %44, %43, %cst_23 {dimension_numbers = #tpu.dot_dimension_numbers<[1], [0], [0], [1], [0, 0, 1, 1], [], []>} : vector<256x3xbf16>, vector<3x8xbf16>, vector<256x8xf32> -> vector<256x8xf32>
    %46 = arith.addf %35, %45 : vector<256x8xf32>
    %c17_24 = arith.constant 17 : index
    %c0_25 = arith.constant 0 : index
    %47 = vector.load %arg21[%c17_24, %c0_25] : memref<290x3xf32, #tpu.memory_space<vmem>>, vector<256x3xf32>
    %c12 = arith.constant 12 : index
    %c0_26 = arith.constant 0 : index
    %48 = vector.load %arg2[%c12, %c0_26] : memref<27x8xbf16, #tpu.memory_space<vmem>>, vector<3x8xbf16>
    %49 = arith.truncf %47 : vector<256x3xf32> to vector<256x3xbf16>
    %cst_27 = arith.constant dense<0.000000e+00> : vector<256x8xf32>
    %50 = tpu.matmul %49, %48, %cst_27 {dimension_numbers = #tpu.dot_dimension_numbers<[1], [0], [0], [1], [0, 0, 1, 1], [], []>} : vector<256x3xbf16>, vector<3x8xbf16>, vector<256x8xf32> -> vector<256x8xf32>
    %51 = arith.addf %46, %50 : vector<256x8xf32>
    %c18 = arith.constant 18 : index
    %c0_28 = arith.constant 0 : index
    %52 = vector.load %arg21[%c18, %c0_28] : memref<290x3xf32, #tpu.memory_space<vmem>>, vector<256x3xf32>
    %c14_i32_29 = arith.constant 14 : i32
    %53 = vector.broadcast %c14_i32_29 : i32 to vector<256x1xi32>
    %54 = arith.cmpi sle, %7, %53 : vector<256x1xi32>
    %cst_30 = arith.constant 0.000000e+00 : f32
    %55 = vector.shape_cast %54 : vector<256x1xi1> to vector<256x1xi1>
    %56 = vector.broadcast %55 : vector<256x1xi1> to vector<256x3xi1>
    %57 = vector.broadcast %cst_30 : f32 to vector<256x3xf32>
    %58 = arith.select %56, %52, %57 : vector<256x3xi1>, vector<256x3xf32>
    %c15 = arith.constant 15 : index
    %c0_31 = arith.constant 0 : index
    %59 = vector.load %arg2[%c15, %c0_31] : memref<27x8xbf16, #tpu.memory_space<vmem>>, vector<3x8xbf16>
    %60 = arith.truncf %58 : vector<256x3xf32> to vector<256x3xbf16>
    %cst_32 = arith.constant dense<0.000000e+00> : vector<256x8xf32>
    %61 = tpu.matmul %60, %59, %cst_32 {dimension_numbers = #tpu.dot_dimension_numbers<[1], [0], [0], [1], [0, 0, 1, 1], [], []>} : vector<256x3xbf16>, vector<3x8xbf16>, vector<256x8xf32> -> vector<256x8xf32>
    %62 = arith.addf %51, %61 : vector<256x8xf32>
    %c32 = arith.constant 32 : index
    %c0_33 = arith.constant 0 : index
    %63 = vector.load %arg21[%c32, %c0_33] : memref<290x3xf32, #tpu.memory_space<vmem>>, vector<256x3xf32>
    %c1_i32_34 = arith.constant 1 : i32
    %64 = vector.broadcast %c1_i32_34 : i32 to vector<256x1xi32>
    %65 = arith.cmpi sge, %7, %64 : vector<256x1xi32>
    %cst_35 = arith.constant 0.000000e+00 : f32
    %66 = vector.shape_cast %65 : vector<256x1xi1> to vector<256x1xi1>
    %67 = vector.broadcast %66 : vector<256x1xi1> to vector<256x3xi1>
    %68 = vector.broadcast %cst_35 : f32 to vector<256x3xf32>
    %69 = arith.select %67, %63, %68 : vector<256x3xi1>, vector<256x3xf32>
    %c18_36 = arith.constant 18 : index
    %c0_37 = arith.constant 0 : index
    %70 = vector.load %arg2[%c18_36, %c0_37] : memref<27x8xbf16, #tpu.memory_space<vmem>>, vector<3x8xbf16>
    %71 = arith.truncf %69 : vector<256x3xf32> to vector<256x3xbf16>
    %cst_38 = arith.constant dense<0.000000e+00> : vector<256x8xf32>
    %72 = tpu.matmul %71, %70, %cst_38 {dimension_numbers = #tpu.dot_dimension_numbers<[1], [0], [0], [1], [0, 0, 1, 1], [], []>} : vector<256x3xbf16>, vector<3x8xbf16>, vector<256x8xf32> -> vector<256x8xf32>
    %73 = arith.addf %62, %72 : vector<256x8xf32>
    %c33 = arith.constant 33 : index
    %c0_39 = arith.constant 0 : index
    %74 = vector.load %arg21[%c33, %c0_39] : memref<290x3xf32, #tpu.memory_space<vmem>>, vector<256x3xf32>
    %c21 = arith.constant 21 : index
    %c0_40 = arith.constant 0 : index
    %75 = vector.load %arg2[%c21, %c0_40] : memref<27x8xbf16, #tpu.memory_space<vmem>>, vector<3x8xbf16>
    %76 = arith.truncf %74 : vector<256x3xf32> to vector<256x3xbf16>
    %cst_41 = arith.constant dense<0.000000e+00> : vector<256x8xf32>
    %77 = tpu.matmul %76, %75, %cst_41 {dimension_numbers = #tpu.dot_dimension_numbers<[1], [0], [0], [1], [0, 0, 1, 1], [], []>} : vector<256x3xbf16>, vector<3x8xbf16>, vector<256x8xf32> -> vector<256x8xf32>
    %78 = arith.addf %73, %77 : vector<256x8xf32>
    %c34 = arith.constant 34 : index
    %c0_42 = arith.constant 0 : index
    %79 = vector.load %arg21[%c34, %c0_42] : memref<290x3xf32, #tpu.memory_space<vmem>>, vector<256x3xf32>
    %c14_i32_43 = arith.constant 14 : i32
    %80 = vector.broadcast %c14_i32_43 : i32 to vector<256x1xi32>
    %81 = arith.cmpi sle, %7, %80 : vector<256x1xi32>
    %cst_44 = arith.constant 0.000000e+00 : f32
    %82 = vector.shape_cast %81 : vector<256x1xi1> to vector<256x1xi1>
    %83 = vector.broadcast %82 : vector<256x1xi1> to vector<256x3xi1>
    %84 = vector.broadcast %cst_44 : f32 to vector<256x3xf32>
    %85 = arith.select %83, %79, %84 : vector<256x3xi1>, vector<256x3xf32>
    %c24 = arith.constant 24 : index
    %c0_45 = arith.constant 0 : index
    %86 = vector.load %arg2[%c24, %c0_45] : memref<27x8xbf16, #tpu.memory_space<vmem>>, vector<3x8xbf16>
    %87 = arith.truncf %85 : vector<256x3xf32> to vector<256x3xbf16>
    %cst_46 = arith.constant dense<0.000000e+00> : vector<256x8xf32>
    %88 = tpu.matmul %87, %86, %cst_46 {dimension_numbers = #tpu.dot_dimension_numbers<[1], [0], [0], [1], [0, 0, 1, 1], [], []>} : vector<256x3xbf16>, vector<3x8xbf16>, vector<256x8xf32> -> vector<256x8xf32>
    %89 = arith.addf %78, %88 : vector<256x8xf32>
    %c0_47 = arith.constant 0 : index
    %c0_48 = arith.constant 0 : index
    %90 = vector.load %arg3[%c0_47, %c0_48] : memref<1x8xf32, #tpu.memory_space<vmem>>, vector<1x8xf32>
    %91 = vector.broadcast %90 : vector<1x8xf32> to vector<256x8xf32>
    %92 = arith.addf %89, %91 : vector<256x8xf32>
    %cst_49 = arith.constant 0.000000e+00 : f32
    %93 = vector.broadcast %cst_49 : f32 to vector<256x8xf32>
    %94 = arith.maximumf %92, %93 : vector<256x8xf32>
    %cst_50 = arith.constant 0.000000e+00 : f32
    %95 = vector.broadcast %cst_50 : f32 to vector<290x8xf32>
    %c0_51 = arith.constant 0 : index
    %c0_52 = arith.constant 0 : index
    %96 = vector.load %arg22[%c0_51, %c0_52] : memref<290x8xf32, #tpu.memory_space<vmem>>, vector<290x8xf32>
    tpu.vector_store %arg22[%c0_51, %c0_52], %95 {strides = array<i32>} : memref<290x8xf32, #tpu.memory_space<vmem>>, vector<290x8xf32>,
    %c17_53 = arith.constant 17 : index
    %c0_54 = arith.constant 0 : index
    %97 = vector.load %arg22[%c17_53, %c0_54] : memref<290x8xf32, #tpu.memory_space<vmem>>, vector<256x8xf32>
    tpu.vector_store %arg22[%c17_53, %c0_54], %94 {strides = array<i32>} : memref<290x8xf32, #tpu.memory_space<vmem>>, vector<256x8xf32>,
    %98 = tpu.iota {dimensions = array<i32: 0>} : vector<256x1xi32>
    %c15_i32_55 = arith.constant 15 : i32
    %99 = vector.broadcast %c15_i32_55 : i32 to vector<256x1xi32>
    %100 = arith.andi %98, %99 : vector<256x1xi32>
    %cst_56 = arith.constant 0.000000e+00 : f32
    %101 = vector.broadcast %cst_56 : f32 to vector<256x8xf32>
    %c0_57 = arith.constant 0 : index
    %c0_58 = arith.constant 0 : index
    %102 = vector.load %arg22[%c0_57, %c0_58] : memref<290x8xf32, #tpu.memory_space<vmem>>, vector<256x8xf32>
    %c1_i32_59 = arith.constant 1 : i32
    %103 = vector.broadcast %c1_i32_59 : i32 to vector<256x1xi32>
    %104 = arith.cmpi sge, %100, %103 : vector<256x1xi32>
    %cst_60 = arith.constant 0.000000e+00 : f32
    %105 = vector.shape_cast %104 : vector<256x1xi1> to vector<256x1xi1>
    %106 = vector.broadcast %105 : vector<256x1xi1> to vector<256x8xi1>
    %107 = vector.broadcast %cst_60 : f32 to vector<256x8xf32>
    %108 = arith.select %106, %102, %107 : vector<256x8xi1>, vector<256x8xf32>
    %c0_61 = arith.constant 0 : index
    %c0_62 = arith.constant 0 : index
    %109 = vector.load %arg4[%c0_61, %c0_62] : memref<72x8xbf16, #tpu.memory_space<vmem>>, vector<8x8xbf16>
    %110 = arith.truncf %108 : vector<256x8xf32> to vector<256x8xbf16>
    %cst_63 = arith.constant dense<0.000000e+00> : vector<256x8xf32>
    %111 = tpu.matmul %110, %109, %cst_63 {dimension_numbers = #tpu.dot_dimension_numbers<[1], [0], [0], [1], [0, 0, 1, 1], [], []>} : vector<256x8xbf16>, vector<8x8xbf16>, vector<256x8xf32> -> vector<256x8xf32>
    %112 = arith.addf %101, %111 : vector<256x8xf32>
    %c1_64 = arith.constant 1 : index
    %c0_65 = arith.constant 0 : index
    %113 = vector.load %arg22[%c1_64, %c0_65] : memref<290x8xf32, #tpu.memory_space<vmem>>, vector<256x8xf32>
    %c8 = arith.constant 8 : index
    %c0_66 = arith.constant 0 : index
    %114 = vector.load %arg4[%c8, %c0_66] : memref<72x8xbf16, #tpu.memory_space<vmem>>, vector<8x8xbf16>
    %115 = arith.truncf %113 : vector<256x8xf32> to vector<256x8xbf16>
    %cst_67 = arith.constant dense<0.000000e+00> : vector<256x8xf32>
    %116 = tpu.matmul %115, %114, %cst_67 {dimension_numbers = #tpu.dot_dimension_numbers<[1], [0], [0], [1], [0, 0, 1, 1], [], []>} : vector<256x8xbf16>, vector<8x8xbf16>, vector<256x8xf32> -> vector<256x8xf32>
    %117 = arith.addf %112, %116 : vector<256x8xf32>
    %c2_68 = arith.constant 2 : index
    %c0_69 = arith.constant 0 : index
    %118 = vector.load %arg22[%c2_68, %c0_69] : memref<290x8xf32, #tpu.memory_space<vmem>>, vector<256x8xf32>
    %c14_i32_70 = arith.constant 14 : i32
    %119 = vector.broadcast %c14_i32_70 : i32 to vector<256x1xi32>
    %120 = arith.cmpi sle, %100, %119 : vector<256x1xi32>
    %cst_71 = arith.constant 0.000000e+00 : f32
    %121 = vector.shape_cast %120 : vector<256x1xi1> to vector<256x1xi1>
    %122 = vector.broadcast %121 : vector<256x1xi1> to vector<256x8xi1>
    %123 = vector.broadcast %cst_71 : f32 to vector<256x8xf32>
    %124 = arith.select %122, %118, %123 : vector<256x8xi1>, vector<256x8xf32>
    %c16_72 = arith.constant 16 : index
    %c0_73 = arith.constant 0 : index
    %125 = vector.load %arg4[%c16_72, %c0_73] : memref<72x8xbf16, #tpu.memory_space<vmem>>, vector<8x8xbf16>
    %126 = arith.truncf %124 : vector<256x8xf32> to vector<256x8xbf16>
    %cst_74 = arith.constant dense<0.000000e+00> : vector<256x8xf32>
    %127 = tpu.matmul %126, %125, %cst_74 {dimension_numbers = #tpu.dot_dimension_numbers<[1], [0], [0], [1], [0, 0, 1, 1], [], []>} : vector<256x8xbf16>, vector<8x8xbf16>, vector<256x8xf32> -> vector<256x8xf32>
    %128 = arith.addf %117, %127 : vector<256x8xf32>
    %c16_75 = arith.constant 16 : index
    %c0_76 = arith.constant 0 : index
    %129 = vector.load %arg22[%c16_75, %c0_76] : memref<290x8xf32, #tpu.memory_space<vmem>>, vector<256x8xf32>
    %c1_i32_77 = arith.constant 1 : i32
    %130 = vector.broadcast %c1_i32_77 : i32 to vector<256x1xi32>
    %131 = arith.cmpi sge, %100, %130 : vector<256x1xi32>
    %cst_78 = arith.constant 0.000000e+00 : f32
    %132 = vector.shape_cast %131 : vector<256x1xi1> to vector<256x1xi1>
    %133 = vector.broadcast %132 : vector<256x1xi1> to vector<256x8xi1>
    %134 = vector.broadcast %cst_78 : f32 to vector<256x8xf32>
    %135 = arith.select %133, %129, %134 : vector<256x8xi1>, vector<256x8xf32>
    %c24_79 = arith.constant 24 : index
    %c0_80 = arith.constant 0 : index
    %136 = vector.load %arg4[%c24_79, %c0_80] : memref<72x8xbf16, #tpu.memory_space<vmem>>, vector<8x8xbf16>
    %137 = arith.truncf %135 : vector<256x8xf32> to vector<256x8xbf16>
    %cst_81 = arith.constant dense<0.000000e+00> : vector<256x8xf32>
    %138 = tpu.matmul %137, %136, %cst_81 {dimension_numbers = #tpu.dot_dimension_numbers<[1], [0], [0], [1], [0, 0, 1, 1], [], []>} : vector<256x8xbf16>, vector<8x8xbf16>, vector<256x8xf32> -> vector<256x8xf32>
    %139 = arith.addf %128, %138 : vector<256x8xf32>
    %c17_82 = arith.constant 17 : index
    %c0_83 = arith.constant 0 : index
    %140 = vector.load %arg22[%c17_82, %c0_83] : memref<290x8xf32, #tpu.memory_space<vmem>>, vector<256x8xf32>
    %c32_84 = arith.constant 32 : index
    %c0_85 = arith.constant 0 : index
    %141 = vector.load %arg4[%c32_84, %c0_85] : memref<72x8xbf16, #tpu.memory_space<vmem>>, vector<8x8xbf16>
    %142 = arith.truncf %140 : vector<256x8xf32> to vector<256x8xbf16>
    %cst_86 = arith.constant dense<0.000000e+00> : vector<256x8xf32>
    %143 = tpu.matmul %142, %141, %cst_86 {dimension_numbers = #tpu.dot_dimension_numbers<[1], [0], [0], [1], [0, 0, 1, 1], [], []>} : vector<256x8xbf16>, vector<8x8xbf16>, vector<256x8xf32> -> vector<256x8xf32>
    %144 = arith.addf %139, %143 : vector<256x8xf32>
    %c18_87 = arith.constant 18 : index
    %c0_88 = arith.constant 0 : index
    %145 = vector.load %arg22[%c18_87, %c0_88] : memref<290x8xf32, #tpu.memory_space<vmem>>, vector<256x8xf32>
    %c14_i32_89 = arith.constant 14 : i32
    %146 = vector.broadcast %c14_i32_89 : i32 to vector<256x1xi32>
    %147 = arith.cmpi sle, %100, %146 : vector<256x1xi32>
    %cst_90 = arith.constant 0.000000e+00 : f32
    %148 = vector.shape_cast %147 : vector<256x1xi1> to vector<256x1xi1>
    %149 = vector.broadcast %148 : vector<256x1xi1> to vector<256x8xi1>
    %150 = vector.broadcast %cst_90 : f32 to vector<256x8xf32>
    %151 = arith.select %149, %145, %150 : vector<256x8xi1>, vector<256x8xf32>
    %c40 = arith.constant 40 : index
    %c0_91 = arith.constant 0 : index
    %152 = vector.load %arg4[%c40, %c0_91] : memref<72x8xbf16, #tpu.memory_space<vmem>>, vector<8x8xbf16>
    %153 = arith.truncf %151 : vector<256x8xf32> to vector<256x8xbf16>
    %cst_92 = arith.constant dense<0.000000e+00> : vector<256x8xf32>
    %154 = tpu.matmul %153, %152, %cst_92 {dimension_numbers = #tpu.dot_dimension_numbers<[1], [0], [0], [1], [0, 0, 1, 1], [], []>} : vector<256x8xbf16>, vector<8x8xbf16>, vector<256x8xf32> -> vector<256x8xf32>
    %155 = arith.addf %144, %154 : vector<256x8xf32>
    %c32_93 = arith.constant 32 : index
    %c0_94 = arith.constant 0 : index
    %156 = vector.load %arg22[%c32_93, %c0_94] : memref<290x8xf32, #tpu.memory_space<vmem>>, vector<256x8xf32>
    %c1_i32_95 = arith.constant 1 : i32
    %157 = vector.broadcast %c1_i32_95 : i32 to vector<256x1xi32>
    %158 = arith.cmpi sge, %100, %157 : vector<256x1xi32>
    %cst_96 = arith.constant 0.000000e+00 : f32
    %159 = vector.shape_cast %158 : vector<256x1xi1> to vector<256x1xi1>
    %160 = vector.broadcast %159 : vector<256x1xi1> to vector<256x8xi1>
    %161 = vector.broadcast %cst_96 : f32 to vector<256x8xf32>
    %162 = arith.select %160, %156, %161 : vector<256x8xi1>, vector<256x8xf32>
    %c48 = arith.constant 48 : index
    %c0_97 = arith.constant 0 : index
    %163 = vector.load %arg4[%c48, %c0_97] : memref<72x8xbf16, #tpu.memory_space<vmem>>, vector<8x8xbf16>
    %164 = arith.truncf %162 : vector<256x8xf32> to vector<256x8xbf16>
    %cst_98 = arith.constant dense<0.000000e+00> : vector<256x8xf32>
    %165 = tpu.matmul %164, %163, %cst_98 {dimension_numbers = #tpu.dot_dimension_numbers<[1], [0], [0], [1], [0, 0, 1, 1], [], []>} : vector<256x8xbf16>, vector<8x8xbf16>, vector<256x8xf32> -> vector<256x8xf32>
    %166 = arith.addf %155, %165 : vector<256x8xf32>
    %c33_99 = arith.constant 33 : index
    %c0_100 = arith.constant 0 : index
    %167 = vector.load %arg22[%c33_99, %c0_100] : memref<290x8xf32, #tpu.memory_space<vmem>>, vector<256x8xf32>
    %c56 = arith.constant 56 : index
    %c0_101 = arith.constant 0 : index
    %168 = vector.load %arg4[%c56, %c0_101] : memref<72x8xbf16, #tpu.memory_space<vmem>>, vector<8x8xbf16>
    %169 = arith.truncf %167 : vector<256x8xf32> to vector<256x8xbf16>
    %cst_102 = arith.constant dense<0.000000e+00> : vector<256x8xf32>
    %170 = tpu.matmul %169, %168, %cst_102 {dimension_numbers = #tpu.dot_dimension_numbers<[1], [0], [0], [1], [0, 0, 1, 1], [], []>} : vector<256x8xbf16>, vector<8x8xbf16>, vector<256x8xf32> -> vector<256x8xf32>
    %171 = arith.addf %166, %170 : vector<256x8xf32>
    %c34_103 = arith.constant 34 : index
    %c0_104 = arith.constant 0 : index
    %172 = vector.load %arg22[%c34_103, %c0_104] : memref<290x8xf32, #tpu.memory_space<vmem>>, vector<256x8xf32>
    %c14_i32_105 = arith.constant 14 : i32
    %173 = vector.broadcast %c14_i32_105 : i32 to vector<256x1xi32>
    %174 = arith.cmpi sle, %100, %173 : vector<256x1xi32>
    %cst_106 = arith.constant 0.000000e+00 : f32
    %175 = vector.shape_cast %174 : vector<256x1xi1> to vector<256x1xi1>
    %176 = vector.broadcast %175 : vector<256x1xi1> to vector<256x8xi1>
    %177 = vector.broadcast %cst_106 : f32 to vector<256x8xf32>
    %178 = arith.select %176, %172, %177 : vector<256x8xi1>, vector<256x8xf32>
    %c64 = arith.constant 64 : index
    %c0_107 = arith.constant 0 : index
    %179 = vector.load %arg4[%c64, %c0_107] : memref<72x8xbf16, #tpu.memory_space<vmem>>, vector<8x8xbf16>
    %180 = arith.truncf %178 : vector<256x8xf32> to vector<256x8xbf16>
    %cst_108 = arith.constant dense<0.000000e+00> : vector<256x8xf32>
    %181 = tpu.matmul %180, %179, %cst_108 {dimension_numbers = #tpu.dot_dimension_numbers<[1], [0], [0], [1], [0, 0, 1, 1], [], []>} : vector<256x8xbf16>, vector<8x8xbf16>, vector<256x8xf32> -> vector<256x8xf32>
    %182 = arith.addf %171, %181 : vector<256x8xf32>
    %c0_109 = arith.constant 0 : index
    %c0_110 = arith.constant 0 : index
    %183 = vector.load %arg5[%c0_109, %c0_110] : memref<1x8xf32, #tpu.memory_space<vmem>>, vector<1x8xf32>
    %184 = vector.broadcast %183 : vector<1x8xf32> to vector<256x8xf32>
    %185 = arith.addf %182, %184 : vector<256x8xf32>
    %cst_111 = arith.constant 0.000000e+00 : f32
    %186 = vector.broadcast %cst_111 : f32 to vector<256x8xf32>
    %187 = arith.maximumf %185, %186 : vector<256x8xf32>
    %c0_112 = arith.constant 0 : index
    %c0_113 = arith.constant 0 : index
    %188 = vector.load %arg23[%c0_112, %c0_113] : memref<256x8xf32, #tpu.memory_space<vmem>>, vector<256x8xf32>
    tpu.vector_store %arg23[%c0_112, %c0_113], %187 {strides = array<i32>} : memref<256x8xf32, #tpu.memory_space<vmem>>, vector<256x8xf32>,
    %cst_114 = arith.constant 0.000000e+00 : f32
    %189 = vector.broadcast %cst_114 : f32 to vector<82x8xf32>
    %c0_115 = arith.constant 0 : index
    %c0_116 = arith.constant 0 : index
    %190 = vector.load %arg24[%c0_115, %c0_116] : memref<82x8xf32, #tpu.memory_space<vmem>>, vector<82x8xf32>
    tpu.vector_store %arg24[%c0_115, %c0_116], %189 {strides = array<i32>} : memref<82x8xf32, #tpu.memory_space<vmem>>, vector<82x8xf32>,
    %c0_117 = arith.constant 0 : index
    %c0_118 = arith.constant 0 : index
    %191 = tpu.strided_load %arg23[%c0_117, %c0_118] {strides = array<i32: 2, 1>} : memref<256x8xf32, #tpu.memory_space<vmem>>, vector<8x8xf32>
    %c1_119 = arith.constant 1 : index
    %c0_120 = arith.constant 0 : index
    %192 = tpu.strided_load %arg23[%c1_119, %c0_120] {strides = array<i32: 2, 1>} : memref<256x8xf32, #tpu.memory_space<vmem>>, vector<8x8xf32>
    %193 = arith.maximumf %191, %192 : vector<8x8xf32>
    %c16_121 = arith.constant 16 : index
    %c0_122 = arith.constant 0 : index
    %194 = tpu.strided_load %arg23[%c16_121, %c0_122] {strides = array<i32: 2, 1>} : memref<256x8xf32, #tpu.memory_space<vmem>>, vector<8x8xf32>
    %195 = arith.maximumf %193, %194 : vector<8x8xf32>
    %c17_123 = arith.constant 17 : index
    %c0_124 = arith.constant 0 : index
    %196 = tpu.strided_load %arg23[%c17_123, %c0_124] {strides = array<i32: 2, 1>} : memref<256x8xf32, #tpu.memory_space<vmem>>, vector<8x8xf32>
    %197 = arith.maximumf %195, %196 : vector<8x8xf32>
    %c9_125 = arith.constant 9 : index
    %c0_126 = arith.constant 0 : index
    %198 = vector.load %arg24[%c9_125, %c0_126] : memref<82x8xf32, #tpu.memory_space<vmem>>, vector<8x8xf32>
    tpu.vector_store %arg24[%c9_125, %c0_126], %197 {strides = array<i32>} : memref<82x8xf32, #tpu.memory_space<vmem>>, vector<8x8xf32>,
    %c32_127 = arith.constant 32 : index
    %c0_128 = arith.constant 0 : index
    %199 = tpu.strided_load %arg23[%c32_127, %c0_128] {strides = array<i32: 2, 1>} : memref<256x8xf32, #tpu.memory_space<vmem>>, vector<8x8xf32>
    %c33_129 = arith.constant 33 : index
    %c0_130 = arith.constant 0 : index
    %200 = tpu.strided_load %arg23[%c33_129, %c0_130] {strides = array<i32: 2, 1>} : memref<256x8xf32, #tpu.memory_space<vmem>>, vector<8x8xf32>
    %201 = arith.maximumf %199, %200 : vector<8x8xf32>
    %c48_131 = arith.constant 48 : index
    %c0_132 = arith.constant 0 : index
    %202 = tpu.strided_load %arg23[%c48_131, %c0_132] {strides = array<i32: 2, 1>} : memref<256x8xf32, #tpu.memory_space<vmem>>, vector<8x8xf32>
    %203 = arith.maximumf %201, %202 : vector<8x8xf32>
    %c49 = arith.constant 49 : index
    %c0_133 = arith.constant 0 : index
    %204 = tpu.strided_load %arg23[%c49, %c0_133] {strides = array<i32: 2, 1>} : memref<256x8xf32, #tpu.memory_space<vmem>>, vector<8x8xf32>
    %205 = arith.maximumf %203, %204 : vector<8x8xf32>
    %c17_134 = arith.constant 17 : index
    %c0_135 = arith.constant 0 : index
    %206 = vector.load %arg24[%c17_134, %c0_135] : memref<82x8xf32, #tpu.memory_space<vmem>>, vector<8x8xf32>
    tpu.vector_store %arg24[%c17_134, %c0_135], %205 {strides = array<i32>} : memref<82x8xf32, #tpu.memory_space<vmem>>, vector<8x8xf32>,
    %c64_136 = arith.constant 64 : index
    %c0_137 = arith.constant 0 : index
    %207 = tpu.strided_load %arg23[%c64_136, %c0_137] {strides = array<i32: 2, 1>} : memref<256x8xf32, #tpu.memory_space<vmem>>, vector<8x8xf32>
    %c65 = arith.constant 65 : index
    %c0_138 = arith.constant 0 : index
    %208 = tpu.strided_load %arg23[%c65, %c0_138] {strides = array<i32: 2, 1>} : memref<256x8xf32, #tpu.memory_space<vmem>>, vector<8x8xf32>
    %209 = arith.maximumf %207, %208 : vector<8x8xf32>
    %c80 = arith.constant 80 : index
    %c0_139 = arith.constant 0 : index
    %210 = tpu.strided_load %arg23[%c80, %c0_139] {strides = array<i32: 2, 1>} : memref<256x8xf32, #tpu.memory_space<vmem>>, vector<8x8xf32>
    %211 = arith.maximumf %209, %210 : vector<8x8xf32>
    %c81 = arith.constant 81 : index
    %c0_140 = arith.constant 0 : index
    %212 = tpu.strided_load %arg23[%c81, %c0_140] {strides = array<i32: 2, 1>} : memref<256x8xf32, #tpu.memory_space<vmem>>, vector<8x8xf32>
    %213 = arith.maximumf %211, %212 : vector<8x8xf32>
    %c25 = arith.constant 25 : index
    %c0_141 = arith.constant 0 : index
    %214 = vector.load %arg24[%c25, %c0_141] : memref<82x8xf32, #tpu.memory_space<vmem>>, vector<8x8xf32>
    tpu.vector_store %arg24[%c25, %c0_141], %213 {strides = array<i32>} : memref<82x8xf32, #tpu.memory_space<vmem>>, vector<8x8xf32>,
    %c96 = arith.constant 96 : index
    %c0_142 = arith.constant 0 : index
    %215 = tpu.strided_load %arg23[%c96, %c0_142] {strides = array<i32: 2, 1>} : memref<256x8xf32, #tpu.memory_space<vmem>>, vector<8x8xf32>
    %c97 = arith.constant 97 : index
    %c0_143 = arith.constant 0 : index
    %216 = tpu.strided_load %arg23[%c97, %c0_143] {strides = array<i32: 2, 1>} : memref<256x8xf32, #tpu.memory_space<vmem>>, vector<8x8xf32>
    %217 = arith.maximumf %215, %216 : vector<8x8xf32>
    %c112 = arith.constant 112 : index
    %c0_144 = arith.constant 0 : index
    %218 = tpu.strided_load %arg23[%c112, %c0_144] {strides = array<i32: 2, 1>} : memref<256x8xf32, #tpu.memory_space<vmem>>, vector<8x8xf32>
    %219 = arith.maximumf %217, %218 : vector<8x8xf32>
    %c113 = arith.constant 113 : index
    %c0_145 = arith.constant 0 : index
    %220 = tpu.strided_load %arg23[%c113, %c0_145] {strides = array<i32: 2, 1>} : memref<256x8xf32, #tpu.memory_space<vmem>>, vector<8x8xf32>
    %221 = arith.maximumf %219, %220 : vector<8x8xf32>
    %c33_146 = arith.constant 33 : index
    %c0_147 = arith.constant 0 : index
    %222 = vector.load %arg24[%c33_146, %c0_147] : memref<82x8xf32, #tpu.memory_space<vmem>>, vector<8x8xf32>
    tpu.vector_store %arg24[%c33_146, %c0_147], %221 {strides = array<i32>} : memref<82x8xf32, #tpu.memory_space<vmem>>, vector<8x8xf32>,
    %c128 = arith.constant 128 : index
    %c0_148 = arith.constant 0 : index
    %223 = tpu.strided_load %arg23[%c128, %c0_148] {strides = array<i32: 2, 1>} : memref<256x8xf32, #tpu.memory_space<vmem>>, vector<8x8xf32>
    %c129 = arith.constant 129 : index
    %c0_149 = arith.constant 0 : index
    %224 = tpu.strided_load %arg23[%c129, %c0_149] {strides = array<i32: 2, 1>} : memref<256x8xf32, #tpu.memory_space<vmem>>, vector<8x8xf32>
    %225 = arith.maximumf %223, %224 : vector<8x8xf32>
    %c144 = arith.constant 144 : index
    %c0_150 = arith.constant 0 : index
    %226 = tpu.strided_load %arg23[%c144, %c0_150] {strides = array<i32: 2, 1>} : memref<256x8xf32, #tpu.memory_space<vmem>>, vector<8x8xf32>
    %227 = arith.maximumf %225, %226 : vector<8x8xf32>
    %c145 = arith.constant 145 : index
    %c0_151 = arith.constant 0 : index
    %228 = tpu.strided_load %arg23[%c145, %c0_151] {strides = array<i32: 2, 1>} : memref<256x8xf32, #tpu.memory_space<vmem>>, vector<8x8xf32>
    %229 = arith.maximumf %227, %228 : vector<8x8xf32>
    %c41 = arith.constant 41 : index
    %c0_152 = arith.constant 0 : index
    %230 = vector.load %arg24[%c41, %c0_152] : memref<82x8xf32, #tpu.memory_space<vmem>>, vector<8x8xf32>
    tpu.vector_store %arg24[%c41, %c0_152], %229 {strides = array<i32>} : memref<82x8xf32, #tpu.memory_space<vmem>>, vector<8x8xf32>,
    %c160 = arith.constant 160 : index
    %c0_153 = arith.constant 0 : index
    %231 = tpu.strided_load %arg23[%c160, %c0_153] {strides = array<i32: 2, 1>} : memref<256x8xf32, #tpu.memory_space<vmem>>, vector<8x8xf32>
    %c161 = arith.constant 161 : index
    %c0_154 = arith.constant 0 : index
    %232 = tpu.strided_load %arg23[%c161, %c0_154] {strides = array<i32: 2, 1>} : memref<256x8xf32, #tpu.memory_space<vmem>>, vector<8x8xf32>
    %233 = arith.maximumf %231, %232 : vector<8x8xf32>
    %c176 = arith.constant 176 : index
    %c0_155 = arith.constant 0 : index
    %234 = tpu.strided_load %arg23[%c176, %c0_155] {strides = array<i32: 2, 1>} : memref<256x8xf32, #tpu.memory_space<vmem>>, vector<8x8xf32>
    %235 = arith.maximumf %233, %234 : vector<8x8xf32>
    %c177 = arith.constant 177 : index
    %c0_156 = arith.constant 0 : index
    %236 = tpu.strided_load %arg23[%c177, %c0_156] {strides = array<i32: 2, 1>} : memref<256x8xf32, #tpu.memory_space<vmem>>, vector<8x8xf32>
    %237 = arith.maximumf %235, %236 : vector<8x8xf32>
    %c49_157 = arith.constant 49 : index
    %c0_158 = arith.constant 0 : index
    %238 = vector.load %arg24[%c49_157, %c0_158] : memref<82x8xf32, #tpu.memory_space<vmem>>, vector<8x8xf32>
    tpu.vector_store %arg24[%c49_157, %c0_158], %237 {strides = array<i32>} : memref<82x8xf32, #tpu.memory_space<vmem>>, vector<8x8xf32>,
    %c192 = arith.constant 192 : index
    %c0_159 = arith.constant 0 : index
    %239 = tpu.strided_load %arg23[%c192, %c0_159] {strides = array<i32: 2, 1>} : memref<256x8xf32, #tpu.memory_space<vmem>>, vector<8x8xf32>
    %c193 = arith.constant 193 : index
    %c0_160 = arith.constant 0 : index
    %240 = tpu.strided_load %arg23[%c193, %c0_160] {strides = array<i32: 2, 1>} : memref<256x8xf32, #tpu.memory_space<vmem>>, vector<8x8xf32>
    %241 = arith.maximumf %239, %240 : vector<8x8xf32>
    %c208 = arith.constant 208 : index
    %c0_161 = arith.constant 0 : index
    %242 = tpu.strided_load %arg23[%c208, %c0_161] {strides = array<i32: 2, 1>} : memref<256x8xf32, #tpu.memory_space<vmem>>, vector<8x8xf32>
    %243 = arith.maximumf %241, %242 : vector<8x8xf32>
    %c209 = arith.constant 209 : index
    %c0_162 = arith.constant 0 : index
    %244 = tpu.strided_load %arg23[%c209, %c0_162] {strides = array<i32: 2, 1>} : memref<256x8xf32, #tpu.memory_space<vmem>>, vector<8x8xf32>
    %245 = arith.maximumf %243, %244 : vector<8x8xf32>
    %c57 = arith.constant 57 : index
    %c0_163 = arith.constant 0 : index
    %246 = vector.load %arg24[%c57, %c0_163] : memref<82x8xf32, #tpu.memory_space<vmem>>, vector<8x8xf32>
    tpu.vector_store %arg24[%c57, %c0_163], %245 {strides = array<i32>} : memref<82x8xf32, #tpu.memory_space<vmem>>, vector<8x8xf32>,
    %c224 = arith.constant 224 : index
    %c0_164 = arith.constant 0 : index
    %247 = tpu.strided_load %arg23[%c224, %c0_164] {strides = array<i32: 2, 1>} : memref<256x8xf32, #tpu.memory_space<vmem>>, vector<8x8xf32>
    %c225 = arith.constant 225 : index
    %c0_165 = arith.constant 0 : index
    %248 = tpu.strided_load %arg23[%c225, %c0_165] {strides = array<i32: 2, 1>} : memref<256x8xf32, #tpu.memory_space<vmem>>, vector<8x8xf32>
    %249 = arith.maximumf %247, %248 : vector<8x8xf32>
    %c240 = arith.constant 240 : index
    %c0_166 = arith.constant 0 : index
    %250 = tpu.strided_load %arg23[%c240, %c0_166] {strides = array<i32: 2, 1>} : memref<256x8xf32, #tpu.memory_space<vmem>>, vector<8x8xf32>
    %251 = arith.maximumf %249, %250 : vector<8x8xf32>
    %c241 = arith.constant 241 : index
    %c0_167 = arith.constant 0 : index
    %252 = tpu.strided_load %arg23[%c241, %c0_167] {strides = array<i32: 2, 1>} : memref<256x8xf32, #tpu.memory_space<vmem>>, vector<8x8xf32>
    %253 = arith.maximumf %251, %252 : vector<8x8xf32>
    %c65_168 = arith.constant 65 : index
    %c0_169 = arith.constant 0 : index
    %254 = vector.load %arg24[%c65_168, %c0_169] : memref<82x8xf32, #tpu.memory_space<vmem>>, vector<8x8xf32>
    tpu.vector_store %arg24[%c65_168, %c0_169], %253 {strides = array<i32>} : memref<82x8xf32, #tpu.memory_space<vmem>>, vector<8x8xf32>,
    %255 = tpu.iota {dimensions = array<i32: 0>} : vector<64x1xi32>
    %c7_i32 = arith.constant 7 : i32
    %256 = vector.broadcast %c7_i32 : i32 to vector<64x1xi32>
    %257 = arith.andi %255, %256 : vector<64x1xi32>
    %cst_170 = arith.constant 0.000000e+00 : f32
    %258 = vector.broadcast %cst_170 : f32 to vector<64x16xf32>
    %c0_171 = arith.constant 0 : index
    %c0_172 = arith.constant 0 : index
    %259 = vector.load %arg24[%c0_171, %c0_172] : memref<82x8xf32, #tpu.memory_space<vmem>>, vector<64x8xf32>
    %c1_i32_173 = arith.constant 1 : i32
    %260 = vector.broadcast %c1_i32_173 : i32 to vector<64x1xi32>
    %261 = arith.cmpi sge, %257, %260 : vector<64x1xi32>
    %cst_174 = arith.constant 0.000000e+00 : f32
    %262 = vector.shape_cast %261 : vector<64x1xi1> to vector<64x1xi1>
    %263 = vector.broadcast %262 : vector<64x1xi1> to vector<64x8xi1>
    %264 = vector.broadcast %cst_174 : f32 to vector<64x8xf32>
    %265 = arith.select %263, %259, %264 : vector<64x8xi1>, vector<64x8xf32>
    %c0_175 = arith.constant 0 : index
    %c0_176 = arith.constant 0 : index
    %266 = vector.load %arg6[%c0_175, %c0_176] : memref<72x16xbf16, #tpu.memory_space<vmem>>, vector<8x16xbf16>
    %267 = arith.truncf %265 : vector<64x8xf32> to vector<64x8xbf16>
    %cst_177 = arith.constant dense<0.000000e+00> : vector<64x16xf32>
    %268 = tpu.matmul %267, %266, %cst_177 {dimension_numbers = #tpu.dot_dimension_numbers<[1], [0], [0], [1], [0, 0, 1, 1], [], []>} : vector<64x8xbf16>, vector<8x16xbf16>, vector<64x16xf32> -> vector<64x16xf32>
    %269 = arith.addf %258, %268 : vector<64x16xf32>
    %c1_178 = arith.constant 1 : index
    %c0_179 = arith.constant 0 : index
    %270 = vector.load %arg24[%c1_178, %c0_179] : memref<82x8xf32, #tpu.memory_space<vmem>>, vector<64x8xf32>
    %c8_180 = arith.constant 8 : index
    %c0_181 = arith.constant 0 : index
    %271 = vector.load %arg6[%c8_180, %c0_181] : memref<72x16xbf16, #tpu.memory_space<vmem>>, vector<8x16xbf16>
    %272 = arith.truncf %270 : vector<64x8xf32> to vector<64x8xbf16>
    %cst_182 = arith.constant dense<0.000000e+00> : vector<64x16xf32>
    %273 = tpu.matmul %272, %271, %cst_182 {dimension_numbers = #tpu.dot_dimension_numbers<[1], [0], [0], [1], [0, 0, 1, 1], [], []>} : vector<64x8xbf16>, vector<8x16xbf16>, vector<64x16xf32> -> vector<64x16xf32>
    %274 = arith.addf %269, %273 : vector<64x16xf32>
    %c2_183 = arith.constant 2 : index
    %c0_184 = arith.constant 0 : index
    %275 = vector.load %arg24[%c2_183, %c0_184] : memref<82x8xf32, #tpu.memory_space<vmem>>, vector<64x8xf32>
    %c6_i32 = arith.constant 6 : i32
    %276 = vector.broadcast %c6_i32 : i32 to vector<64x1xi32>
    %277 = arith.cmpi sle, %257, %276 : vector<64x1xi32>
    %cst_185 = arith.constant 0.000000e+00 : f32
    %278 = vector.shape_cast %277 : vector<64x1xi1> to vector<64x1xi1>
    %279 = vector.broadcast %278 : vector<64x1xi1> to vector<64x8xi1>
    %280 = vector.broadcast %cst_185 : f32 to vector<64x8xf32>
    %281 = arith.select %279, %275, %280 : vector<64x8xi1>, vector<64x8xf32>
    %c16_186 = arith.constant 16 : index
    %c0_187 = arith.constant 0 : index
    %282 = vector.load %arg6[%c16_186, %c0_187] : memref<72x16xbf16, #tpu.memory_space<vmem>>, vector<8x16xbf16>
    %283 = arith.truncf %281 : vector<64x8xf32> to vector<64x8xbf16>
    %cst_188 = arith.constant dense<0.000000e+00> : vector<64x16xf32>
    %284 = tpu.matmul %283, %282, %cst_188 {dimension_numbers = #tpu.dot_dimension_numbers<[1], [0], [0], [1], [0, 0, 1, 1], [], []>} : vector<64x8xbf16>, vector<8x16xbf16>, vector<64x16xf32> -> vector<64x16xf32>
    %285 = arith.addf %274, %284 : vector<64x16xf32>
    %c8_189 = arith.constant 8 : index
    %c0_190 = arith.constant 0 : index
    %286 = vector.load %arg24[%c8_189, %c0_190] : memref<82x8xf32, #tpu.memory_space<vmem>>, vector<64x8xf32>
    %c1_i32_191 = arith.constant 1 : i32
    %287 = vector.broadcast %c1_i32_191 : i32 to vector<64x1xi32>
    %288 = arith.cmpi sge, %257, %287 : vector<64x1xi32>
    %cst_192 = arith.constant 0.000000e+00 : f32
    %289 = vector.shape_cast %288 : vector<64x1xi1> to vector<64x1xi1>
    %290 = vector.broadcast %289 : vector<64x1xi1> to vector<64x8xi1>
    %291 = vector.broadcast %cst_192 : f32 to vector<64x8xf32>
    %292 = arith.select %290, %286, %291 : vector<64x8xi1>, vector<64x8xf32>
    %c24_193 = arith.constant 24 : index
    %c0_194 = arith.constant 0 : index
    %293 = vector.load %arg6[%c24_193, %c0_194] : memref<72x16xbf16, #tpu.memory_space<vmem>>, vector<8x16xbf16>
    %294 = arith.truncf %292 : vector<64x8xf32> to vector<64x8xbf16>
    %cst_195 = arith.constant dense<0.000000e+00> : vector<64x16xf32>
    %295 = tpu.matmul %294, %293, %cst_195 {dimension_numbers = #tpu.dot_dimension_numbers<[1], [0], [0], [1], [0, 0, 1, 1], [], []>} : vector<64x8xbf16>, vector<8x16xbf16>, vector<64x16xf32> -> vector<64x16xf32>
    %296 = arith.addf %285, %295 : vector<64x16xf32>
    %c9_196 = arith.constant 9 : index
    %c0_197 = arith.constant 0 : index
    %297 = vector.load %arg24[%c9_196, %c0_197] : memref<82x8xf32, #tpu.memory_space<vmem>>, vector<64x8xf32>
    %c32_198 = arith.constant 32 : index
    %c0_199 = arith.constant 0 : index
    %298 = vector.load %arg6[%c32_198, %c0_199] : memref<72x16xbf16, #tpu.memory_space<vmem>>, vector<8x16xbf16>
    %299 = arith.truncf %297 : vector<64x8xf32> to vector<64x8xbf16>
    %cst_200 = arith.constant dense<0.000000e+00> : vector<64x16xf32>
    %300 = tpu.matmul %299, %298, %cst_200 {dimension_numbers = #tpu.dot_dimension_numbers<[1], [0], [0], [1], [0, 0, 1, 1], [], []>} : vector<64x8xbf16>, vector<8x16xbf16>, vector<64x16xf32> -> vector<64x16xf32>
    %301 = arith.addf %296, %300 : vector<64x16xf32>
    %c10 = arith.constant 10 : index
    %c0_201 = arith.constant 0 : index
    %302 = vector.load %arg24[%c10, %c0_201] : memref<82x8xf32, #tpu.memory_space<vmem>>, vector<64x8xf32>
    %c6_i32_202 = arith.constant 6 : i32
    %303 = vector.broadcast %c6_i32_202 : i32 to vector<64x1xi32>
    %304 = arith.cmpi sle, %257, %303 : vector<64x1xi32>
    %cst_203 = arith.constant 0.000000e+00 : f32
    %305 = vector.shape_cast %304 : vector<64x1xi1> to vector<64x1xi1>
    %306 = vector.broadcast %305 : vector<64x1xi1> to vector<64x8xi1>
    %307 = vector.broadcast %cst_203 : f32 to vector<64x8xf32>
    %308 = arith.select %306, %302, %307 : vector<64x8xi1>, vector<64x8xf32>
    %c40_204 = arith.constant 40 : index
    %c0_205 = arith.constant 0 : index
    %309 = vector.load %arg6[%c40_204, %c0_205] : memref<72x16xbf16, #tpu.memory_space<vmem>>, vector<8x16xbf16>
    %310 = arith.truncf %308 : vector<64x8xf32> to vector<64x8xbf16>
    %cst_206 = arith.constant dense<0.000000e+00> : vector<64x16xf32>
    %311 = tpu.matmul %310, %309, %cst_206 {dimension_numbers = #tpu.dot_dimension_numbers<[1], [0], [0], [1], [0, 0, 1, 1], [], []>} : vector<64x8xbf16>, vector<8x16xbf16>, vector<64x16xf32> -> vector<64x16xf32>
    %312 = arith.addf %301, %311 : vector<64x16xf32>
    %c16_207 = arith.constant 16 : index
    %c0_208 = arith.constant 0 : index
    %313 = vector.load %arg24[%c16_207, %c0_208] : memref<82x8xf32, #tpu.memory_space<vmem>>, vector<64x8xf32>
    %c1_i32_209 = arith.constant 1 : i32
    %314 = vector.broadcast %c1_i32_209 : i32 to vector<64x1xi32>
    %315 = arith.cmpi sge, %257, %314 : vector<64x1xi32>
    %cst_210 = arith.constant 0.000000e+00 : f32
    %316 = vector.shape_cast %315 : vector<64x1xi1> to vector<64x1xi1>
    %317 = vector.broadcast %316 : vector<64x1xi1> to vector<64x8xi1>
    %318 = vector.broadcast %cst_210 : f32 to vector<64x8xf32>
    %319 = arith.select %317, %313, %318 : vector<64x8xi1>, vector<64x8xf32>
    %c48_211 = arith.constant 48 : index
    %c0_212 = arith.constant 0 : index
    %320 = vector.load %arg6[%c48_211, %c0_212] : memref<72x16xbf16, #tpu.memory_space<vmem>>, vector<8x16xbf16>
    %321 = arith.truncf %319 : vector<64x8xf32> to vector<64x8xbf16>
    %cst_213 = arith.constant dense<0.000000e+00> : vector<64x16xf32>
    %322 = tpu.matmul %321, %320, %cst_213 {dimension_numbers = #tpu.dot_dimension_numbers<[1], [0], [0], [1], [0, 0, 1, 1], [], []>} : vector<64x8xbf16>, vector<8x16xbf16>, vector<64x16xf32> -> vector<64x16xf32>
    %323 = arith.addf %312, %322 : vector<64x16xf32>
    %c17_214 = arith.constant 17 : index
    %c0_215 = arith.constant 0 : index
    %324 = vector.load %arg24[%c17_214, %c0_215] : memref<82x8xf32, #tpu.memory_space<vmem>>, vector<64x8xf32>
    %c56_216 = arith.constant 56 : index
    %c0_217 = arith.constant 0 : index
    %325 = vector.load %arg6[%c56_216, %c0_217] : memref<72x16xbf16, #tpu.memory_space<vmem>>, vector<8x16xbf16>
    %326 = arith.truncf %324 : vector<64x8xf32> to vector<64x8xbf16>
    %cst_218 = arith.constant dense<0.000000e+00> : vector<64x16xf32>
    %327 = tpu.matmul %326, %325, %cst_218 {dimension_numbers = #tpu.dot_dimension_numbers<[1], [0], [0], [1], [0, 0, 1, 1], [], []>} : vector<64x8xbf16>, vector<8x16xbf16>, vector<64x16xf32> -> vector<64x16xf32>
    %328 = arith.addf %323, %327 : vector<64x16xf32>
    %c18_219 = arith.constant 18 : index
    %c0_220 = arith.constant 0 : index
    %329 = vector.load %arg24[%c18_219, %c0_220] : memref<82x8xf32, #tpu.memory_space<vmem>>, vector<64x8xf32>
    %c6_i32_221 = arith.constant 6 : i32
    %330 = vector.broadcast %c6_i32_221 : i32 to vector<64x1xi32>
    %331 = arith.cmpi sle, %257, %330 : vector<64x1xi32>
    %cst_222 = arith.constant 0.000000e+00 : f32
    %332 = vector.shape_cast %331 : vector<64x1xi1> to vector<64x1xi1>
    %333 = vector.broadcast %332 : vector<64x1xi1> to vector<64x8xi1>
    %334 = vector.broadcast %cst_222 : f32 to vector<64x8xf32>
    %335 = arith.select %333, %329, %334 : vector<64x8xi1>, vector<64x8xf32>
    %c64_223 = arith.constant 64 : index
    %c0_224 = arith.constant 0 : index
    %336 = vector.load %arg6[%c64_223, %c0_224] : memref<72x16xbf16, #tpu.memory_space<vmem>>, vector<8x16xbf16>
    %337 = arith.truncf %335 : vector<64x8xf32> to vector<64x8xbf16>
    %cst_225 = arith.constant dense<0.000000e+00> : vector<64x16xf32>
    %338 = tpu.matmul %337, %336, %cst_225 {dimension_numbers = #tpu.dot_dimension_numbers<[1], [0], [0], [1], [0, 0, 1, 1], [], []>} : vector<64x8xbf16>, vector<8x16xbf16>, vector<64x16xf32> -> vector<64x16xf32>
    %339 = arith.addf %328, %338 : vector<64x16xf32>
    %c0_226 = arith.constant 0 : index
    %c0_227 = arith.constant 0 : index
    %340 = vector.load %arg7[%c0_226, %c0_227] : memref<1x16xf32, #tpu.memory_space<vmem>>, vector<1x16xf32>
    %341 = vector.broadcast %340 : vector<1x16xf32> to vector<64x16xf32>
    %342 = arith.addf %339, %341 : vector<64x16xf32>
    %cst_228 = arith.constant 0.000000e+00 : f32
    %343 = vector.broadcast %cst_228 : f32 to vector<64x16xf32>
    %344 = arith.maximumf %342, %343 : vector<64x16xf32>
    %cst_229 = arith.constant 0.000000e+00 : f32
    %345 = vector.broadcast %cst_229 : f32 to vector<82x16xf32>
    %c0_230 = arith.constant 0 : index
    %c0_231 = arith.constant 0 : index
    %346 = vector.load %arg25[%c0_230, %c0_231] : memref<82x16xf32, #tpu.memory_space<vmem>>, vector<82x16xf32>
    tpu.vector_store %arg25[%c0_230, %c0_231], %345 {strides = array<i32>} : memref<82x16xf32, #tpu.memory_space<vmem>>, vector<82x16xf32>,
    %c9_232 = arith.constant 9 : index
    %c0_233 = arith.constant 0 : index
    %347 = vector.load %arg25[%c9_232, %c0_233] : memref<82x16xf32, #tpu.memory_space<vmem>>, vector<64x16xf32>
    tpu.vector_store %arg25[%c9_232, %c0_233], %344 {strides = array<i32>} : memref<82x16xf32, #tpu.memory_space<vmem>>, vector<64x16xf32>,
    %cst_234 = arith.constant 0.000000e+00 : f32
    %348 = vector.broadcast %cst_234 : f32 to vector<26x16xf32>
    %c0_235 = arith.constant 0 : index
    %c0_236 = arith.constant 0 : index
    %349 = vector.load %arg26[%c0_235, %c0_236] : memref<26x16xf32, #tpu.memory_space<vmem>>, vector<26x16xf32>
    tpu.vector_store %arg26[%c0_235, %c0_236], %348 {strides = array<i32>} : memref<26x16xf32, #tpu.memory_space<vmem>>, vector<26x16xf32>,
    %c9_237 = arith.constant 9 : index
    %c0_238 = arith.constant 0 : index
    %350 = tpu.strided_load %arg25[%c9_237, %c0_238] {strides = array<i32: 2, 1>} : memref<82x16xf32, #tpu.memory_space<vmem>>, vector<4x16xf32>
    %c10_239 = arith.constant 10 : index
    %c0_240 = arith.constant 0 : index
    %351 = tpu.strided_load %arg25[%c10_239, %c0_240] {strides = array<i32: 2, 1>} : memref<82x16xf32, #tpu.memory_space<vmem>>, vector<4x16xf32>
    %352 = arith.maximumf %350, %351 : vector<4x16xf32>
    %c17_241 = arith.constant 17 : index
    %c0_242 = arith.constant 0 : index
    %353 = tpu.strided_load %arg25[%c17_241, %c0_242] {strides = array<i32: 2, 1>} : memref<82x16xf32, #tpu.memory_space<vmem>>, vector<4x16xf32>
    %354 = arith.maximumf %352, %353 : vector<4x16xf32>
    %c18_243 = arith.constant 18 : index
    %c0_244 = arith.constant 0 : index
    %355 = tpu.strided_load %arg25[%c18_243, %c0_244] {strides = array<i32: 2, 1>} : memref<82x16xf32, #tpu.memory_space<vmem>>, vector<4x16xf32>
    %356 = arith.maximumf %354, %355 : vector<4x16xf32>
    %c5 = arith.constant 5 : index
    %c0_245 = arith.constant 0 : index
    %357 = vector.load %arg26[%c5, %c0_245] : memref<26x16xf32, #tpu.memory_space<vmem>>, vector<4x16xf32>
    tpu.vector_store %arg26[%c5, %c0_245], %356 {strides = array<i32>} : memref<26x16xf32, #tpu.memory_space<vmem>>, vector<4x16xf32>,
    %c25_246 = arith.constant 25 : index
    %c0_247 = arith.constant 0 : index
    %358 = tpu.strided_load %arg25[%c25_246, %c0_247] {strides = array<i32: 2, 1>} : memref<82x16xf32, #tpu.memory_space<vmem>>, vector<4x16xf32>
    %c26 = arith.constant 26 : index
    %c0_248 = arith.constant 0 : index
    %359 = tpu.strided_load %arg25[%c26, %c0_248] {strides = array<i32: 2, 1>} : memref<82x16xf32, #tpu.memory_space<vmem>>, vector<4x16xf32>
    %360 = arith.maximumf %358, %359 : vector<4x16xf32>
    %c33_249 = arith.constant 33 : index
    %c0_250 = arith.constant 0 : index
    %361 = tpu.strided_load %arg25[%c33_249, %c0_250] {strides = array<i32: 2, 1>} : memref<82x16xf32, #tpu.memory_space<vmem>>, vector<4x16xf32>
    %362 = arith.maximumf %360, %361 : vector<4x16xf32>
    %c34_251 = arith.constant 34 : index
    %c0_252 = arith.constant 0 : index
    %363 = tpu.strided_load %arg25[%c34_251, %c0_252] {strides = array<i32: 2, 1>} : memref<82x16xf32, #tpu.memory_space<vmem>>, vector<4x16xf32>
    %364 = arith.maximumf %362, %363 : vector<4x16xf32>
    %c9_253 = arith.constant 9 : index
    %c0_254 = arith.constant 0 : index
    %365 = vector.load %arg26[%c9_253, %c0_254] : memref<26x16xf32, #tpu.memory_space<vmem>>, vector<4x16xf32>
    tpu.vector_store %arg26[%c9_253, %c0_254], %364 {strides = array<i32>} : memref<26x16xf32, #tpu.memory_space<vmem>>, vector<4x16xf32>,
    %c41_255 = arith.constant 41 : index
    %c0_256 = arith.constant 0 : index
    %366 = tpu.strided_load %arg25[%c41_255, %c0_256] {strides = array<i32: 2, 1>} : memref<82x16xf32, #tpu.memory_space<vmem>>, vector<4x16xf32>
    %c42 = arith.constant 42 : index
    %c0_257 = arith.constant 0 : index
    %367 = tpu.strided_load %arg25[%c42, %c0_257] {strides = array<i32: 2, 1>} : memref<82x16xf32, #tpu.memory_space<vmem>>, vector<4x16xf32>
    %368 = arith.maximumf %366, %367 : vector<4x16xf32>
    %c49_258 = arith.constant 49 : index
    %c0_259 = arith.constant 0 : index
    %369 = tpu.strided_load %arg25[%c49_258, %c0_259] {strides = array<i32: 2, 1>} : memref<82x16xf32, #tpu.memory_space<vmem>>, vector<4x16xf32>
    %370 = arith.maximumf %368, %369 : vector<4x16xf32>
    %c50 = arith.constant 50 : index
    %c0_260 = arith.constant 0 : index
    %371 = tpu.strided_load %arg25[%c50, %c0_260] {strides = array<i32: 2, 1>} : memref<82x16xf32, #tpu.memory_space<vmem>>, vector<4x16xf32>
    %372 = arith.maximumf %370, %371 : vector<4x16xf32>
    %c13 = arith.constant 13 : index
    %c0_261 = arith.constant 0 : index
    %373 = vector.load %arg26[%c13, %c0_261] : memref<26x16xf32, #tpu.memory_space<vmem>>, vector<4x16xf32>
    tpu.vector_store %arg26[%c13, %c0_261], %372 {strides = array<i32>} : memref<26x16xf32, #tpu.memory_space<vmem>>, vector<4x16xf32>,
    %c57_262 = arith.constant 57 : index
    %c0_263 = arith.constant 0 : index
    %374 = tpu.strided_load %arg25[%c57_262, %c0_263] {strides = array<i32: 2, 1>} : memref<82x16xf32, #tpu.memory_space<vmem>>, vector<4x16xf32>
    %c58 = arith.constant 58 : index
    %c0_264 = arith.constant 0 : index
    %375 = tpu.strided_load %arg25[%c58, %c0_264] {strides = array<i32: 2, 1>} : memref<82x16xf32, #tpu.memory_space<vmem>>, vector<4x16xf32>
    %376 = arith.maximumf %374, %375 : vector<4x16xf32>
    %c65_265 = arith.constant 65 : index
    %c0_266 = arith.constant 0 : index
    %377 = tpu.strided_load %arg25[%c65_265, %c0_266] {strides = array<i32: 2, 1>} : memref<82x16xf32, #tpu.memory_space<vmem>>, vector<4x16xf32>
    %378 = arith.maximumf %376, %377 : vector<4x16xf32>
    %c66 = arith.constant 66 : index
    %c0_267 = arith.constant 0 : index
    %379 = tpu.strided_load %arg25[%c66, %c0_267] {strides = array<i32: 2, 1>} : memref<82x16xf32, #tpu.memory_space<vmem>>, vector<4x16xf32>
    %380 = arith.maximumf %378, %379 : vector<4x16xf32>
    %c17_268 = arith.constant 17 : index
    %c0_269 = arith.constant 0 : index
    %381 = vector.load %arg26[%c17_268, %c0_269] : memref<26x16xf32, #tpu.memory_space<vmem>>, vector<4x16xf32>
    tpu.vector_store %arg26[%c17_268, %c0_269], %380 {strides = array<i32>} : memref<26x16xf32, #tpu.memory_space<vmem>>, vector<4x16xf32>,
    %382 = tpu.iota {dimensions = array<i32: 0>} : vector<16x1xi32>
    %c3_i32 = arith.constant 3 : i32
    %383 = vector.broadcast %c3_i32 : i32 to vector<16x1xi32>
    %384 = arith.andi %382, %383 : vector<16x1xi32>
    %cst_270 = arith.constant 0.000000e+00 : f32
    %385 = vector.broadcast %cst_270 : f32 to vector<16x16xf32>
    %c0_271 = arith.constant 0 : index
    %c0_272 = arith.constant 0 : index
    %386 = vector.load %arg26[%c0_271, %c0_272] : memref<26x16xf32, #tpu.memory_space<vmem>>, vector<16x16xf32>
    %c1_i32_273 = arith.constant 1 : i32
    %387 = vector.broadcast %c1_i32_273 : i32 to vector<16x1xi32>
    %388 = arith.cmpi sge, %384, %387 : vector<16x1xi32>
    %cst_274 = arith.constant 0.000000e+00 : f32
    %389 = vector.shape_cast %388 : vector<16x1xi1> to vector<16x1xi1>
    %390 = vector.broadcast %389 : vector<16x1xi1> to vector<16x16xi1>
    %391 = vector.broadcast %cst_274 : f32 to vector<16x16xf32>
    %392 = arith.select %390, %386, %391 : vector<16x16xi1>, vector<16x16xf32>
    %c0_275 = arith.constant 0 : index
    %c0_276 = arith.constant 0 : index
    %393 = vector.load %arg8[%c0_275, %c0_276] : memref<144x16xbf16, #tpu.memory_space<vmem>>, vector<16x16xbf16>
    %394 = arith.truncf %392 : vector<16x16xf32> to vector<16x16xbf16>
    %cst_277 = arith.constant dense<0.000000e+00> : vector<16x16xf32>
    %395 = tpu.matmul %394, %393, %cst_277 {dimension_numbers = #tpu.dot_dimension_numbers<[1], [0], [0], [1], [0, 0, 1, 1], [], []>} : vector<16x16xbf16>, vector<16x16xbf16>, vector<16x16xf32> -> vector<16x16xf32>
    %396 = arith.addf %385, %395 : vector<16x16xf32>
    %c1_278 = arith.constant 1 : index
    %c0_279 = arith.constant 0 : index
    %397 = vector.load %arg26[%c1_278, %c0_279] : memref<26x16xf32, #tpu.memory_space<vmem>>, vector<16x16xf32>
    %c16_280 = arith.constant 16 : index
    %c0_281 = arith.constant 0 : index
    %398 = vector.load %arg8[%c16_280, %c0_281] : memref<144x16xbf16, #tpu.memory_space<vmem>>, vector<16x16xbf16>
    %399 = arith.truncf %397 : vector<16x16xf32> to vector<16x16xbf16>
    %cst_282 = arith.constant dense<0.000000e+00> : vector<16x16xf32>
    %400 = tpu.matmul %399, %398, %cst_282 {dimension_numbers = #tpu.dot_dimension_numbers<[1], [0], [0], [1], [0, 0, 1, 1], [], []>} : vector<16x16xbf16>, vector<16x16xbf16>, vector<16x16xf32> -> vector<16x16xf32>
    %401 = arith.addf %396, %400 : vector<16x16xf32>
    %c2_283 = arith.constant 2 : index
    %c0_284 = arith.constant 0 : index
    %402 = vector.load %arg26[%c2_283, %c0_284] : memref<26x16xf32, #tpu.memory_space<vmem>>, vector<16x16xf32>
    %c2_i32 = arith.constant 2 : i32
    %403 = vector.broadcast %c2_i32 : i32 to vector<16x1xi32>
    %404 = arith.cmpi sle, %384, %403 : vector<16x1xi32>
    %cst_285 = arith.constant 0.000000e+00 : f32
    %405 = vector.shape_cast %404 : vector<16x1xi1> to vector<16x1xi1>
    %406 = vector.broadcast %405 : vector<16x1xi1> to vector<16x16xi1>
    %407 = vector.broadcast %cst_285 : f32 to vector<16x16xf32>
    %408 = arith.select %406, %402, %407 : vector<16x16xi1>, vector<16x16xf32>
    %c32_286 = arith.constant 32 : index
    %c0_287 = arith.constant 0 : index
    %409 = vector.load %arg8[%c32_286, %c0_287] : memref<144x16xbf16, #tpu.memory_space<vmem>>, vector<16x16xbf16>
    %410 = arith.truncf %408 : vector<16x16xf32> to vector<16x16xbf16>
    %cst_288 = arith.constant dense<0.000000e+00> : vector<16x16xf32>
    %411 = tpu.matmul %410, %409, %cst_288 {dimension_numbers = #tpu.dot_dimension_numbers<[1], [0], [0], [1], [0, 0, 1, 1], [], []>} : vector<16x16xbf16>, vector<16x16xbf16>, vector<16x16xf32> -> vector<16x16xf32>
    %412 = arith.addf %401, %411 : vector<16x16xf32>
    %c4 = arith.constant 4 : index
    %c0_289 = arith.constant 0 : index
    %413 = vector.load %arg26[%c4, %c0_289] : memref<26x16xf32, #tpu.memory_space<vmem>>, vector<16x16xf32>
    %c1_i32_290 = arith.constant 1 : i32
    %414 = vector.broadcast %c1_i32_290 : i32 to vector<16x1xi32>
    %415 = arith.cmpi sge, %384, %414 : vector<16x1xi32>
    %cst_291 = arith.constant 0.000000e+00 : f32
    %416 = vector.shape_cast %415 : vector<16x1xi1> to vector<16x1xi1>
    %417 = vector.broadcast %416 : vector<16x1xi1> to vector<16x16xi1>
    %418 = vector.broadcast %cst_291 : f32 to vector<16x16xf32>
    %419 = arith.select %417, %413, %418 : vector<16x16xi1>, vector<16x16xf32>
    %c48_292 = arith.constant 48 : index
    %c0_293 = arith.constant 0 : index
    %420 = vector.load %arg8[%c48_292, %c0_293] : memref<144x16xbf16, #tpu.memory_space<vmem>>, vector<16x16xbf16>
    %421 = arith.truncf %419 : vector<16x16xf32> to vector<16x16xbf16>
    %cst_294 = arith.constant dense<0.000000e+00> : vector<16x16xf32>
    %422 = tpu.matmul %421, %420, %cst_294 {dimension_numbers = #tpu.dot_dimension_numbers<[1], [0], [0], [1], [0, 0, 1, 1], [], []>} : vector<16x16xbf16>, vector<16x16xbf16>, vector<16x16xf32> -> vector<16x16xf32>
    %423 = arith.addf %412, %422 : vector<16x16xf32>
    %c5_295 = arith.constant 5 : index
    %c0_296 = arith.constant 0 : index
    %424 = vector.load %arg26[%c5_295, %c0_296] : memref<26x16xf32, #tpu.memory_space<vmem>>, vector<16x16xf32>
    %c64_297 = arith.constant 64 : index
    %c0_298 = arith.constant 0 : index
    %425 = vector.load %arg8[%c64_297, %c0_298] : memref<144x16xbf16, #tpu.memory_space<vmem>>, vector<16x16xbf16>
    %426 = arith.truncf %424 : vector<16x16xf32> to vector<16x16xbf16>
    %cst_299 = arith.constant dense<0.000000e+00> : vector<16x16xf32>
    %427 = tpu.matmul %426, %425, %cst_299 {dimension_numbers = #tpu.dot_dimension_numbers<[1], [0], [0], [1], [0, 0, 1, 1], [], []>} : vector<16x16xbf16>, vector<16x16xbf16>, vector<16x16xf32> -> vector<16x16xf32>
    %428 = arith.addf %423, %427 : vector<16x16xf32>
    %c6_300 = arith.constant 6 : index
    %c0_301 = arith.constant 0 : index
    %429 = vector.load %arg26[%c6_300, %c0_301] : memref<26x16xf32, #tpu.memory_space<vmem>>, vector<16x16xf32>
    %c2_i32_302 = arith.constant 2 : i32
    %430 = vector.broadcast %c2_i32_302 : i32 to vector<16x1xi32>
    %431 = arith.cmpi sle, %384, %430 : vector<16x1xi32>
    %cst_303 = arith.constant 0.000000e+00 : f32
    %432 = vector.shape_cast %431 : vector<16x1xi1> to vector<16x1xi1>
    %433 = vector.broadcast %432 : vector<16x1xi1> to vector<16x16xi1>
    %434 = vector.broadcast %cst_303 : f32 to vector<16x16xf32>
    %435 = arith.select %433, %429, %434 : vector<16x16xi1>, vector<16x16xf32>
    %c80_304 = arith.constant 80 : index
    %c0_305 = arith.constant 0 : index
    %436 = vector.load %arg8[%c80_304, %c0_305] : memref<144x16xbf16, #tpu.memory_space<vmem>>, vector<16x16xbf16>
    %437 = arith.truncf %435 : vector<16x16xf32> to vector<16x16xbf16>
    %cst_306 = arith.constant dense<0.000000e+00> : vector<16x16xf32>
    %438 = tpu.matmul %437, %436, %cst_306 {dimension_numbers = #tpu.dot_dimension_numbers<[1], [0], [0], [1], [0, 0, 1, 1], [], []>} : vector<16x16xbf16>, vector<16x16xbf16>, vector<16x16xf32> -> vector<16x16xf32>
    %439 = arith.addf %428, %438 : vector<16x16xf32>
    %c8_307 = arith.constant 8 : index
    %c0_308 = arith.constant 0 : index
    %440 = vector.load %arg26[%c8_307, %c0_308] : memref<26x16xf32, #tpu.memory_space<vmem>>, vector<16x16xf32>
    %c1_i32_309 = arith.constant 1 : i32
    %441 = vector.broadcast %c1_i32_309 : i32 to vector<16x1xi32>
    %442 = arith.cmpi sge, %384, %441 : vector<16x1xi32>
    %cst_310 = arith.constant 0.000000e+00 : f32
    %443 = vector.shape_cast %442 : vector<16x1xi1> to vector<16x1xi1>
    %444 = vector.broadcast %443 : vector<16x1xi1> to vector<16x16xi1>
    %445 = vector.broadcast %cst_310 : f32 to vector<16x16xf32>
    %446 = arith.select %444, %440, %445 : vector<16x16xi1>, vector<16x16xf32>
    %c96_311 = arith.constant 96 : index
    %c0_312 = arith.constant 0 : index
    %447 = vector.load %arg8[%c96_311, %c0_312] : memref<144x16xbf16, #tpu.memory_space<vmem>>, vector<16x16xbf16>
    %448 = arith.truncf %446 : vector<16x16xf32> to vector<16x16xbf16>
    %cst_313 = arith.constant dense<0.000000e+00> : vector<16x16xf32>
    %449 = tpu.matmul %448, %447, %cst_313 {dimension_numbers = #tpu.dot_dimension_numbers<[1], [0], [0], [1], [0, 0, 1, 1], [], []>} : vector<16x16xbf16>, vector<16x16xbf16>, vector<16x16xf32> -> vector<16x16xf32>
    %450 = arith.addf %439, %449 : vector<16x16xf32>
    %c9_314 = arith.constant 9 : index
    %c0_315 = arith.constant 0 : index
    %451 = vector.load %arg26[%c9_314, %c0_315] : memref<26x16xf32, #tpu.memory_space<vmem>>, vector<16x16xf32>
    %c112_316 = arith.constant 112 : index
    %c0_317 = arith.constant 0 : index
    %452 = vector.load %arg8[%c112_316, %c0_317] : memref<144x16xbf16, #tpu.memory_space<vmem>>, vector<16x16xbf16>
    %453 = arith.truncf %451 : vector<16x16xf32> to vector<16x16xbf16>
    %cst_318 = arith.constant dense<0.000000e+00> : vector<16x16xf32>
    %454 = tpu.matmul %453, %452, %cst_318 {dimension_numbers = #tpu.dot_dimension_numbers<[1], [0], [0], [1], [0, 0, 1, 1], [], []>} : vector<16x16xbf16>, vector<16x16xbf16>, vector<16x16xf32> -> vector<16x16xf32>
    %455 = arith.addf %450, %454 : vector<16x16xf32>
    %c10_319 = arith.constant 10 : index
    %c0_320 = arith.constant 0 : index
    %456 = vector.load %arg26[%c10_319, %c0_320] : memref<26x16xf32, #tpu.memory_space<vmem>>, vector<16x16xf32>
    %c2_i32_321 = arith.constant 2 : i32
    %457 = vector.broadcast %c2_i32_321 : i32 to vector<16x1xi32>
    %458 = arith.cmpi sle, %384, %457 : vector<16x1xi32>
    %cst_322 = arith.constant 0.000000e+00 : f32
    %459 = vector.shape_cast %458 : vector<16x1xi1> to vector<16x1xi1>
    %460 = vector.broadcast %459 : vector<16x1xi1> to vector<16x16xi1>
    %461 = vector.broadcast %cst_322 : f32 to vector<16x16xf32>
    %462 = arith.select %460, %456, %461 : vector<16x16xi1>, vector<16x16xf32>
    %c128_323 = arith.constant 128 : index
    %c0_324 = arith.constant 0 : index
    %463 = vector.load %arg8[%c128_323, %c0_324] : memref<144x16xbf16, #tpu.memory_space<vmem>>, vector<16x16xbf16>
    %464 = arith.truncf %462 : vector<16x16xf32> to vector<16x16xbf16>
    %cst_325 = arith.constant dense<0.000000e+00> : vector<16x16xf32>
    %465 = tpu.matmul %464, %463, %cst_325 {dimension_numbers = #tpu.dot_dimension_numbers<[1], [0], [0], [1], [0, 0, 1, 1], [], []>} : vector<16x16xbf16>, vector<16x16xbf16>, vector<16x16xf32> -> vector<16x16xf32>
    %466 = arith.addf %455, %465 : vector<16x16xf32>
    %c0_326 = arith.constant 0 : index
    %c0_327 = arith.constant 0 : index
    %467 = vector.load %arg9[%c0_326, %c0_327] : memref<1x16xf32, #tpu.memory_space<vmem>>, vector<1x16xf32>
    %468 = vector.broadcast %467 : vector<1x16xf32> to vector<16x16xf32>
    %469 = arith.addf %466, %468 : vector<16x16xf32>
    %cst_328 = arith.constant 0.000000e+00 : f32
    %470 = vector.broadcast %cst_328 : f32 to vector<16x16xf32>
    %471 = arith.maximumf %469, %470 : vector<16x16xf32>
    %cst_329 = arith.constant 0.000000e+00 : f32
    %472 = vector.broadcast %cst_329 : f32 to vector<26x16xf32>
    %c0_330 = arith.constant 0 : index
    %c0_331 = arith.constant 0 : index
    %473 = vector.load %arg27[%c0_330, %c0_331] : memref<26x16xf32, #tpu.memory_space<vmem>>, vector<26x16xf32>
    tpu.vector_store %arg27[%c0_330, %c0_331], %472 {strides = array<i32>} : memref<26x16xf32, #tpu.memory_space<vmem>>, vector<26x16xf32>,
    %c5_332 = arith.constant 5 : index
    %c0_333 = arith.constant 0 : index
    %474 = vector.load %arg27[%c5_332, %c0_333] : memref<26x16xf32, #tpu.memory_space<vmem>>, vector<16x16xf32>
    tpu.vector_store %arg27[%c5_332, %c0_333], %471 {strides = array<i32>} : memref<26x16xf32, #tpu.memory_space<vmem>>, vector<16x16xf32>,
    %475 = tpu.iota {dimensions = array<i32: 0>} : vector<16x1xi32>
    %c3_i32_334 = arith.constant 3 : i32
    %476 = vector.broadcast %c3_i32_334 : i32 to vector<16x1xi32>
    %477 = arith.andi %475, %476 : vector<16x1xi32>
    %cst_335 = arith.constant 0.000000e+00 : f32
    %478 = vector.broadcast %cst_335 : f32 to vector<16x16xf32>
    %c0_336 = arith.constant 0 : index
    %c0_337 = arith.constant 0 : index
    %479 = vector.load %arg27[%c0_336, %c0_337] : memref<26x16xf32, #tpu.memory_space<vmem>>, vector<16x16xf32>
    %c1_i32_338 = arith.constant 1 : i32
    %480 = vector.broadcast %c1_i32_338 : i32 to vector<16x1xi32>
    %481 = arith.cmpi sge, %477, %480 : vector<16x1xi32>
    %cst_339 = arith.constant 0.000000e+00 : f32
    %482 = vector.shape_cast %481 : vector<16x1xi1> to vector<16x1xi1>
    %483 = vector.broadcast %482 : vector<16x1xi1> to vector<16x16xi1>
    %484 = vector.broadcast %cst_339 : f32 to vector<16x16xf32>
    %485 = arith.select %483, %479, %484 : vector<16x16xi1>, vector<16x16xf32>
    %c0_340 = arith.constant 0 : index
    %c0_341 = arith.constant 0 : index
    %486 = vector.load %arg10[%c0_340, %c0_341] : memref<144x16xbf16, #tpu.memory_space<vmem>>, vector<16x16xbf16>
    %487 = arith.truncf %485 : vector<16x16xf32> to vector<16x16xbf16>
    %cst_342 = arith.constant dense<0.000000e+00> : vector<16x16xf32>
    %488 = tpu.matmul %487, %486, %cst_342 {dimension_numbers = #tpu.dot_dimension_numbers<[1], [0], [0], [1], [0, 0, 1, 1], [], []>} : vector<16x16xbf16>, vector<16x16xbf16>, vector<16x16xf32> -> vector<16x16xf32>
    %489 = arith.addf %478, %488 : vector<16x16xf32>
    %c1_343 = arith.constant 1 : index
    %c0_344 = arith.constant 0 : index
    %490 = vector.load %arg27[%c1_343, %c0_344] : memref<26x16xf32, #tpu.memory_space<vmem>>, vector<16x16xf32>
    %c16_345 = arith.constant 16 : index
    %c0_346 = arith.constant 0 : index
    %491 = vector.load %arg10[%c16_345, %c0_346] : memref<144x16xbf16, #tpu.memory_space<vmem>>, vector<16x16xbf16>
    %492 = arith.truncf %490 : vector<16x16xf32> to vector<16x16xbf16>
    %cst_347 = arith.constant dense<0.000000e+00> : vector<16x16xf32>
    %493 = tpu.matmul %492, %491, %cst_347 {dimension_numbers = #tpu.dot_dimension_numbers<[1], [0], [0], [1], [0, 0, 1, 1], [], []>} : vector<16x16xbf16>, vector<16x16xbf16>, vector<16x16xf32> -> vector<16x16xf32>
    %494 = arith.addf %489, %493 : vector<16x16xf32>
    %c2_348 = arith.constant 2 : index
    %c0_349 = arith.constant 0 : index
    %495 = vector.load %arg27[%c2_348, %c0_349] : memref<26x16xf32, #tpu.memory_space<vmem>>, vector<16x16xf32>
    %c2_i32_350 = arith.constant 2 : i32
    %496 = vector.broadcast %c2_i32_350 : i32 to vector<16x1xi32>
    %497 = arith.cmpi sle, %477, %496 : vector<16x1xi32>
    %cst_351 = arith.constant 0.000000e+00 : f32
    %498 = vector.shape_cast %497 : vector<16x1xi1> to vector<16x1xi1>
    %499 = vector.broadcast %498 : vector<16x1xi1> to vector<16x16xi1>
    %500 = vector.broadcast %cst_351 : f32 to vector<16x16xf32>
    %501 = arith.select %499, %495, %500 : vector<16x16xi1>, vector<16x16xf32>
    %c32_352 = arith.constant 32 : index
    %c0_353 = arith.constant 0 : index
    %502 = vector.load %arg10[%c32_352, %c0_353] : memref<144x16xbf16, #tpu.memory_space<vmem>>, vector<16x16xbf16>
    %503 = arith.truncf %501 : vector<16x16xf32> to vector<16x16xbf16>
    %cst_354 = arith.constant dense<0.000000e+00> : vector<16x16xf32>
    %504 = tpu.matmul %503, %502, %cst_354 {dimension_numbers = #tpu.dot_dimension_numbers<[1], [0], [0], [1], [0, 0, 1, 1], [], []>} : vector<16x16xbf16>, vector<16x16xbf16>, vector<16x16xf32> -> vector<16x16xf32>
    %505 = arith.addf %494, %504 : vector<16x16xf32>
    %c4_355 = arith.constant 4 : index
    %c0_356 = arith.constant 0 : index
    %506 = vector.load %arg27[%c4_355, %c0_356] : memref<26x16xf32, #tpu.memory_space<vmem>>, vector<16x16xf32>
    %c1_i32_357 = arith.constant 1 : i32
    %507 = vector.broadcast %c1_i32_357 : i32 to vector<16x1xi32>
    %508 = arith.cmpi sge, %477, %507 : vector<16x1xi32>
    %cst_358 = arith.constant 0.000000e+00 : f32
    %509 = vector.shape_cast %508 : vector<16x1xi1> to vector<16x1xi1>
    %510 = vector.broadcast %509 : vector<16x1xi1> to vector<16x16xi1>
    %511 = vector.broadcast %cst_358 : f32 to vector<16x16xf32>
    %512 = arith.select %510, %506, %511 : vector<16x16xi1>, vector<16x16xf32>
    %c48_359 = arith.constant 48 : index
    %c0_360 = arith.constant 0 : index
    %513 = vector.load %arg10[%c48_359, %c0_360] : memref<144x16xbf16, #tpu.memory_space<vmem>>, vector<16x16xbf16>
    %514 = arith.truncf %512 : vector<16x16xf32> to vector<16x16xbf16>
    %cst_361 = arith.constant dense<0.000000e+00> : vector<16x16xf32>
    %515 = tpu.matmul %514, %513, %cst_361 {dimension_numbers = #tpu.dot_dimension_numbers<[1], [0], [0], [1], [0, 0, 1, 1], [], []>} : vector<16x16xbf16>, vector<16x16xbf16>, vector<16x16xf32> -> vector<16x16xf32>
    %516 = arith.addf %505, %515 : vector<16x16xf32>
    %c5_362 = arith.constant 5 : index
    %c0_363 = arith.constant 0 : index
    %517 = vector.load %arg27[%c5_362, %c0_363] : memref<26x16xf32, #tpu.memory_space<vmem>>, vector<16x16xf32>
    %c64_364 = arith.constant 64 : index
    %c0_365 = arith.constant 0 : index
    %518 = vector.load %arg10[%c64_364, %c0_365] : memref<144x16xbf16, #tpu.memory_space<vmem>>, vector<16x16xbf16>
    %519 = arith.truncf %517 : vector<16x16xf32> to vector<16x16xbf16>
    %cst_366 = arith.constant dense<0.000000e+00> : vector<16x16xf32>
    %520 = tpu.matmul %519, %518, %cst_366 {dimension_numbers = #tpu.dot_dimension_numbers<[1], [0], [0], [1], [0, 0, 1, 1], [], []>} : vector<16x16xbf16>, vector<16x16xbf16>, vector<16x16xf32> -> vector<16x16xf32>
    %521 = arith.addf %516, %520 : vector<16x16xf32>
    %c6_367 = arith.constant 6 : index
    %c0_368 = arith.constant 0 : index
    %522 = vector.load %arg27[%c6_367, %c0_368] : memref<26x16xf32, #tpu.memory_space<vmem>>, vector<16x16xf32>
    %c2_i32_369 = arith.constant 2 : i32
    %523 = vector.broadcast %c2_i32_369 : i32 to vector<16x1xi32>
    %524 = arith.cmpi sle, %477, %523 : vector<16x1xi32>
    %cst_370 = arith.constant 0.000000e+00 : f32
    %525 = vector.shape_cast %524 : vector<16x1xi1> to vector<16x1xi1>
    %526 = vector.broadcast %525 : vector<16x1xi1> to vector<16x16xi1>
    %527 = vector.broadcast %cst_370 : f32 to vector<16x16xf32>
    %528 = arith.select %526, %522, %527 : vector<16x16xi1>, vector<16x16xf32>
    %c80_371 = arith.constant 80 : index
    %c0_372 = arith.constant 0 : index
    %529 = vector.load %arg10[%c80_371, %c0_372] : memref<144x16xbf16, #tpu.memory_space<vmem>>, vector<16x16xbf16>
    %530 = arith.truncf %528 : vector<16x16xf32> to vector<16x16xbf16>
    %cst_373 = arith.constant dense<0.000000e+00> : vector<16x16xf32>
    %531 = tpu.matmul %530, %529, %cst_373 {dimension_numbers = #tpu.dot_dimension_numbers<[1], [0], [0], [1], [0, 0, 1, 1], [], []>} : vector<16x16xbf16>, vector<16x16xbf16>, vector<16x16xf32> -> vector<16x16xf32>
    %532 = arith.addf %521, %531 : vector<16x16xf32>
    %c8_374 = arith.constant 8 : index
    %c0_375 = arith.constant 0 : index
    %533 = vector.load %arg27[%c8_374, %c0_375] : memref<26x16xf32, #tpu.memory_space<vmem>>, vector<16x16xf32>
    %c1_i32_376 = arith.constant 1 : i32
    %534 = vector.broadcast %c1_i32_376 : i32 to vector<16x1xi32>
    %535 = arith.cmpi sge, %477, %534 : vector<16x1xi32>
    %cst_377 = arith.constant 0.000000e+00 : f32
    %536 = vector.shape_cast %535 : vector<16x1xi1> to vector<16x1xi1>
    %537 = vector.broadcast %536 : vector<16x1xi1> to vector<16x16xi1>
    %538 = vector.broadcast %cst_377 : f32 to vector<16x16xf32>
    %539 = arith.select %537, %533, %538 : vector<16x16xi1>, vector<16x16xf32>
    %c96_378 = arith.constant 96 : index
    %c0_379 = arith.constant 0 : index
    %540 = vector.load %arg10[%c96_378, %c0_379] : memref<144x16xbf16, #tpu.memory_space<vmem>>, vector<16x16xbf16>
    %541 = arith.truncf %539 : vector<16x16xf32> to vector<16x16xbf16>
    %cst_380 = arith.constant dense<0.000000e+00> : vector<16x16xf32>
    %542 = tpu.matmul %541, %540, %cst_380 {dimension_numbers = #tpu.dot_dimension_numbers<[1], [0], [0], [1], [0, 0, 1, 1], [], []>} : vector<16x16xbf16>, vector<16x16xbf16>, vector<16x16xf32> -> vector<16x16xf32>
    %543 = arith.addf %532, %542 : vector<16x16xf32>
    %c9_381 = arith.constant 9 : index
    %c0_382 = arith.constant 0 : index
    %544 = vector.load %arg27[%c9_381, %c0_382] : memref<26x16xf32, #tpu.memory_space<vmem>>, vector<16x16xf32>
    %c112_383 = arith.constant 112 : index
    %c0_384 = arith.constant 0 : index
    %545 = vector.load %arg10[%c112_383, %c0_384] : memref<144x16xbf16, #tpu.memory_space<vmem>>, vector<16x16xbf16>
    %546 = arith.truncf %544 : vector<16x16xf32> to vector<16x16xbf16>
    %cst_385 = arith.constant dense<0.000000e+00> : vector<16x16xf32>
    %547 = tpu.matmul %546, %545, %cst_385 {dimension_numbers = #tpu.dot_dimension_numbers<[1], [0], [0], [1], [0, 0, 1, 1], [], []>} : vector<16x16xbf16>, vector<16x16xbf16>, vector<16x16xf32> -> vector<16x16xf32>
    %548 = arith.addf %543, %547 : vector<16x16xf32>
    %c10_386 = arith.constant 10 : index
    %c0_387 = arith.constant 0 : index
    %549 = vector.load %arg27[%c10_386, %c0_387] : memref<26x16xf32, #tpu.memory_space<vmem>>, vector<16x16xf32>
    %c2_i32_388 = arith.constant 2 : i32
    %550 = vector.broadcast %c2_i32_388 : i32 to vector<16x1xi32>
    %551 = arith.cmpi sle, %477, %550 : vector<16x1xi32>
    %cst_389 = arith.constant 0.000000e+00 : f32
    %552 = vector.shape_cast %551 : vector<16x1xi1> to vector<16x1xi1>
    %553 = vector.broadcast %552 : vector<16x1xi1> to vector<16x16xi1>
    %554 = vector.broadcast %cst_389 : f32 to vector<16x16xf32>
    %555 = arith.select %553, %549, %554 : vector<16x16xi1>, vector<16x16xf32>
    %c128_390 = arith.constant 128 : index
    %c0_391 = arith.constant 0 : index
    %556 = vector.load %arg10[%c128_390, %c0_391] : memref<144x16xbf16, #tpu.memory_space<vmem>>, vector<16x16xbf16>
    %557 = arith.truncf %555 : vector<16x16xf32> to vector<16x16xbf16>
    %cst_392 = arith.constant dense<0.000000e+00> : vector<16x16xf32>
    %558 = tpu.matmul %557, %556, %cst_392 {dimension_numbers = #tpu.dot_dimension_numbers<[1], [0], [0], [1], [0, 0, 1, 1], [], []>} : vector<16x16xbf16>, vector<16x16xbf16>, vector<16x16xf32> -> vector<16x16xf32>
    %559 = arith.addf %548, %558 : vector<16x16xf32>
    %c0_393 = arith.constant 0 : index
    %c0_394 = arith.constant 0 : index
    %560 = vector.load %arg11[%c0_393, %c0_394] : memref<1x16xf32, #tpu.memory_space<vmem>>, vector<1x16xf32>
    %561 = vector.broadcast %560 : vector<1x16xf32> to vector<16x16xf32>
    %562 = arith.addf %559, %561 : vector<16x16xf32>
    %cst_395 = arith.constant 0.000000e+00 : f32
    %563 = vector.broadcast %cst_395 : f32 to vector<16x16xf32>
    %564 = arith.maximumf %562, %563 : vector<16x16xf32>
    %c0_396 = arith.constant 0 : index
    %c0_397 = arith.constant 0 : index
    %565 = vector.load %arg28[%c0_396, %c0_397] : memref<16x16xf32, #tpu.memory_space<vmem>>, vector<16x16xf32>
    tpu.vector_store %arg28[%c0_396, %c0_397], %564 {strides = array<i32>} : memref<16x16xf32, #tpu.memory_space<vmem>>, vector<16x16xf32>,
    %cst_398 = arith.constant 0.000000e+00 : f32
    %566 = vector.broadcast %cst_398 : f32 to vector<10x16xf32>
    %c0_399 = arith.constant 0 : index
    %c0_400 = arith.constant 0 : index
    %567 = vector.load %arg29[%c0_399, %c0_400] : memref<10x16xf32, #tpu.memory_space<vmem>>, vector<10x16xf32>
    tpu.vector_store %arg29[%c0_399, %c0_400], %566 {strides = array<i32>} : memref<10x16xf32, #tpu.memory_space<vmem>>, vector<10x16xf32>,
    %c0_401 = arith.constant 0 : index
    %c0_402 = arith.constant 0 : index
    %568 = vector.load %arg28[%c0_401, %c0_402] : memref<16x16xf32, #tpu.memory_space<vmem>>, vector<1x16xf32>
    %c3_403 = arith.constant 3 : index
    %c0_404 = arith.constant 0 : index
    %569 = vector.load %arg29[%c3_403, %c0_404] : memref<10x16xf32, #tpu.memory_space<vmem>>, vector<1x16xf32>
    tpu.vector_store %arg29[%c3_403, %c0_404], %568 {strides = array<i32>} : memref<10x16xf32, #tpu.memory_space<vmem>>, vector<1x16xf32>,
    %c2_405 = arith.constant 2 : index
    %c0_406 = arith.constant 0 : index
    %570 = vector.load %arg28[%c2_405, %c0_406] : memref<16x16xf32, #tpu.memory_space<vmem>>, vector<1x16xf32>
    %c4_407 = arith.constant 4 : index
    %c0_408 = arith.constant 0 : index
    %571 = vector.load %arg29[%c4_407, %c0_408] : memref<10x16xf32, #tpu.memory_space<vmem>>, vector<1x16xf32>
    tpu.vector_store %arg29[%c4_407, %c0_408], %570 {strides = array<i32>} : memref<10x16xf32, #tpu.memory_space<vmem>>, vector<1x16xf32>,
    %c8_409 = arith.constant 8 : index
    %c0_410 = arith.constant 0 : index
    %572 = vector.load %arg28[%c8_409, %c0_410] : memref<16x16xf32, #tpu.memory_space<vmem>>, vector<1x16xf32>
    %c5_411 = arith.constant 5 : index
    %c0_412 = arith.constant 0 : index
    %573 = vector.load %arg29[%c5_411, %c0_412] : memref<10x16xf32, #tpu.memory_space<vmem>>, vector<1x16xf32>
    tpu.vector_store %arg29[%c5_411, %c0_412], %572 {strides = array<i32>} : memref<10x16xf32, #tpu.memory_space<vmem>>, vector<1x16xf32>,
    %c10_413 = arith.constant 10 : index
    %c0_414 = arith.constant 0 : index
    %574 = vector.load %arg28[%c10_413, %c0_414] : memref<16x16xf32, #tpu.memory_space<vmem>>, vector<1x16xf32>
    %c6_415 = arith.constant 6 : index
    %c0_416 = arith.constant 0 : index
    %575 = vector.load %arg29[%c6_415, %c0_416] : memref<10x16xf32, #tpu.memory_space<vmem>>, vector<1x16xf32>
    tpu.vector_store %arg29[%c6_415, %c0_416], %574 {strides = array<i32>} : memref<10x16xf32, #tpu.memory_space<vmem>>, vector<1x16xf32>,
    %576 = tpu.iota {dimensions = array<i32: 0>} : vector<64x1xi32>
    %c7_i32_417 = arith.constant 7 : i32
    %577 = vector.broadcast %c7_i32_417 : i32 to vector<64x1xi32>
    %578 = arith.andi %576, %577 : vector<64x1xi32>
    %cst_418 = arith.constant 0.000000e+00 : f32
    %579 = vector.broadcast %cst_418 : f32 to vector<64x40xf32>
    %c0_419 = arith.constant 0 : index
    %c0_420 = arith.constant 0 : index
    %580 = vector.load %arg25[%c0_419, %c0_420] : memref<82x16xf32, #tpu.memory_space<vmem>>, vector<64x16xf32>
    %c1_i32_421 = arith.constant 1 : i32
    %581 = vector.broadcast %c1_i32_421 : i32 to vector<64x1xi32>
    %582 = arith.cmpi sge, %578, %581 : vector<64x1xi32>
    %cst_422 = arith.constant 0.000000e+00 : f32
    %583 = vector.shape_cast %582 : vector<64x1xi1> to vector<64x1xi1>
    %584 = vector.broadcast %583 : vector<64x1xi1> to vector<64x16xi1>
    %585 = vector.broadcast %cst_422 : f32 to vector<64x16xf32>
    %586 = arith.select %584, %580, %585 : vector<64x16xi1>, vector<64x16xf32>
    %c0_423 = arith.constant 0 : index
    %c0_424 = arith.constant 0 : index
    %587 = vector.load %arg12[%c0_423, %c0_424] : memref<144x40xbf16, #tpu.memory_space<vmem>>, vector<16x40xbf16>
    %588 = arith.truncf %586 : vector<64x16xf32> to vector<64x16xbf16>
    %cst_425 = arith.constant dense<0.000000e+00> : vector<64x40xf32>
    %589 = tpu.matmul %588, %587, %cst_425 {dimension_numbers = #tpu.dot_dimension_numbers<[1], [0], [0], [1], [0, 0, 1, 1], [], []>} : vector<64x16xbf16>, vector<16x40xbf16>, vector<64x40xf32> -> vector<64x40xf32>
    %590 = arith.addf %579, %589 : vector<64x40xf32>
    %c1_426 = arith.constant 1 : index
    %c0_427 = arith.constant 0 : index
    %591 = vector.load %arg25[%c1_426, %c0_427] : memref<82x16xf32, #tpu.memory_space<vmem>>, vector<64x16xf32>
    %c16_428 = arith.constant 16 : index
    %c0_429 = arith.constant 0 : index
    %592 = vector.load %arg12[%c16_428, %c0_429] : memref<144x40xbf16, #tpu.memory_space<vmem>>, vector<16x40xbf16>
    %593 = arith.truncf %591 : vector<64x16xf32> to vector<64x16xbf16>
    %cst_430 = arith.constant dense<0.000000e+00> : vector<64x40xf32>
    %594 = tpu.matmul %593, %592, %cst_430 {dimension_numbers = #tpu.dot_dimension_numbers<[1], [0], [0], [1], [0, 0, 1, 1], [], []>} : vector<64x16xbf16>, vector<16x40xbf16>, vector<64x40xf32> -> vector<64x40xf32>
    %595 = arith.addf %590, %594 : vector<64x40xf32>
    %c2_431 = arith.constant 2 : index
    %c0_432 = arith.constant 0 : index
    %596 = vector.load %arg25[%c2_431, %c0_432] : memref<82x16xf32, #tpu.memory_space<vmem>>, vector<64x16xf32>
    %c6_i32_433 = arith.constant 6 : i32
    %597 = vector.broadcast %c6_i32_433 : i32 to vector<64x1xi32>
    %598 = arith.cmpi sle, %578, %597 : vector<64x1xi32>
    %cst_434 = arith.constant 0.000000e+00 : f32
    %599 = vector.shape_cast %598 : vector<64x1xi1> to vector<64x1xi1>
    %600 = vector.broadcast %599 : vector<64x1xi1> to vector<64x16xi1>
    %601 = vector.broadcast %cst_434 : f32 to vector<64x16xf32>
    %602 = arith.select %600, %596, %601 : vector<64x16xi1>, vector<64x16xf32>
    %c32_435 = arith.constant 32 : index
    %c0_436 = arith.constant 0 : index
    %603 = vector.load %arg12[%c32_435, %c0_436] : memref<144x40xbf16, #tpu.memory_space<vmem>>, vector<16x40xbf16>
    %604 = arith.truncf %602 : vector<64x16xf32> to vector<64x16xbf16>
    %cst_437 = arith.constant dense<0.000000e+00> : vector<64x40xf32>
    %605 = tpu.matmul %604, %603, %cst_437 {dimension_numbers = #tpu.dot_dimension_numbers<[1], [0], [0], [1], [0, 0, 1, 1], [], []>} : vector<64x16xbf16>, vector<16x40xbf16>, vector<64x40xf32> -> vector<64x40xf32>
    %606 = arith.addf %595, %605 : vector<64x40xf32>
    %c8_438 = arith.constant 8 : index
    %c0_439 = arith.constant 0 : index
    %607 = vector.load %arg25[%c8_438, %c0_439] : memref<82x16xf32, #tpu.memory_space<vmem>>, vector<64x16xf32>
    %c1_i32_440 = arith.constant 1 : i32
    %608 = vector.broadcast %c1_i32_440 : i32 to vector<64x1xi32>
    %609 = arith.cmpi sge, %578, %608 : vector<64x1xi32>
    %cst_441 = arith.constant 0.000000e+00 : f32
    %610 = vector.shape_cast %609 : vector<64x1xi1> to vector<64x1xi1>
    %611 = vector.broadcast %610 : vector<64x1xi1> to vector<64x16xi1>
    %612 = vector.broadcast %cst_441 : f32 to vector<64x16xf32>
    %613 = arith.select %611, %607, %612 : vector<64x16xi1>, vector<64x16xf32>
    %c48_442 = arith.constant 48 : index
    %c0_443 = arith.constant 0 : index
    %614 = vector.load %arg12[%c48_442, %c0_443] : memref<144x40xbf16, #tpu.memory_space<vmem>>, vector<16x40xbf16>
    %615 = arith.truncf %613 : vector<64x16xf32> to vector<64x16xbf16>
    %cst_444 = arith.constant dense<0.000000e+00> : vector<64x40xf32>
    %616 = tpu.matmul %615, %614, %cst_444 {dimension_numbers = #tpu.dot_dimension_numbers<[1], [0], [0], [1], [0, 0, 1, 1], [], []>} : vector<64x16xbf16>, vector<16x40xbf16>, vector<64x40xf32> -> vector<64x40xf32>
    %617 = arith.addf %606, %616 : vector<64x40xf32>
    %c9_445 = arith.constant 9 : index
    %c0_446 = arith.constant 0 : index
    %618 = vector.load %arg25[%c9_445, %c0_446] : memref<82x16xf32, #tpu.memory_space<vmem>>, vector<64x16xf32>
    %c64_447 = arith.constant 64 : index
    %c0_448 = arith.constant 0 : index
    %619 = vector.load %arg12[%c64_447, %c0_448] : memref<144x40xbf16, #tpu.memory_space<vmem>>, vector<16x40xbf16>
    %620 = arith.truncf %618 : vector<64x16xf32> to vector<64x16xbf16>
    %cst_449 = arith.constant dense<0.000000e+00> : vector<64x40xf32>
    %621 = tpu.matmul %620, %619, %cst_449 {dimension_numbers = #tpu.dot_dimension_numbers<[1], [0], [0], [1], [0, 0, 1, 1], [], []>} : vector<64x16xbf16>, vector<16x40xbf16>, vector<64x40xf32> -> vector<64x40xf32>
    %622 = arith.addf %617, %621 : vector<64x40xf32>
    %c10_450 = arith.constant 10 : index
    %c0_451 = arith.constant 0 : index
    %623 = vector.load %arg25[%c10_450, %c0_451] : memref<82x16xf32, #tpu.memory_space<vmem>>, vector<64x16xf32>
    %c6_i32_452 = arith.constant 6 : i32
    %624 = vector.broadcast %c6_i32_452 : i32 to vector<64x1xi32>
    %625 = arith.cmpi sle, %578, %624 : vector<64x1xi32>
    %cst_453 = arith.constant 0.000000e+00 : f32
    %626 = vector.shape_cast %625 : vector<64x1xi1> to vector<64x1xi1>
    %627 = vector.broadcast %626 : vector<64x1xi1> to vector<64x16xi1>
    %628 = vector.broadcast %cst_453 : f32 to vector<64x16xf32>
    %629 = arith.select %627, %623, %628 : vector<64x16xi1>, vector<64x16xf32>
    %c80_454 = arith.constant 80 : index
    %c0_455 = arith.constant 0 : index
    %630 = vector.load %arg12[%c80_454, %c0_455] : memref<144x40xbf16, #tpu.memory_space<vmem>>, vector<16x40xbf16>
    %631 = arith.truncf %629 : vector<64x16xf32> to vector<64x16xbf16>
    %cst_456 = arith.constant dense<0.000000e+00> : vector<64x40xf32>
    %632 = tpu.matmul %631, %630, %cst_456 {dimension_numbers = #tpu.dot_dimension_numbers<[1], [0], [0], [1], [0, 0, 1, 1], [], []>} : vector<64x16xbf16>, vector<16x40xbf16>, vector<64x40xf32> -> vector<64x40xf32>
    %633 = arith.addf %622, %632 : vector<64x40xf32>
    %c16_457 = arith.constant 16 : index
    %c0_458 = arith.constant 0 : index
    %634 = vector.load %arg25[%c16_457, %c0_458] : memref<82x16xf32, #tpu.memory_space<vmem>>, vector<64x16xf32>
    %c1_i32_459 = arith.constant 1 : i32
    %635 = vector.broadcast %c1_i32_459 : i32 to vector<64x1xi32>
    %636 = arith.cmpi sge, %578, %635 : vector<64x1xi32>
    %cst_460 = arith.constant 0.000000e+00 : f32
    %637 = vector.shape_cast %636 : vector<64x1xi1> to vector<64x1xi1>
    %638 = vector.broadcast %637 : vector<64x1xi1> to vector<64x16xi1>
    %639 = vector.broadcast %cst_460 : f32 to vector<64x16xf32>
    %640 = arith.select %638, %634, %639 : vector<64x16xi1>, vector<64x16xf32>
    %c96_461 = arith.constant 96 : index
    %c0_462 = arith.constant 0 : index
    %641 = vector.load %arg12[%c96_461, %c0_462] : memref<144x40xbf16, #tpu.memory_space<vmem>>, vector<16x40xbf16>
    %642 = arith.truncf %640 : vector<64x16xf32> to vector<64x16xbf16>
    %cst_463 = arith.constant dense<0.000000e+00> : vector<64x40xf32>
    %643 = tpu.matmul %642, %641, %cst_463 {dimension_numbers = #tpu.dot_dimension_numbers<[1], [0], [0], [1], [0, 0, 1, 1], [], []>} : vector<64x16xbf16>, vector<16x40xbf16>, vector<64x40xf32> -> vector<64x40xf32>
    %644 = arith.addf %633, %643 : vector<64x40xf32>
    %c17_464 = arith.constant 17 : index
    %c0_465 = arith.constant 0 : index
    %645 = vector.load %arg25[%c17_464, %c0_465] : memref<82x16xf32, #tpu.memory_space<vmem>>, vector<64x16xf32>
    %c112_466 = arith.constant 112 : index
    %c0_467 = arith.constant 0 : index
    %646 = vector.load %arg12[%c112_466, %c0_467] : memref<144x40xbf16, #tpu.memory_space<vmem>>, vector<16x40xbf16>
    %647 = arith.truncf %645 : vector<64x16xf32> to vector<64x16xbf16>
    %cst_468 = arith.constant dense<0.000000e+00> : vector<64x40xf32>
    %648 = tpu.matmul %647, %646, %cst_468 {dimension_numbers = #tpu.dot_dimension_numbers<[1], [0], [0], [1], [0, 0, 1, 1], [], []>} : vector<64x16xbf16>, vector<16x40xbf16>, vector<64x40xf32> -> vector<64x40xf32>
    %649 = arith.addf %644, %648 : vector<64x40xf32>
    %c18_469 = arith.constant 18 : index
    %c0_470 = arith.constant 0 : index
    %650 = vector.load %arg25[%c18_469, %c0_470] : memref<82x16xf32, #tpu.memory_space<vmem>>, vector<64x16xf32>
    %c6_i32_471 = arith.constant 6 : i32
    %651 = vector.broadcast %c6_i32_471 : i32 to vector<64x1xi32>
    %652 = arith.cmpi sle, %578, %651 : vector<64x1xi32>
    %cst_472 = arith.constant 0.000000e+00 : f32
    %653 = vector.shape_cast %652 : vector<64x1xi1> to vector<64x1xi1>
    %654 = vector.broadcast %653 : vector<64x1xi1> to vector<64x16xi1>
    %655 = vector.broadcast %cst_472 : f32 to vector<64x16xf32>
    %656 = arith.select %654, %650, %655 : vector<64x16xi1>, vector<64x16xf32>
    %c128_473 = arith.constant 128 : index
    %c0_474 = arith.constant 0 : index
    %657 = vector.load %arg12[%c128_473, %c0_474] : memref<144x40xbf16, #tpu.memory_space<vmem>>, vector<16x40xbf16>
    %658 = arith.truncf %656 : vector<64x16xf32> to vector<64x16xbf16>
    %cst_475 = arith.constant dense<0.000000e+00> : vector<64x40xf32>
    %659 = tpu.matmul %658, %657, %cst_475 {dimension_numbers = #tpu.dot_dimension_numbers<[1], [0], [0], [1], [0, 0, 1, 1], [], []>} : vector<64x16xbf16>, vector<16x40xbf16>, vector<64x40xf32> -> vector<64x40xf32>
    %660 = arith.addf %649, %659 : vector<64x40xf32>
    %c0_476 = arith.constant 0 : index
    %c0_477 = arith.constant 0 : index
    %661 = vector.load %arg13[%c0_476, %c0_477] : memref<1x40xf32, #tpu.memory_space<vmem>>, vector<1x40xf32>
    %662 = vector.broadcast %661 : vector<1x40xf32> to vector<64x40xf32>
    %663 = arith.addf %660, %662 : vector<64x40xf32>
    %c0_478 = arith.constant 0 : index
    %c0_479 = arith.constant 0 : index
    %c0_480 = arith.constant 0 : index
    %664 = vector.load %arg18[%c0_478, %c0_479, %c0_480] : memref<1x64x40xf32, #tpu.memory_space<vmem>>, vector<1x64x40xf32>
    %665 = vector.shape_cast %664 : vector<1x64x40xf32> to vector<64x40xf32>
    %666 = vector.shape_cast %663 : vector<64x40xf32> to vector<1x64x40xf32>
    tpu.vector_store %arg18[%c0_478, %c0_479, %c0_480], %666 {strides = array<i32>} : memref<1x64x40xf32, #tpu.memory_space<vmem>>, vector<1x64x40xf32>,
    %667 = tpu.iota {dimensions = array<i32: 0>} : vector<16x1xi32>
    %c3_i32_481 = arith.constant 3 : i32
    %668 = vector.broadcast %c3_i32_481 : i32 to vector<16x1xi32>
    %669 = arith.andi %667, %668 : vector<16x1xi32>
    %cst_482 = arith.constant 0.000000e+00 : f32
    %670 = vector.broadcast %cst_482 : f32 to vector<16x60xf32>
    %c0_483 = arith.constant 0 : index
    %c0_484 = arith.constant 0 : index
    %671 = vector.load %arg27[%c0_483, %c0_484] : memref<26x16xf32, #tpu.memory_space<vmem>>, vector<16x16xf32>
    %c1_i32_485 = arith.constant 1 : i32
    %672 = vector.broadcast %c1_i32_485 : i32 to vector<16x1xi32>
    %673 = arith.cmpi sge, %669, %672 : vector<16x1xi32>
    %cst_486 = arith.constant 0.000000e+00 : f32
    %674 = vector.shape_cast %673 : vector<16x1xi1> to vector<16x1xi1>
    %675 = vector.broadcast %674 : vector<16x1xi1> to vector<16x16xi1>
    %676 = vector.broadcast %cst_486 : f32 to vector<16x16xf32>
    %677 = arith.select %675, %671, %676 : vector<16x16xi1>, vector<16x16xf32>
    %c0_487 = arith.constant 0 : index
    %c0_488 = arith.constant 0 : index
    %678 = vector.load %arg14[%c0_487, %c0_488] : memref<144x60xbf16, #tpu.memory_space<vmem>>, vector<16x60xbf16>
    %679 = arith.truncf %677 : vector<16x16xf32> to vector<16x16xbf16>
    %cst_489 = arith.constant dense<0.000000e+00> : vector<16x60xf32>
    %680 = tpu.matmul %679, %678, %cst_489 {dimension_numbers = #tpu.dot_dimension_numbers<[1], [0], [0], [1], [0, 0, 1, 1], [], []>} : vector<16x16xbf16>, vector<16x60xbf16>, vector<16x60xf32> -> vector<16x60xf32>
    %681 = arith.addf %670, %680 : vector<16x60xf32>
    %c1_490 = arith.constant 1 : index
    %c0_491 = arith.constant 0 : index
    %682 = vector.load %arg27[%c1_490, %c0_491] : memref<26x16xf32, #tpu.memory_space<vmem>>, vector<16x16xf32>
    %c16_492 = arith.constant 16 : index
    %c0_493 = arith.constant 0 : index
    %683 = vector.load %arg14[%c16_492, %c0_493] : memref<144x60xbf16, #tpu.memory_space<vmem>>, vector<16x60xbf16>
    %684 = arith.truncf %682 : vector<16x16xf32> to vector<16x16xbf16>
    %cst_494 = arith.constant dense<0.000000e+00> : vector<16x60xf32>
    %685 = tpu.matmul %684, %683, %cst_494 {dimension_numbers = #tpu.dot_dimension_numbers<[1], [0], [0], [1], [0, 0, 1, 1], [], []>} : vector<16x16xbf16>, vector<16x60xbf16>, vector<16x60xf32> -> vector<16x60xf32>
    %686 = arith.addf %681, %685 : vector<16x60xf32>
    %c2_495 = arith.constant 2 : index
    %c0_496 = arith.constant 0 : index
    %687 = vector.load %arg27[%c2_495, %c0_496] : memref<26x16xf32, #tpu.memory_space<vmem>>, vector<16x16xf32>
    %c2_i32_497 = arith.constant 2 : i32
    %688 = vector.broadcast %c2_i32_497 : i32 to vector<16x1xi32>
    %689 = arith.cmpi sle, %669, %688 : vector<16x1xi32>
    %cst_498 = arith.constant 0.000000e+00 : f32
    %690 = vector.shape_cast %689 : vector<16x1xi1> to vector<16x1xi1>
    %691 = vector.broadcast %690 : vector<16x1xi1> to vector<16x16xi1>
    %692 = vector.broadcast %cst_498 : f32 to vector<16x16xf32>
    %693 = arith.select %691, %687, %692 : vector<16x16xi1>, vector<16x16xf32>
    %c32_499 = arith.constant 32 : index
    %c0_500 = arith.constant 0 : index
    %694 = vector.load %arg14[%c32_499, %c0_500] : memref<144x60xbf16, #tpu.memory_space<vmem>>, vector<16x60xbf16>
    %695 = arith.truncf %693 : vector<16x16xf32> to vector<16x16xbf16>
    %cst_501 = arith.constant dense<0.000000e+00> : vector<16x60xf32>
    %696 = tpu.matmul %695, %694, %cst_501 {dimension_numbers = #tpu.dot_dimension_numbers<[1], [0], [0], [1], [0, 0, 1, 1], [], []>} : vector<16x16xbf16>, vector<16x60xbf16>, vector<16x60xf32> -> vector<16x60xf32>
    %697 = arith.addf %686, %696 : vector<16x60xf32>
    %c4_502 = arith.constant 4 : index
    %c0_503 = arith.constant 0 : index
    %698 = vector.load %arg27[%c4_502, %c0_503] : memref<26x16xf32, #tpu.memory_space<vmem>>, vector<16x16xf32>
    %c1_i32_504 = arith.constant 1 : i32
    %699 = vector.broadcast %c1_i32_504 : i32 to vector<16x1xi32>
    %700 = arith.cmpi sge, %669, %699 : vector<16x1xi32>
    %cst_505 = arith.constant 0.000000e+00 : f32
    %701 = vector.shape_cast %700 : vector<16x1xi1> to vector<16x1xi1>
    %702 = vector.broadcast %701 : vector<16x1xi1> to vector<16x16xi1>
    %703 = vector.broadcast %cst_505 : f32 to vector<16x16xf32>
    %704 = arith.select %702, %698, %703 : vector<16x16xi1>, vector<16x16xf32>
    %c48_506 = arith.constant 48 : index
    %c0_507 = arith.constant 0 : index
    %705 = vector.load %arg14[%c48_506, %c0_507] : memref<144x60xbf16, #tpu.memory_space<vmem>>, vector<16x60xbf16>
    %706 = arith.truncf %704 : vector<16x16xf32> to vector<16x16xbf16>
    %cst_508 = arith.constant dense<0.000000e+00> : vector<16x60xf32>
    %707 = tpu.matmul %706, %705, %cst_508 {dimension_numbers = #tpu.dot_dimension_numbers<[1], [0], [0], [1], [0, 0, 1, 1], [], []>} : vector<16x16xbf16>, vector<16x60xbf16>, vector<16x60xf32> -> vector<16x60xf32>
    %708 = arith.addf %697, %707 : vector<16x60xf32>
    %c5_509 = arith.constant 5 : index
    %c0_510 = arith.constant 0 : index
    %709 = vector.load %arg27[%c5_509, %c0_510] : memref<26x16xf32, #tpu.memory_space<vmem>>, vector<16x16xf32>
    %c64_511 = arith.constant 64 : index
    %c0_512 = arith.constant 0 : index
    %710 = vector.load %arg14[%c64_511, %c0_512] : memref<144x60xbf16, #tpu.memory_space<vmem>>, vector<16x60xbf16>
    %711 = arith.truncf %709 : vector<16x16xf32> to vector<16x16xbf16>
    %cst_513 = arith.constant dense<0.000000e+00> : vector<16x60xf32>
    %712 = tpu.matmul %711, %710, %cst_513 {dimension_numbers = #tpu.dot_dimension_numbers<[1], [0], [0], [1], [0, 0, 1, 1], [], []>} : vector<16x16xbf16>, vector<16x60xbf16>, vector<16x60xf32> -> vector<16x60xf32>
    %713 = arith.addf %708, %712 : vector<16x60xf32>
    %c6_514 = arith.constant 6 : index
    %c0_515 = arith.constant 0 : index
    %714 = vector.load %arg27[%c6_514, %c0_515] : memref<26x16xf32, #tpu.memory_space<vmem>>, vector<16x16xf32>
    %c2_i32_516 = arith.constant 2 : i32
    %715 = vector.broadcast %c2_i32_516 : i32 to vector<16x1xi32>
    %716 = arith.cmpi sle, %669, %715 : vector<16x1xi32>
    %cst_517 = arith.constant 0.000000e+00 : f32
    %717 = vector.shape_cast %716 : vector<16x1xi1> to vector<16x1xi1>
    %718 = vector.broadcast %717 : vector<16x1xi1> to vector<16x16xi1>
    %719 = vector.broadcast %cst_517 : f32 to vector<16x16xf32>
    %720 = arith.select %718, %714, %719 : vector<16x16xi1>, vector<16x16xf32>
    %c80_518 = arith.constant 80 : index
    %c0_519 = arith.constant 0 : index
    %721 = vector.load %arg14[%c80_518, %c0_519] : memref<144x60xbf16, #tpu.memory_space<vmem>>, vector<16x60xbf16>
    %722 = arith.truncf %720 : vector<16x16xf32> to vector<16x16xbf16>
    %cst_520 = arith.constant dense<0.000000e+00> : vector<16x60xf32>
    %723 = tpu.matmul %722, %721, %cst_520 {dimension_numbers = #tpu.dot_dimension_numbers<[1], [0], [0], [1], [0, 0, 1, 1], [], []>} : vector<16x16xbf16>, vector<16x60xbf16>, vector<16x60xf32> -> vector<16x60xf32>
    %724 = arith.addf %713, %723 : vector<16x60xf32>
    %c8_521 = arith.constant 8 : index
    %c0_522 = arith.constant 0 : index
    %725 = vector.load %arg27[%c8_521, %c0_522] : memref<26x16xf32, #tpu.memory_space<vmem>>, vector<16x16xf32>
    %c1_i32_523 = arith.constant 1 : i32
    %726 = vector.broadcast %c1_i32_523 : i32 to vector<16x1xi32>
    %727 = arith.cmpi sge, %669, %726 : vector<16x1xi32>
    %cst_524 = arith.constant 0.000000e+00 : f32
    %728 = vector.shape_cast %727 : vector<16x1xi1> to vector<16x1xi1>
    %729 = vector.broadcast %728 : vector<16x1xi1> to vector<16x16xi1>
    %730 = vector.broadcast %cst_524 : f32 to vector<16x16xf32>
    %731 = arith.select %729, %725, %730 : vector<16x16xi1>, vector<16x16xf32>
    %c96_525 = arith.constant 96 : index
    %c0_526 = arith.constant 0 : index
    %732 = vector.load %arg14[%c96_525, %c0_526] : memref<144x60xbf16, #tpu.memory_space<vmem>>, vector<16x60xbf16>
    %733 = arith.truncf %731 : vector<16x16xf32> to vector<16x16xbf16>
    %cst_527 = arith.constant dense<0.000000e+00> : vector<16x60xf32>
    %734 = tpu.matmul %733, %732, %cst_527 {dimension_numbers = #tpu.dot_dimension_numbers<[1], [0], [0], [1], [0, 0, 1, 1], [], []>} : vector<16x16xbf16>, vector<16x60xbf16>, vector<16x60xf32> -> vector<16x60xf32>
    %735 = arith.addf %724, %734 : vector<16x60xf32>
    %c9_528 = arith.constant 9 : index
    %c0_529 = arith.constant 0 : index
    %736 = vector.load %arg27[%c9_528, %c0_529] : memref<26x16xf32, #tpu.memory_space<vmem>>, vector<16x16xf32>
    %c112_530 = arith.constant 112 : index
    %c0_531 = arith.constant 0 : index
    %737 = vector.load %arg14[%c112_530, %c0_531] : memref<144x60xbf16, #tpu.memory_space<vmem>>, vector<16x60xbf16>
    %738 = arith.truncf %736 : vector<16x16xf32> to vector<16x16xbf16>
    %cst_532 = arith.constant dense<0.000000e+00> : vector<16x60xf32>
    %739 = tpu.matmul %738, %737, %cst_532 {dimension_numbers = #tpu.dot_dimension_numbers<[1], [0], [0], [1], [0, 0, 1, 1], [], []>} : vector<16x16xbf16>, vector<16x60xbf16>, vector<16x60xf32> -> vector<16x60xf32>
    %740 = arith.addf %735, %739 : vector<16x60xf32>
    %c10_533 = arith.constant 10 : index
    %c0_534 = arith.constant 0 : index
    %741 = vector.load %arg27[%c10_533, %c0_534] : memref<26x16xf32, #tpu.memory_space<vmem>>, vector<16x16xf32>
    %c2_i32_535 = arith.constant 2 : i32
    %742 = vector.broadcast %c2_i32_535 : i32 to vector<16x1xi32>
    %743 = arith.cmpi sle, %669, %742 : vector<16x1xi32>
    %cst_536 = arith.constant 0.000000e+00 : f32
    %744 = vector.shape_cast %743 : vector<16x1xi1> to vector<16x1xi1>
    %745 = vector.broadcast %744 : vector<16x1xi1> to vector<16x16xi1>
    %746 = vector.broadcast %cst_536 : f32 to vector<16x16xf32>
    %747 = arith.select %745, %741, %746 : vector<16x16xi1>, vector<16x16xf32>
    %c128_537 = arith.constant 128 : index
    %c0_538 = arith.constant 0 : index
    %748 = vector.load %arg14[%c128_537, %c0_538] : memref<144x60xbf16, #tpu.memory_space<vmem>>, vector<16x60xbf16>
    %749 = arith.truncf %747 : vector<16x16xf32> to vector<16x16xbf16>
    %cst_539 = arith.constant dense<0.000000e+00> : vector<16x60xf32>
    %750 = tpu.matmul %749, %748, %cst_539 {dimension_numbers = #tpu.dot_dimension_numbers<[1], [0], [0], [1], [0, 0, 1, 1], [], []>} : vector<16x16xbf16>, vector<16x60xbf16>, vector<16x60xf32> -> vector<16x60xf32>
    %751 = arith.addf %740, %750 : vector<16x60xf32>
    %c0_540 = arith.constant 0 : index
    %c0_541 = arith.constant 0 : index
    %752 = vector.load %arg15[%c0_540, %c0_541] : memref<1x60xf32, #tpu.memory_space<vmem>>, vector<1x60xf32>
    %753 = vector.broadcast %752 : vector<1x60xf32> to vector<16x60xf32>
    %754 = arith.addf %751, %753 : vector<16x60xf32>
    %c0_542 = arith.constant 0 : index
    %c0_543 = arith.constant 0 : index
    %c0_544 = arith.constant 0 : index
    %755 = vector.load %arg19[%c0_542, %c0_543, %c0_544] : memref<1x16x60xf32, #tpu.memory_space<vmem>>, vector<1x16x60xf32>
    %756 = vector.shape_cast %755 : vector<1x16x60xf32> to vector<16x60xf32>
    %757 = vector.shape_cast %754 : vector<16x60xf32> to vector<1x16x60xf32>
    tpu.vector_store %arg19[%c0_542, %c0_543, %c0_544], %757 {strides = array<i32>} : memref<1x16x60xf32, #tpu.memory_space<vmem>>, vector<1x16x60xf32>,
    %758 = tpu.iota {dimensions = array<i32: 0>} : vector<4x1xi32>
    %c1_i32_545 = arith.constant 1 : i32
    %759 = vector.broadcast %c1_i32_545 : i32 to vector<4x1xi32>
    %760 = arith.andi %758, %759 : vector<4x1xi32>
    %cst_546 = arith.constant 0.000000e+00 : f32
    %761 = vector.broadcast %cst_546 : f32 to vector<4x40xf32>
    %c0_547 = arith.constant 0 : index
    %c0_548 = arith.constant 0 : index
    %762 = vector.load %arg29[%c0_547, %c0_548] : memref<10x16xf32, #tpu.memory_space<vmem>>, vector<4x16xf32>
    %c1_i32_549 = arith.constant 1 : i32
    %763 = vector.broadcast %c1_i32_549 : i32 to vector<4x1xi32>
    %764 = arith.cmpi sge, %760, %763 : vector<4x1xi32>
    %cst_550 = arith.constant 0.000000e+00 : f32
    %765 = vector.shape_cast %764 : vector<4x1xi1> to vector<4x1xi1>
    %766 = vector.broadcast %765 : vector<4x1xi1> to vector<4x16xi1>
    %767 = vector.broadcast %cst_550 : f32 to vector<4x16xf32>
    %768 = arith.select %766, %762, %767 : vector<4x16xi1>, vector<4x16xf32>
    %c0_551 = arith.constant 0 : index
    %c0_552 = arith.constant 0 : index
    %769 = vector.load %arg16[%c0_551, %c0_552] : memref<144x40xbf16, #tpu.memory_space<vmem>>, vector<16x40xbf16>
    %770 = arith.truncf %768 : vector<4x16xf32> to vector<4x16xbf16>
    %cst_553 = arith.constant dense<0.000000e+00> : vector<4x40xf32>
    %771 = tpu.matmul %770, %769, %cst_553 {dimension_numbers = #tpu.dot_dimension_numbers<[1], [0], [0], [1], [0, 0, 1, 1], [], []>} : vector<4x16xbf16>, vector<16x40xbf16>, vector<4x40xf32> -> vector<4x40xf32>
    %772 = arith.addf %761, %771 : vector<4x40xf32>
    %c1_554 = arith.constant 1 : index
    %c0_555 = arith.constant 0 : index
    %773 = vector.load %arg29[%c1_554, %c0_555] : memref<10x16xf32, #tpu.memory_space<vmem>>, vector<4x16xf32>
    %c16_556 = arith.constant 16 : index
    %c0_557 = arith.constant 0 : index
    %774 = vector.load %arg16[%c16_556, %c0_557] : memref<144x40xbf16, #tpu.memory_space<vmem>>, vector<16x40xbf16>
    %775 = arith.truncf %773 : vector<4x16xf32> to vector<4x16xbf16>
    %cst_558 = arith.constant dense<0.000000e+00> : vector<4x40xf32>
    %776 = tpu.matmul %775, %774, %cst_558 {dimension_numbers = #tpu.dot_dimension_numbers<[1], [0], [0], [1], [0, 0, 1, 1], [], []>} : vector<4x16xbf16>, vector<16x40xbf16>, vector<4x40xf32> -> vector<4x40xf32>
    %777 = arith.addf %772, %776 : vector<4x40xf32>
    %c2_559 = arith.constant 2 : index
    %c0_560 = arith.constant 0 : index
    %778 = vector.load %arg29[%c2_559, %c0_560] : memref<10x16xf32, #tpu.memory_space<vmem>>, vector<4x16xf32>
    %c0_i32 = arith.constant 0 : i32
    %779 = vector.broadcast %c0_i32 : i32 to vector<4x1xi32>
    %780 = arith.cmpi sle, %760, %779 : vector<4x1xi32>
    %cst_561 = arith.constant 0.000000e+00 : f32
    %781 = vector.shape_cast %780 : vector<4x1xi1> to vector<4x1xi1>
    %782 = vector.broadcast %781 : vector<4x1xi1> to vector<4x16xi1>
    %783 = vector.broadcast %cst_561 : f32 to vector<4x16xf32>
    %784 = arith.select %782, %778, %783 : vector<4x16xi1>, vector<4x16xf32>
    %c32_562 = arith.constant 32 : index
    %c0_563 = arith.constant 0 : index
    %785 = vector.load %arg16[%c32_562, %c0_563] : memref<144x40xbf16, #tpu.memory_space<vmem>>, vector<16x40xbf16>
    %786 = arith.truncf %784 : vector<4x16xf32> to vector<4x16xbf16>
    %cst_564 = arith.constant dense<0.000000e+00> : vector<4x40xf32>
    %787 = tpu.matmul %786, %785, %cst_564 {dimension_numbers = #tpu.dot_dimension_numbers<[1], [0], [0], [1], [0, 0, 1, 1], [], []>} : vector<4x16xbf16>, vector<16x40xbf16>, vector<4x40xf32> -> vector<4x40xf32>
    %788 = arith.addf %777, %787 : vector<4x40xf32>
    %c2_565 = arith.constant 2 : index
    %c0_566 = arith.constant 0 : index
    %789 = vector.load %arg29[%c2_565, %c0_566] : memref<10x16xf32, #tpu.memory_space<vmem>>, vector<4x16xf32>
    %c1_i32_567 = arith.constant 1 : i32
    %790 = vector.broadcast %c1_i32_567 : i32 to vector<4x1xi32>
    %791 = arith.cmpi sge, %760, %790 : vector<4x1xi32>
    %cst_568 = arith.constant 0.000000e+00 : f32
    %792 = vector.shape_cast %791 : vector<4x1xi1> to vector<4x1xi1>
    %793 = vector.broadcast %792 : vector<4x1xi1> to vector<4x16xi1>
    %794 = vector.broadcast %cst_568 : f32 to vector<4x16xf32>
    %795 = arith.select %793, %789, %794 : vector<4x16xi1>, vector<4x16xf32>
    %c48_569 = arith.constant 48 : index
    %c0_570 = arith.constant 0 : index
    %796 = vector.load %arg16[%c48_569, %c0_570] : memref<144x40xbf16, #tpu.memory_space<vmem>>, vector<16x40xbf16>
    %797 = arith.truncf %795 : vector<4x16xf32> to vector<4x16xbf16>
    %cst_571 = arith.constant dense<0.000000e+00> : vector<4x40xf32>
    %798 = tpu.matmul %797, %796, %cst_571 {dimension_numbers = #tpu.dot_dimension_numbers<[1], [0], [0], [1], [0, 0, 1, 1], [], []>} : vector<4x16xbf16>, vector<16x40xbf16>, vector<4x40xf32> -> vector<4x40xf32>
    %799 = arith.addf %788, %798 : vector<4x40xf32>
    %c3_572 = arith.constant 3 : index
    %c0_573 = arith.constant 0 : index
    %800 = vector.load %arg29[%c3_572, %c0_573] : memref<10x16xf32, #tpu.memory_space<vmem>>, vector<4x16xf32>
    %c64_574 = arith.constant 64 : index
    %c0_575 = arith.constant 0 : index
    %801 = vector.load %arg16[%c64_574, %c0_575] : memref<144x40xbf16, #tpu.memory_space<vmem>>, vector<16x40xbf16>
    %802 = arith.truncf %800 : vector<4x16xf32> to vector<4x16xbf16>
    %cst_576 = arith.constant dense<0.000000e+00> : vector<4x40xf32>
    %803 = tpu.matmul %802, %801, %cst_576 {dimension_numbers = #tpu.dot_dimension_numbers<[1], [0], [0], [1], [0, 0, 1, 1], [], []>} : vector<4x16xbf16>, vector<16x40xbf16>, vector<4x40xf32> -> vector<4x40xf32>
    %804 = arith.addf %799, %803 : vector<4x40xf32>
    %c4_577 = arith.constant 4 : index
    %c0_578 = arith.constant 0 : index
    %805 = vector.load %arg29[%c4_577, %c0_578] : memref<10x16xf32, #tpu.memory_space<vmem>>, vector<4x16xf32>
    %c0_i32_579 = arith.constant 0 : i32
    %806 = vector.broadcast %c0_i32_579 : i32 to vector<4x1xi32>
    %807 = arith.cmpi sle, %760, %806 : vector<4x1xi32>
    %cst_580 = arith.constant 0.000000e+00 : f32
    %808 = vector.shape_cast %807 : vector<4x1xi1> to vector<4x1xi1>
    %809 = vector.broadcast %808 : vector<4x1xi1> to vector<4x16xi1>
    %810 = vector.broadcast %cst_580 : f32 to vector<4x16xf32>
    %811 = arith.select %809, %805, %810 : vector<4x16xi1>, vector<4x16xf32>
    %c80_581 = arith.constant 80 : index
    %c0_582 = arith.constant 0 : index
    %812 = vector.load %arg16[%c80_581, %c0_582] : memref<144x40xbf16, #tpu.memory_space<vmem>>, vector<16x40xbf16>
    %813 = arith.truncf %811 : vector<4x16xf32> to vector<4x16xbf16>
    %cst_583 = arith.constant dense<0.000000e+00> : vector<4x40xf32>
    %814 = tpu.matmul %813, %812, %cst_583 {dimension_numbers = #tpu.dot_dimension_numbers<[1], [0], [0], [1], [0, 0, 1, 1], [], []>} : vector<4x16xbf16>, vector<16x40xbf16>, vector<4x40xf32> -> vector<4x40xf32>
    %815 = arith.addf %804, %814 : vector<4x40xf32>
    %c4_584 = arith.constant 4 : index
    %c0_585 = arith.constant 0 : index
    %816 = vector.load %arg29[%c4_584, %c0_585] : memref<10x16xf32, #tpu.memory_space<vmem>>, vector<4x16xf32>
    %c1_i32_586 = arith.constant 1 : i32
    %817 = vector.broadcast %c1_i32_586 : i32 to vector<4x1xi32>
    %818 = arith.cmpi sge, %760, %817 : vector<4x1xi32>
    %cst_587 = arith.constant 0.000000e+00 : f32
    %819 = vector.shape_cast %818 : vector<4x1xi1> to vector<4x1xi1>
    %820 = vector.broadcast %819 : vector<4x1xi1> to vector<4x16xi1>
    %821 = vector.broadcast %cst_587 : f32 to vector<4x16xf32>
    %822 = arith.select %820, %816, %821 : vector<4x16xi1>, vector<4x16xf32>
    %c96_588 = arith.constant 96 : index
    %c0_589 = arith.constant 0 : index
    %823 = vector.load %arg16[%c96_588, %c0_589] : memref<144x40xbf16, #tpu.memory_space<vmem>>, vector<16x40xbf16>
    %824 = arith.truncf %822 : vector<4x16xf32> to vector<4x16xbf16>
    %cst_590 = arith.constant dense<0.000000e+00> : vector<4x40xf32>
    %825 = tpu.matmul %824, %823, %cst_590 {dimension_numbers = #tpu.dot_dimension_numbers<[1], [0], [0], [1], [0, 0, 1, 1], [], []>} : vector<4x16xbf16>, vector<16x40xbf16>, vector<4x40xf32> -> vector<4x40xf32>
    %826 = arith.addf %815, %825 : vector<4x40xf32>
    %c5_591 = arith.constant 5 : index
    %c0_592 = arith.constant 0 : index
    %827 = vector.load %arg29[%c5_591, %c0_592] : memref<10x16xf32, #tpu.memory_space<vmem>>, vector<4x16xf32>
    %c112_593 = arith.constant 112 : index
    %c0_594 = arith.constant 0 : index
    %828 = vector.load %arg16[%c112_593, %c0_594] : memref<144x40xbf16, #tpu.memory_space<vmem>>, vector<16x40xbf16>
    %829 = arith.truncf %827 : vector<4x16xf32> to vector<4x16xbf16>
    %cst_595 = arith.constant dense<0.000000e+00> : vector<4x40xf32>
    %830 = tpu.matmul %829, %828, %cst_595 {dimension_numbers = #tpu.dot_dimension_numbers<[1], [0], [0], [1], [0, 0, 1, 1], [], []>} : vector<4x16xbf16>, vector<16x40xbf16>, vector<4x40xf32> -> vector<4x40xf32>
    %831 = arith.addf %826, %830 : vector<4x40xf32>
    %c6_596 = arith.constant 6 : index
    %c0_597 = arith.constant 0 : index
    %832 = vector.load %arg29[%c6_596, %c0_597] : memref<10x16xf32, #tpu.memory_space<vmem>>, vector<4x16xf32>
    %c0_i32_598 = arith.constant 0 : i32
    %833 = vector.broadcast %c0_i32_598 : i32 to vector<4x1xi32>
    %834 = arith.cmpi sle, %760, %833 : vector<4x1xi32>
    %cst_599 = arith.constant 0.000000e+00 : f32
    %835 = vector.shape_cast %834 : vector<4x1xi1> to vector<4x1xi1>
    %836 = vector.broadcast %835 : vector<4x1xi1> to vector<4x16xi1>
    %837 = vector.broadcast %cst_599 : f32 to vector<4x16xf32>
    %838 = arith.select %836, %832, %837 : vector<4x16xi1>, vector<4x16xf32>
    %c128_600 = arith.constant 128 : index
    %c0_601 = arith.constant 0 : index
    %839 = vector.load %arg16[%c128_600, %c0_601] : memref<144x40xbf16, #tpu.memory_space<vmem>>, vector<16x40xbf16>
    %840 = arith.truncf %838 : vector<4x16xf32> to vector<4x16xbf16>
    %cst_602 = arith.constant dense<0.000000e+00> : vector<4x40xf32>
    %841 = tpu.matmul %840, %839, %cst_602 {dimension_numbers = #tpu.dot_dimension_numbers<[1], [0], [0], [1], [0, 0, 1, 1], [], []>} : vector<4x16xbf16>, vector<16x40xbf16>, vector<4x40xf32> -> vector<4x40xf32>
    %842 = arith.addf %831, %841 : vector<4x40xf32>
    %c0_603 = arith.constant 0 : index
    %c0_604 = arith.constant 0 : index
    %843 = vector.load %arg17[%c0_603, %c0_604] : memref<1x40xf32, #tpu.memory_space<vmem>>, vector<1x40xf32>
    %844 = vector.broadcast %843 : vector<1x40xf32> to vector<4x40xf32>
    %845 = arith.addf %842, %844 : vector<4x40xf32>
    %c0_605 = arith.constant 0 : index
    %c0_606 = arith.constant 0 : index
    %c0_607 = arith.constant 0 : index
    %846 = vector.load %arg20[%c0_605, %c0_606, %c0_607] : memref<1x4x40xf32, #tpu.memory_space<vmem>>, vector<1x4x40xf32>
    %847 = vector.shape_cast %846 : vector<1x4x40xf32> to vector<4x40xf32>
    %848 = vector.shape_cast %845 : vector<4x40xf32> to vector<1x4x40xf32>
    tpu.vector_store %arg20[%c0_605, %c0_606, %c0_607], %848 {strides = array<i32>} : memref<1x4x40xf32, #tpu.memory_space<vmem>>, vector<1x4x40xf32>,
    return
  }
  func.func @transform_0(%arg0: i32) -> (i32, i32, i32) {
    %c0_i32 = arith.constant 0 : i32
    %c0_i32_0 = arith.constant 0 : i32
    %c0_i32_1 = arith.constant 0 : i32
    return %arg0, %c0_i32, %c0_i32_0 : i32, i32, i32
  }
  func.func @transform_1(%arg0: i32) -> (i32, i32) {
    %c0_i32 = arith.constant 0 : i32
    %c0_i32_0 = arith.constant 0 : i32
    %c0_i32_1 = arith.constant 0 : i32
    return %c0_i32, %c0_i32_0 : i32, i32
  }
  func.func @transform_2(%arg0: i32) -> (i32, i32) {
    %c0_i32 = arith.constant 0 : i32
    %c0_i32_0 = arith.constant 0 : i32
    %c0_i32_1 = arith.constant 0 : i32
    return %c0_i32, %c0_i32_0 : i32, i32
  }
  func.func @transform_3(%arg0: i32) -> (i32, i32) {
    %c0_i32 = arith.constant 0 : i32
    %c0_i32_0 = arith.constant 0 : i32
    %c0_i32_1 = arith.constant 0 : i32
    return %c0_i32, %c0_i32_0 : i32, i32
  }
  func.func @transform_4(%arg0: i32) -> (i32, i32) {
    %c0_i32 = arith.constant 0 : i32
    %c0_i32_0 = arith.constant 0 : i32
    %c0_i32_1 = arith.constant 0 : i32
    return %c0_i32, %c0_i32_0 : i32, i32
  }
  func.func @transform_5(%arg0: i32) -> (i32, i32) {
    %c0_i32 = arith.constant 0 : i32
    %c0_i32_0 = arith.constant 0 : i32
    %c0_i32_1 = arith.constant 0 : i32
    return %c0_i32, %c0_i32_0 : i32, i32
  }
  func.func @transform_6(%arg0: i32) -> (i32, i32) {
    %c0_i32 = arith.constant 0 : i32
    %c0_i32_0 = arith.constant 0 : i32
    %c0_i32_1 = arith.constant 0 : i32
    return %c0_i32, %c0_i32_0 : i32, i32
  }
  func.func @transform_7(%arg0: i32) -> (i32, i32) {
    %c0_i32 = arith.constant 0 : i32
    %c0_i32_0 = arith.constant 0 : i32
    %c0_i32_1 = arith.constant 0 : i32
    return %c0_i32, %c0_i32_0 : i32, i32
  }
  func.func @transform_8(%arg0: i32) -> (i32, i32) {
    %c0_i32 = arith.constant 0 : i32
    %c0_i32_0 = arith.constant 0 : i32
    %c0_i32_1 = arith.constant 0 : i32
    return %c0_i32, %c0_i32_0 : i32, i32
  }
  func.func @transform_9(%arg0: i32) -> (i32, i32) {
    %c0_i32 = arith.constant 0 : i32
    %c0_i32_0 = arith.constant 0 : i32
    %c0_i32_1 = arith.constant 0 : i32
    return %c0_i32, %c0_i32_0 : i32, i32
  }
  func.func @transform_10(%arg0: i32) -> (i32, i32) {
    %c0_i32 = arith.constant 0 : i32
    %c0_i32_0 = arith.constant 0 : i32
    %c0_i32_1 = arith.constant 0 : i32
    return %c0_i32, %c0_i32_0 : i32, i32
  }
  func.func @transform_11(%arg0: i32) -> (i32, i32) {
    %c0_i32 = arith.constant 0 : i32
    %c0_i32_0 = arith.constant 0 : i32
    %c0_i32_1 = arith.constant 0 : i32
    return %c0_i32, %c0_i32_0 : i32, i32
  }
  func.func @transform_12(%arg0: i32) -> (i32, i32) {
    %c0_i32 = arith.constant 0 : i32
    %c0_i32_0 = arith.constant 0 : i32
    %c0_i32_1 = arith.constant 0 : i32
    return %c0_i32, %c0_i32_0 : i32, i32
  }
  func.func @transform_13(%arg0: i32) -> (i32, i32) {
    %c0_i32 = arith.constant 0 : i32
    %c0_i32_0 = arith.constant 0 : i32
    %c0_i32_1 = arith.constant 0 : i32
    return %c0_i32, %c0_i32_0 : i32, i32
  }
  func.func @transform_14(%arg0: i32) -> (i32, i32) {
    %c0_i32 = arith.constant 0 : i32
    %c0_i32_0 = arith.constant 0 : i32
    %c0_i32_1 = arith.constant 0 : i32
    return %c0_i32, %c0_i32_0 : i32, i32
  }
  func.func @transform_15(%arg0: i32) -> (i32, i32) {
    %c0_i32 = arith.constant 0 : i32
    %c0_i32_0 = arith.constant 0 : i32
    %c0_i32_1 = arith.constant 0 : i32
    return %c0_i32, %c0_i32_0 : i32, i32
  }
  func.func @transform_16(%arg0: i32) -> (i32, i32) {
    %c0_i32 = arith.constant 0 : i32
    %c0_i32_0 = arith.constant 0 : i32
    %c0_i32_1 = arith.constant 0 : i32
    return %c0_i32, %c0_i32_0 : i32, i32
  }
  func.func @transform_17(%arg0: i32) -> (i32, i32, i32) {
    %c0_i32 = arith.constant 0 : i32
    %c0_i32_0 = arith.constant 0 : i32
    %c0_i32_1 = arith.constant 0 : i32
    return %arg0, %c0_i32, %c0_i32_0 : i32, i32, i32
  }
  func.func @transform_18(%arg0: i32) -> (i32, i32, i32) {
    %c0_i32 = arith.constant 0 : i32
    %c0_i32_0 = arith.constant 0 : i32
    %c0_i32_1 = arith.constant 0 : i32
    return %arg0, %c0_i32, %c0_i32_0 : i32, i32, i32
  }
  func.func @transform_19(%arg0: i32) -> (i32, i32, i32) {
    %c0_i32 = arith.constant 0 : i32
    %c0_i32_0 = arith.constant 0 : i32
    %c0_i32_1 = arith.constant 0 : i32
    return %arg0, %c0_i32, %c0_i32_0 : i32, i32, i32
  }
}

</mosaic_0001>

<bundles_post_ra>
// kernel: ssd_forward.1
= control target key start
LH: loop header
LB: loop body
LE: loop exit
PB: predicated region body
PF: predicated region fallthrough
CT: control target
= control target key end

     0   :  { %s18073_s0 = inlined_call_operand.vmem [shape: f32[2,256,3], index: 0, kind: input, shape index: {}]   ;;  %s18074_s1 = inlined_call_operand.vmem [shape: bf16[27,8], index: 1, kind: input, shape index: {}]   ;;  %s18075_s2 = inlined_call_operand.vmem [shape: f32[1,8], index: 2, kind: input, shape index: {}]   ;;  %s18076_s3 = inlined_call_operand.vmem [shape: bf16[72,8], index: 3, kind: input, shape index: {}]   ;;  %s18077_s4 = inlined_call_operand.vmem [shape: f32[1,8], index: 4, kind: input, shape index: {}]   ;;  %s18078_s5 = inlined_call_operand.vmem [shape: bf16[72,16], index: 5, kind: input, shape index: {}]   ;;  %s18079_s6 = inlined_call_operand.vmem [shape: f32[1,16], index: 6, kind: input, shape index: {}]   ;;  %s18080_s7 = inlined_call_operand.vmem [shape: bf16[144,16], index: 7, kind: input, shape index: {}]   ;;  %s18081_s8 = inlined_call_operand.vmem [shape: f32[1,16], index: 8, kind: input, shape index: {}]   ;;  %s18082_s9 = inlined_call_operand.vmem [shape: bf16[144,16], index: 9, kind: input, shape index: {}]   ;;  %s18083_s10 = inlined_call_operand.vmem [shape: f32[1,16], index: 10, kind: input, shape index: {}]   ;;  %s18084_s11 = inlined_call_operand.vmem [shape: bf16[144,40], index: 11, kind: input, shape index: {}]   ;;  %s18085_s12 = inlined_call_operand.vmem [shape: f32[1,40], index: 12, kind: input, shape index: {}]   ;;  %s18086_s13 = inlined_call_operand.vmem [shape: bf16[144,60], index: 13, kind: input, shape index: {}]   ;;  %s18087_s14 = inlined_call_operand.vmem [shape: f32[1,60], index: 14, kind: input, shape index: {}]   ;;  %s18088_s15 = inlined_call_operand.vmem [shape: bf16[144,40], index: 15, kind: input, shape index: {}]   ;;  %s18089_s16 = inlined_call_operand.vmem [shape: f32[1,40], index: 16, kind: input, shape index: {}]   ;;  %s18090_s17 = inlined_call_operand.vmem [shape: f32[2,64,40], index: 17, kind: output, shape index: {0}]   ;;  %s18091_s18 = inlined_call_operand.vmem [shape: f32[2,16,60], index: 18, kind: output, shape index: {1}]   ;;  %s18092_s19 = inlined_call_operand.vmem [shape: f32[2,4,40], index: 19, kind: output, shape index: {2}]  }
   0x1   :  { %18393 = sst [smem:[#allocation132_spill]] %s18073_s0  ;;  %s13424_s0 = smov 0  }
   0x2   :  { %18394 = sst [smem:[#allocation133_spill]] %s18074_s1 }
   0x3   :  { %18395 = sst [smem:[#allocation134_spill]] %s18075_s2 }
   0x4   :  { %18396 = sst [smem:[#allocation135_spill]] %s18076_s3 }
   0x5 LB: > { %s11283_s30 = sadd.s32 4294967295, %s13319_s0   ;;  %p11287_p0 = scmp.ge.s32.totalorder %s13319_s0, 1  ;;  %s13319_s0 = sphi %s13424_s0, %s30_s0  }
   0x6   : > { %p542_p1 = scmp.lt.s32.totalorder %s13319_s0, 3 }
   0x8   : > { %p543_p2 = pnand %p11287_p0, %p542_p1 }
   0xa   : > { %546 = sbr.rel (%p543_p2) target bundleno = 2084 (0x824), region = 88 }
   0xf   : > { %s18397_s1 = sld [smem:[#allocation133_spill]]  ;;  %vm1080_vm0 = vcmask 1040384   ;;  %v730_v1 = vlaneseq  ;;  %vm1081_vm1 = vcmask 1041408   ;;  %vm18106_vm2 = vcmask 23552   ;;  %p607_p3 = scmp.lt.s32.totalorder %s11283_s30, 1 }
  0x10   : > { %v13321_v5 = vmov 65535   ;;  %v18095_v7 = vmov 0.0   ;;  %s18400_s27 = sld [smem:[#allocation132_spill]]  ;;  %v18401_v18 = vmov 0  ;;  %v18406_v47 = vmov 0 }
  0x11   : > { %v1082_v6 = vsel %vm1080_vm0, 4294967295, %v13321_v5  ;;  %660 = vst.msk [vmem:[#allocation2] sm:$0xff] %vm18106_vm2, %v18095_v7  ;;  %661 = vst.msk [vmem:[#allocation2 + $0x8] sm:$0xff] %vm18106_vm2, %v18095_v7  ;;  %v13518_v10 = vshrl.u32 %v730_v1, 7  ;;  %s19607_s30 = smov (!%p607_p3, %s11283_s30), 1  ;;  %v18409_v52 = vmov 0 }
  0x12   : > { %662 = vst.msk [vmem:[#allocation2 + $0x10] sm:$0xff] %vm18106_vm2, %v18095_v7  ;;  %663 = vst.msk [vmem:[#allocation2 + $0x18] sm:$0xff] %vm18106_vm2, %v18095_v7  ;;  %v13513_v8 = vsel %vm1081_vm1, %v1082_v6, 0  ;;  %s11753_s25 = sshll.u32 %s19607_s30, 8  ;;  %v18413_v5 = vmov 0  ;;  %s18713_s21 = sld [smem:[#allocation135_spill]] }
  0x13   : > { %664 = vst.msk [vmem:[#allocation2 + $0x20] sm:$0xff] %vm18106_vm2, %v18095_v7  ;;  %665 = vst.msk [vmem:[#allocation2 + $0x28] sm:$0xff] %vm18106_vm2, %v18095_v7  ;;  %v763_v15 = vand.u32 15, %v13518_v10  ;;  %v13528_v17 = vadd.s32 16, %v13518_v10  ;;  %v13540_v19 = vadd.s32 32, %v13518_v10  ;;  %v13558_v34 = vadd.s32 48, %v13518_v10 }
  0x14   : > { %666 = vst.msk [vmem:[#allocation2 + $0x30] sm:$0xff] %vm18106_vm2, %v18095_v7  ;;  %667 = vst.msk [vmem:[#allocation2 + $0x38] sm:$0xff] %vm18106_vm2, %v18095_v7  ;;  %v739_v40 = vadd.s32 64, %v13518_v10  ;;  %v741_v6 = vadd.s32 80, %v13518_v10  ;;  %s11754_s24 = sshll.u32 %s19607_s30, 6  ;;  %s11755_s29 = sshll.u32 %s19607_s30, 4 }
  0x15   : > { %v13261_v0 = vld [vmem:[%s18397_s1] ss:$0 sps:$4 sm:$0x66]   ;;  %668 = vst.msk [vmem:[#allocation2 + $0x40] sm:$0xff] %vm18106_vm2, %v18095_v7  ;;  %669 = vst.msk [vmem:[#allocation2 + $0x48] sm:$0xff] %vm18106_vm2, %v18095_v7  ;;  %vm13535_vm3 = vcmp.ge.s32.totalorder %v763_v15, 1 }
  0x16   : > { %v955_v2 = vld [vmem:[%s18397_s1] sm:$0x3]  ;;  %v1025_v3 = vshrl.u32 %v13261_v0, 16  ;;  %v1028_v4 = vshll.u32 %v13261_v0, 16  ;;  %670 = vst.msk [vmem:[#allocation2 + $0x50] sm:$0xff] %vm18106_vm2, %v18095_v7  ;;  %671 = vst.msk [vmem:[#allocation2 + $0x58] sm:$0xff] %vm18106_vm2, %v18095_v7  ;;  %s13533_s28 = scalar_lea.vmem %s18400_s27, %s11753_s25 }
  0x17   : > { %672 = vst.msk [vmem:[#allocation2 + $0x60] sm:$0xff] %vm18106_vm2, %v18095_v7  ;;  %673 = vst.msk [vmem:[#allocation2 + $0x68] sm:$0xff] %vm18106_vm2, %v18095_v7  ;;  %v13262_v9 = vld [vmem:[%s18397_s1] sm:$0x18]   ;;  %v1297_v13 = vand.u32 %v13513_v8, %v955_v2  ;;  %v18402_v18 = vsel %vm13535_vm3, 4294967295, %v18401_v18  ;;  %v628_v23 = vld [vmem:[%s13533_s28 + $0x8] sm:$0xff] }
  0x18   : > { %674 = vst.msk [vmem:[#allocation2 + $0x70] sm:$0xff] %vm18106_vm2, %v18095_v7  ;;  %675 = vst.msk [vmem:[#allocation2 + $0x78] sm:$0xff] %vm18106_vm2, %v18095_v7  ;;  %v1027_v11 = vrot.slane %v1025_v3, 1  ;;  %v1030_v12 = vrot.slane %v1028_v4, 2  ;;  %v1643_v14 = vrot.slane %v13262_v9, 3  ;;  %v627_v22 = vld [vmem:[%s13533_s28] sm:$0xff] }
  0x19   : > { %676 = vst.msk [vmem:[#allocation2 + $0x80] sm:$0xff] %vm18106_vm2, %v18095_v7  ;;  %677 = vst.msk [vmem:[#allocation2 + $0x88] sm:$0xff] %vm18106_vm2, %v18095_v7  ;;  %12258 = vmatprep.subr.bf16.mxu1 %v1297_v13  ;;  %v629_v24 = vld [vmem:[%s13533_s28 + $0x10] sm:$0xff]  ;;  %v972_v25 = vld [vmem:[#allocation2 + $0x1] sm:$0xff]  ;;  %v765_v31 = vand.u32 15, %v13528_v17  ;;  %v767_v37 = vand.u32 15, %v13540_v19 }
  0x1a   : > { %678 = vst.msk [vmem:[#allocation2 + $0x90] sm:$0xff] %vm18106_vm2, %v18095_v7  ;;  %679 = vst.msk [vmem:[#allocation2 + $0x98] sm:$0xff] %vm18106_vm2, %v18095_v7  ;;  %v1031_v16 = vor.u32 %v1030_v12, %v1027_v11  ;;  %12259 = vmatpush3.bf16.msra.mxu1 %v1297_v13  ;;  %v13544_v21 = vand.u32 %v1643_v14, %v13513_v8  ;;  %v973_v26 = vld [vmem:[#allocation2 + $0x9] sm:$0xff]  ;;  %v795_v27 = vld [vmem:[#allocation2] sm:$0xff]  ;;  %v769_v48 = vand.u32 15, %v13558_v34  ;;  %v771_v53 = vand.u32 15, %v739_v40 }
  0x1b   : > { %680 = vst.msk [vmem:[#allocation2 + $0xa0] sm:$0xff] %vm18106_vm2, %v18095_v7  ;;  %681 = vst.msk [vmem:[#allocation2 + $0xa8] sm:$0xff] %vm18106_vm2, %v18095_v7  ;;  %v1005_v28 = vpack.c.bf16 %v973_v26, %v972_v25  ;;  %v796_v29 = vld [vmem:[#allocation2 + $0x8] sm:$0xff]  ;;  %v923_v30 = vsel %vm13535_vm3, %v795_v27, 0.0  ;;  %v630_v32 = vld [vmem:[%s13533_s28 + $0x18] sm:$0xff]  ;;  %vm13582_vm4 = vcmp.ge.s32.totalorder %v765_v31, 1 }
  0x1c   : > { %682 = vst.msk [vmem:[#allocation2 + $0xb0] sm:$0xff] %vm18106_vm2, %v18095_v7  ;;  %683 = vst.msk [vmem:[#allocation2 + $0xb8] sm:$0xff] %vm18106_vm2, %v18095_v7  ;;  %v1085_v20 = vand.u32 %v13513_v8, %v1031_v16  ;;  %v631_v33 = vld [vmem:[%s13533_s28 + $0x20] sm:$0xff]  ;;  %v956_v35 = vpack.c.bf16 %v796_v29, %v923_v30  ;;  %v632_v36 = vld [vmem:[%s13533_s28 + $0x28] sm:$0xff]  ;;  %v18407_v47 = vsel %vm13582_vm4, 4294967295, %v18406_v47  ;;  %vm13593_vm5 = vcmp.ge.s32.totalorder %v767_v37, 1 }
  0x1d   : > { %684 = vst.msk [vmem:[#allocation2 + $0xc0] sm:$0xff] %vm18106_vm2, %v18095_v7  ;;  %685 = vst.msk [vmem:[#allocation2 + $0xc8] sm:$0xff] %vm18106_vm2, %v18095_v7  ;;  %v633_v38 = vld [vmem:[%s13533_s28 + $0x30] sm:$0xff]  ;;  %v634_v39 = vld [vmem:[%s13533_s28 + $0x38] sm:$0xff]  ;;  %12226 = vmatprep.mubr.msk.bf16.mxu0 %vm18106_vm2, %v1005_v28  ;;  %v18410_v52 = vsel %vm13593_vm5, 4294967295, %v18409_v52  ;;  %vm13623_vm6 = vcmp.ge.s32.totalorder %v769_v48, 1 }
  0x1e   : > { %686 = vst.msk [vmem:[#allocation2 + $0xd0] sm:$0xff] %vm18106_vm2, %v18095_v7  ;;  %687 = vst.msk [vmem:[#allocation2 + $0xd8] sm:$0xff] %vm18106_vm2, %v18095_v7  ;;  %12224 = vmatprep.subr.bf16.mxu0 %v1085_v20  ;;  %v635_v41 = vld [vmem:[%s13533_s28 + $0x40] sm:$0xff]  ;;  %v636_v42 = vld [vmem:[%s13533_s28 + $0x48] sm:$0xff]  ;;  %12260 = vmatprep.mubr.msk.bf16.mxu1 %vm18106_vm2, %v956_v35  ;;  %v18414_v5 = vsel %vm13623_vm6, 4294967295, %v18413_v5  ;;  %vm13635_vm7 = vcmp.ge.s32.totalorder %v771_v53, 1 }
  0x1f   : > { %688 = vst.msk [vmem:[#allocation2 + $0xe0] sm:$0xff] %vm18106_vm2, %v18095_v7  ;;  %689 = vst.msk [vmem:[#allocation2 + $0xe8] sm:$0xff] %vm18106_vm2, %v18095_v7  ;;  %12225 = vmatpush3.bf16.msra.mxu0 %v1085_v20  ;;  %v637_v43 = vld [vmem:[%s13533_s28 + $0x50] sm:$0xff]  ;;  %v638_v44 = vld [vmem:[%s13533_s28 + $0x58] sm:$0xff]  ;;  %v18417_v13 = vmov 0  ;;  %v743_v14 = vadd.s32 96, %v13518_v10 }
  0x20   : > { %690 = vst.msk [vmem:[#allocation2 + $0xf0] sm:$0xff] %vm18106_vm2, %v18095_v7  ;;  %691 = vst.msk [vmem:[#allocation2 + $0xf8] sm:$0xff] %vm18106_vm2, %v18095_v7  ;;  %12292 = vmatprep.subr.bf16.mxu0 %v13544_v21  ;;  %v639_v45 = vld [vmem:[%s13533_s28 + $0x60] sm:$0xff]  ;;  %v640_v46 = vld [vmem:[%s13533_s28 + $0x68] sm:$0xff]  ;;  %v18418_v13 = vsel %vm13635_vm7, 4294967295, %v18417_v13  ;;  %v773_v27 = vand.u32 15, %v741_v6 }
  0x21   : > { %692 = vst.msk [vmem:[#allocation2 + $0x100] sm:$0xff] %vm18106_vm2, %v18095_v7  ;;  %693 = vst.msk [vmem:[#allocation2 + $0x108] sm:$0xff] %vm18106_vm2, %v18095_v7  ;;  %v641_v49 = vld [vmem:[%s13533_s28 + $0x70] sm:$0xff]  ;;  %v642_v50 = vld [vmem:[%s13533_s28 + $0x78] sm:$0xff]  ;;  %v775_v29 = vand.u32 15, %v743_v14  ;;  %v745_v37 = vadd.s32 112, %v13518_v10 }
  0x22   : > { %694 = vst.msk [vmem:[#allocation2 + $0x110] sm:$0xff] %vm18106_vm2, %v18095_v7  ;;  %695 = vst.msk [vmem:[#allocation2 + $0x118] sm:$0xff] %vm18106_vm2, %v18095_v7  ;;  %v643_v51 = vld [vmem:[%s13533_s28 + $0x80] sm:$0xff]  ;;  %v644_v54 = vld [vmem:[%s13533_s28 + $0x88] sm:$0xff]  ;;  %vm13668_vm8 = vcmp.ge.s32.totalorder %v773_v27, 1  ;;  %v18452_v7 = vmov 0 }
  0x23   : > { %18398 = vst [vmem:[#allocation11_spill] sm:$0xff] %v13518_v10  ;;  %18399 = vst [vmem:[#allocation12_spill] sm:$0xff] %v13528_v17  ;;  %v645_v55 = vld [vmem:[%s13533_s28 + $0x90] sm:$0xff]  ;;  %v646_v56 = vld [vmem:[%s13533_s28 + $0x98] sm:$0xff]  ;;  %vm13678_vm9 = vcmp.ge.s32.totalorder %v775_v29, 1  ;;  %v18430_v29 = vmov 0 }
  0x24   : > { %18403 = vst [vmem:[#allocation13_spill] sm:$0xff] %v18402_v18  ;;  %18404 = vst [vmem:[#allocation14_spill] sm:$0xff] %v13540_v19  ;;  %v13263_v30 = vld [vmem:[%s18397_s1 + $0x4] ss:$0 sps:$4 sm:$0x33]   ;;  %v648_v53 = vld [vmem:[%s13533_s28 + $0xa8] sm:$0xff] }
  0x25   : > { %698 = vst.msk [vmem:[#allocation2 + $0x11] sm:$0xff] %vm18106_vm2, %v627_v22  ;;  %699 = vst.msk [vmem:[#allocation2 + $0x19] sm:$0xff] %vm18106_vm2, %v628_v23  ;;  %v647_v48 = vld [vmem:[%s13533_s28 + $0xa0] sm:$0xff]  ;;  %v654_v6 = vld [vmem:[%s13533_s28 + $0xd8] sm:$0xff]  ;;  %v13840_v17 = vadd.s32 24, %v13518_v10  ;;  %s11294_s25 = sshll.u32 %s19607_s30, 2 }
  0x26   : > { %700 = vst.msk [vmem:[#allocation2 + $0x21] sm:$0xff] %vm18106_vm2, %v629_v24  ;;  %18405 = vst [vmem:[#allocation15_spill] sm:$0xff] %v13558_v34 }
  0x27   : > { %701 = vst.msk [vmem:[#allocation2 + $0x29] sm:$0xff] %vm18106_vm2, %v630_v32  ;;  %702 = vst.msk [vmem:[#allocation2 + $0x31] sm:$0xff] %vm18106_vm2, %v631_v33 }
  0x28   : > { %703 = vst.msk [vmem:[#allocation2 + $0x39] sm:$0xff] %vm18106_vm2, %v632_v36  ;;  %704 = vst.msk [vmem:[#allocation2 + $0x41] sm:$0xff] %vm18106_vm2, %v633_v38  ;;  %v18422_v36 = vmov 0  ;;  %v747_v38 = vadd.s32 128, %v13518_v10 }
  0x29   : > { %705 = vst.msk [vmem:[#allocation2 + $0x49] sm:$0xff] %vm18106_vm2, %v634_v39  ;;  %706 = vst.msk [vmem:[#allocation2 + $0x51] sm:$0xff] %vm18106_vm2, %v635_v41  ;;  %v18423_v36 = vsel %vm13668_vm8, 4294967295, %v18422_v36 }
  0x2a   : > { %707 = vst.msk [vmem:[#allocation2 + $0x59] sm:$0xff] %vm18106_vm2, %v636_v42  ;;  %708 = vst.msk [vmem:[#allocation2 + $0x61] sm:$0xff] %vm18106_vm2, %v637_v43  ;;  %v18425_v42 = vmov 0  ;;  %v1973_v43 = vshrl.u32 %v13263_v30, 16 }
  0x2b   : > { %18408 = vst [vmem:[#allocation16_spill] sm:$0xff] %v18407_v47  ;;  %709 = vst.msk [vmem:[#allocation2 + $0x69] sm:$0xff] %vm18106_vm2, %v638_v44  ;;  %v18426_v42 = vsel %vm13678_vm9, 4294967295, %v18425_v42  ;;  %v1975_v44 = vshll.u32 %v13263_v30, 16  ;;  %v749_v30 = vadd.s32 144, %v13518_v10 }
  0x2c   : > { %710 = vst.msk [vmem:[#allocation2 + $0x71] sm:$0xff] %vm18106_vm2, %v639_v45  ;;  %711 = vst.msk [vmem:[#allocation2 + $0x79] sm:$0xff] %vm18106_vm2, %v640_v46  ;;  %v974_v57 = vld [vmem:[#allocation2 + $0x11] sm:$0xff]  ;;  %v975_v58 = vld [vmem:[#allocation2 + $0x19] sm:$0xff] }
  0x2d   : > { %18411 = vst [vmem:[#allocation17_spill] sm:$0xff] %v18410_v52  ;;  %712 = vst.msk [vmem:[#allocation2 + $0x81] sm:$0xff] %vm18106_vm2, %v641_v49  ;;  %v13603_v59 = vld [vmem:[#allocation2 + $0x10] sm:$0xff]  ;;  %v13608_v60 = vpack.c.bf16 %v975_v58, %v974_v57  ;;  %v13610_v61 = vld [vmem:[#allocation2 + $0x18] sm:$0xff] }
  0x2e   : > { %713 = vst.msk [vmem:[#allocation2 + $0x89] sm:$0xff] %vm18106_vm2, %v642_v50  ;;  %714 = vst.msk [vmem:[#allocation2 + $0x91] sm:$0xff] %vm18106_vm2, %v643_v51  ;;  %v925_v62 = vsel %vm13582_vm4, %v13603_v59, 0.0  ;;  %v976_v63 = vld [vmem:[#allocation2 + $0x21] sm:$0xff]  ;;  %v977_v2 = vld [vmem:[#allocation2 + $0x29] sm:$0xff] }
  0x2f   : > { %715 = vst.msk [vmem:[#allocation2 + $0x99] sm:$0xff] %vm18106_vm2, %v644_v54  ;;  %716 = vst.msk [vmem:[#allocation2 + $0xa1] sm:$0xff] %vm18106_vm2, %v645_v55  ;;  %v13615_v0 = vld [vmem:[#allocation2 + $0x20] sm:$0xff]  ;;  %v957_v1 = vpack.c.bf16 %v13610_v61, %v925_v62  ;;  %v13618_v3 = vld [vmem:[#allocation2 + $0x28] sm:$0xff]  ;;  %12227 = vmatmul.mubr.msk.bf16.vlgmr.msra.gmra.mxu0 %vm18106_vm2, %v13608_v60  ;;  %v13630_v9 = vpack.c.bf16 %v977_v2, %v976_v63  ;;  %v1977_v54 = vrot.slane %v1975_v44, 1 }
  0x30   : > { %717 = vst.msk [vmem:[#allocation2 + $0xa9] sm:$0xff] %vm18106_vm2, %v646_v56  ;;  %18412 = vst [vmem:[#allocation18_spill] sm:$0xff] %v13608_v60  ;;  %v927_v4 = vsel %vm13593_vm5, %v13615_v0, 0.0  ;;  %v13633_v12 = vld [vmem:[#allocation2 + $0x30] sm:$0xff]  ;;  %12293 = vmatpush3.bf16.msra.mxu0 %v13544_v21  ;;  %v979_v16 = vld [vmem:[#allocation2 + $0x39] sm:$0xff]  ;;  %v777_v56 = vand.u32 15, %v745_v37 }
  0x31   : > { %18415 = vst [vmem:[#allocation19_spill] sm:$0xff] %v18414_v5  ;;  %18416 = vst [vmem:[#allocation20_spill] sm:$0xff] %v13630_v9  ;;  %v958_v11 = vpack.c.bf16 %v13618_v3, %v927_v4  ;;  %12261 = vmatmul.mubr.msk.bf16.vlgmr.msra.gmra.mxu1 %vm18106_vm2, %v957_v1  ;;  %v978_v15 = vld [vmem:[#allocation2 + $0x31] sm:$0xff]  ;;  %12230 = vmatprep.mubr.msk.bf16.mxu0 %vm18106_vm2, %v13630_v9  ;;  %v929_v22 = vsel %vm13623_vm6, %v13633_v12, 0.0  ;;  %v980_v23 = vld [vmem:[#allocation2 + $0x41] sm:$0xff]  ;;  %v779_v1 = vand.u32 15, %v747_v38 }
  0x32   : > { %18419 = vst [vmem:[#allocation21_spill] sm:$0xff] %v18418_v13  ;;  %v13642_v20 = vld [vmem:[#allocation2 + $0x38] sm:$0xff]  ;;  %v981_v24 = vld [vmem:[#allocation2 + $0x49] sm:$0xff]  ;;  %v13650_v25 = vld [vmem:[#allocation2 + $0x40] sm:$0xff]  ;;  %v13657_v28 = vpack.c.bf16 %v979_v16, %v978_v15  ;;  %vm13728_vm10 = vcmp.ge.s32.totalorder %v777_v56, 1  ;;  %v751_v37 = vadd.s32 160, %v13518_v10 }
  0x33   : > { %12264 = vmatprep.mubr.msk.bf16.mxu1 %vm18106_vm2, %v958_v11  ;;  %v13652_v21 = vld [vmem:[#allocation2 + $0x48] sm:$0xff]  ;;  %v931_v26 = vsel %vm13635_vm7, %v13650_v25, 0.0  ;;  %v959_v31 = vpack.c.bf16 %v13642_v20, %v929_v22  ;;  %v13663_v32 = vpack.c.bf16 %v981_v24, %v980_v23  ;;  %v13666_v35 = vld [vmem:[#allocation2 + $0x50] sm:$0xff]  ;;  %18424 = vst [vmem:[#allocation24_spill] sm:$0xff] %v18423_v36  ;;  %v983_v40 = vld [vmem:[#allocation2 + $0x59] sm:$0xff]  ;;  %v1978_v11 = vor.u32 %v1977_v54, %v1973_v43 }
  0x34   : > { %18420 = vst [vmem:[#allocation22_spill] sm:$0xff] %v13657_v28  ;;  %v960_v33 = vpack.c.bf16 %v13652_v21, %v931_v26  ;;  %v982_v39 = vld [vmem:[#allocation2 + $0x51] sm:$0xff]  ;;  %v13676_v41 = vld [vmem:[#allocation2 + $0x60] sm:$0xff]  ;;  %18427 = vst [vmem:[#allocation25_spill] sm:$0xff] %v18426_v42  ;;  %v933_v49 = vsel %vm13668_vm8, %v13666_v35, 0.0  ;;  %v18431_v29 = vsel %vm13728_vm10, 4294967295, %v18430_v29 }
  0x35   : > { %18421 = vst [vmem:[#allocation23_spill] sm:$0xff] %v13663_v32  ;;  %v13685_v45 = vld [vmem:[#allocation2 + $0x58] sm:$0xff]  ;;  %v984_v46 = vld [vmem:[#allocation2 + $0x61] sm:$0xff]  ;;  %v985_v50 = vld [vmem:[#allocation2 + $0x69] sm:$0xff]  ;;  %v935_v55 = vsel %vm13678_vm9, %v13676_v41, 0.0  ;;  %v13703_v63 = vpack.c.bf16 %v983_v40, %v982_v39  ;;  %v2028_v24 = vand.u32 %v1978_v11, %v13513_v8  ;;  %vm13737_vm11 = vcmp.ge.s32.totalorder %v779_v1, 1 }
  0x36   : > { %v13692_v51 = vld [vmem:[#allocation2 + $0x68] sm:$0xff]  ;;  %718 = vst.msk [vmem:[#allocation2 + $0xb1] sm:$0xff] %vm18106_vm2, %v647_v48  ;;  %719 = vst.msk [vmem:[#allocation2 + $0xb9] sm:$0xff] %vm18106_vm2, %v648_v53  ;;  %v649_v57 = vld [vmem:[%s13533_s28 + $0xb0] sm:$0xff]  ;;  %v961_v14 = vpack.c.bf16 %v13685_v45, %v933_v49  ;;  %v13712_v15 = vpack.c.bf16 %v985_v50, %v984_v46  ;;  %v781_v54 = vand.u32 15, %v749_v30  ;;  %v783_v56 = vand.u32 15, %v751_v37 }
  0x37   : > { %12231 = vmatmul.mubr.msk.bf16.gmra.mxu0 %vm18106_vm2, %v13657_v28  ;;  %v650_v58 = vld [vmem:[%s13533_s28 + $0xb8] sm:$0xff]  ;;  %v651_v62 = vld [vmem:[%s13533_s28 + $0xc0] sm:$0xff]  ;;  %18428 = vst [vmem:[#allocation26_spill] sm:$0xff] %v13703_v63  ;;  %720 = vst.msk [vmem:[#allocation2 + $0xc1] sm:$0xff] %vm18106_vm2, %v649_v57  ;;  %v962_v23 = vpack.c.bf16 %v13692_v51, %v935_v55  ;;  %12326 = vmatprep.subr.bf16.mxu1 %v2028_v24  ;;  %v18443_v11 = vmov 0  ;;  %v18482_v60 = vmov 0 }
  0x38   : > { %12234 = vmatprep.mubr.msk.bf16.mxu0 %vm18106_vm2, %v13663_v32  ;;  %721 = vst.msk [vmem:[#allocation2 + $0xc9] sm:$0xff] %vm18106_vm2, %v650_v58  ;;  %v652_v2 = vld [vmem:[%s13533_s28 + $0xc8] sm:$0xff]  ;;  %722 = vst.msk [vmem:[#allocation2 + $0xd1] sm:$0xff] %vm18106_vm2, %v651_v62  ;;  %v653_v4 = vld [vmem:[%s13533_s28 + $0xd0] sm:$0xff]  ;;  %12327 = vmatpush3.bf16.msra.mxu1 %v2028_v24  ;;  %vm13768_vm12 = vcmp.ge.s32.totalorder %v781_v54, 1  ;;  %vm13777_vm13 = vcmp.ge.s32.totalorder %v783_v56, 1 }
  0x39   : > { %12265 = vmatmul.mubr.msk.bf16.gmra.mxu1 %vm18106_vm2, %v959_v31  ;;  %18429 = vst [vmem:[#allocation27_spill] sm:$0xff] %v13712_v15  ;;  %723 = vst.msk [vmem:[#allocation2 + $0xd9] sm:$0xff] %vm18106_vm2, %v652_v2  ;;  %v655_v16 = vld [vmem:[%s13533_s28 + $0xe0] sm:$0xff]  ;;  %v656_v22 = vld [vmem:[%s13533_s28 + $0xe8] sm:$0xff]  ;;  %v18439_v2 = vmov 0  ;;  %v18444_v11 = vsel %vm13777_vm13, 4294967295, %v18443_v11 }
  0x3a   : > { %12268 = vmatprep.mubr.msk.bf16.mxu1 %vm18106_vm2, %v960_v33  ;;  %724 = vst.msk [vmem:[#allocation2 + $0xe1] sm:$0xff] %vm18106_vm2, %v653_v4  ;;  %725 = vst.msk [vmem:[#allocation2 + $0xe9] sm:$0xff] %vm18106_vm2, %v654_v6  ;;  %v13264_v26 = vld [vmem:[%s18397_s1 + $0x4] ss:$0 sps:$4 sm:$0xcc]   ;;  %v13726_v27 = vld [vmem:[#allocation2 + $0x70] sm:$0xff] }
  0x3b   : > { %726 = vst.msk [vmem:[#allocation2 + $0xf1] sm:$0xff] %vm18106_vm2, %v655_v16  ;;  %727 = vst.msk [vmem:[#allocation2 + $0xf9] sm:$0xff] %vm18106_vm2, %v656_v22  ;;  %v13735_v31 = vld [vmem:[#allocation2 + $0x80] sm:$0xff]  ;;  %v18433_v33 = vmov 0  ;;  %v2275_v38 = vrot.slane %v13264_v26, 2  ;;  %v986_v39 = vld [vmem:[#allocation2 + $0x71] sm:$0xff] }
  0x3c   : > { %18432 = vst [vmem:[#allocation28_spill] sm:$0xff] %v18431_v29  ;;  %v18434_v33 = vsel %vm13737_vm11, 4294967295, %v18433_v33  ;;  %v987_v40 = vld [vmem:[#allocation2 + $0x79] sm:$0xff]  ;;  %v937_v44 = vsel %vm13728_vm10, %v13726_v27, 0.0  ;;  %v988_v46 = vld [vmem:[#allocation2 + $0x81] sm:$0xff]  ;;  %v989_v48 = vld [vmem:[#allocation2 + $0x89] sm:$0xff] }
  0x3d   : > { %18435 = vst [vmem:[#allocation29_spill] sm:$0xff] %v18434_v33  ;;  %v13746_v43 = vld [vmem:[#allocation2 + $0x78] sm:$0xff]  ;;  %v13752_v49 = vand.u32 %v2275_v38, %v13513_v8  ;;  %v13754_v50 = vld [vmem:[#allocation2 + $0x88] sm:$0xff]  ;;  %v939_v53 = vsel %vm13737_vm11, %v13735_v31, 0.0  ;;  %v13759_v55 = vpack.c.bf16 %v987_v40, %v986_v39  ;;  %v13763_v58 = vpack.c.bf16 %v989_v48, %v988_v46  ;;  %v13766_v1 = vld [vmem:[#allocation2 + $0x90] sm:$0xff] }
  0x3e   : > { %18436 = vst [vmem:[#allocation30_spill] sm:$0xff] %v13754_v50  ;;  %v963_v57 = vpack.c.bf16 %v13746_v43, %v937_v44  ;;  %v964_v62 = vpack.c.bf16 %v13754_v50, %v939_v53  ;;  %v18440_v2 = vsel %vm13768_vm12, 4294967295, %v18439_v2  ;;  %v753_v4 = vadd.s32 176, %v13518_v10  ;;  %v13775_v6 = vld [vmem:[#allocation2 + $0xa0] sm:$0xff]  ;;  %18445 = vst [vmem:[#allocation35_spill] sm:$0xff] %v18444_v11  ;;  %v990_v16 = vld [vmem:[#allocation2 + $0x91] sm:$0xff] }
  0x3f   : > { %12235 = vmatmul.mubr.msk.bf16.gmra.mxu0 %vm18106_vm2, %v13703_v63  ;;  %18437 = vst [vmem:[#allocation31_spill] sm:$0xff] %v13759_v55  ;;  %12360 = vmatprep.subr.bf16.mxu0 %v13752_v49  ;;  %18438 = vst [vmem:[#allocation32_spill] sm:$0xff] %v13763_v58  ;;  %v991_v22 = vld [vmem:[#allocation2 + $0x99] sm:$0xff]  ;;  %v941_v24 = vsel %vm13768_vm12, %v13766_v1, 0.0  ;;  %v992_v26 = vld [vmem:[#allocation2 + $0xa1] sm:$0xff]  ;;  %v943_v38 = vsel %vm13777_vm13, %v13775_v6, 0.0 }
  0x40   : > { %12238 = vmatprep.mubr.msk.bf16.mxu0 %vm18106_vm2, %v13712_v15  ;;  %18441 = vst [vmem:[#allocation33_spill] sm:$0xff] %v18440_v2  ;;  %18442 = vst [vmem:[#allocation34_spill] sm:$0xff] %v13775_v6  ;;  %v993_v30 = vld [vmem:[#allocation2 + $0xa9] sm:$0xff]  ;;  %v785_v39 = vand.u32 15, %v753_v4  ;;  %v757_v40 = vadd.s32 208, %v13518_v10  ;;  %v759_v44 = vadd.s32 224, %v13518_v10  ;;  %v13798_v46 = vpack.c.bf16 %v991_v22, %v990_v16 }
  0x41   : > { %12269 = vmatmul.mubr.msk.bf16.gmra.mxu1 %vm18106_vm2, %v961_v14  ;;  %v755_v14 = vadd.s32 192, %v13518_v10  ;;  %v13791_v37 = vld [vmem:[#allocation2 + $0xa8] sm:$0xff]  ;;  %v761_v53 = vadd.s32 240, %v13518_v10  ;;  %v13802_v56 = vpack.c.bf16 %v993_v30, %v992_v26  ;;  %v13808_v4 = vld [vmem:[#allocation2 + $0xb0] sm:$0xff]  ;;  %v13816_v22 = vld [vmem:[#allocation2 + $0xc0] sm:$0xff]  ;;  %v13823_v30 = vadd.s32 56, %v13518_v10 }
  0x42   : > { %12272 = vmatprep.mubr.msk.bf16.mxu1 %vm18106_vm2, %v962_v23  ;;  %v13786_v23 = vld [vmem:[#allocation2 + $0x98] sm:$0xff]  ;;  %18447 = vst [vmem:[#allocation37_spill] sm:$0xff] %v13791_v37  ;;  %18448 = vst [vmem:[#allocation38_spill] sm:$0xff] %v13798_v46  ;;  %vm13810_vm14 = vcmp.ge.s32.totalorder %v785_v39, 1  ;;  %v789_v16 = vand.u32 15, %v757_v40  ;;  %v997_v19 = vld [vmem:[#allocation2 + $0xc9] sm:$0xff] }
  0x43   : > { %18446 = vst [vmem:[#allocation36_spill] sm:$0xff] %v13786_v23  ;;  %v787_v48 = vand.u32 15, %v755_v14  ;;  %v965_v54 = vpack.c.bf16 %v13786_v23, %v941_v24  ;;  %18449 = vst [vmem:[#allocation39_spill] sm:$0xff] %v13802_v56  ;;  %v18453_v7 = vsel %vm13810_vm14, 4294967295, %v18452_v7  ;;  %v791_v14 = vand.u32 15, %v759_v44  ;;  %v658_v39 = vld [vmem:[%s13533_s28 + $0xf8] sm:$0xff] }
  0x44   : > { %18451 = vst [vmem:[#allocation41_spill] sm:$0xff] %v13808_v4  ;;  %18454 = vst [vmem:[#allocation42_spill] sm:$0xff] %v18453_v7  ;;  %v18456_v24 = vmov 0  ;;  %v793_v26 = vand.u32 15, %v761_v53  ;;  %v994_v40 = vld [vmem:[#allocation2 + $0xb1] sm:$0xff]  ;;  %v995_v44 = vld [vmem:[#allocation2 + $0xb9] sm:$0xff] }
  0x45   : > { %18455 = vst [vmem:[#allocation43_spill] sm:$0xff] %v13816_v22  ;;  %vm13818_vm15 = vcmp.ge.s32.totalorder %v787_v48, 1  ;;  %18459 = vst [vmem:[#allocation45_spill] sm:$0xff] %v13823_v30  ;;  %v13834_v48 = vld [vmem:[#allocation2 + $0xb8] sm:$0xff]  ;;  %v945_v53 = vsel %vm13810_vm14, %v13808_v4, 0.0  ;;  %vm13847_vm0 = vcmp.ge.s32.totalorder %v789_v16, 1 }
  0x46   : > { %v18457_v24 = vsel %vm13818_vm15, 4294967295, %v18456_v24  ;;  %729 = vst.msk [vmem:[#allocation2 + $0x109] sm:$0xff] %vm18106_vm2, %v658_v39  ;;  %18460 = vst [vmem:[#allocation46_spill] sm:$0xff] %v13834_v48  ;;  %v18463_v39 = vmov 0  ;;  %vm13851_vm1 = vcmp.ge.s32.totalorder %v791_v14, 1  ;;  %v967_v16 = vpack.c.bf16 %v13834_v48, %v945_v53  ;;  %v998_v63 = vld [vmem:[#allocation2 + $0xd1] sm:$0xff] }
  0x47   : > { %12239 = vmatmul.mubr.msk.bf16.gmra.mxu0 %vm18106_vm2, %v13759_v55  ;;  %18458 = vst [vmem:[#allocation44_spill] sm:$0xff] %v18457_v24  ;;  %18461 = vst [vmem:[#allocation47_spill] sm:$0xff] %v13840_v17  ;;  %v18464_v39 = vsel %vm13847_vm0, 4294967295, %v18463_v39  ;;  %v770_v55 = vand.u32 15, %v13823_v30  ;;  %v13868_v14 = vld [vmem:[#allocation2 + $0xa] sm:$0xff]  ;;  %v18475_v32 = vmov 0 }
  0x48   : > { %12242 = vmatprep.mubr.msk.bf16.mxu0 %vm18106_vm2, %v13763_v58  ;;  %18465 = vst [vmem:[#allocation49_spill] sm:$0xff] %v18464_v39  ;;  %v13862_v58 = vadd.s32 40, %v13518_v10  ;;  %v13878_v28 = vld [vmem:[#allocation2 + $0xd0] sm:$0xff]  ;;  %v766_v53 = vand.u32 15, %v13840_v17  ;;  %vm18480_vm14 = vcmask 23552   ;;  %v1000_v30 = vld [vmem:[#allocation2 + $0xe1] sm:$0xff] }
  0x49   : > { %12273 = vmatmul.mubr.msk.bf16.gmra.mxu1 %vm18106_vm2, %v963_v57  ;;  %v13805_v57 = vadd.s32 8, %v13518_v10  ;;  %18478 = vst [vmem:[#allocation56_spill] sm:$0xff] %v13878_v28  ;;  %v13889_v9 = vld [vmem:[#allocation2 + $0xe0] sm:$0xff]  ;;  %vm13895_vm13 = vcmp.le.s32.totalorder %v770_v55, 14  ;;  %vm18485_vm12 = vmmov %vm18480_vm14  ;;  %v13907_v24 = vld [vmem:[#allocation2 + $0xf0] sm:$0xff]  ;;  %v754_v39 = vadd.s32 184, %v13518_v10 }
  0x4a   : > { %12276 = vmatprep.mubr.msk.bf16.mxu1 %vm18106_vm2, %v964_v62  ;;  %v966_v62 = vpack.c.bf16 %v13791_v37, %v943_v38  ;;  %v657_v38 = vld [vmem:[%s13533_s28 + $0xf0] sm:$0xff]  ;;  %18473 = vst [vmem:[#allocation53_spill] sm:$0xff] %v13862_v58  ;;  %18481 = vst [vmem:[#allocation58_spill] sm:$0xff] %v13889_v9  ;;  %v768_v17 = vand.u32 15, %v13862_v58  ;;  %v18483_v60 = vsel %vm13895_vm13, 4294967295, %v18482_v60  ;;  %v13955_v11 = vld [vmem:[#allocation2 + $0x82] sm:$0xff] }
  0x4b   : > { %18450 = vst [vmem:[#allocation40_spill] sm:$0xff] %v13805_v57  ;;  %v764_v34 = vand.u32 15, %v13805_v57  ;;  %728 = vst.msk [vmem:[#allocation2 + $0x101] sm:$0xff] %vm18106_vm2, %v657_v38  ;;  %v947_v38 = vsel %vm13818_vm15, %v13816_v22, 0.0  ;;  %v13855_v57 = vpack.c.bf16 %v995_v44, %v994_v40  ;;  %v999_v40 = vld [vmem:[#allocation2 + $0xd9] sm:$0xff]  ;;  %v13987_v2 = vld [vmem:[#allocation2 + $0xca] sm:$0xff] }
  0x4c   : > { %18484 = vst [vmem:[#allocation59_spill] sm:$0xff] %v18483_v60  ;;  %vm18486_vm11 = vmmov %vm18485_vm12  ;;  %v13910_v58 = vpack.c.bf16 %v999_v40, %v998_v63  ;;  %v13922_v63 = vadd.s32 72, %v13518_v10  ;;  %v758_v40 = vadd.s32 216, %v13518_v10  ;;  %v14016_v23 = vld [vmem:[#allocation2 + $0xea] sm:$0xff]  ;;  %v14075_v47 = vld [vmem:[#allocation2 + $0x3a] sm:$0xff]  ;;  %s18810_s28 = sld [smem:[#allocation134_spill]] }
  0x4d   : > { %18469 = vst [vmem:[#allocation51_spill] sm:$0xff] %v13855_v57  ;;  %vm13870_vm15 = vcmp.le.s32.totalorder %v764_v34, 14  ;;  %v13265_v34 = vld [vmem:[%s18397_s1 + $0x4] sm:$0x18]   ;;  %18488 = vst [vmem:[#allocation61_spill] sm:$0xff] %v13907_v24 }
  0x4e   : > { %v18476_v32 = vsel %vm13870_vm15, 4294967295, %v18475_v32  ;;  %18489 = vst [vmem:[#allocation62_spill] sm:$0xff] %v13910_v58  ;;  %v2611_v7 = vshll.u32 %v13265_v34, 16  ;;  %v790_v4 = vand.u32 15, %v758_v40  ;;  %18513 = vst [vmem:[#allocation71_spill] sm:$0xff] %v13987_v2 }
  0x4f   : > { %12243 = vmatmul.mubr.msk.bf16.gmra.mxu0 %vm18106_vm2, %v13798_v46  ;;  %v18470_v46 = vmov 0  ;;  %18477 = vst [vmem:[#allocation55_spill] sm:$0xff] %v18476_v32 }
  0x50   : > { %12246 = vmatprep.mubr.msk.bf16.mxu0 %vm18106_vm2, %v13802_v56  ;;  %v13842_v56 = vld [vmem:[#allocation2 + $0xc8] sm:$0xff]  ;;  %v2613_v37 = vrot.slane %v2611_v7, 4  ;;  %v1002_v7 = vld [vmem:[#allocation2 + $0xf1] sm:$0xff] }
  0x51   : > { %12277 = vmatmul.mubr.msk.bf16.gmra.mxu1 %vm18106_vm2, %v965_v54  ;;  %v996_v54 = vld [vmem:[#allocation2 + $0xc1] sm:$0xff]  ;;  %18462 = vst [vmem:[#allocation48_spill] sm:$0xff] %v13842_v56  ;;  %v968_v44 = vpack.c.bf16 %v13842_v56, %v947_v38  ;;  %v746_v38 = vadd.s32 120, %v13518_v10 }
  0x52   : > { %12280 = vmatprep.mubr.msk.bf16.mxu1 %vm18106_vm2, %v966_v62  ;;  %v18466_v62 = vmov 0  ;;  %vm13857_vm2 = vcmp.ge.s32.totalorder %v793_v26, 1  ;;  %v13866_v15 = vpack.c.bf16 %v997_v19, %v996_v54  ;;  %v742_v19 = vadd.s32 88, %v13518_v10  ;;  %v13882_v54 = vld [vmem:[#allocation2 + $0xd8] sm:$0xff]  ;;  %v1001_v26 = vld [vmem:[#allocation2 + $0xe9] sm:$0xff] }
  0x53   : > { %v18467_v62 = vsel %vm13851_vm1, 4294967295, %v18466_v62  ;;  %v18471_v46 = vsel %vm13857_vm2, 4294967295, %v18470_v46  ;;  %18479 = vst [vmem:[#allocation57_spill] sm:$0xff] %v13882_v54  ;;  %v13905_v56 = vld [vmem:[#allocation2 + $0xe8] sm:$0xff]  ;;  %v13919_v48 = vpack.c.bf16 %v1001_v26, %v1000_v30  ;;  %v18495_v30 = vmov 0 }
  0x54   : > { %18468 = vst [vmem:[#allocation50_spill] sm:$0xff] %v18467_v62  ;;  %18472 = vst [vmem:[#allocation52_spill] sm:$0xff] %v18471_v46  ;;  %v774_v55 = vand.u32 15, %v742_v19  ;;  %v13928_v19 = vld [vmem:[#allocation2 + $0x4a] sm:$0xff]  ;;  %v778_v62 = vand.u32 15, %v746_v38  ;;  %v13939_v26 = vld [vmem:[#allocation2 + $0x42] sm:$0xff] }
  0x55   : > { %18474 = vst [vmem:[#allocation54_spill] sm:$0xff] %v13866_v15  ;;  %18487 = vst [vmem:[#allocation60_spill] sm:$0xff] %v13905_v56  ;;  %v18498_v46 = vmov 0  ;;  %v1003_v38 = vld [vmem:[#allocation2 + $0xf9] sm:$0xff] }
  0x56   : > { %18491 = vst [vmem:[#allocation63_spill] sm:$0xff] %v13919_v48  ;;  %vm13963_vm10 = vcmp.le.s32.totalorder %v778_v62, 14  ;;  %v18510_v62 = vmov 0  ;;  %v14006_v6 = vpack.c.bf16 %v1003_v38, %v1002_v7  ;;  %v13267_v7 = vld [vmem:[%s18397_s1 + $0x8] ss:$0 sps:$4 sm:$0xcc]  }
  0x57   : > { %12247 = vmatmul.mubr.msk.bf16.gmra.mxu0 %vm18480_vm14, %v13855_v57  ;;  %v949_v57 = vsel %vm13847_vm0, %v13878_v28, 0.0  ;;  %vm18490_vm14 = vmmov %vm18486_vm11  ;;  %v2608_v28 = vshrl.u32 %v13265_v34, 16 }
  0x58   : > { %12250 = vmatprep.mubr.msk.bf16.mxu0 %vm18486_vm11, %v13866_v15  ;;  %v951_v15 = vsel %vm13851_vm1, %v13889_v9, 0.0  ;;  %v969_v22 = vpack.c.bf16 %v13882_v54, %v949_v57  ;;  %vm13931_vm11 = vcmp.le.s32.totalorder %v766_v53, 14  ;;  %v18492_v57 = vmov 0  ;;  %v13949_v53 = vld [vmem:[#allocation2 + $0x8a] sm:$0xff]  ;;  %v13953_v54 = vld [vmem:[#allocation2 + $0xf8] sm:$0xff]  ;;  %18519 = vst [vmem:[#allocation75_spill] sm:$0xff] %v14006_v6 }
  0x59   : > { %12281 = vmatmul.mubr.msk.bf16.gmra.mxu1 %vm18485_vm12, %v967_v16  ;;  %v750_v16 = vadd.s32 152, %v13518_v10  ;;  %v2610_v9 = vrot.slane %v2608_v28, 3  ;;  %v970_v34 = vpack.c.bf16 %v13905_v56, %v951_v15  ;;  %v18493_v57 = vsel %vm13931_vm11, 4294967295, %v18492_v57  ;;  %v13947_v15 = vld [vmem:[#allocation2 + $0x62] sm:$0xff] }
  0x5a   : > { %12284 = vmatprep.mubr.msk.bf16.mxu1 %vm18490_vm14, %v968_v44  ;;  %v953_v44 = vsel %vm13857_vm2, %v13907_v24, 0.0  ;;  %18494 = vst [vmem:[#allocation64_spill] sm:$0xff] %v18493_v57  ;;  %vm13935_vm12 = vcmp.le.s32.totalorder %v768_v17, 14  ;;  %vm13941_vm14 = vcmp.le.s32.totalorder %v774_v55, 14  ;;  %v13945_v24 = vld [vmem:[#allocation2 + $0x6a] sm:$0xff]  ;;  %v786_v56 = vand.u32 15, %v754_v39 }
  0x5b   : > { %v18496_v30 = vsel %vm13935_vm12, 4294967295, %v18495_v30  ;;  %v18499_v46 = vsel %vm13941_vm14, 4294967295, %v18498_v46  ;;  %v782_v28 = vand.u32 15, %v750_v16  ;;  %v2614_v17 = vor.u32 %v2613_v37, %v2610_v9  ;;  %v1460_v55 = vld [vmem:[#allocation2 + $0x2] sm:$0xff]  ;;  %v13969_v39 = vld [vmem:[#allocation2 + $0xaa] sm:$0xff]  ;;  %v3499_v57 = vld [vmem:[#allocation2 + $0x5a] sm:$0xff] }
  0x5c   : > { %18497 = vst [vmem:[#allocation65_spill] sm:$0xff] %v18496_v30  ;;  %18500 = vst [vmem:[#allocation66_spill] sm:$0xff] %v18499_v46  ;;  %vm18501_vm2 = vcmask 23552   ;;  %v2559_v16 = vsel %vm13895_vm13, %v13928_v19, 0.0  ;;  %v18504_v9 = vmov 0  ;;  %v13967_v37 = vld [vmem:[#allocation2 + $0xa2] sm:$0xff]  ;;  %v971_v38 = vpack.c.bf16 %v13953_v54, %v953_v44 }
  0x5d   : > { %vm18502_vm1 = vmmov %vm18501_vm2  ;;  %v18505_v9 = vsel %vm13963_vm10, 4294967295, %v18504_v9  ;;  %18507 = vst [vmem:[#allocation68_spill] sm:$0xff] %v13969_v39  ;;  %v13975_v40 = vpack.c.bf16 %v2559_v16, %v13939_v26  ;;  %v2567_v16 = vsel %vm13963_vm10, %v13949_v53, 0.0 }
  0x5e   : > { %vm18503_vm0 = vmmov %vm18502_vm1  ;;  %18506 = vst [vmem:[#allocation67_spill] sm:$0xff] %v18505_v9 }
  0x5f   : > { %12251 = vmatmul.mubr.msk.bf16.gmra.mxu0 %vm18501_vm2, %v13910_v58  ;;  %v13972_v58 = vand.u32 %v2614_v17, %v13513_v8  ;;  %18508 = vst [vmem:[#allocation69_spill] sm:$0xff] %v13975_v40  ;;  %vm18509_vm2 = vmmov %vm18503_vm0  ;;  %v18515_v40 = vmov 0 }
  0x60   : > { %12254 = vmatprep.mubr.msk.bf16.mxu0 %vm18503_vm0, %v13919_v48  ;;  %vm13981_vm0 = vcmp.le.s32.totalorder %v782_v28, 14  ;;  %v13985_v48 = vld [vmem:[#allocation2 + $0xc2] sm:$0xff] }
  0x61   : > { %12285 = vmatmul.mubr.msk.bf16.gmra.mxu1 %vm18502_vm1, %v969_v22  ;;  %v2563_v22 = vsel %vm13941_vm14, %v13945_v24, 0.0  ;;  %v18511_v62 = vsel %vm13981_vm0, 4294967295, %v18510_v62  ;;  %vm13995_vm1 = vcmp.le.s32.totalorder %v786_v56, 14  ;;  %12394 = vmatprep.subr.bf16.mxu1 %v13972_v58  ;;  %v2571_v28 = vsel %vm13981_vm0, %v13969_v39, 0.0  ;;  %v14032_v39 = vld [vmem:[#allocation2 + $0xe2] sm:$0xff] }
  0x62   : > { %12288 = vmatprep.mubr.msk.bf16.mxu1 %vm18509_vm2, %v970_v34  ;;  %18512 = vst [vmem:[#allocation70_spill] sm:$0xff] %v18511_v62  ;;  %v13990_v17 = vpack.c.bf16 %v2563_v22, %v13947_v15  ;;  %v18516_v40 = vsel %vm13995_vm1, 4294967295, %v18515_v40  ;;  %v14001_v34 = vpack.c.bf16 %v2567_v16, %v13955_v11  ;;  %v14008_v22 = vld [vmem:[#allocation2 + $0x1a] sm:$0xff]  ;;  %vm14012_vm2 = vcmp.le.s32.totalorder %v790_v4, 14 }
  0x63   : > { %18517 = vst [vmem:[#allocation73_spill] sm:$0xff] %v18516_v40  ;;  %v18520_v56 = vmov 0  ;;  %v14019_v50 = vpack.c.bf16 %v2571_v28, %v13967_v37  ;;  %v2575_v16 = vsel %vm13995_vm1, %v13987_v2, 0.0  ;;  %v18524_v4 = vsel %vm13870_vm15, %v13868_v14, 0.0 }
  0x64   : > { %18514 = vst [vmem:[#allocation72_spill] sm:$0xff] %v13990_v17  ;;  %18518 = vst [vmem:[#allocation74_spill] sm:$0xff] %v14001_v34  ;;  %v14010_v17 = vld [vmem:[#allocation2 + $0x2a] sm:$0xff]  ;;  %v18521_v56 = vsel %vm14012_vm2, 4294967295, %v18520_v56  ;;  %v1622_v34 = vpack.c.bf16 %v18524_v4, %v1460_v55  ;;  %v14035_v28 = vpack.c.bf16 %v2575_v16, %v13985_v48  ;;  %v18526_v2 = vsel %vm13535_vm3, %v13603_v59, 0.0 }
  0x65   : > { %18522 = vst [vmem:[#allocation76_spill] sm:$0xff] %v18521_v56  ;;  %18523 = vst [vmem:[#allocation77_spill] sm:$0xff] %v14019_v50  ;;  %v2579_v50 = vsel %vm14012_vm2, %v14016_v23, 0.0  ;;  %v1953_v44 = vpack.c.bf16 %v13610_v61, %v18526_v2  ;;  %v13266_v14 = vld [vmem:[%s18397_s1 + $0x8] ss:$0 sps:$4 sm:$0x66]  }
  0x66   : > { %18525 = vst [vmem:[#allocation78_spill] sm:$0xff] %v14035_v28  ;;  %v14049_v55 = vpack.c.bf16 %v2579_v50, %v14032_v39  ;;  %v3241_v4 = vshrl.u32 %v13267_v7, 16  ;;  %v1922_v16 = vsel %vm13582_vm4, %v13615_v0, 0.0  ;;  %v3244_v28 = vshll.u32 %v13267_v7, 16  ;;  %v14059_v61 = vld [vmem:[#allocation2 + $0x12] sm:$0xff]  ;;  %v14064_v2 = vld [vmem:[#allocation2 + $0x22] sm:$0xff] }
  0x67   : > { %vm18528_vm15 = vcmask 23552   ;;  %v772_v59 = vand.u32 15, %v13922_v63  ;;  %v1591_v50 = vsel %vm13931_vm11, %v14008_v22, 0.0  ;;  %v1593_v0 = vsel %vm13935_vm12, %v14010_v17, 0.0 }
  0x68   : > { %18527 = vst [vmem:[#allocation79_spill] sm:$0xff] %v14049_v55  ;;  %12255 = vmatmul.mubr.msk.bf16.gmra.mxu0 %vm18528_vm15, %v14006_v6  ;;  %v3243_v18 = vrot.slane %v3241_v4, 2  ;;  %vm18529_vm3 = vmmov %vm18528_vm15  ;;  %v1924_v63 = vsel %vm13593_vm5, %v13633_v12, 0.0  ;;  %v3246_v7 = vrot.slane %v3244_v28, 3  ;;  %v1623_v4 = vpack.c.bf16 %v1591_v50, %v14059_v61  ;;  %v14123_v50 = vld [vmem:[#allocation2 + $0x52] sm:$0xff] }
  0x69   : > { %12289 = vmatmul.mubr.msk.bf16.gmra.mxu1 %vm18529_vm3, %v971_v38  ;;  %vm18530_vm2 = vmmov %vm18529_vm3  ;;  %v2943_v38 = vrot.slane %v13266_v14, 1  ;;  %vm14077_vm15 = vcmp.le.s32.totalorder %v772_v59, 14  ;;  %v18532_v6 = vmov 0  ;;  %v1954_v30 = vpack.c.bf16 %v13618_v3, %v1922_v16  ;;  %v14113_v16 = vld [vmem:[#allocation2 + $0x5a] sm:$0xff] }
  0x6a   : > { %12294 = vmatprep.mubr.msk.bf16.mxu0 %vm18530_vm2, %v1622_v34  ;;  %vm18531_vm3 = vmmov %vm18530_vm2  ;;  %v744_v34 = vadd.s32 104, %v13518_v10  ;;  %v18533_v6 = vsel %vm14077_vm15, 4294967295, %v18532_v6  ;;  %v3247_v55 = vor.u32 %v3246_v7, %v3243_v18  ;;  %v1624_v52 = vpack.c.bf16 %v1593_v0, %v14064_v2 }
  0x6b   : > { %12328 = vmatprep.mubr.msk.bf16.mxu1 %vm18531_vm3, %v1953_v44  ;;  %18534 = vst [vmem:[#allocation80_spill] sm:$0xff] %v18533_v6  ;;  %v1955_v12 = vpack.c.bf16 %v13642_v20, %v1924_v63  ;;  %v1926_v28 = vsel %vm13623_vm6, %v13650_v25, 0.0  ;;  %v14087_v44 = vld [vmem:[#allocation2 + $0x32] sm:$0xff]  ;;  %v1595_v14 = vsel %vm13895_vm13, %v14075_v47, 0.0  ;;  %v1597_v18 = vsel %vm14077_vm15, %v13928_v19, 0.0  ;;  %vm18535_vm3 = vmmov %vm18530_vm2 }
  0x6c   : > { %v776_v59 = vand.u32 15, %v744_v34  ;;  %v14096_v3 = vand.u32 %v2943_v38, %v13513_v8  ;;  %v14100_v20 = vand.u32 %v3247_v55, %v13513_v8  ;;  %vm18536_vm6 = vmmov %vm18530_vm2  ;;  %v1928_v25 = vsel %vm13635_vm7, %v13666_v35, 0.0 }
  0x6d   : > { %vm18537_vm13 = vmmov %vm18530_vm2  ;;  %v748_v19 = vadd.s32 136, %v13518_v10  ;;  %v1625_v55 = vpack.c.bf16 %v1595_v14, %v14087_v44  ;;  %v1626_v35 = vpack.c.bf16 %v1597_v18, %v13939_v26  ;;  %v1930_v0 = vsel %vm13668_vm8, %v13676_v41, 0.0  ;;  %v14142_v41 = vld [vmem:[#allocation2 + $0x7a] sm:$0xff] }
  0x6e   : > { %vm18543_vm7 = vmmov %vm18535_vm3  ;;  %v18544_v26 = vmov 0  ;;  %v18552_v14 = vld [vmem:[#allocation30_spill] sm:$0xff] }
  0x6f   : > { %v780_v7 = vand.u32 15, %v748_v19 }
  0x70   : > { %12295 = vmatmul.mubr.msk.bf16.vlgmr.msra.gmra.mxu0 %vm18530_vm2, %v1623_v4  ;;  %vm14115_vm2 = vcmp.le.s32.totalorder %v776_v59, 14  ;;  %v14151_v4 = vld [vmem:[#allocation2 + $0x72] sm:$0xff]  ;;  %v14173_v59 = vld [vmem:[#allocation2 + $0x9a] sm:$0xff] }
  0x71   : > { %12361 = vmatpush3.bf16.msra.mxu0 %v13752_v49  ;;  %12329 = vmatmul.mubr.msk.bf16.vlgmr.msra.gmra.mxu1 %vm18535_vm3, %v1954_v30  ;;  %v18538_v49 = vmov 0  ;;  %v1957_v30 = vpack.c.bf16 %v13685_v45, %v1928_v25  ;;  %v1601_v63 = vsel %vm14115_vm2, %v13945_v24, 0.0  ;;  %v1958_v24 = vpack.c.bf16 %v13692_v51, %v1930_v0  ;;  %v18553_v25 = vld [vmem:[#allocation36_spill] sm:$0xff] }
  0x72   : > { %12298 = vmatprep.mubr.msk.bf16.mxu0 %vm18536_vm6, %v1624_v52  ;;  %12332 = vmatprep.mubr.msk.bf16.mxu1 %vm18537_vm13, %v1955_v12  ;;  %v18539_v49 = vsel %vm14115_vm2, 4294967295, %v18538_v49  ;;  %v1956_v52 = vpack.c.bf16 %v13652_v21, %v1926_v28  ;;  %vm18541_vm6 = vmmov %vm18535_vm3  ;;  %v1932_v21 = vsel %vm13678_vm9, %v13726_v27, 0.0  ;;  %v1628_v34 = vpack.c.bf16 %v1601_v63, %v13947_v15  ;;  %v18563_v0 = vld [vmem:[#allocation68_spill] sm:$0xff] }
  0x73   : > { %12395 = vmatpush3.bf16.msra.mxu1 %v13972_v58  ;;  %12428 = vmatprep.subr.bf16.mxu0 %v14096_v3  ;;  %18540 = vst [vmem:[#allocation81_spill] sm:$0xff] %v18539_v49  ;;  %v1599_v58 = vsel %vm13941_vm14, %v14113_v16, 0.0  ;;  %vm18542_vm13 = vmmov %vm18535_vm3  ;;  %vm14144_vm14 = vcmp.le.s32.totalorder %v780_v7, 14  ;;  %v1959_v38 = vpack.c.bf16 %v13746_v43, %v1932_v21  ;;  %v1603_v27 = vsel %vm13963_vm10, %v14142_v41, 0.0  ;;  %v18564_v7 = vld [vmem:[#allocation41_spill] sm:$0xff]  ;;  %v18565_v21 = vld [vmem:[#allocation35_spill] sm:$0xff] }
  0x74   : > { %12462 = vmatprep.subr.bf16.mxu1 %v14100_v20  ;;  %v1627_v45 = vpack.c.bf16 %v1599_v58, %v14123_v50  ;;  %v18545_v26 = vsel %vm14144_vm14, 4294967295, %v18544_v26  ;;  %v1605_v28 = vsel %vm14144_vm14, %v13949_v53, 0.0  ;;  %v752_v51 = vadd.s32 168, %v13518_v10  ;;  %vm18550_vm9 = vmmov %vm18535_vm3 }
  0x75   : > { %18546 = vst [vmem:[#allocation82_spill] sm:$0xff] %v18545_v26  ;;  %vm18551_vm10 = vnez %v18434_v33  ;;  %v1630_v53 = vpack.c.bf16 %v1605_v28, %v13955_v11  ;;  %v1607_v11 = vsel %vm13981_vm0, %v14173_v59, 0.0  ;;  %v14202_v28 = vld [vmem:[#allocation2 + $0xba] sm:$0xff]  ;;  %vm18573_vm0 = vmmov %vm18535_vm3 }
  0x76   : > { %v1936_v43 = vsel %vm18551_vm10, %v13766_v1, 0.0  ;;  %v784_v15 = vand.u32 15, %v752_v51  ;;  %v14184_v1 = vld [vmem:[#allocation2 + $0x92] sm:$0xff]  ;;  %vm18559_vm10 = vmmov %vm18535_vm3 }
  0x77   : > { %v1961_v19 = vpack.c.bf16 %v18553_v25, %v1936_v43  ;;  %v18568_v51 = vld [vmem:[#allocation46_spill] sm:$0xff] }
  0x78   : > { %12299 = vmatmul.mubr.msk.bf16.gmra.mxu0 %vm18541_vm6, %v1625_v55  ;;  %vm18548_vm6 = vmmov %vm18535_vm3  ;;  %v18554_v55 = vmov 0 }
  0x79   : > { %12333 = vmatmul.mubr.msk.bf16.gmra.mxu1 %vm18542_vm13, %v1956_v52  ;;  %12302 = vmatprep.mubr.msk.bf16.mxu0 %vm18535_vm3, %v1626_v35  ;;  %vm18549_vm13 = vmmov %vm18535_vm3  ;;  %v756_v52 = vadd.s32 200, %v13518_v10  ;;  %v18560_v35 = vld [vmem:[#allocation34_spill] sm:$0xff] }
  0x7a   : > { %12336 = vmatprep.mubr.msk.bf16.mxu1 %vm18543_vm7, %v1957_v30  ;;  %vm18547_vm7 = vnez %v18431_v29  ;;  %v18561_v30 = vld [vmem:[#allocation33_spill] sm:$0xff] }
  0x7b   : > { %v1934_v12 = vsel %vm18547_vm7, %v13735_v31, 0.0  ;;  %v1629_v31 = vpack.c.bf16 %v1603_v27, %v14151_v4  ;;  %vm18562_vm7 = vnez %v18561_v30 }
  0x7c   : > { %v1960_v18 = vpack.c.bf16 %v18552_v14, %v1934_v12  ;;  %v1938_v58 = vsel %vm18562_vm7, %v18560_v35, 0.0  ;;  %v14213_v14 = vld [vmem:[#allocation2 + $0xb2] sm:$0xff]  ;;  %v18580_v35 = vld [vmem:[#allocation44_spill] sm:$0xff] }
  0x80   : > { %12303 = vmatmul.mubr.msk.bf16.gmra.mxu0 %vm18548_vm6, %v1627_v45  ;;  %vm14176_vm6 = vcmp.le.s32.totalorder %v784_v15, 14  ;;  %v18569_v15 = vmov 0 }
  0x81   : > { %12337 = vmatmul.mubr.msk.bf16.gmra.mxu1 %vm18549_vm13, %v1958_v24  ;;  %12306 = vmatprep.mubr.msk.bf16.mxu0 %vm18535_vm3, %v1628_v34  ;;  %v18555_v55 = vsel %vm14176_vm6, 4294967295, %v18554_v55  ;;  %vm18558_vm13 = vmmov %vm18535_vm3  ;;  %v1609_v63 = vsel %vm14176_vm6, %v18563_v0, 0.0  ;;  %v788_v24 = vand.u32 15, %v756_v52  ;;  %v1631_v34 = vpack.c.bf16 %v1607_v11, %v14184_v1  ;;  %v18579_v11 = vld [vmem:[#allocation56_spill] sm:$0xff] }
  0x82   : > { %12340 = vmatprep.mubr.msk.bf16.mxu1 %vm18550_vm9, %v1959_v38  ;;  %18556 = vst [vmem:[#allocation30_spill] sm:$0xff] %v18555_v55  ;;  %vm18557_vm9 = vmmov %vm18535_vm3  ;;  %v18567_v38 = vld [vmem:[#allocation37_spill] sm:$0xff]  ;;  %v1632_v12 = vpack.c.bf16 %v1609_v63, %v13967_v37  ;;  %v1611_v37 = vsel %vm13995_vm1, %v14202_v28, 0.0 }
  0x83   : > { %v1962_v27 = vpack.c.bf16 %v18567_v38, %v1938_v58  ;;  %v1633_v63 = vpack.c.bf16 %v1611_v37, %v14213_v14  ;;  %v18583_v38 = vld [vmem:[#allocation57_spill] sm:$0xff]  ;;  %vm18588_vm1 = vmmov %vm18535_vm3 }
  0x84   : > { %v18592_v37 = vld [vmem:[#allocation49_spill] sm:$0xff] }
  0x85   : > { %vm18593_vm8 = vnez %v18592_v37 }
  0x88   : > { %12307 = vmatmul.mubr.msk.bf16.gmra.mxu0 %vm18557_vm9, %v1629_v31  ;;  %vm18566_vm9 = vnez %v18565_v21  ;;  %v760_v31 = vadd.s32 232, %v13518_v10 }
  0x89   : > { %12341 = vmatmul.mubr.msk.bf16.gmra.mxu1 %vm18558_vm13, %v1960_v18  ;;  %12310 = vmatprep.mubr.msk.bf16.mxu0 %vm18535_vm3, %v1630_v53  ;;  %v1940_v45 = vsel %vm18566_vm9, %v18564_v7, 0.0  ;;  %vm18572_vm13 = vmmov %vm18535_vm3  ;;  %v18575_v18 = vld [vmem:[#allocation43_spill] sm:$0xff]  ;;  %v18576_v53 = vld [vmem:[#allocation42_spill] sm:$0xff] }
  0x8a   : > { %12344 = vmatprep.mubr.msk.bf16.mxu1 %vm18559_vm10, %v1961_v19  ;;  %v1963_v43 = vpack.c.bf16 %v18568_v51, %v1940_v45  ;;  %vm14205_vm10 = vcmp.le.s32.totalorder %v788_v24, 14  ;;  %vm18574_vm9 = vmmov %vm18573_vm0  ;;  %vm18577_vm7 = vnez %v18576_v53  ;;  %v18578_v19 = vld [vmem:[#allocation71_spill] sm:$0xff]  ;;  %v792_v0 = vand.u32 15, %v760_v31  ;;  %v18582_v7 = vld [vmem:[#allocation48_spill] sm:$0xff] }
  0x8b   : > { %v18570_v15 = vsel %vm14205_vm10, 4294967295, %v18569_v15  ;;  %v1942_v25 = vsel %vm18577_vm7, %v18575_v18, 0.0  ;;  %v1613_v52 = vsel %vm14205_vm10, %v18578_v19, 0.0  ;;  %v18584_v51 = vmov 0  ;;  %vm18590_vm7 = vmmov %vm18588_vm1  ;;  %v18591_v31 = vld [vmem:[#allocation58_spill] sm:$0xff] }
  0x8c   : > { %18571 = vst [vmem:[#allocation36_spill] sm:$0xff] %v18570_v15  ;;  %v1964_v45 = vpack.c.bf16 %v18582_v7, %v1942_v25  ;;  %v1634_v24 = vpack.c.bf16 %v1613_v52, %v13985_v48  ;;  %v1946_v18 = vsel %vm18593_vm8, %v18591_v31, 0.0  ;;  %v18594_v52 = vld [vmem:[#allocation61_spill] sm:$0xff]  ;;  %v14277_v31 = vld [vmem:[#allocation2 + $0x108] sm:$0xff] }
  0x90   : > { %12311 = vmatmul.mubr.msk.bf16.gmra.mxu0 %vm18572_vm13, %v1631_v34  ;;  %vm18581_vm13 = vnez %v18580_v35  ;;  %v14231_v34 = vld [vmem:[#allocation2 + $0xda] sm:$0xff] }
  0x91   : > { %12345 = vmatmul.mubr.msk.bf16.gmra.mxu1 %vm18535_vm3, %v1962_v27  ;;  %12314 = vmatprep.mubr.msk.bf16.mxu0 %vm18573_vm0, %v1632_v12  ;;  %v1944_v58 = vsel %vm18581_vm13, %v18579_v11, 0.0  ;;  %v762_v12 = vadd.s32 248, %v13518_v10  ;;  %vm14235_vm0 = vcmp.le.s32.totalorder %v792_v0, 14  ;;  %vm18589_vm13 = vnez %v18521_v56  ;;  %v18595_v11 = vld [vmem:[#allocation50_spill] sm:$0xff] }
  0x92   : > { %12348 = vmatprep.mubr.msk.bf16.mxu1 %vm18574_vm9, %v1963_v43  ;;  %v1965_v27 = vpack.c.bf16 %v18583_v38, %v1944_v58  ;;  %v18585_v51 = vsel %vm14235_vm0, 4294967295, %v18584_v51  ;;  %vm18587_vm9 = vmmov %vm18535_vm3  ;;  %v14242_v43 = vld [vmem:[#allocation2 + $0xd2] sm:$0xff]  ;;  %v1615_v48 = vsel %vm18589_vm13, %v14231_v34, 0.0  ;;  %v1617_v25 = vsel %vm14235_vm0, %v14016_v23, 0.0  ;;  %v14267_v23 = vld [vmem:[#allocation2 + $0x100] sm:$0xff] }
  0x93   : > { %18586 = vst [vmem:[#allocation34_spill] sm:$0xff] %v18585_v51  ;;  %v794_v19 = vand.u32 15, %v762_v12  ;;  %v1635_v0 = vpack.c.bf16 %v1615_v48, %v14242_v43  ;;  %v18598_v38 = vmov 0  ;;  %v18601_v12 = vmov 0.0   ;;  %vm18602_vm13 = vmmov %vm18535_vm3 }
  0x98   : > { %12315 = vmatmul.mubr.msk.bf16.gmra.mxu0 %vm18587_vm9, %v1633_v63  ;;  %v18597_v63 = vld [vmem:[#allocation60_spill] sm:$0xff]  ;;  %vm696_vm9 = vcmask 17408  }
  0x99   : > { %12349 = vmatmul.mubr.msk.bf16.gmra.mxu1 %vm18535_vm3, %v1964_v45  ;;  %12318 = vmatprep.mubr.msk.bf16.mxu0 %vm18588_vm1, %v1634_v24  ;;  %vm18596_vm1 = vnez %v18595_v11  ;;  %v1966_v7 = vpack.c.bf16 %v18597_v63, %v1946_v18  ;;  %v1636_v45 = vpack.c.bf16 %v1617_v25, %v14032_v39  ;;  %v14260_v24 = vld [vmem:[#allocation2 + $0xfa] sm:$0xff]  ;;  %697 = vst.msk [vmem:[#allocation2 + $0x120] sm:$0x3] %vm696_vm9, %v18601_v12  ;;  %v1490_v39 = vld [vmem:[#allocation2 + $0xf2] sm:$0xff]  ;;  %v2555_v63 = vsel %vm13931_vm11, %v14010_v17, 0.0 }
  0x9a   : > { %12352 = vmatprep.mubr.msk.bf16.mxu1 %vm18590_vm7, %v1965_v27  ;;  %v1948_v58 = vsel %vm18596_vm1, %v18594_v52, 0.0  ;;  %vm14262_vm7 = vcmp.le.s32.totalorder %v794_v19, 14  ;;  %vm18603_vm1 = vmmov %vm18535_vm3  ;;  %vm18607_vm9 = vnez %v18476_v32  ;;  %v18615_v17 = vld [vmem:[#allocation22_spill] sm:$0xff] }
  0x9b   : > { %v18599_v38 = vsel %vm14262_vm7, 4294967295, %v18598_v38  ;;  %v1967_v27 = vpack.c.bf16 %v13953_v54, %v1948_v58  ;;  %v1619_v48 = vsel %vm14262_vm7, %v14260_v24, 0.0  ;;  %vm18604_vm8 = vmmov %vm18603_vm1  ;;  %v18605_v54 = vld [vmem:[#allocation52_spill] sm:$0xff]  ;;  %v2553_v25 = vsel %vm18607_vm9, %v14008_v22, 0.0  ;;  %v18612_v22 = vld [vmem:[#allocation65_spill] sm:$0xff] }
  0x9c   : > { %18600 = vst [vmem:[#allocation68_spill] sm:$0xff] %v18599_v38  ;;  %vm18606_vm5 = vnez %v18605_v54  ;;  %v1637_v19 = vpack.c.bf16 %v1619_v48, %v1490_v39  ;;  %v2586_v58 = vpack.c.bf16 %v2553_v25, %v14059_v61  ;;  %v3556_v61 = vld [vmem:[%s18397_s1 + $0xc] sm:$0x3]  ;;  %v18624_v25 = vld [vmem:[#allocation27_spill] sm:$0xff] }
  0x9d   : > { %v1950_v18 = vsel %vm18606_vm5, %v14267_v23, 0.0  ;;  %v14304_v48 = vand.u32 %v3556_v61, %v13513_v8  ;;  %v18640_v61 = vld [vmem:[#allocation51_spill] sm:$0xff] }
  0x9e   : > { %v1968_v52 = vpack.c.bf16 %v14277_v31, %v1950_v18  ;;  %v18613_v18 = vld [vmem:[#allocation20_spill] sm:$0xff] }
  0xa0   : > { %12319 = vmatmul.mubr.msk.bf16.gmra.mxu0 %vm18535_vm3, %v1635_v0  ;;  %v18609_v0 = vld [vmem:[#allocation18_spill] sm:$0xff]  ;;  %vm18611_vm3 = vmmov %vm18603_vm1 }
  0xa1   : > { %12353 = vmatmul.mubr.msk.bf16.gmra.mxu1 %vm18602_vm13, %v1966_v7  ;;  %12322 = vmatprep.mubr.msk.bf16.mxu0 %vm18603_vm1, %v1636_v45  ;;  %vm18608_vm13 = vmmov %vm18603_vm1  ;;  %v2557_v7 = vsel %vm13935_vm12, %v14075_v47, 0.0  ;;  %v2587_v45 = vpack.c.bf16 %v2555_v63, %v14064_v2  ;;  %v2561_v47 = vsel %vm14077_vm15, %v14113_v16, 0.0  ;;  %v18618_v2 = vld [vmem:[#allocation23_spill] sm:$0xff]  ;;  %v2565_v16 = vsel %vm14115_vm2, %v14142_v41, 0.0  ;;  %v18630_v41 = vld [vmem:[#allocation32_spill] sm:$0xff] }
  0xa2   : > { %12356 = vmatprep.mubr.msk.bf16.mxu1 %vm18604_vm8, %v1967_v27  ;;  %vm18610_vm8 = vmmov %vm18603_vm1  ;;  %v2588_v27 = vpack.c.bf16 %v2557_v7, %v14087_v44  ;;  %v2590_v8 = vpack.c.bf16 %v2561_v47, %v14123_v50  ;;  %v18620_v44 = vld [vmem:[#allocation69_spill] sm:$0xff]  ;;  %v18626_v50 = vld [vmem:[#allocation72_spill] sm:$0xff]  ;;  %v2573_v63 = vsel %vm14176_vm6, %v14202_v28, 0.0 }
  0xa3   : > { %vm18625_vm15 = vmmov %vm18603_vm1  ;;  %v2596_v7 = vpack.c.bf16 %v2573_v63, %v14213_v14  ;;  %v18643_v28 = vld [vmem:[#allocation54_spill] sm:$0xff] }
  0xa4   : > { %vm18627_vm12 = vmmov %vm18603_vm1  ;;  %v18645_v14 = vld [vmem:[#allocation78_spill] sm:$0xff] }
  0xa8   : > { %12323 = vmatmul.mubr.msk.bf16.gmra.mxu0 %vm18608_vm13, %v1637_v19  ;;  %vm18614_vm13 = vmmov %vm18603_vm1  ;;  %v18628_v19 = vld [vmem:[#allocation31_spill] sm:$0xff] }
  0xa9   : > { %12357 = vmatmul.mubr.msk.bf16.gmra.mxu1 %vm18603_vm1, %v1968_v52  ;;  %12362 = vmatprep.mubr.msk.bf16.mxu0 %vm18610_vm8, %v18609_v0  ;;  %vm18616_vm8 = vmmov %vm18603_vm1  ;;  %v2569_v52 = vsel %vm14144_vm14, %v14173_v59, 0.0  ;;  %v18634_v0 = vld [vmem:[#allocation38_spill] sm:$0xff]  ;;  %v18637_v59 = vld [vmem:[#allocation39_spill] sm:$0xff] }
  0xaa   : > { %12396 = vmatprep.mubr.msk.bf16.mxu1 %vm18611_vm3, %v2586_v58  ;;  %vm18617_vm3 = vmmov %vm18603_vm1  ;;  %v2594_v58 = vpack.c.bf16 %v2569_v52, %v14184_v1  ;;  %v18639_v1 = vld [vmem:[#allocation77_spill] sm:$0xff] }
  0xab   : > { %v3189_v52 = vld [vmem:[#allocation2 + $0x29] sm:$0xff] }
  0xb0   : > { %12363 = vmatmul.mubr.msk.bf16.vlgmr.msra.gmra.mxu0 %vm18614_vm13, %v18613_v18  ;;  %vm18619_vm13 = vmmov %vm18603_vm1  ;;  %v18647_v18 = vld [vmem:[#allocation62_spill] sm:$0xff] }
  0xb1   : > { %12429 = vmatpush3.bf16.msra.mxu0 %v14096_v3  ;;  %12397 = vmatmul.mubr.msk.bf16.vlgmr.msra.gmra.mxu1 %vm18603_vm1, %v2587_v45  ;;  %v18621_v3 = vld [vmem:[#allocation26_spill] sm:$0xff]  ;;  %v2577_v45 = vsel %vm14205_vm10, %v14231_v34, 0.0  ;;  %v2859_v34 = vld [vmem:[#allocation2 + $0x20] sm:$0xff] }
  0xb2   : > { %12366 = vmatprep.mubr.msk.bf16.mxu0 %vm18616_vm8, %v18615_v17  ;;  %12400 = vmatprep.mubr.msk.bf16.mxu1 %vm18617_vm3, %v2588_v27  ;;  %vm18622_vm8 = vmmov %vm18603_vm1  ;;  %v2598_v27 = vpack.c.bf16 %v2577_v45, %v14242_v43  ;;  %v2581_v17 = vsel %vm14235_vm0, %v14260_v24, 0.0  ;;  %v18649_v43 = vld [vmem:[#allocation63_spill] sm:$0xff]  ;;  %v3190_v45 = vld [vmem:[#allocation2 + $0x31] sm:$0xff] }
  0xb3   : > { %12463 = vmatpush3.bf16.msra.mxu1 %v14100_v20  ;;  %12496 = vmatprep.subr.bf16.mxu0 %v14304_v48  ;;  %vm18623_vm3 = vmmov %vm18603_vm1  ;;  %v2592_v20 = vpack.c.bf16 %v2565_v16, %v14151_v4  ;;  %v18632_v4 = vld [vmem:[#allocation74_spill] sm:$0xff]  ;;  %v2600_v47 = vpack.c.bf16 %v2581_v17, %v1490_v39  ;;  %v2254_v16 = vld [vmem:[#allocation2 + $0x109] sm:$0xff] }
  0xb4   : > { %v2860_v39 = vld [vmem:[#allocation2 + $0x28] sm:$0xff] }
  0xb5   : > { %v3192_v17 = vld [vmem:[#allocation2 + $0x41] sm:$0xff] }
  0xb8   : > { %12367 = vmatmul.mubr.msk.bf16.gmra.mxu0 %vm18619_vm13, %v18618_v2  ;;  %vm18629_vm13 = vmmov %vm18603_vm1  ;;  %v18651_v2 = vld [vmem:[#allocation79_spill] sm:$0xff] }
  0xb9   : > { %12401 = vmatmul.mubr.msk.bf16.gmra.mxu1 %vm18603_vm1, %v18620_v44  ;;  %12370 = vmatprep.mubr.msk.bf16.mxu0 %vm18622_vm8, %v18621_v3  ;;  %vm18631_vm8 = vmmov %vm18603_vm1  ;;  %v18653_v44 = vld [vmem:[#allocation75_spill] sm:$0xff] }
  0xba   : > { %12404 = vmatprep.mubr.msk.bf16.mxu1 %vm18623_vm3, %v2590_v8  ;;  %vm18633_vm3 = vmmov %vm18603_vm1  ;;  %v14373_v8 = vld [vmem:[#allocation2 + $0x10a] sm:$0xff]  ;;  %v2253_v3 = vld [vmem:[#allocation2 + $0x101] sm:$0xff] }
  0xbb   : > { %v2583_v24 = vsel %vm14262_vm7, %v14373_v8, 0.0 }
  0xc0   : > { %12371 = vmatmul.mubr.msk.bf16.gmra.mxu0 %vm18625_vm15, %v18624_v25  ;;  %vm18635_vm15 = vmmov %vm18603_vm1  ;;  %v18656_v25 = vld [vmem:[#allocation13_spill] sm:$0xff] }
  0xc1   : > { %12405 = vmatmul.mubr.msk.bf16.gmra.mxu1 %vm18627_vm12, %v18626_v50  ;;  %12374 = vmatprep.mubr.msk.bf16.mxu0 %vm18629_vm13, %v18628_v19  ;;  %vm18636_vm12 = vmmov %vm18603_vm1  ;;  %v3188_v19 = vld [vmem:[#allocation2 + $0x21] sm:$0xff] }
  0xc2   : > { %12408 = vmatprep.mubr.msk.bf16.mxu1 %vm18603_vm1, %v2592_v20  ;;  %vm18638_vm13 = vmmov %vm18603_vm1  ;;  %v14382_v20 = vld [vmem:[#allocation2 + $0x102] sm:$0xff]  ;;  %v3221_v63 = vpack.c.bf16 %v3189_v52, %v3188_v19 }
  0xc8   : > { %12375 = vmatmul.mubr.msk.bf16.gmra.mxu0 %vm18631_vm8, %v18630_v41  ;;  %vm18641_vm8 = vmmov %vm18603_vm1  ;;  %v2601_v41 = vpack.c.bf16 %v2583_v24, %v14382_v20 }
  0xc9   : > { %12409 = vmatmul.mubr.msk.bf16.gmra.mxu1 %vm18633_vm3, %v18632_v4  ;;  %12378 = vmatprep.mubr.msk.bf16.mxu0 %vm18635_vm15, %v18634_v0  ;;  %vm18642_vm3 = vmmov %vm18603_vm1  ;;  %v2861_v0 = vld [vmem:[#allocation2 + $0x30] sm:$0xff] }
  0xca   : > { %12412 = vmatprep.mubr.msk.bf16.mxu1 %vm18636_vm12, %v2594_v58  ;;  %vm18644_vm15 = vmmov %vm18603_vm1  ;;  %v14389_v58 = vpack.c.bf16 %v2254_v16, %v2253_v3  ;;  %v2867_v16 = vld [vmem:[#allocation2 + $0x60] sm:$0xff] }
  0xcb   : > { %vm18646_vm12 = vmmov %vm18603_vm1 }
  0xd0   : > { %12379 = vmatmul.mubr.msk.bf16.gmra.mxu0 %vm18638_vm13, %v18637_v59  ;;  %vm18648_vm13 = vmmov %vm18603_vm1  ;;  %v2862_v59 = vld [vmem:[#allocation2 + $0x38] sm:$0xff] }
  0xd1   : > { %12413 = vmatmul.mubr.msk.bf16.gmra.mxu1 %vm18603_vm1, %v18639_v1  ;;  %12382 = vmatprep.mubr.msk.bf16.mxu0 %vm18641_vm8, %v18640_v61  ;;  %vm18650_vm8 = vmmov %vm18603_vm1  ;;  %v2893_v61 = vsel %vm13582_vm4, %v2861_v0, 0.0  ;;  %v3195_v0 = vld [vmem:[#allocation2 + $0x59] sm:$0xff]  ;;  %vm18673_vm4 = vnez %v18426_v42 }
  0xd2   : > { %12416 = vmatprep.mubr.msk.bf16.mxu1 %vm18642_vm3, %v2596_v7  ;;  %vm18652_vm3 = vmmov %vm18603_vm1  ;;  %v2863_v7 = vld [vmem:[#allocation2 + $0x40] sm:$0xff] }
  0xd8   : > { %12383 = vmatmul.mubr.msk.bf16.gmra.mxu0 %vm18644_vm15, %v18643_v28  ;;  %vm18654_vm15 = vmmov %vm18603_vm1  ;;  %v2864_v28 = vld [vmem:[#allocation2 + $0x48] sm:$0xff] }
  0xd9   : > { %12417 = vmatmul.mubr.msk.bf16.gmra.mxu1 %vm18646_vm12, %v18645_v14  ;;  %12386 = vmatprep.mubr.msk.bf16.mxu0 %vm18648_vm13, %v18647_v18  ;;  %vm18655_vm12 = vmmov %vm18603_vm1  ;;  %vm18657_vm13 = vnez %v18656_v25  ;;  %v18662_v14 = vld [vmem:[#allocation17_spill] sm:$0xff]  ;;  %v2883_v25 = vld [vmem:[#allocation2 + $0xe0] sm:$0xff] }
  0xda   : > { %12420 = vmatprep.mubr.msk.bf16.mxu1 %vm18603_vm1, %v2598_v27  ;;  %v2891_v50 = vsel %vm18657_vm13, %v2859_v34, 0.0  ;;  %v3191_v27 = vld [vmem:[#allocation2 + $0x39] sm:$0xff]  ;;  %v2925_v34 = vpack.c.bf16 %v2862_v59, %v2893_v61  ;;  %v3196_v59 = vld [vmem:[#allocation2 + $0x61] sm:$0xff]  ;;  %v3197_v61 = vld [vmem:[#allocation2 + $0x69] sm:$0xff] }
  0xdb   : > { %v2924_v4 = vpack.c.bf16 %v2860_v39, %v2891_v50  ;;  %v2866_v50 = vld [vmem:[#allocation2 + $0x58] sm:$0xff] }
  0xe0   : > { %12387 = vmatmul.mubr.msk.bf16.gmra.mxu0 %vm18650_vm8, %v18649_v43  ;;  %vm18658_vm8 = vmmov %vm18603_vm1  ;;  %v3222_v43 = vpack.c.bf16 %v3191_v27, %v3190_v45 }
  0xe1   : > { %12421 = vmatmul.mubr.msk.bf16.gmra.mxu1 %vm18652_vm3, %v18651_v2  ;;  %12390 = vmatprep.mubr.msk.bf16.mxu0 %vm18654_vm15, %v18653_v44  ;;  %vm18659_vm3 = vmmov %vm18603_vm1  ;;  %v2865_v44 = vld [vmem:[#allocation2 + $0x50] sm:$0xff] }
  0xe2   : > { %12424 = vmatprep.mubr.msk.bf16.mxu1 %vm18655_vm12, %v2600_v47  ;;  %vm18661_vm15 = vmmov %vm18603_vm1  ;;  %vm18663_vm12 = vnez %v18662_v14  ;;  %v3193_v47 = vld [vmem:[#allocation2 + $0x49] sm:$0xff]  ;;  %v2879_v14 = vld [vmem:[#allocation2 + $0xc0] sm:$0xff] }
  0xe3   : > { %v2895_v18 = vsel %vm18663_vm12, %v2863_v7, 0.0  ;;  %v3223_v3 = vpack.c.bf16 %v3193_v47, %v3192_v17  ;;  %vm18667_vm12 = vmmov %vm18603_vm1 }
  0xe4   : > { %v2926_v2 = vpack.c.bf16 %v2864_v28, %v2895_v18 }
  0xe8   : > { %12391 = vmatmul.mubr.msk.bf16.gmra.mxu0 %vm18603_vm1, %v14389_v58 }
  0xe9   : > { %12425 = vmatmul.mubr.msk.bf16.gmra.mxu1 %vm18658_vm8, %v2601_v41  ;;  %12430 = vmatprep.mubr.msk.bf16.mxu0 %vm18659_vm3, %v2924_v4  ;;  %vm18664_vm8 = vmmov %vm18603_vm1  ;;  %vm18665_vm3 = vnez %v18414_v5  ;;  %v3194_v4 = vld [vmem:[#allocation2 + $0x51] sm:$0xff] }
  0xea   : > { %12464 = vmatprep.mubr.msk.bf16.mxu1 %vm18661_vm15, %v3221_v63  ;;  %v2897_v19 = vsel %vm18665_vm3, %v2865_v44, 0.0  ;;  %vm18666_vm15 = vmmov %vm18603_vm1  ;;  %v2868_v63 = vld [vmem:[#allocation2 + $0x68] sm:$0xff]  ;;  %v3224_v17 = vpack.c.bf16 %v3195_v0, %v3194_v4  ;;  %v3225_v44 = vpack.c.bf16 %v3197_v61, %v3196_v59  ;;  %v3198_v0 = vld [vmem:[#allocation2 + $0x71] sm:$0xff] }
  0xeb   : > { %v2927_v28 = vpack.c.bf16 %v2866_v50, %v2897_v19  ;;  %v2870_v50 = vld [vmem:[#allocation2 + $0x78] sm:$0xff]  ;;  %vm18672_vm3 = vmmov %vm18664_vm8  ;;  %v3200_v61 = vld [vmem:[#allocation2 + $0x81] sm:$0xff] }
  0xef   : > { %v12228_v24 = vpop.f32.mrf.mxu0 }
  0xf0   : > { %12431 = vmatmul.mubr.msk.bf16.vlgmr.msra.gmra.mxu0 %vm18603_vm1, %v2925_v34  ;;  %vm18668_vm1 = vnez %v18418_v13  ;;  %v2875_v13 = vld [vmem:[#allocation2 + $0xa0] sm:$0xff] }
  0xf1   : > { %12497 = vmatpush3.bf16.msra.mxu0 %v14304_v48  ;;  %v12262_v39 = vpop.f32.mrf.mxu1  ;;  %12465 = vmatmul.mubr.msk.bf16.vlgmr.msra.gmra.mxu1 %vm18664_vm8, %v3222_v43  ;;  %v1121_v41 = vpop.f32.mrf.mxu0  ;;  %v2899_v48 = vsel %vm18668_vm1, %v2867_v16, 0.0  ;;  %vm18671_vm1 = vnez %v18423_v36 }
  0xf2   : > { %v14406_v52 = vadd.f32 %v12262_v39, %v12228_v24  ;;  %12434 = vmatprep.mubr.msk.bf16.mxu0 %vm18666_vm15, %v2926_v2  ;;  %12468 = vmatprep.mubr.msk.bf16.mxu1 %vm18667_vm12, %v3223_v3  ;;  %v2928_v47 = vpack.c.bf16 %v2868_v63, %v2899_v48  ;;  %v2869_v2 = vld [vmem:[#allocation2 + $0x70] sm:$0xff]  ;;  %v2871_v24 = vld [vmem:[#allocation2 + $0x80] sm:$0xff]  ;;  %vm18669_vm12 = vmmov %vm18664_vm8 }
  0xf3   : > { %v1333_v7 = vpop.f32.mrf.mxu1  ;;  %v12229_v27 = vpop.f32.mrf.mxu0  ;;  %vm18670_vm15 = vmmov %vm18664_vm8  ;;  %v2901_v19 = vsel %vm18671_vm1, %v2869_v2, 0.0  ;;  %v3199_v63 = vld [vmem:[#allocation2 + $0x79] sm:$0xff]  ;;  %v2872_v48 = vld [vmem:[#allocation2 + $0x88] sm:$0xff]  ;;  %vm18678_vm1 = vnez %v18434_v33 }
  0xf4   : > { %v14412_v45 = vadd.f32 %v1333_v7, %v1121_v41  ;;  %v2903_v7 = vsel %vm18673_vm4, %v2871_v24, 0.0  ;;  %vm18677_vm4 = vmmov %vm18672_vm3 }
  0xf5   : > { %v12263_v18 = vpop.f32.mrf.mxu1  ;;  %v1124_v43 = vpop.f32.mrf.mxu0 }
  0xf6   : > { %v14414_v34 = vadd.f32 %v12263_v18, %v12229_v27  ;;  %v3201_v27 = vld [vmem:[#allocation2 + $0x89] sm:$0xff] }
  0xf7   : > { %v1336_v3 = vpop.f32.mrf.mxu1  ;;  %v12232_v16 = vpop.f32.mrf.mxu0 }
  0xf8   : > { %v14416_v39 = vadd.f32 %v1336_v3, %v1124_v43  ;;  %12435 = vmatmul.mubr.msk.bf16.gmra.mxu0 %vm18669_vm12, %v2927_v28  ;;  %v3226_v43 = vpack.c.bf16 %v3199_v63, %v3198_v0  ;;  %vm18674_vm12 = vmmov %vm18672_vm3  ;;  %v3202_v63 = vld [vmem:[#allocation2 + $0x91] sm:$0xff] }
  0xf9   : > { %v12266_v10 = vpop.f32.mrf.mxu1  ;;  %12469 = vmatmul.mubr.msk.bf16.gmra.mxu1 %vm18664_vm8, %v3224_v17  ;;  %12438 = vmatprep.mubr.msk.bf16.mxu0 %vm18670_vm15, %v2928_v47  ;;  %v1137_v4 = vpop.f32.mrf.mxu0  ;;  %v2929_v17 = vpack.c.bf16 %v2870_v50, %v2901_v19  ;;  %vm18675_vm8 = vmmov %vm18672_vm3  ;;  %v2874_v50 = vld [vmem:[#allocation2 + $0x98] sm:$0xff]  ;;  %vm18676_vm15 = vnez %v18431_v29 }
  0xfa   : > { %v14423_v41 = vadd.f32 %v12266_v10, %v12232_v16  ;;  %12472 = vmatprep.mubr.msk.bf16.mxu1 %vm18672_vm3, %v3225_v44  ;;  %v2930_v10 = vpack.c.bf16 %v2872_v48, %v2903_v7  ;;  %v2873_v44 = vld [vmem:[#allocation2 + $0x90] sm:$0xff]  ;;  %v3227_v16 = vpack.c.bf16 %v3201_v27, %v3200_v61  ;;  %v2876_v48 = vld [vmem:[#allocation2 + $0xa8] sm:$0xff]  ;;  %v2907_v7 = vsel %vm18678_vm1, %v2875_v13, 0.0  ;;  %vm18682_vm1 = vmmov %vm18672_vm3 }
  0xfb   : > { %v1349_v59 = vpop.f32.mrf.mxu1  ;;  %v12233_v18 = vpop.f32.mrf.mxu0  ;;  %v2905_v19 = vsel %vm18676_vm15, %v2873_v44, 0.0  ;;  %v3204_v61 = vld [vmem:[#allocation2 + $0xa1] sm:$0xff]  ;;  %v3205_v27 = vld [vmem:[#allocation2 + $0xa9] sm:$0xff]  ;;  %vm18683_vm15 = vnez %v18565_v21 }
  0xfc   : > { %v14428_v28 = vadd.f32 %v1349_v59, %v1137_v4 }
  0xfd   : > { %v12267_v47 = vpop.f32.mrf.mxu1  ;;  %v1140_v3 = vpop.f32.mrf.mxu0 }
  0xfe   : > { %v14430_v2 = vadd.f32 %v12267_v47, %v12233_v18  ;;  %v2931_v47 = vpack.c.bf16 %v2874_v50, %v2905_v19  ;;  %v2878_v50 = vld [vmem:[#allocation2 + $0xb8] sm:$0xff] }
  0xff   : > { %v1352_v36 = vpop.f32.mrf.mxu1  ;;  %v12236_v24 = vpop.f32.mrf.mxu0 }
 0x100   : > { %v14432_v5 = vadd.f32 %v1352_v36, %v1140_v3  ;;  %12439 = vmatmul.mubr.msk.bf16.gmra.mxu0 %vm18672_vm3, %v2929_v17  ;;  %v3203_v36 = vld [vmem:[#allocation2 + $0x99] sm:$0xff] }
 0x101   : > { %v12270_v42 = vpop.f32.mrf.mxu1  ;;  %12473 = vmatmul.mubr.msk.bf16.gmra.mxu1 %vm18674_vm12, %v3226_v43  ;;  %12442 = vmatprep.mubr.msk.bf16.mxu0 %vm18675_vm8, %v2930_v10  ;;  %v1153_v0 = vpop.f32.mrf.mxu0  ;;  %v3228_v10 = vpack.c.bf16 %v3203_v36, %v3202_v63  ;;  %vm18680_vm12 = vmmov %vm18672_vm3  ;;  %vm18681_vm8 = vnez %v18561_v30  ;;  %v3206_v36 = vld [vmem:[#allocation2 + $0xb1] sm:$0xff] }
 0x102   : > { %v14439_v4 = vadd.f32 %v12270_v42, %v12236_v24  ;;  %12476 = vmatprep.mubr.msk.bf16.mxu1 %vm18677_vm4, %v3227_v16  ;;  %v2932_v42 = vpack.c.bf16 %v2876_v48, %v2907_v7  ;;  %v2877_v16 = vld [vmem:[#allocation2 + $0xb0] sm:$0xff]  ;;  %v3229_v24 = vpack.c.bf16 %v3205_v27, %v3204_v61  ;;  %vm18679_vm4 = vmmov %vm18672_vm3  ;;  %v2880_v48 = vld [vmem:[#allocation2 + $0xc8] sm:$0xff]  ;;  %v2911_v7 = vsel %vm18683_vm15, %v2879_v14, 0.0 }
 0x103   : > { %v1365_v59 = vpop.f32.mrf.mxu1  ;;  %v12237_v17 = vpop.f32.mrf.mxu0  ;;  %v2909_v19 = vsel %vm18681_vm8, %v2877_v16, 0.0  ;;  %v3208_v61 = vld [vmem:[#allocation2 + $0xc1] sm:$0xff]  ;;  %v3209_v27 = vld [vmem:[#allocation2 + $0xc9] sm:$0xff]  ;;  %vm18687_vm15 = vmmov %vm18682_vm1  ;;  %vm18688_vm8 = vnez %v18580_v35 }
 0x104   : > { %v14444_v18 = vadd.f32 %v1365_v59, %v1153_v0 }
 0x105   : > { %v12271_v43 = vpop.f32.mrf.mxu1  ;;  %v1156_v44 = vpop.f32.mrf.mxu0 }
 0x106   : > { %v14446_v3 = vadd.f32 %v12271_v43, %v12237_v17  ;;  %v2933_v43 = vpack.c.bf16 %v2878_v50, %v2909_v19  ;;  %v2882_v50 = vld [vmem:[#allocation2 + $0xd8] sm:$0xff] }
 0x107   : > { %v1368_v29 = vpop.f32.mrf.mxu1  ;;  %v12240_v13 = vpop.f32.mrf.mxu0 }
 0x108   : > { %v14448_v1 = vadd.f32 %v1368_v29, %v1156_v44  ;;  %12443 = vmatmul.mubr.msk.bf16.gmra.mxu0 %vm18679_vm4, %v2931_v47  ;;  %v3207_v29 = vld [vmem:[#allocation2 + $0xb9] sm:$0xff]  ;;  %vm18684_vm4 = vmmov %vm18682_vm1 }
 0x109   : > { %v12274_v33 = vpop.f32.mrf.mxu1  ;;  %12477 = vmatmul.mubr.msk.bf16.gmra.mxu1 %vm18672_vm3, %v3228_v10  ;;  %12446 = vmatprep.mubr.msk.bf16.mxu0 %vm18680_vm12, %v2932_v42  ;;  %v1169_v63 = vpop.f32.mrf.mxu0  ;;  %v3230_v42 = vpack.c.bf16 %v3207_v29, %v3206_v36  ;;  %vm18685_vm3 = vmmov %vm18682_vm1  ;;  %vm18686_vm12 = vnez %v18576_v53  ;;  %v3210_v29 = vld [vmem:[#allocation2 + $0xd1] sm:$0xff] }
 0x10a   : > { %v14455_v0 = vadd.f32 %v12274_v33, %v12240_v13  ;;  %12480 = vmatprep.mubr.msk.bf16.mxu1 %vm18682_vm1, %v3229_v24  ;;  %v2934_v33 = vpack.c.bf16 %v2880_v48, %v2911_v7  ;;  %v2881_v24 = vld [vmem:[#allocation2 + $0xd0] sm:$0xff]  ;;  %v3231_v13 = vpack.c.bf16 %v3209_v27, %v3208_v61  ;;  %v2884_v48 = vld [vmem:[#allocation2 + $0xe8] sm:$0xff]  ;;  %v2915_v7 = vsel %vm18688_vm8, %v2883_v25, 0.0  ;;  %vm18692_vm8 = vmmov %vm18682_vm1 }
 0x10b   : > { %v1381_v59 = vpop.f32.mrf.mxu1  ;;  %v12241_v47 = vpop.f32.mrf.mxu0  ;;  %v2913_v19 = vsel %vm18686_vm12, %v2881_v24, 0.0  ;;  %v3212_v61 = vld [vmem:[#allocation2 + $0xe1] sm:$0xff]  ;;  %v3213_v27 = vld [vmem:[#allocation2 + $0xe9] sm:$0xff]  ;;  %vm18693_vm12 = vnez %v18595_v11 }
 0x10c   : > { %v14460_v17 = vadd.f32 %v1381_v59, %v1169_v63  ;;  %v3495_v11 = vld [vmem:[#allocation2 + $0x3a] sm:$0xff] }
 0x10d   : > { %v12275_v10 = vpop.f32.mrf.mxu1  ;;  %v1172_v16 = vpop.f32.mrf.mxu0 }
 0x10e   : > { %v14462_v44 = vadd.f32 %v12275_v10, %v12241_v47  ;;  %v2935_v10 = vpack.c.bf16 %v2882_v50, %v2913_v19  ;;  %v2886_v50 = vld [vmem:[#allocation2 + $0xf8] sm:$0xff] }
 0x10f   : > { %v1384_v30 = vpop.f32.mrf.mxu1  ;;  %v12244_v14 = vpop.f32.mrf.mxu0 }
 0x110   : > { %v14464_v12 = vadd.f32 %v1384_v30, %v1172_v16  ;;  %12447 = vmatmul.mubr.msk.bf16.gmra.mxu0 %vm18682_vm1, %v2933_v43  ;;  %v3211_v30 = vld [vmem:[#allocation2 + $0xd9] sm:$0xff] }
 0x111   : > { %v12278_v21 = vpop.f32.mrf.mxu1  ;;  %12481 = vmatmul.mubr.msk.bf16.gmra.mxu1 %vm18684_vm4, %v3230_v42  ;;  %12450 = vmatprep.mubr.msk.bf16.mxu0 %vm18685_vm3, %v2934_v33  ;;  %v1185_v36 = vpop.f32.mrf.mxu0  ;;  %v3232_v33 = vpack.c.bf16 %v3211_v30, %v3210_v29  ;;  %vm18690_vm4 = vmmov %vm18682_vm1  ;;  %vm18691_vm3 = vnez %v18592_v37  ;;  %v3214_v30 = vld [vmem:[#allocation2 + $0xf1] sm:$0xff] }
 0x112   : > { %v14471_v63 = vadd.f32 %v12278_v21, %v12244_v14  ;;  %12484 = vmatprep.mubr.msk.bf16.mxu1 %vm18687_vm15, %v3231_v13  ;;  %v2936_v21 = vpack.c.bf16 %v2884_v48, %v2915_v7  ;;  %v2885_v13 = vld [vmem:[#allocation2 + $0xf0] sm:$0xff]  ;;  %v3233_v14 = vpack.c.bf16 %v3213_v27, %v3212_v61  ;;  %vm18689_vm15 = vmmov %vm18682_vm1  ;;  %v3215_v48 = vld [vmem:[#allocation2 + $0xf9] sm:$0xff]  ;;  %v2919_v7 = vsel %vm18693_vm12, %v14267_v23, 0.0 }
 0x113   : > { %v1397_v59 = vpop.f32.mrf.mxu1  ;;  %v12245_v43 = vpop.f32.mrf.mxu0  ;;  %v2917_v19 = vsel %vm18691_vm3, %v2885_v13, 0.0  ;;  %v2889_v13 = vld [vmem:[#allocation2 + $0x110] sm:$0xff] }
 0x114   : > { %v14476_v47 = vadd.f32 %v1397_v59, %v1185_v36 }
 0x115   : > { %v12279_v42 = vpop.f32.mrf.mxu1  ;;  %v14480_v24 = vpop.f32.mrf.mxu0 }
 0x116   : > { %v14478_v16 = vadd.f32 %v12279_v42, %v12245_v43  ;;  %v2937_v43 = vpack.c.bf16 %v2886_v50, %v2917_v19  ;;  %v3234_v42 = vpack.c.bf16 %v3215_v48, %v3214_v30  ;;  %v2890_v50 = vld [vmem:[#allocation2 + $0x118] sm:$0xff] }
 0x117   : > { %v14482_v53 = vpop.f32.mrf.mxu1  ;;  %v12248_v35 = vpop.f32.mrf.mxu0  ;;  %v3218_v30 = vld [vmem:[#allocation2 + $0x111] sm:$0xff]  ;;  %v3219_v48 = vld [vmem:[#allocation2 + $0x119] sm:$0xff] }
 0x118   : > { %12451 = vmatmul.mubr.msk.bf16.gmra.mxu0 %vm18689_vm15, %v2935_v10  ;;  %vm18697_vm15 = vmmov %vm18682_vm1  ;;  %v3236_v54 = vpack.c.bf16 %v3219_v48, %v3218_v30  ;;  %v3496_v48 = vld [vmem:[#allocation2 + $0x42] sm:$0xff] }
 0x119   : > { %v12282_v25 = vpop.f32.mrf.mxu1  ;;  %12485 = vmatmul.mubr.msk.bf16.gmra.mxu1 %vm18682_vm1, %v3232_v33  ;;  %12454 = vmatprep.mubr.msk.bf16.mxu0 %vm18690_vm4, %v2936_v21  ;;  %v1201_v29 = vpop.f32.mrf.mxu0  ;;  %v2938_v33 = vpack.c.bf16 %v14277_v31, %v2919_v7  ;;  %v2921_v31 = vsel %vm18606_vm5, %v2889_v13, 0.0  ;;  %vm18698_vm4 = vmmov %vm18682_vm1  ;;  %v3492_v7 = vld [vmem:[#allocation2 + $0x22] sm:$0xff] }
 0x11a   : > { %v14489_v36 = vadd.f32 %v12282_v25, %v12248_v35  ;;  %12488 = vmatprep.mubr.msk.bf16.mxu1 %vm18692_vm8, %v3233_v14  ;;  %v3493_v25 = vld [vmem:[#allocation2 + $0x2a] sm:$0xff]  ;;  %vm18696_vm8 = vmmov %vm18682_vm1 }
 0x11b   : > { %v1413_v59 = vpop.f32.mrf.mxu1  ;;  %v12249_v27 = vpop.f32.mrf.mxu0 }
 0x11c   : > { %v14495_v61 = vadd.f32 %v1413_v59, %v1201_v29  ;;  %v3525_v59 = vsel %vm18607_vm9, %v3493_v25, 0.0 }
 0x11d   : > { %v12283_v10 = vpop.f32.mrf.mxu1  ;;  %v14500_v21 = vpop.f32.mrf.mxu0  ;;  %v3557_v13 = vpack.c.bf16 %v3525_v59, %v3492_v7 }
 0x11e   : > { %v14498_v35 = vadd.f32 %v12283_v10, %v12249_v27  ;;  %18694 = vst [vmem:[#allocation41_spill] sm:$0xff] %v14500_v21 }
 0x11f   : > { %v14502_v14 = vpop.f32.mrf.mxu1  ;;  %v12252_v37 = vpop.f32.mrf.mxu0 }
 0x120   : > { %18695 = vst [vmem:[#allocation37_spill] sm:$0xff] %v14502_v14  ;;  %12455 = vmatmul.mubr.msk.bf16.gmra.mxu0 %vm18696_vm8, %v2937_v43  ;;  %v3497_v14 = vld [vmem:[#allocation2 + $0x4a] sm:$0xff]  ;;  %vm18700_vm8 = vmmov %vm18682_vm1 }
 0x121   : > { %v12286_v23 = vpop.f32.mrf.mxu1  ;;  %12489 = vmatmul.mubr.msk.bf16.gmra.mxu1 %vm18697_vm15, %v3234_v42  ;;  %12458 = vmatprep.mubr.msk.bf16.mxu0 %vm18682_vm1, %v2938_v33  ;;  %v1217_v29 = vpop.f32.mrf.mxu0  ;;  %v2939_v42 = vpack.c.bf16 %v2890_v50, %v2921_v31  ;;  %vm18701_vm15 = vmmov %vm18682_vm1  ;;  %v3494_v50 = vld [vmem:[#allocation2 + $0x32] sm:$0xff]  ;;  %v3527_v31 = vsel %vm13931_vm11, %v3495_v11, 0.0  ;;  %vm18715_vm11 = vnez %v18511_v62 }
 0x122   : > { %v14509_v19 = vadd.f32 %v12286_v23, %v12252_v37  ;;  %12492 = vmatprep.mubr.msk.bf16.mxu1 %vm18698_vm4, %v14389_v58  ;;  %vm18702_vm4 = vnez %v18612_v22 }
 0x123   : > { %v1429_v27 = vpop.f32.mrf.mxu1  ;;  %v12253_v10 = vpop.f32.mrf.mxu0  ;;  %v3529_v7 = vsel %vm18702_vm4, %v3497_v14, 0.0  ;;  %vm18708_vm4 = vnez %v18533_v6 }
 0x124   : > { %v14515_v43 = vadd.f32 %v1429_v27, %v1217_v29 }
 0x125   : > { %v12287_v33 = vpop.f32.mrf.mxu1  ;;  %v14519_v23 = vpop.f32.mrf.mxu0 }
 0x126   : > { %v14517_v37 = vadd.f32 %v12287_v33, %v12253_v10 }
 0x127   : > { %v14521_v58 = vpop.f32.mrf.mxu1 }
 0x128   : > { %18699 = vst [vmem:[#allocation46_spill] sm:$0xff] %v14521_v58  ;;  %v12256_v21 = vpop.f32.mrf.mxu0  ;;  %12459 = vmatmul.mubr.msk.bf16.gmra.mxu0 %vm18700_vm8, %v2939_v42  ;;  %v3558_v42 = vpack.c.bf16 %v3527_v31, %v3494_v50  ;;  %vm18705_vm8 = vmmov %vm18682_vm1 }
 0x129   : > { %v12290_v25 = vpop.f32.mrf.mxu1  ;;  %12493 = vmatmul.mubr.msk.bf16.gmra.mxu1 %vm18701_vm15, %v3236_v54  ;;  %12498 = vmatprep.mubr.msk.bf16.mxu0 %vm18682_vm1, %v3557_v13  ;;  %v3559_v54 = vpack.c.bf16 %v3529_v7, %v3496_v48  ;;  %vm18706_vm15 = vmmov %vm18682_vm1  ;;  %vm18707_vm1 = vnez %v18483_v60  ;;  %v3500_v48 = vld [vmem:[#allocation2 + $0x62] sm:$0xff] }
 0x12a   : > { %v14528_v29 = vadd.f32 %v12290_v25, %v12256_v21  ;;  %v1233_v30 = vpop.f32.mrf.mxu0  ;;  %v3501_v21 = vld [vmem:[#allocation2 + $0x6a] sm:$0xff]  ;;  %v3531_v50 = vsel %vm18707_vm1, %v3499_v57, 0.0  ;;  %v3503_v57 = vld [vmem:[#allocation2 + $0x7a] sm:$0xff] }
 0x12b   : > { %v1445_v59 = vpop.f32.mrf.mxu1  ;;  %v3533_v7 = vsel %vm18708_vm4, %v3501_v21, 0.0  ;;  %vm18710_vm4 = vnez %v18499_v46 }
 0x12c   : > { %v14532_v27 = vadd.f32 %v1445_v59, %v1233_v30  ;;  %v12257_v10 = vpop.f32.mrf.mxu0  ;;  %v3498_v30 = vld [vmem:[#allocation2 + $0x52] sm:$0xff] }
 0x12d   : > { %v12291_v33 = vpop.f32.mrf.mxu1 }
 0x12e   : > { %v14534_v32 = vadd.f32 %v12291_v33, %v12257_v10  ;;  %v14536_v13 = vpop.f32.mrf.mxu0 }
 0x12f   : > { %18703 = vst [vmem:[#allocation43_spill] sm:$0xff] %v14536_v13  ;;  %v14538_v11 = vpop.f32.mrf.mxu1  ;;  %v3561_v13 = vpack.c.bf16 %v3533_v7, %v3500_v48 }
 0x130   : > { %18704 = vst [vmem:[#allocation71_spill] sm:$0xff] %v14538_v11  ;;  %v12296_v25 = vpop.f32.mrf.mxu0  ;;  %12499 = vmatmul.mubr.msk.bf16.vlgmr.msra.gmra.mxu0 %vm18705_vm8, %v3558_v42  ;;  %v3560_v11 = vpack.c.bf16 %v3531_v50, %v3498_v30  ;;  %v3502_v30 = vld [vmem:[#allocation2 + $0x72] sm:$0xff]  ;;  %v3535_v50 = vsel %vm18710_vm4, %v3503_v57, 0.0  ;;  %v3507_v57 = vld [vmem:[#allocation2 + $0x9a] sm:$0xff] }
 0x131   : > { %v1858_v14 = vadd.f32 %v12296_v25, %v14406_v52  ;;  %v12330_v22 = vpop.f32.mrf.mxu1  ;;  %12502 = vmatprep.mubr.msk.bf16.mxu0 %vm18706_vm15, %v3559_v54  ;;  %vm18709_vm15 = vmmov %vm18705_vm8 }
 0x132   : > { %v1729_v31 = vpop.f32.mrf.mxu0 }
 0x133   : > { %v1856_v59 = vadd.f32 %v1729_v31, %v14412_v45  ;;  %v14548_v10 = vadd.f32 %v12330_v22, %v1858_v14  ;;  %v2064_v33 = vpop.f32.mrf.mxu1  ;;  %v3505_v22 = vld [vmem:[#allocation2 + $0x8a] sm:$0xff] }
 0x134   : > { %v12297_v42 = vpop.f32.mrf.mxu0 }
 0x135   : > { %v1859_v52 = vadd.f32 %v12297_v42, %v14414_v34  ;;  %v14551_v25 = vadd.f32 %v2064_v33, %v1856_v59  ;;  %v12331_v54 = vpop.f32.mrf.mxu1  ;;  %v3562_v33 = vpack.c.bf16 %v3535_v50, %v3502_v30  ;;  %v3506_v30 = vld [vmem:[#allocation2 + $0x92] sm:$0xff] }
 0x136   : > { %v1732_v60 = vpop.f32.mrf.mxu0 }
 0x137   : > { %v14554_v58 = vadd.f32 %v1732_v60, %v14416_v39  ;;  %v14556_v6 = vadd.f32 %v12331_v54, %v1859_v52  ;;  %v14558_v21 = vpop.f32.mrf.mxu1  ;;  %v3504_v60 = vld [vmem:[#allocation2 + $0x82] sm:$0xff]  ;;  %v3537_v39 = vsel %vm14115_vm2, %v3505_v22, 0.0  ;;  %vm18712_vm2 = vnez %v18505_v9 }
 0x138   : > { %v12300_v45 = vpop.f32.mrf.mxu0  ;;  %12503 = vmatmul.mubr.msk.bf16.gmra.mxu0 %vm18705_vm8, %v3560_v11  ;;  %v3563_v52 = vpack.c.bf16 %v3537_v39, %v3504_v60  ;;  %v3539_v50 = vsel %vm18712_vm2, %v3507_v57, 0.0  ;;  %v3511_v57 = vld [vmem:[#allocation2 + $0xba] sm:$0xff] }
 0x139   : > { %v1862_v14 = vadd.f32 %v12300_v45, %v14423_v41  ;;  %v12334_v34 = vpop.f32.mrf.mxu1  ;;  %12506 = vmatprep.mubr.msk.bf16.mxu0 %vm18709_vm15, %v3561_v13  ;;  %vm18711_vm15 = vmmov %vm18705_vm8 }
 0x13a   : > { %v1745_v31 = vpop.f32.mrf.mxu0 }
 0x13b   : > { %v1860_v48 = vadd.f32 %v1745_v31, %v14428_v28  ;;  %v14568_v7 = vadd.f32 %v12334_v34, %v1862_v14  ;;  %v2080_v59 = vpop.f32.mrf.mxu1  ;;  %v3509_v28 = vld [vmem:[#allocation2 + $0xaa] sm:$0xff] }
 0x13c   : > { %v12301_v11 = vpop.f32.mrf.mxu0  ;;  %v3541_v60 = vsel %vm14144_vm14, %v3509_v28, 0.0  ;;  %vm18714_vm14 = vmmov %vm18711_vm15 }
 0x13d   : > { %v1863_v41 = vadd.f32 %v12301_v11, %v14430_v2  ;;  %v14571_v42 = vadd.f32 %v2080_v59, %v1860_v48  ;;  %v12335_v13 = vpop.f32.mrf.mxu1 }
 0x13e   : > { %v1748_v54 = vpop.f32.mrf.mxu0 }
 0x13f   : > { %v14574_v45 = vadd.f32 %v1748_v54, %v14432_v5  ;;  %v14576_v49 = vadd.f32 %v12335_v13, %v1863_v41  ;;  %v14578_v22 = vpop.f32.mrf.mxu1  ;;  %v3508_v5 = vld [vmem:[#allocation2 + $0xa2] sm:$0xff] }
 0x140   : > { %v12304_v14 = vpop.f32.mrf.mxu0  ;;  %12507 = vmatmul.mubr.msk.bf16.gmra.mxu0 %vm18705_vm8, %v3562_v33  ;;  %v3564_v33 = vpack.c.bf16 %v3539_v50, %v3506_v30  ;;  %vm18255_vm8 = vcmask 1043456   ;;  %v3510_v50 = vld [vmem:[#allocation2 + $0xb2] sm:$0xff] }
 0x141   : > { %v1866_v34 = vadd.f32 %v12304_v14, %v14439_v4  ;;  %v12338_v2 = vpop.f32.mrf.mxu1  ;;  %12510 = vmatprep.mubr.msk.bf16.mxu0 %vm18711_vm15, %v3563_v52  ;;  %v3565_v52 = vpack.c.bf16 %v3541_v60, %v3508_v5  ;;  %v3512_v60 = vld [vmem:[#allocation2 + $0xc2] sm:$0xff] }
 0x142   : > { %v1761_v31 = vpop.f32.mrf.mxu0 }
 0x143   : > { %v1864_v39 = vadd.f32 %v1761_v31, %v14444_v18  ;;  %v14588_v48 = vadd.f32 %v12338_v2, %v1866_v34  ;;  %v2096_v59 = vpop.f32.mrf.mxu1  ;;  %v3513_v18 = vld [vmem:[#allocation2 + $0xca] sm:$0xff]  ;;  %v4072_v34 = vld [vmem:[%s18713_s21 + $0x4] sm:$0xf]  ;;  %v3543_v31 = vsel %vm18715_vm11, %v3511_v57, 0.0 }
 0x144   : > { %v12305_v11 = vpop.f32.mrf.mxu0  ;;  %13232 = vmatprep.subr.msk.bf16.mxu1 %vm18255_vm8, %v4072_v34  ;;  %v4139_v2 = vsel %vm18255_vm8, %v4072_v34, 0  ;;  %vm18717_vm8 = vnez %v18516_v40 }
 0x145   : > { %v1867_v4 = vadd.f32 %v12305_v11, %v14446_v3  ;;  %v14591_v41 = vadd.f32 %v2096_v59, %v1864_v39  ;;  %v12339_v13 = vpop.f32.mrf.mxu1  ;;  %12531 = vmatpush3.bf16.msra.mxu1 %v4139_v2  ;;  %v3545_v39 = vsel %vm14176_vm6, %v3513_v18, 0.0 }
 0x146   : > { %v1764_v54 = vpop.f32.mrf.mxu0  ;;  %v3567_v34 = vpack.c.bf16 %v3545_v39, %v3512_v60 }
 0x147   : > { %v14594_v14 = vadd.f32 %v1764_v54, %v14448_v1  ;;  %v14596_v26 = vadd.f32 %v12339_v13, %v1867_v4  ;;  %v14598_v28 = vpop.f32.mrf.mxu1 }
 0x148   : > { %v12308_v3 = vpop.f32.mrf.mxu0  ;;  %12511 = vmatmul.mubr.msk.bf16.gmra.mxu0 %vm18711_vm15, %v3564_v33  ;;  %vm18716_vm15 = vmmov %vm18714_vm14 }
 0x149   : > { %v1870_v1 = vadd.f32 %v12308_v3, %v14455_v0  ;;  %v12342_v30 = vpop.f32.mrf.mxu1  ;;  %12514 = vmatprep.mubr.msk.bf16.mxu0 %vm18714_vm14, %v3565_v52  ;;  %v3566_v0 = vpack.c.bf16 %v3543_v31, %v3510_v50  ;;  %v3515_v3 = vld [vmem:[#allocation2 + $0xda] sm:$0xff]  ;;  %v3514_v50 = vld [vmem:[#allocation2 + $0xd2] sm:$0xff] }
 0x14a   : > { %v1777_v5 = vpop.f32.mrf.mxu0  ;;  %v3547_v31 = vsel %vm18717_vm8, %v3515_v3, 0.0  ;;  %v3519_v3 = vld [vmem:[#allocation2 + $0xfa] sm:$0xff] }
 0x14b   : > { %v1868_v59 = vadd.f32 %v1777_v5, %v14460_v17  ;;  %v14613_v11 = vadd.f32 %v12342_v30, %v1870_v1  ;;  %v2112_v33 = vpop.f32.mrf.mxu1  ;;  %v3517_v17 = vld [vmem:[#allocation2 + $0xea] sm:$0xff] }
 0x14c   : > { %v12309_v4 = vpop.f32.mrf.mxu0  ;;  %v3549_v60 = vsel %vm14205_vm10, %v3517_v17, 0.0  ;;  %vm18719_vm10 = vnez %v18521_v56 }
 0x14d   : > { %v1871_v13 = vadd.f32 %v12309_v4, %v14462_v44  ;;  %v14616_v52 = vadd.f32 %v2112_v33, %v1868_v59  ;;  %v12343_v54 = vpop.f32.mrf.mxu1 }
 0x14e   : > { %v1780_v57 = vpop.f32.mrf.mxu0 }
 0x14f   : > { %v14619_v2 = vadd.f32 %v1780_v57, %v14464_v12  ;;  %v14621_v55 = vadd.f32 %v12343_v54, %v1871_v13  ;;  %v14623_v18 = vpop.f32.mrf.mxu1  ;;  %v3516_v12 = vld [vmem:[#allocation2 + $0xe2] sm:$0xff] }
 0x150   : > { %v12312_v1 = vpop.f32.mrf.mxu0  ;;  %12515 = vmatmul.mubr.msk.bf16.gmra.mxu0 %vm18714_vm14, %v3566_v0  ;;  %v3568_v0 = vpack.c.bf16 %v3547_v31, %v3514_v50  ;;  %v3553_v31 = vsel %vm14235_vm0, %v14373_v8, 0.0 }
 0x151   : > { %v1874_v30 = vadd.f32 %v12312_v1, %v14471_v63  ;;  %v12346_v44 = vpop.f32.mrf.mxu1  ;;  %12518 = vmatprep.mubr.msk.bf16.mxu0 %vm18716_vm15, %v3567_v34  ;;  %v3569_v34 = vpack.c.bf16 %v3549_v60, %v3516_v12  ;;  %vm18718_vm15 = vmmov %vm18714_vm14 }
 0x152   : > { %v1793_v5 = vpop.f32.mrf.mxu0 }
 0x153   : > { %v1872_v39 = vadd.f32 %v1793_v5, %v14476_v47  ;;  %v14633_v59 = vadd.f32 %v12346_v44, %v1874_v30  ;;  %v2128_v33 = vpop.f32.mrf.mxu1  ;;  %v3551_v44 = vsel %vm18719_vm10, %v3519_v3, 0.0 }
 0x154   : > { %v12313_v4 = vpop.f32.mrf.mxu0 }
 0x155   : > { %v1875_v63 = vadd.f32 %v12313_v4, %v14478_v16  ;;  %v14636_v13 = vadd.f32 %v2128_v33, %v1872_v39  ;;  %v12347_v54 = vpop.f32.mrf.mxu1  ;;  %v3518_v16 = vld [vmem:[#allocation2 + $0xf2] sm:$0xff] }
 0x156   : > { %v14638_v57 = vpop.f32.mrf.mxu0  ;;  %v3570_v33 = vpack.c.bf16 %v3551_v44, %v3518_v16 }
 0x157   : > { %v14640_v1 = vadd.f32 %v12347_v54, %v1875_v63  ;;  %v14642_v15 = vpop.f32.mrf.mxu1  ;;  %v3571_v63 = vpack.c.bf16 %v3553_v31, %v14382_v20 }
 0x158   : > { %v12316_v17 = vpop.f32.mrf.mxu0  ;;  %12519 = vmatmul.mubr.msk.bf16.gmra.mxu0 %vm18714_vm14, %v3568_v0 }
 0x159   : > { %v1878_v47 = vadd.f32 %v12316_v17, %v14489_v36  ;;  %v12350_v30 = vpop.f32.mrf.mxu1  ;;  %12522 = vmatprep.mubr.msk.bf16.mxu0 %vm18718_vm15, %v3569_v34  ;;  %v3523_v34 = vld [vmem:[#allocation2 + $0x11a] sm:$0xff]  ;;  %vm18720_vm15 = vmmov %vm18714_vm14 }
 0x15a   : > { %v1809_v50 = vpop.f32.mrf.mxu0 }
 0x15b   : > { %v1876_v5 = vadd.f32 %v1809_v50, %v14495_v61  ;;  %v14653_v12 = vadd.f32 %v12350_v30, %v1878_v47  ;;  %v2144_v60 = vpop.f32.mrf.mxu1  ;;  %v3555_v30 = vsel %vm14262_vm7, %v3523_v34, 0.0 }
 0x15c   : > { %v12317_v39 = vpop.f32.mrf.mxu0 }
 0x15d   : > { %v1879_v36 = vadd.f32 %v12317_v39, %v14498_v35  ;;  %v14656_v4 = vadd.f32 %v2144_v60, %v1876_v5  ;;  %v12351_v0 = vpop.f32.mrf.mxu1  ;;  %v3522_v35 = vld [vmem:[#allocation2 + $0x112] sm:$0xff] }
 0x15e   : > { %v14659_v54 = vpop.f32.mrf.mxu0  ;;  %v3572_v5 = vpack.c.bf16 %v3555_v30, %v3522_v35 }
 0x15f   : > { %v14661_v3 = vadd.f32 %v12351_v0, %v1879_v36  ;;  %v14663_v8 = vpop.f32.mrf.mxu1 }
 0x160   : > { %v12320_v61 = vpop.f32.mrf.mxu0  ;;  %12523 = vmatmul.mubr.msk.bf16.gmra.mxu0 %vm18714_vm14, %v3570_v33 }
 0x161   : > { %v1882_v17 = vadd.f32 %v12320_v61, %v14509_v19  ;;  %v12354_v47 = vpop.f32.mrf.mxu1  ;;  %12526 = vmatprep.mubr.msk.bf16.mxu0 %vm18720_vm15, %v3571_v63  ;;  %vm18269_vm15 = vcmask 64512  }
 0x162   : > { %v1825_v20 = vpop.f32.mrf.mxu0 }
 0x163   : > { %v1880_v16 = vadd.f32 %v1825_v20, %v14515_v43  ;;  %v14671_v44 = vadd.f32 %v12354_v47, %v1882_v17  ;;  %v2160_v50 = vpop.f32.mrf.mxu1 }
 0x164   : > { %v12321_v31 = vpop.f32.mrf.mxu0 }
 0x165   : > { %v1883_v60 = vadd.f32 %v12321_v31, %v14517_v37  ;;  %v14674_v39 = vadd.f32 %v2160_v50, %v1880_v16  ;;  %v12355_v19 = vpop.f32.mrf.mxu1 }
 0x166   : > { %v14676_v33 = vpop.f32.mrf.mxu0 }
 0x167   : > { %v14678_v36 = vadd.f32 %v12355_v19, %v1883_v60  ;;  %v14680_v0 = vpop.f32.mrf.mxu1 }
 0x168   : > { %v12324_v63 = vpop.f32.mrf.mxu0  ;;  %12527 = vmatmul.mubr.msk.bf16.gmra.mxu0 %vm18714_vm14, %v3572_v5  ;;  %vm18728_vm14 = vcmask 1043456  }
 0x169   : > { %v1886_v43 = vadd.f32 %v12324_v63, %v14528_v29  ;;  %v12358_v34 = vpop.f32.mrf.mxu1 }
 0x16a   : > { %v1841_v61 = vpop.f32.mrf.mxu0 }
 0x16b   : > { %v1884_v17 = vadd.f32 %v1841_v61, %v14532_v27  ;;  %v14685_v47 = vadd.f32 %v12358_v34, %v1886_v43  ;;  %v2176_v37 = vpop.f32.mrf.mxu1 }
 0x16c   : > { %v12325_v35 = vpop.f32.mrf.mxu0 }
 0x16d   : > { %v1887_v30 = vadd.f32 %v12325_v35, %v14534_v32  ;;  %v14688_v20 = vadd.f32 %v2176_v37, %v1884_v17  ;;  %v12359_v16 = vpop.f32.mrf.mxu1  ;;  %v18722_v37 = vmov 0.0  }
 0x16e   : > { %v14690_v50 = vpop.f32.mrf.mxu0  ;;  %3893 = vst.msk [vmem:[#allocation3 + $0x20] sm:$0xff] %vm18269_vm15, %v18722_v37  ;;  %3894 = vst.msk [vmem:[#allocation3 + $0x28] sm:$0xff] %vm18269_vm15, %v18722_v37 }
 0x16f   : > { %v14692_v31 = vadd.f32 %v12359_v16, %v1887_v30  ;;  %v14694_v5 = vpop.f32.mrf.mxu1  ;;  %3889 = vst.msk [vmem:[#allocation3] sm:$0xff] %vm18269_vm15, %v18722_v37  ;;  %3890 = vst.msk [vmem:[#allocation3 + $0x8] sm:$0xff] %vm18269_vm15, %v18722_v37 }
 0x170   : > { %18721 = vst [vmem:[#allocation56_spill] sm:$0xff] %v14694_v5  ;;  %v12364_v29 = vpop.f32.mrf.mxu0  ;;  %3891 = vst.msk [vmem:[#allocation3 + $0x10] sm:$0xff] %vm18269_vm15, %v18722_v37 }
 0x171   : > { %v14697_v60 = vadd.f32 %v12364_v29, %v14548_v10  ;;  %v14699_v27 = vpop.f32.mrf.mxu1  ;;  %3892 = vst.msk [vmem:[#allocation3 + $0x18] sm:$0xff] %vm18269_vm15, %v18722_v37  ;;  %3895 = vst.msk [vmem:[#allocation3 + $0x30] sm:$0xff] %vm18269_vm15, %v18722_v37 }
 0x172   : > { %v2361_v19 = vpop.f32.mrf.mxu0  ;;  %3896 = vst.msk [vmem:[#allocation3 + $0x38] sm:$0xff] %vm18269_vm15, %v18722_v37  ;;  %3897 = vst.msk [vmem:[#allocation3 + $0x40] sm:$0xff] %vm18269_vm15, %v18722_v37 }
 0x173   : > { %v14702_v63 = vadd.f32 %v2361_v19, %v14551_v25  ;;  %v14704_v32 = vpop.f32.mrf.mxu1  ;;  %3898 = vst.msk [vmem:[#allocation3 + $0x48] sm:$0xff] %vm18269_vm15, %v18722_v37  ;;  %3899 = vst.msk [vmem:[#allocation3 + $0x50] sm:$0xff] %vm18269_vm15, %v18722_v37 }
 0x174   : > { %v12365_v43 = vpop.f32.mrf.mxu0  ;;  %3900 = vst.msk [vmem:[#allocation3 + $0x58] sm:$0xff] %vm18269_vm15, %v18722_v37  ;;  %3901 = vst.msk [vmem:[#allocation3 + $0x60] sm:$0xff] %vm18269_vm15, %v18722_v37 }
 0x175   : > { %v14707_v34 = vadd.f32 %v12365_v43, %v14556_v6  ;;  %v14709_v61 = vpop.f32.mrf.mxu1  ;;  %3902 = vst.msk [vmem:[#allocation3 + $0x68] sm:$0xff] %vm18269_vm15, %v18722_v37  ;;  %3903 = vst.msk [vmem:[#allocation3 + $0x70] sm:$0xff] %vm18269_vm15, %v18722_v37 }
 0x176   : > { %v14711_v17 = vpop.f32.mrf.mxu0  ;;  %3904 = vst.msk [vmem:[#allocation3 + $0x78] sm:$0xff] %vm18269_vm15, %v18722_v37  ;;  %3905 = vst.msk [vmem:[#allocation3 + $0x80] sm:$0xff] %vm18269_vm15, %v18722_v37  ;;  %v3959_v40 = vld [vmem:[#allocation3] sm:$0xff] }
 0x177   : > { %3906 = vst.msk [vmem:[#allocation3 + $0x88] sm:$0xff] %vm18269_vm15, %v18722_v37  ;;  %3907 = vst.msk [vmem:[#allocation3 + $0x90] sm:$0xff] %vm18269_vm15, %v18722_v37  ;;  %v14805_v6 = vpop.f32.mrf.mxu1  ;;  %v4040_v9 = vld [vmem:[#allocation3 + $0x1] sm:$0xff] }
 0x178   : > { %3908 = vst.msk [vmem:[#allocation3 + $0x98] sm:$0xff] %vm18269_vm15, %v18722_v37  ;;  %3909 = vst.msk [vmem:[#allocation3 + $0xa0] sm:$0xff] %vm18269_vm15, %v18722_v37  ;;  %v12368_v10 = vpop.f32.mrf.mxu0 }
 0x179   : > { %3910 = vst.msk [vmem:[#allocation3 + $0xa8] sm:$0xff] %vm18269_vm15, %v18722_v37  ;;  %3911 = vst.msk [vmem:[#allocation3 + $0xb0] sm:$0xff] %vm18269_vm15, %v18722_v37  ;;  %v14808_v25 = vadd.f32 %v12368_v10, %v14568_v7  ;;  %v14810_v35 = vpop.f32.mrf.mxu1 }
 0x17a   : > { %3912 = vst.msk [vmem:[#allocation3 + $0xb8] sm:$0xff] %vm18269_vm15, %v18722_v37  ;;  %3913 = vst.msk [vmem:[#allocation3 + $0xc0] sm:$0xff] %vm18269_vm15, %v18722_v37  ;;  %v2377_v30 = vpop.f32.mrf.mxu0 }
 0x17b   : > { %3914 = vst.msk [vmem:[#allocation3 + $0xc8] sm:$0xff] %vm18269_vm15, %v18722_v37  ;;  %3915 = vst.msk [vmem:[#allocation3 + $0xd0] sm:$0xff] %vm18269_vm15, %v18722_v37  ;;  %v14813_v16 = vadd.f32 %v2377_v30, %v14571_v42  ;;  %v14815_v29 = vpop.f32.mrf.mxu1  ;;  %v4023_v30 = vld [vmem:[%s18713_s21] sm:$0xf] }
 0x17c   : > { %3916 = vst.msk [vmem:[#allocation3 + $0xd8] sm:$0xff] %vm18269_vm15, %v18722_v37  ;;  %3917 = vst.msk [vmem:[#allocation3 + $0xe0] sm:$0xff] %vm18269_vm15, %v18722_v37  ;;  %v12369_v19 = vpop.f32.mrf.mxu0  ;;  %13233 = vmatprep.subr.msk.bf16.mxu0 %vm18728_vm14, %v4023_v30 }
 0x17d   : > { %3918 = vst.msk [vmem:[#allocation3 + $0xe8] sm:$0xff] %vm18269_vm15, %v18722_v37  ;;  %3919 = vst.msk [vmem:[#allocation3 + $0xf0] sm:$0xff] %vm18269_vm15, %v18722_v37  ;;  %v14818_v43 = vadd.f32 %v12369_v19, %v14576_v49  ;;  %v14820_v38 = vpop.f32.mrf.mxu1 }
 0x17e   : > { %3920 = vst.msk [vmem:[#allocation3 + $0xf8] sm:$0xff] %vm18269_vm15, %v18722_v37  ;;  %3921 = vst.msk [vmem:[#allocation3 + $0x100] sm:$0xff] %vm18269_vm15, %v18722_v37 }
 0x17f   : > { %3922 = vst.msk [vmem:[#allocation3 + $0x108] sm:$0xff] %vm18269_vm15, %v18722_v37  ;;  %3923 = vst.msk [vmem:[#allocation3 + $0x110] sm:$0xff] %vm18269_vm15, %v18722_v37  ;;  %v14824_v51 = vpop.f32.mrf.mxu1 }
 0x180   : > { %3924 = vst.msk [vmem:[#allocation3 + $0x118] sm:$0xff] %vm18269_vm15, %v18722_v37  ;;  %6828 = vst.msk [vmem:[#allocation5] sm:$0xff] %vm18269_vm15, %v18722_v37 }
 0x181   : > { %6829 = vst.msk [vmem:[#allocation5 + $0x8] sm:$0xff] %vm18269_vm15, %v18722_v37  ;;  %6830 = vst.msk [vmem:[#allocation5 + $0x10] sm:$0xff] %vm18269_vm15, %v18722_v37  ;;  %v14829_v56 = vpop.f32.mrf.mxu1 }
 0x182   : > { %6831 = vst.msk [vmem:[#allocation5 + $0x18] sm:$0xff] %vm18269_vm15, %v18722_v37  ;;  %6832 = vst.msk [vmem:[#allocation5 + $0x20] sm:$0xff] %vm18269_vm15, %v18722_v37 }
 0x183   : > { %6833 = vst.msk [vmem:[#allocation5 + $0x28] sm:$0xff] %vm18269_vm15, %v18722_v37  ;;  %6834 = vst.msk [vmem:[#allocation5 + $0x30] sm:$0xff] %vm18269_vm15, %v18722_v37  ;;  %v14837_v19 = vpop.f32.mrf.mxu1 }
 0x184   : > { %6835 = vst.msk [vmem:[#allocation5 + $0x38] sm:$0xff] %vm18269_vm15, %v18722_v37  ;;  %6836 = vst.msk [vmem:[#allocation5 + $0x40] sm:$0xff] %vm18269_vm15, %v18722_v37 }
 0x185   : > { %6837 = vst.msk [vmem:[#allocation5 + $0x48] sm:$0xff] %vm18269_vm15, %v18722_v37  ;;  %18723 = vst [vmem:[#allocation48_spill] sm:$0xff] %v14820_v38  ;;  %v14822_v37 = vpop.f32.mrf.mxu0 }
 0x186   : > { %18724 = vst [vmem:[#allocation57_spill] sm:$0xff] %v14824_v51  ;;  %18726 = vst [vmem:[#allocation61_spill] sm:$0xff] %v14829_v56  ;;  %v3991_v56 = vsel %vm18657_vm13, %v3959_v40, 0.0 }
 0x187   : > { %v12372_v7 = vpop.f32.mrf.mxu0  ;;  %18727 = vst [vmem:[#allocation60_spill] sm:$0xff] %v14837_v19  ;;  %vm18729_vm15 = vmmov %vm18728_vm14  ;;  %vm18731_vm14 = vcmask 64512  }
 0x188   : > { %v14827_v10 = vadd.f32 %v12372_v7, %v14588_v48  ;;  %v4351_v62 = vsel %vm18729_vm15, %v4023_v30, 0  ;;  %v4041_v48 = vld [vmem:[#allocation3 + $0x9] sm:$0xff]  ;;  %vm18732_vm15 = vmmov %vm18731_vm14 }
 0x189   : > { %v2393_v42 = vpop.f32.mrf.mxu0  ;;  %v3960_v7 = vld [vmem:[#allocation3 + $0x8] sm:$0xff]  ;;  %12565 = vmatpush3.bf16.msra.mxu0 %v4351_v62  ;;  %v4073_v51 = vpack.c.bf16 %v4041_v48, %v4040_v9 }
 0x18a   : > { %18725 = vst [vmem:[#allocation58_spill] sm:$0xff] %v14827_v10  ;;  %v14835_v49 = vadd.f32 %v2393_v42, %v14591_v41  ;;  %v4024_v5 = vpack.c.bf16 %v3960_v7, %v3991_v56  ;;  %v14846_v41 = vpop.f32.mrf.mxu1 }
 0x18b   : > { %v12373_v10 = vpop.f32.mrf.mxu0  ;;  %12532 = vmatprep.mubr.msk.bf16.mxu1 %vm18731_vm14, %v4073_v51  ;;  %vm18739_vm14 = vcmask 1043456  }
 0x18c   : > { %v14844_v38 = vadd.f32 %v12373_v10, %v14596_v26  ;;  %12566 = vmatprep.mubr.msk.bf16.mxu0 %vm18732_vm15, %v4024_v5  ;;  %v14852_v30 = vpop.f32.mrf.mxu1  ;;  %v14872_v5 = vld [vmem:[%s18713_s21 + $0x8] sm:$0xf]  ;;  %vm18776_vm15 = vmmov %vm18739_vm14 }
 0x18d   : > { %v14848_v42 = vpop.f32.mrf.mxu0  ;;  %18737 = vst [vmem:[#allocation69_spill] sm:$0xff] %v14872_v5  ;;  %13234 = vmatprep.subr.msk.bf16.mxu1 %vm18739_vm14, %v14872_v5  ;;  %vm18814_vm14 = vcmask 64512  }
 0x18e   : > { %v14857_v62 = vpop.f32.mrf.mxu1  ;;  %vm18859_vm6 = vmmov %vm18814_vm14 }
 0x18f   : > { %v12376_v19 = vpop.f32.mrf.mxu0  ;;  %vm18868_vm0 = vmmov %vm18859_vm6 }
 0x190   : > { %v14855_v40 = vadd.f32 %v12376_v19, %v14613_v11  ;;  %v14862_v26 = vpop.f32.mrf.mxu1 }
 0x191   : > { %v2409_v9 = vpop.f32.mrf.mxu0  ;;  %18734 = vst [vmem:[#allocation20_spill] sm:$0xff] %v14862_v26 }
 0x192   : > { %v14860_v56 = vadd.f32 %v2409_v9, %v14616_v52  ;;  %v14867_v51 = vpop.f32.mrf.mxu1 }
 0x193   : > { %v12377_v10 = vpop.f32.mrf.mxu0  ;;  %18736 = vst [vmem:[#allocation23_spill] sm:$0xff] %v14867_v51 }
 0x194   : > { %18733 = vst [vmem:[#allocation18_spill] sm:$0xff] %v14860_v56  ;;  %v14865_v48 = vadd.f32 %v12377_v10, %v14621_v55  ;;  %v14878_v52 = vpop.f32.mrf.mxu1 }
 0x195   : > { %v14874_v11 = vpop.f32.mrf.mxu0  ;;  %18740 = vst [vmem:[#allocation27_spill] sm:$0xff] %v14878_v52 }
 0x196   : > { %18735 = vst [vmem:[#allocation22_spill] sm:$0xff] %v14865_v48  ;;  %18738 = vst [vmem:[#allocation26_spill] sm:$0xff] %v14874_v11  ;;  %v14883_v55 = vpop.f32.mrf.mxu1 }
 0x197   : > { %v12380_v19 = vpop.f32.mrf.mxu0  ;;  %18742 = vst [vmem:[#allocation31_spill] sm:$0xff] %v14883_v55 }
 0x198   : > { %v14881_v7 = vadd.f32 %v12380_v19, %v14633_v59  ;;  %v14888_v46 = vpop.f32.mrf.mxu1 }
 0x199   : > { %v2425_v9 = vpop.f32.mrf.mxu0  ;;  %18744 = vst [vmem:[#allocation74_spill] sm:$0xff] %v14888_v46 }
 0x19a   : > { %18741 = vst [vmem:[#allocation72_spill] sm:$0xff] %v14881_v7  ;;  %v14886_v10 = vadd.f32 %v2425_v9, %v14636_v13  ;;  %v14893_v26 = vpop.f32.mrf.mxu1 }
 0x19b   : > { %v12381_v51 = vpop.f32.mrf.mxu0  ;;  %18746 = vst [vmem:[#allocation39_spill] sm:$0xff] %v14893_v26 }
 0x19c   : > { %18743 = vst [vmem:[#allocation32_spill] sm:$0xff] %v14886_v10  ;;  %v14891_v48 = vadd.f32 %v12381_v51, %v14640_v1  ;;  %v14897_v52 = vpop.f32.mrf.mxu1 }
 0x19d   : > { %v14895_v5 = vpop.f32.mrf.mxu0  ;;  %18748 = vst [vmem:[#allocation51_spill] sm:$0xff] %v14897_v52 }
 0x19e   : > { %18745 = vst [vmem:[#allocation38_spill] sm:$0xff] %v14891_v48  ;;  %18747 = vst [vmem:[#allocation77_spill] sm:$0xff] %v14895_v5  ;;  %v14902_v55 = vpop.f32.mrf.mxu1 }
 0x19f   : > { %v12384_v59 = vpop.f32.mrf.mxu0  ;;  %18750 = vst [vmem:[#allocation78_spill] sm:$0xff] %v14902_v55 }
 0x1a0   : > { %v14900_v19 = vadd.f32 %v12384_v59, %v14653_v12  ;;  %v14907_v46 = vpop.f32.mrf.mxu1 }
 0x1a1   : > { %v2441_v13 = vpop.f32.mrf.mxu0  ;;  %18752 = vst [vmem:[#allocation63_spill] sm:$0xff] %v14907_v46 }
 0x1a2   : > { %18749 = vst [vmem:[#allocation54_spill] sm:$0xff] %v14900_v19  ;;  %v14905_v9 = vadd.f32 %v2441_v13, %v14656_v4  ;;  %v14912_v26 = vpop.f32.mrf.mxu1 }
 0x1a3   : > { %v12385_v1 = vpop.f32.mrf.mxu0  ;;  %18754 = vst [vmem:[#allocation75_spill] sm:$0xff] %v14912_v26 }
 0x1a4   : > { %18751 = vst [vmem:[#allocation62_spill] sm:$0xff] %v14905_v9  ;;  %v14910_v51 = vadd.f32 %v12385_v1, %v14661_v3  ;;  %v14916_v52 = vpop.f32.mrf.mxu1 }
 0x1a5   : > { %v14914_v48 = vpop.f32.mrf.mxu0  ;;  %18756 = vst [vmem:[#allocation84_spill] sm:$0xff] %v14916_v52 }
 0x1a6   : > { %18753 = vst [vmem:[#allocation79_spill] sm:$0xff] %v14910_v51  ;;  %18755 = vst [vmem:[#allocation83_spill] sm:$0xff] %v14914_v48  ;;  %v14921_v55 = vpop.f32.mrf.mxu1 }
 0x1a7   : > { %v12388_v12 = vpop.f32.mrf.mxu0  ;;  %18758 = vst [vmem:[#allocation86_spill] sm:$0xff] %v14921_v55 }
 0x1a8   : > { %v14919_v59 = vadd.f32 %v12388_v12, %v14671_v44  ;;  %v14926_v46 = vpop.f32.mrf.mxu1 }
 0x1a9   : > { %v2457_v4 = vpop.f32.mrf.mxu0  ;;  %18760 = vst [vmem:[#allocation88_spill] sm:$0xff] %v14926_v46 }
 0x1aa   : > { %18757 = vst [vmem:[#allocation85_spill] sm:$0xff] %v14919_v59  ;;  %v14924_v13 = vadd.f32 %v2457_v4, %v14674_v39  ;;  %v14931_v26 = vpop.f32.mrf.mxu1 }
 0x1ab   : > { %v12389_v3 = vpop.f32.mrf.mxu0  ;;  %18762 = vst [vmem:[#allocation90_spill] sm:$0xff] %v14931_v26 }
 0x1ac   : > { %18759 = vst [vmem:[#allocation87_spill] sm:$0xff] %v14924_v13  ;;  %v14929_v1 = vadd.f32 %v12389_v3, %v14678_v36  ;;  %v14935_v52 = vpop.f32.mrf.mxu1  ;;  %v14983_v13 = vld [vmem:[%s18713_s21 + $0xc] sm:$0xf] }
 0x1ad   : > { %v14933_v51 = vpop.f32.mrf.mxu0  ;;  %18764 = vst [vmem:[#allocation92_spill] sm:$0xff] %v14935_v52  ;;  %18774 = vst [vmem:[#allocation102_spill] sm:$0xff] %v14983_v13  ;;  %13235 = vmatprep.subr.msk.bf16.mxu0 %vm18776_vm15, %v14983_v13 }
 0x1ae   : > { %18761 = vst [vmem:[#allocation89_spill] sm:$0xff] %v14929_v1  ;;  %18763 = vst [vmem:[#allocation91_spill] sm:$0xff] %v14933_v51  ;;  %v14940_v55 = vpop.f32.mrf.mxu1 }
 0x1af   : > { %v12392_v44 = vpop.f32.mrf.mxu0  ;;  %18766 = vst [vmem:[#allocation94_spill] sm:$0xff] %v14940_v55  ;;  %vm18818_vm15 = vmmov %vm18814_vm14 }
 0x1b0   : > { %v14938_v12 = vadd.f32 %v12392_v44, %v14685_v47  ;;  %v14945_v46 = vpop.f32.mrf.mxu1 }
 0x1b1   : > { %v2473_v39 = vpop.f32.mrf.mxu0  ;;  %18768 = vst [vmem:[#allocation96_spill] sm:$0xff] %v14945_v46 }
 0x1b2   : > { %18765 = vst [vmem:[#allocation93_spill] sm:$0xff] %v14938_v12  ;;  %v14943_v4 = vadd.f32 %v2473_v39, %v14688_v20  ;;  %v14950_v26 = vpop.f32.mrf.mxu1 }
 0x1b3   : > { %v12393_v36 = vpop.f32.mrf.mxu0  ;;  %18770 = vst [vmem:[#allocation98_spill] sm:$0xff] %v14950_v26 }
 0x1b4   : > { %18767 = vst [vmem:[#allocation95_spill] sm:$0xff] %v14943_v4  ;;  %v14948_v3 = vadd.f32 %v12393_v36, %v14692_v31  ;;  %v14954_v52 = vpop.f32.mrf.mxu1 }
 0x1b5   : > { %v14952_v1 = vpop.f32.mrf.mxu0  ;;  %18772 = vst [vmem:[#allocation100_spill] sm:$0xff] %v14954_v52 }
 0x1b6   : > { %18769 = vst [vmem:[#allocation97_spill] sm:$0xff] %v14948_v3  ;;  %18771 = vst [vmem:[#allocation99_spill] sm:$0xff] %v14952_v1  ;;  %v14956_v44 = vpop.f32.mrf.mxu1 }
 0x1b7   : > { %v12432_v47 = vpop.f32.mrf.mxu0 }
 0x1b8   : > { %v14958_v12 = vpop.f32.mrf.mxu1 }
 0x1b9   : > { %v3029_v55 = vpop.f32.mrf.mxu0 }
 0x1ba   : > { %v14960_v39 = vpop.f32.mrf.mxu1 }
 0x1bb   : > { %v12433_v20 = vpop.f32.mrf.mxu0 }
 0x1bc   : > { %v14966_v31 = vpop.f32.mrf.mxu1 }
 0x1bd   : > { %v14962_v46 = vpop.f32.mrf.mxu0 }
 0x1be   : > { %v14972_v52 = vpop.f32.mrf.mxu1 }
 0x1bf   : > { %v14964_v4 = vpop.f32.mrf.mxu0 }
 0x1c0   : > { %v14978_v51 = vpop.f32.mrf.mxu1 }
 0x1c1   : > { %v14968_v36 = vpop.f32.mrf.mxu0 }
 0x1c2   : > { %v14991_v19 = vpop.f32.mrf.mxu1 }
 0x1c3   : > { %v14970_v26 = vpop.f32.mrf.mxu0  ;;  %18778 = vst [vmem:[#allocation105_spill] sm:$0xff] %v14991_v19 }
 0x1c4   : > { %v14997_v7 = vpop.f32.mrf.mxu1 }
 0x1c5   : > { %v14974_v3 = vpop.f32.mrf.mxu0  ;;  %18781 = vst [vmem:[#allocation108_spill] sm:$0xff] %v14997_v7 }
 0x1c7   : > { %v14976_v1 = vpop.f32.mrf.mxu0 }
 0x1c8   : > { %18773 = vst [vmem:[#allocation101_spill] sm:$0xff] %v14976_v1  ;;  %v15003_v1 = vpop.f32.mrf.mxu1 }
 0x1c9   : > { %v14985_v59 = vpop.f32.mrf.mxu0  ;;  %18784 = vst [vmem:[#allocation111_spill] sm:$0xff] %v15003_v1 }
 0x1ca   : > { %18775 = vst [vmem:[#allocation103_spill] sm:$0xff] %v14985_v59  ;;  %v15009_v13 = vpop.f32.mrf.mxu1 }
 0x1cb   : > { %v14989_v9 = vpop.f32.mrf.mxu0  ;;  %18787 = vst [vmem:[#allocation114_spill] sm:$0xff] %v15009_v13 }
 0x1cc   : > { %18777 = vst [vmem:[#allocation104_spill] sm:$0xff] %v14989_v9 }
 0x1cd   : > { %v14993_v48 = vpop.f32.mrf.mxu0 }
 0x1ce   : > { %18779 = vst [vmem:[#allocation106_spill] sm:$0xff] %v14993_v48  ;;  %v15015_v48 = vpop.f32.mrf.mxu1 }
 0x1cf   : > { %v14995_v10 = vpop.f32.mrf.mxu0  ;;  %18790 = vst [vmem:[#allocation117_spill] sm:$0xff] %v15015_v48 }
 0x1d0   : > { %18780 = vst [vmem:[#allocation107_spill] sm:$0xff] %v14995_v10 }
 0x1d1   : > { %v14999_v5 = vpop.f32.mrf.mxu0 }
 0x1d2   : > { %18782 = vst [vmem:[#allocation109_spill] sm:$0xff] %v14999_v5  ;;  %v15021_v5 = vpop.f32.mrf.mxu1 }
 0x1d3   : > { %v15001_v56 = vpop.f32.mrf.mxu0 }
 0x1d4   : > { %18783 = vst [vmem:[#allocation110_spill] sm:$0xff] %v15001_v56 }
 0x1d5   : > { %v15005_v59 = vpop.f32.mrf.mxu0 }
 0x1d6   : > { %18785 = vst [vmem:[#allocation112_spill] sm:$0xff] %v15005_v59  ;;  %v15027_v59 = vpop.f32.mrf.mxu1 }
 0x1d7   : > { %v15007_v11 = vpop.f32.mrf.mxu0  ;;  %18795 = vst [vmem:[#allocation122_spill] sm:$0xff] %v15027_v59 }
 0x1d8   : > { %18786 = vst [vmem:[#allocation113_spill] sm:$0xff] %v15007_v11 }
 0x1d9   : > { %v15011_v9 = vpop.f32.mrf.mxu0 }
 0x1da   : > { %18788 = vst [vmem:[#allocation115_spill] sm:$0xff] %v15011_v9  ;;  %v15033_v9 = vpop.f32.mrf.mxu1 }
 0x1db   : > { %v15013_v19 = vpop.f32.mrf.mxu0  ;;  %18798 = vst [vmem:[#allocation125_spill] sm:$0xff] %v15033_v9 }
 0x1dc   : > { %18789 = vst [vmem:[#allocation116_spill] sm:$0xff] %v15013_v19 }
 0x1dd   : > { %v15017_v10 = vpop.f32.mrf.mxu0 }
 0x1de   : > { %18791 = vst [vmem:[#allocation118_spill] sm:$0xff] %v15017_v10  ;;  %v15039_v10 = vpop.f32.mrf.mxu1 }
 0x1df   : > { %v15019_v7 = vpop.f32.mrf.mxu0  ;;  %18801 = vst [vmem:[#allocation128_spill] sm:$0xff] %v15039_v10 }
 0x1e0   : > { %18792 = vst [vmem:[#allocation119_spill] sm:$0xff] %v15019_v7  ;;  %v15049_v59 = vpop.f32.mrf.mxu1 }
 0x1e1   : > { %v15023_v56 = vpop.f32.mrf.mxu0 }
 0x1e2   : > { %18793 = vst [vmem:[#allocation120_spill] sm:$0xff] %v15023_v56  ;;  %v2192_v56 = vadd.f32 %v14558_v21, %v14554_v58  ;;  %v2830_v58 = vadd.f32 %v14709_v61, %v14707_v34  ;;  %v2196_v34 = vadd.f32 %v14578_v22, %v14574_v45  ;;  %v2200_v45 = vadd.f32 %v14598_v28, %v14594_v14 }
 0x1e3   : > { %v15025_v1 = vpop.f32.mrf.mxu0  ;;  %v2204_v22 = vadd.f32 %v14623_v18, %v14619_v2  ;;  %v2831_v14 = vadd.f32 %v14815_v29, %v14813_v16 }
 0x1e4   : > { %18794 = vst [vmem:[#allocation121_spill] sm:$0xff] %v15025_v1 }
 0x1e5   : > { %v15029_v11 = vpop.f32.mrf.mxu0 }
 0x1e6   : > { %18796 = vst [vmem:[#allocation123_spill] sm:$0xff] %v15029_v11  ;;  %v2829_v11 = vadd.f32 %v14699_v27, %v14697_v60  ;;  %v15062_v60 = vpop.f32.mrf.mxu1  ;;  %v18805_v27 = vld [vmem:[#allocation41_spill] sm:$0xff] }
 0x1e7   : > { %v15031_v13 = vpop.f32.mrf.mxu0 }
 0x1e8   : > { %18797 = vst [vmem:[#allocation124_spill] sm:$0xff] %v15031_v13  ;;  %v2489_v13 = vadd.f32 %v14711_v17, %v2192_v56  ;;  %v18807_v56 = vld [vmem:[#allocation46_spill] sm:$0xff] }
 0x1e9   : > { %v15035_v19 = vpop.f32.mrf.mxu0 }
 0x1ea   : > { %18799 = vst [vmem:[#allocation126_spill] sm:$0xff] %v15035_v19  ;;  %v3158_v19 = vadd.f32 %v12432_v47, %v2829_v11 }
 0x1eb   : > { %v15037_v48 = vpop.f32.mrf.mxu0 }
 0x1ec   : > { %18800 = vst [vmem:[#allocation127_spill] sm:$0xff] %v15037_v48  ;;  %v2827_v48 = vadd.f32 %v14704_v32, %v14702_v63  ;;  %v2828_v32 = vadd.f32 %v14805_v6, %v2489_v13  ;;  %v3462_v61 = vadd.f32 %v14956_v44, %v3158_v19 }
 0x1ed   : > { %v15041_v7 = vpop.f32.mrf.mxu0 }
 0x1ee   : > { %18802 = vst [vmem:[#allocation129_spill] sm:$0xff] %v15041_v7  ;;  %v1401_v7 = vadd.f32 %v14482_v53, %v14480_v24  ;;  %v3156_v21 = vadd.f32 %v3029_v55, %v2827_v48  ;;  %v18808_v53 = vld [vmem:[#allocation43_spill] sm:$0xff]  ;;  %v3159_v48 = vadd.f32 %v12433_v20, %v2830_v58  ;;  %v3160_v20 = vadd.f32 %v14968_v36, %v2831_v14  ;;  %v18823_v14 = vld [vmem:[#allocation20_spill] sm:$0xff] }
 0x1ef   : > { %v15045_v1 = vpop.f32.mrf.mxu0  ;;  %v18809_v24 = vld [vmem:[#allocation71_spill] sm:$0xff] }
 0x1f0   : > { %18803 = vst [vmem:[#allocation130_spill] sm:$0xff] %v15045_v1  ;;  %v18806_v1 = vld [vmem:[#allocation37_spill] sm:$0xff]  ;;  %v1873_v63 = vadd.f32 %v14638_v57, %v1401_v7  ;;  %v1449_v47 = vadd.f32 %v18809_v24, %v18808_v53  ;;  %v3157_v57 = vadd.f32 %v14962_v46, %v2828_v32  ;;  %v15085_v7 = vld [vmem:[%s18810_s28] ss:$0 sm:$0xff]  ;;  %v3463_v28 = vadd.f32 %v14960_v39, %v3159_v48  ;;  %v18815_v53 = vld [vmem:[#allocation58_spill] sm:$0xff]  ;;  %s18024_s28 = scalar_lea.vmem %s18090_s17, %s11754_s24  ;;  %s621_s24 = scalar_lea.vmem %s18091_s18, %s11755_s29 }
 0x1f1   : > { %v15052_v9 = vpop.f32.mrf.mxu0  ;;  %v1417_v17 = vadd.f32 %v18806_v1, %v18805_v27  ;;  %v18813_v27 = vld [vmem:[#allocation57_spill] sm:$0xff]  ;;  %s625_s29 = scalar_lea.vmem %s18092_s19, %s11294_s25 }
 0x1f2   : > { %18804 = vst [vmem:[#allocation131_spill] sm:$0xff] %v15052_v9  ;;  %v1433_v9 = vadd.f32 %v18807_v56, %v14519_v23  ;;  %v2833_v23 = vadd.f32 %v14810_v35, %v14808_v25  ;;  %v2208_v25 = vadd.f32 %v14642_v15, %v1873_v63  ;;  %v1885_v46 = vadd.f32 %v14690_v50, %v1449_v47  ;;  %v18811_v50 = vld [vmem:[#allocation48_spill] sm:$0xff]  ;;  %v18816_v24 = vld [vmem:[#allocation61_spill] sm:$0xff] }
 0x1f3   : > { %v15058_v10 = vpop.f32.mrf.mxu0  ;;  %v1877_v55 = vadd.f32 %v14659_v54, %v1417_v17  ;;  %v3460_v54 = vadd.f32 %v14958_v12, %v3156_v21  ;;  %v2493_v35 = vadd.f32 %v14822_v37, %v2196_v34  ;;  %v2834_v37 = vadd.f32 %v18811_v50, %v14818_v43  ;;  %v18812_v21 = vld [vmem:[#allocation56_spill] sm:$0xff]  ;;  %v18827_v50 = vld [vmem:[#allocation69_spill] sm:$0xff] }
 0x1f4   : > { %v1881_v1 = vadd.f32 %v14676_v33, %v1433_v9  ;;  %v15092_v33 = vpop.f32.mrf.mxu1  ;;  %v3162_v9 = vadd.f32 %v14964_v4, %v2833_v23  ;;  %v3461_v4 = vadd.f32 %v14966_v31, %v3157_v57  ;;  %v2497_v17 = vadd.f32 %v14848_v42, %v2200_v45  ;;  %v18817_v34 = vld [vmem:[#allocation60_spill] sm:$0xff]  ;;  %v18819_v45 = vld [vmem:[#allocation26_spill] sm:$0xff] }
 0x1f5   : > { %v15070_v11 = vpop.f32.mrf.mxu0  ;;  %v15103_v12 = vadd.f32 %v14663_v8, %v1877_v55  ;;  %v15116_v8 = vadd.f32 %v18812_v21, %v1885_v46  ;;  %v3163_v31 = vadd.f32 %v14970_v26, %v2834_v37  ;;  %v2837_v47 = vadd.f32 %v18816_v24, %v18815_v53  ;;  %v18830_v21 = vld [vmem:[#allocation27_spill] sm:$0xff] }
 0x1f6   : > { %v15106_v15 = vadd.f32 %v14680_v0, %v1881_v1  ;;  %v15112_v16 = vpop.f32.mrf.mxu1  ;;  %v2832_v0 = vadd.f32 %v18813_v27, %v2493_v35  ;;  %v3466_v43 = vadd.f32 %v14972_v52, %v3162_v9  ;;  %v2838_v42 = vadd.f32 %v14846_v41, %v14844_v38  ;;  %v18820_v41 = vld [vmem:[#allocation101_spill] sm:$0xff] }
 0x1f7   : > { %v12500_v6 = vpop.f32.mrf.mxu0  ;;  %v3464_v26 = vadd.f32 %v14978_v51, %v3160_v20  ;;  %v2501_v38 = vadd.f32 %v18819_v45, %v2204_v22 }
 0x1f8   : > { %v3787_v19 = vadd.f32 %v12500_v6, %v3462_v61  ;;  %v2835_v61 = vadd.f32 %v18817_v34, %v14835_v49  ;;  %v3161_v52 = vadd.f32 %v14974_v3, %v2832_v0  ;;  %v15132_v55 = vpop.f32.mrf.mxu1  ;;  %v2836_v6 = vadd.f32 %v14852_v30, %v2497_v17  ;;  %v18824_v30 = vld [vmem:[#allocation22_spill] sm:$0xff]  ;;  %v18831_v0 = vld [vmem:[#allocation77_spill] sm:$0xff] }
 0x1f9   : > { %v3658_v13 = vpop.f32.mrf.mxu0  ;;  %v2841_v49 = vadd.f32 %v14857_v62, %v14855_v40  ;;  %v3166_v3 = vadd.f32 %v18820_v41, %v2837_v47  ;;  %v18826_v40 = vld [vmem:[#allocation108_spill] sm:$0xff]  ;;  %v2840_v27 = vadd.f32 %v18830_v21, %v2501_v38  ;;  %v2505_v17 = vadd.f32 %v18831_v0, %v2208_v25  ;;  %v18840_v25 = vld [vmem:[#allocation38_spill] sm:$0xff]  ;;  %v18849_v21 = vld [vmem:[#allocation109_spill] sm:$0xff] }
 0x1fa   : > { %v3826_v2 = vadd.f32 %v15085_v7, %v3787_v19  ;;  %v3785_v18 = vadd.f32 %v3658_v13, %v3460_v54  ;;  %v18821_v19 = vld [vmem:[#allocation105_spill] sm:$0xff]  ;;  %v18822_v13 = vld [vmem:[#allocation18_spill] sm:$0xff]  ;;  %v3465_v62 = vadd.f32 %v18826_v40, %v3161_v52  ;;  %v15154_v20 = vpop.f32.mrf.mxu1  ;;  %v18837_v52 = vld [vmem:[#allocation31_spill] sm:$0xff] }
 0x1fb   : > { %v12501_v44 = vpop.f32.mrf.mxu0  ;;  %v3467_v51 = vadd.f32 %v18821_v19, %v3163_v31  ;;  %v18833_v31 = vld [vmem:[#allocation104_spill] sm:$0xff]  ;;  %v18843_v41 = vld [vmem:[#allocation114_spill] sm:$0xff] }
 0x1fc   : > { %v3858_v29 = vmax.f32 %v3826_v2, 0.0  ;;  %v3824_v39 = vadd.f32 %v15085_v7, %v3785_v18  ;;  %v3788_v58 = vadd.f32 %v12501_v44, %v3463_v28  ;;  %v2839_v28 = vadd.f32 %v18823_v14, %v18822_v13  ;;  %v18825_v2 = vld [vmem:[#allocation23_spill] sm:$0xff] }
 0x1fd   : > { %v3661_v56 = vpop.f32.mrf.mxu0  ;;  %v2842_v18 = vadd.f32 %v18825_v2, %v18824_v30  ;;  %v18845_v14 = vld [vmem:[#allocation83_spill] sm:$0xff] }
 0x1fe   : > { %3929 = vst.msk [vmem:[#allocation3 + $0x21] sm:$0xff] %vm18814_vm14, %v3858_v29  ;;  %v3856_v36 = vmax.f32 %v3824_v39, 0.0  ;;  %v3827_v63 = vadd.f32 %v15085_v7, %v3788_v58  ;;  %v3786_v32 = vadd.f32 %v3661_v56, %v3461_v4  ;;  %v18829_v4 = vld [vmem:[#allocation103_spill] sm:$0xff]  ;;  %v2509_v30 = vadd.f32 %v18845_v14, %v15103_v12 }
 0x1ff   : > { %v12504_v48 = vpop.f32.mrf.mxu0  ;;  %v3164_v44 = vadd.f32 %v18829_v4, %v2835_v61  ;;  %v18836_v61 = vld [vmem:[#allocation72_spill] sm:$0xff]  ;;  %v3168_v0 = vadd.f32 %v18849_v21, %v2839_v28 }
 0x200   : > { %3927 = vst.msk [vmem:[#allocation3 + $0x11] sm:$0xff] %vm18818_vm15, %v3856_v36  ;;  %v3859_v1 = vmax.f32 %v3827_v63, 0.0  ;;  %v3825_v23 = vadd.f32 %v15085_v7, %v3786_v32  ;;  %v3791_v57 = vadd.f32 %v12504_v48, %v3466_v43  ;;  %vm18828_vm15 = vcmask 1043456   ;;  %v18832_v43 = vld [vmem:[#allocation111_spill] sm:$0xff]  ;;  %v18834_v32 = vld [vmem:[#allocation106_spill] sm:$0xff] }
 0x201   : > { %v3674_v54 = vpop.f32.mrf.mxu0  ;;  %v15151_v37 = vsel %vm18828_vm15, %v18827_v50, 0  ;;  %v3470_v56 = vadd.f32 %v18832_v43, %v3166_v3  ;;  %v3167_v36 = vadd.f32 %v18833_v31, %v2838_v42  ;;  %v3165_v53 = vadd.f32 %v18834_v32, %v2836_v6  ;;  %vm18835_vm15 = vmmov %vm18814_vm14  ;;  %v18842_v42 = vld [vmem:[#allocation107_spill] sm:$0xff]  ;;  %v18851_v43 = vld [vmem:[#allocation110_spill] sm:$0xff] }
 0x202   : > { %3930 = vst.msk [vmem:[#allocation3 + $0x29] sm:$0xff] %vm18814_vm14, %v3859_v1  ;;  %v3857_v46 = vmax.f32 %v3825_v23, 0.0  ;;  %v3830_v35 = vadd.f32 %v15085_v7, %v3791_v57  ;;  %v3789_v9 = vadd.f32 %v3674_v54, %v3464_v26  ;;  %v2845_v48 = vadd.f32 %v18837_v52, %v18836_v61  ;;  %v18838_v26 = vld [vmem:[#allocation32_spill] sm:$0xff]  ;;  %v18839_v1 = vld [vmem:[#allocation74_spill] sm:$0xff]  ;;  %v18841_v57 = vld [vmem:[#allocation39_spill] sm:$0xff]  ;;  %v15177_v54 = vpop.f32.mrf.mxu1 }
 0x203   : > { %v12505_v22 = vpop.f32.mrf.mxu0  ;;  %v15169_v23 = vadd.f32 %v18839_v1, %v18838_v26  ;;  %v15173_v45 = vadd.f32 %v18841_v57, %v18840_v25  ;;  %v3170_v38 = vadd.f32 %v18842_v42, %v2841_v49  ;;  %v3468_v3 = vadd.f32 %v18843_v41, %v3164_v44  ;;  %v18846_v49 = vld [vmem:[#allocation117_spill] sm:$0xff]  ;;  %v18855_v52 = vld [vmem:[#allocation112_spill] sm:$0xff] }
 0x204   : > { %3928 = vst.msk [vmem:[#allocation3 + $0x19] sm:$0xff] %vm18814_vm14, %v3857_v46  ;;  %v3862_v29 = vmax.f32 %v3830_v35, 0.0  ;;  %v3828_v39 = vadd.f32 %v15085_v7, %v3789_v9  ;;  %v3792_v58 = vadd.f32 %v12505_v22, %v3467_v51  ;;  %v18844_v9 = vld [vmem:[#allocation51_spill] sm:$0xff]  ;;  %v3471_v2 = vadd.f32 %v18846_v49, %v3167_v36  ;;  %v18862_v49 = vld [vmem:[#allocation62_spill] sm:$0xff] }
 0x205   : > { %v3677_v63 = vpop.f32.mrf.mxu0  ;;  %v15184_v13 = vadd.f32 %v18844_v9, %v2505_v17  ;;  %v3469_v50 = vadd.f32 %v15021_v5, %v3165_v53  ;;  %v18850_v17 = vld [vmem:[#allocation122_spill] sm:$0xff]  ;;  %v18852_v5 = vld [vmem:[#allocation16_spill] sm:$0xff]  ;;  %v3169_v26 = vadd.f32 %v18855_v52, %v2840_v27 }
 0x206   : > { %3933 = vst.msk [vmem:[#allocation3 + $0x41] sm:$0xff] %vm18835_vm15, %v3862_v29  ;;  %v3860_v24 = vmax.f32 %v3828_v39, 0.0  ;;  %v3831_v47 = vadd.f32 %v15085_v7, %v3792_v58  ;;  %v3790_v34 = vadd.f32 %v3677_v63, %v3465_v62  ;;  %v18847_v62 = vld [vmem:[#allocation102_spill] sm:$0xff]  ;;  %vm18848_vm15 = vcmask 1043456  }
 0x207   : > { %v12508_v6 = vpop.f32.mrf.mxu0  ;;  %v15181_v35 = vld [vmem:[#allocation3 + $0x10] sm:$0xff]  ;;  %v4969_v22 = vsel %vm18848_vm15, %v18847_v62, 0  ;;  %v3474_v12 = vadd.f32 %v18850_v17, %v3170_v38  ;;  %vm18853_vm15 = vnez %v18852_v5  ;;  %v18857_v38 = vld [vmem:[#allocation17_spill] sm:$0xff] }
 0x208   : > { %3931 = vst.msk [vmem:[#allocation3 + $0x31] sm:$0xff] %vm18814_vm14, %v3860_v24  ;;  %v3863_v19 = vmax.f32 %v3831_v47, 0.0  ;;  %v3829_v51 = vadd.f32 %v15085_v7, %v3790_v34  ;;  %v3795_v46 = vadd.f32 %v12508_v6, %v3470_v56  ;;  %v4042_v39 = vld [vmem:[#allocation3 + $0x11] sm:$0xff]  ;;  %v3171_v56 = vadd.f32 %v18851_v43, %v2842_v18  ;;  %v15204_v24 = vpop.f32.mrf.mxu1  ;;  %v4044_v18 = vld [vmem:[#allocation3 + $0x21] sm:$0xff] }
 0x209   : > { %v3690_v40 = vpop.f32.mrf.mxu0  ;;  %v4045_v58 = vld [vmem:[#allocation3 + $0x29] sm:$0xff]  ;;  %v3993_v32 = vsel %vm18853_vm15, %v15181_v35, 0.0  ;;  %vm18858_vm7 = vnez %v18857_v38  ;;  %v18869_v43 = vld [vmem:[#allocation79_spill] sm:$0xff] }
 0x20a   : > { %3934 = vst.msk [vmem:[#allocation3 + $0x49] sm:$0xff] %vm18814_vm14, %v3863_v19  ;;  %v3861_v4 = vmax.f32 %v3829_v51, 0.0  ;;  %v3834_v44 = vadd.f32 %v15085_v7, %v3795_v46  ;;  %v3793_v29 = vadd.f32 %v3690_v40, %v3468_v3  ;;  %v15212_v57 = vpack.c.bf16 %v4045_v58, %v4044_v18  ;;  %v15214_v42 = vld [vmem:[#allocation3 + $0x28] sm:$0xff]  ;;  %v18860_v46 = vld [vmem:[#allocation54_spill] sm:$0xff]  ;;  %v15244_v58 = vpop.f32.mrf.mxu1 }
 0x20b   : > { %v12509_v31 = vpop.f32.mrf.mxu0  ;;  %v4043_v36 = vld [vmem:[#allocation3 + $0x19] sm:$0xff]  ;;  %v15227_v51 = vld [vmem:[%s18713_s21 + $0x10] sm:$0xf]  ;;  %v18861_v9 = vld [vmem:[#allocation78_spill] sm:$0xff] }
 0x20c   : > { %v15197_v63 = vld [vmem:[#allocation3 + $0x18] sm:$0xff]  ;;  %v15202_v53 = vld [vmem:[#allocation3 + $0x20] sm:$0xff]  ;;  %3932 = vst.msk [vmem:[#allocation3 + $0x39] sm:$0xff] %vm18814_vm14, %v3861_v4  ;;  %v3866_v47 = vmax.f32 %v3834_v44, 0.0  ;;  %v3832_v28 = vadd.f32 %v15085_v7, %v3793_v29  ;;  %v3796_v34 = vadd.f32 %v12509_v31, %v3471_v2  ;;  %v15208_v61 = vpack.c.bf16 %v4043_v36, %v4042_v39  ;;  %18856 = vst [vmem:[#allocation37_spill] sm:$0xff] %v15212_v57 }
 0x20d   : > { %v3693_v1 = vpop.f32.mrf.mxu0  ;;  %v4025_v25 = vpack.c.bf16 %v15197_v63, %v3993_v32  ;;  %v3995_v6 = vsel %vm18858_vm7, %v15202_v53, 0.0  ;;  %v2849_v14 = vadd.f32 %v18861_v9, %v18860_v46  ;;  %v18863_v2 = vld [vmem:[#allocation63_spill] sm:$0xff]  ;;  %v18864_v62 = vld [vmem:[#allocation113_spill] sm:$0xff] }
 0x20e   : > { %18854 = vst [vmem:[#allocation41_spill] sm:$0xff] %v15208_v61  ;;  %3937 = vst.msk [vmem:[#allocation3 + $0x61] sm:$0xff] %vm18814_vm14, %v3866_v47  ;;  %v3864_v41 = vmax.f32 %v3832_v28, 0.0  ;;  %v3835_v3 = vadd.f32 %v15085_v7, %v3796_v34  ;;  %v3794_v19 = vadd.f32 %v3693_v1, %v3469_v50  ;;  %12533 = vmatmul.mubr.msk.bf16.vlgmr.msra.gmra.mxu1 %vm18859_vm6, %v15208_v61  ;;  %v15241_v44 = vld [vmem:[%s18713_s21 + $0x14] sm:$0xf]  ;;  %v18870_v31 = vld [vmem:[#allocation75_spill] sm:$0xff] }
 0x20f   : > { %v4026_v27 = vpack.c.bf16 %v15214_v42, %v3995_v6  ;;  %v15233_v40 = vadd.f32 %v18863_v2, %v18862_v49  ;;  %v3174_v4 = vadd.f32 %v18864_v62, %v2845_v48  ;;  %vm18865_vm14 = vmmov %vm18859_vm6  ;;  %12599 = vmatpush3.bf16.msra.mxu1 %v15151_v37  ;;  %v12512_v50 = vpop.f32.mrf.mxu0  ;;  %v18866_v29 = vld [vmem:[#allocation125_spill] sm:$0xff]  ;;  %v15251_v37 = vld [vmem:[#allocation3 + $0x30] sm:$0xff]  ;;  %v15255_v36 = vadd.f32 %v18870_v31, %v18869_v43  ;;  %v15280_v49 = vpop.f32.mrf.mxu1 }
 0x210   : > { %12567 = vmatmul.mubr.msk.bf16.vlgmr.msra.gmra.mxu0 %vm18865_vm14, %v4025_v25  ;;  %v3472_v39 = vadd.f32 %v18866_v29, %v3168_v0  ;;  %3935 = vst.msk [vmem:[#allocation3 + $0x51] sm:$0xff] %vm18859_vm6, %v3864_v41  ;;  %v3867_v21 = vmax.f32 %v3835_v3, 0.0  ;;  %v3833_v17 = vadd.f32 %v15085_v7, %v3794_v19  ;;  %v3799_v48 = vadd.f32 %v12512_v50, %v3474_v12  ;;  %vm18867_vm14 = vmmov %vm18859_vm6  ;;  %v18871_v0 = vld [vmem:[#allocation84_spill] sm:$0xff]  ;;  %v4046_v25 = vld [vmem:[#allocation3 + $0x31] sm:$0xff] }
 0x211   : > { %12536 = vmatprep.mubr.msk.bf16.mxu1 %vm18867_vm14, %v15212_v57  ;;  %12570 = vmatprep.mubr.msk.bf16.mxu0 %vm18868_vm0, %v4026_v27  ;;  %v15258_v32 = vadd.f32 %v18871_v0, %v2509_v30  ;;  %v18872_v47 = vld [vmem:[#allocation128_spill] sm:$0xff]  ;;  %v3706_v34 = vpop.f32.mrf.mxu0  ;;  %vm18873_vm6 = vcmask 1043456   ;;  %v3473_v12 = vadd.f32 %v15049_v59, %v3169_v26  ;;  %vm18874_vm14 = vmmov %vm18868_vm0  ;;  %v4049_v6 = vld [vmem:[#allocation3 + $0x49] sm:$0xff] }
 0x212   : > { %v3475_v28 = vadd.f32 %v18872_v47, %v3171_v56  ;;  %12633 = vmatpush3.bf16.msra.mxu0 %v4969_v22  ;;  %13236 = vmatprep.subr.msk.bf16.mxu1 %vm18873_vm6, %v15227_v51  ;;  %3938 = vst.msk [vmem:[#allocation3 + $0x69] sm:$0xff] %vm18874_vm14, %v3867_v21  ;;  %v3865_v18 = vmax.f32 %v3833_v17, 0.0  ;;  %v3838_v52 = vadd.f32 %v15085_v7, %v3799_v48  ;;  %vm18875_vm0 = vmmov %vm18873_vm6  ;;  %v18876_v30 = vld [vmem:[#allocation115_spill] sm:$0xff]  ;;  %v18877_v41 = vld [vmem:[#allocation116_spill] sm:$0xff] }
 0x213   : > { %v3797_v1 = vadd.f32 %v3706_v34, %v3472_v39  ;;  %13237 = vmatprep.subr.msk.bf16.mxu0 %vm18875_vm0, %v15241_v44  ;;  %v3172_v56 = vadd.f32 %v18876_v30, %v15169_v23  ;;  %v3478_v22 = vadd.f32 %v15062_v60, %v3174_v4  ;;  %v3175_v3 = vadd.f32 %v18877_v41, %v15173_v45  ;;  %v12513_v59 = vpop.f32.mrf.mxu0  ;;  %v4047_v26 = vld [vmem:[#allocation3 + $0x39] sm:$0xff]  ;;  %v4048_v45 = vld [vmem:[#allocation3 + $0x41] sm:$0xff]  ;;  %v18881_v4 = vld [vmem:[#allocation118_spill] sm:$0xff] }
 0x214   : > { %v15273_v19 = vld [vmem:[#allocation3 + $0x38] sm:$0xff]  ;;  %v15278_v9 = vld [vmem:[#allocation3 + $0x40] sm:$0xff]  ;;  %3936 = vst.msk [vmem:[#allocation3 + $0x59] sm:$0xff] %vm18874_vm14, %v3865_v18  ;;  %v3870_v23 = vmax.f32 %v3838_v52, 0.0  ;;  %v3800_v2 = vadd.f32 %v12513_v59, %v3475_v28  ;;  %v15284_v62 = vpack.c.bf16 %v4047_v26, %v4046_v25  ;;  %v3173_v50 = vadd.f32 %v18881_v4, %v15184_v13  ;;  %v15291_v17 = vld [vmem:[#allocation3 + $0x48] sm:$0xff]  ;;  %v15312_v59 = vpop.f32.mrf.mxu1 }
 0x215   : > { %v18878_v27 = vld [vmem:[#allocation19_spill] sm:$0xff]  ;;  %v3836_v60 = vadd.f32 %v15085_v7, %v3797_v1  ;;  %v3709_v29 = vpop.f32.mrf.mxu0  ;;  %v15289_v21 = vpack.c.bf16 %v4049_v6, %v4048_v45  ;;  %v18883_v48 = vld [vmem:[#allocation21_spill] sm:$0xff]  ;;  %v18887_v34 = vld [vmem:[#allocation86_spill] sm:$0xff] }
 0x216   : > { %vm18879_vm6 = vnez %v18878_v27  ;;  %18880 = vst [vmem:[#allocation46_spill] sm:$0xff] %v15284_v62  ;;  %vm18884_vm0 = vnez %v18883_v48  ;;  %3941 = vst.msk [vmem:[#allocation3 + $0x81] sm:$0xff] %vm18874_vm14, %v3870_v23  ;;  %v3839_v0 = vadd.f32 %v15085_v7, %v3800_v2  ;;  %v3798_v47 = vadd.f32 %v3709_v29, %v3473_v12  ;;  %v18886_v28 = vld [vmem:[#allocation85_spill] sm:$0xff]  ;;  %v18888_v52 = vld [vmem:[#allocation87_spill] sm:$0xff] }
 0x217   : > { %v3997_v46 = vsel %vm18879_vm6, %v15251_v37, 0.0  ;;  %18882 = vst [vmem:[#allocation43_spill] sm:$0xff] %v15289_v21  ;;  %v3999_v43 = vsel %vm18884_vm0, %v15278_v9, 0.0  ;;  %v3868_v31 = vmax.f32 %v3836_v60, 0.0  ;;  %vm18885_vm6 = vmmov %vm18874_vm14  ;;  %v2853_v18 = vadd.f32 %v18887_v34, %v18886_v28  ;;  %v18889_v1 = vld [vmem:[#allocation88_spill] sm:$0xff]  ;;  %v18890_v6 = vld [vmem:[#allocation119_spill] sm:$0xff]  ;;  %v12516_v41 = vpop.f32.mrf.mxu0 }
 0x218   : > { %v4027_v39 = vpack.c.bf16 %v15273_v19, %v3997_v46  ;;  %12537 = vmatmul.mubr.msk.bf16.gmra.mxu1 %vm18885_vm6, %v15284_v62  ;;  %v4028_v13 = vpack.c.bf16 %v15291_v17, %v3999_v43  ;;  %v15305_v25 = vadd.f32 %v18889_v1, %v18888_v52  ;;  %v3178_v30 = vadd.f32 %v18890_v6, %v2849_v14  ;;  %vm18891_vm0 = vmmov %vm18885_vm6  ;;  %v15317_v60 = vld [vmem:[#allocation3 + $0x50] sm:$0xff]  ;;  %v18895_v2 = vld [vmem:[#allocation91_spill] sm:$0xff] }
 0x219   : > { %vm18892_vm14 = vmmov %vm18891_vm0  ;;  %v3476_v12 = vadd.f32 %v15092_v33, %v3172_v56  ;;  %v3871_v26 = vmax.f32 %v3839_v0, 0.0  ;;  %v3837_v46 = vadd.f32 %v15085_v7, %v3798_v47  ;;  %v3803_v23 = vadd.f32 %v12516_v41, %v3478_v22  ;;  %v15319_v14 = vld [vmem:[#allocation3 + $0x4a] sm:$0xff]  ;;  %v3722_v43 = vpop.f32.mrf.mxu0  ;;  %v18898_v22 = vld [vmem:[#allocation120_spill] sm:$0xff] }
 0x21a   : > { %12571 = vmatmul.mubr.msk.bf16.gmra.mxu0 %vm18891_vm0, %v4027_v39  ;;  %12540 = vmatprep.mubr.msk.bf16.mxu1 %vm18892_vm14, %v15289_v21  ;;  %vm18893_vm6 = vmmov %vm18891_vm0  ;;  %v2513_v45 = vadd.f32 %v18895_v2, %v15106_v15  ;;  %v18896_v4 = vld [vmem:[#allocation89_spill] sm:$0xff]  ;;  %v18897_v29 = vld [vmem:[#allocation90_spill] sm:$0xff]  ;;  %v3479_v56 = vadd.f32 %v15112_v16, %v3175_v3  ;;  %v3477_v39 = vadd.f32 %v15132_v55, %v3173_v50 }
 0x21b   : > { %3939 = vst.msk [vmem:[#allocation3 + $0x71] sm:$0xff] %vm18893_vm6, %v3868_v31  ;;  %vm18894_vm7 = vmmov %vm18891_vm0  ;;  %v15325_v33 = vadd.f32 %v18897_v29, %v18896_v4  ;;  %v3176_v31 = vadd.f32 %v18898_v22, %v15233_v40  ;;  %v3869_v0 = vmax.f32 %v3837_v46, 0.0  ;;  %v3842_v47 = vadd.f32 %v15085_v7, %v3803_v23  ;;  %v4050_v28 = vld [vmem:[#allocation3 + $0x51] sm:$0xff]  ;;  %v4053_v15 = vld [vmem:[#allocation3 + $0x69] sm:$0xff]  ;;  %v12517_v16 = vpop.f32.mrf.mxu0 }
 0x21c   : > { %12574 = vmatprep.mubr.msk.bf16.mxu0 %vm18894_vm7, %v4028_v13  ;;  %vm18899_vm7 = vmmov %vm18891_vm0  ;;  %v3801_v13 = vadd.f32 %v3722_v43, %v3476_v12  ;;  %v3482_v34 = vadd.f32 %v15154_v20, %v3178_v30  ;;  %v18900_v52 = vld [vmem:[#allocation121_spill] sm:$0xff]  ;;  %v4051_v3 = vld [vmem:[#allocation3 + $0x59] sm:$0xff]  ;;  %v5496_v12 = vsel %vm18707_vm1, %v15319_v14, 0.0  ;;  %v3804_v30 = vadd.f32 %v12517_v16, %v3479_v56 }
 0x21d   : > { %3942 = vst.msk [vmem:[#allocation3 + $0x89] sm:$0xff] %vm18899_vm7, %v3871_v26  ;;  %v3179_v1 = vadd.f32 %v18900_v52, %v15255_v36  ;;  %v15336_v55 = vld [vmem:[#allocation3 + $0x58] sm:$0xff]  ;;  %v18901_v50 = vld [vmem:[#allocation24_spill] sm:$0xff]  ;;  %v15346_v26 = vpop.f32.mrf.mxu1  ;;  %vm18904_vm14 = vmmov %vm18893_vm6  ;;  %v3874_v20 = vmax.f32 %v3842_v47, 0.0  ;;  %v15350_v46 = vpack.c.bf16 %v4051_v3, %v4050_v28  ;;  %v3725_v29 = vpop.f32.mrf.mxu0 }
 0x21e   : > { %vm18902_vm0 = vnez %v18901_v50  ;;  %v15341_v6 = vld [vmem:[#allocation3 + $0x60] sm:$0xff]  ;;  %v18903_v41 = vld [vmem:[#allocation59_spill] sm:$0xff]  ;;  %3940 = vst.msk [vmem:[#allocation3 + $0x79] sm:$0xff] %vm18904_vm14, %v3869_v0  ;;  %v3840_v36 = vadd.f32 %v15085_v7, %v3801_v13  ;;  %v15357_v52 = vld [vmem:[#allocation3 + $0x68] sm:$0xff]  ;;  %v3843_v47 = vadd.f32 %v15085_v7, %v3804_v30  ;;  %v3802_v13 = vadd.f32 %v3725_v29, %v3477_v39 }
 0x21f   : > { %v4001_v40 = vsel %vm18902_vm0, %v15317_v60, 0.0  ;;  %18905 = vst [vmem:[#allocation71_spill] sm:$0xff] %v15350_v46  ;;  %v4052_v23 = vld [vmem:[#allocation3 + $0x61] sm:$0xff]  ;;  %v18906_v2 = vld [vmem:[#allocation123_spill] sm:$0xff]  ;;  %18908 = vst [vmem:[#allocation56_spill] sm:$0xff] %v15357_v52  ;;  %v3480_v39 = vadd.f32 %v15177_v54, %v3176_v31  ;;  %v3483_v31 = vadd.f32 %v15204_v24, %v3179_v1 }
 0x220   : > { %v3177_v4 = vadd.f32 %v18906_v2, %v15258_v32  ;;  %v4029_v43 = vpack.c.bf16 %v15336_v55, %v4001_v40  ;;  %v15355_v22 = vpack.c.bf16 %v4053_v15, %v4052_v23  ;;  %v18909_v21 = vld [vmem:[#allocation25_spill] sm:$0xff]  ;;  %3945 = vst.msk [vmem:[#allocation3 + $0xa1] sm:$0xff] %vm18899_vm7, %v3874_v20  ;;  %v3872_v56 = vmax.f32 %v3840_v36, 0.0  ;;  %vm18911_vm14 = vmmov %vm18899_vm7  ;;  %v18912_v15 = vld [vmem:[#allocation92_spill] sm:$0xff]  ;;  %v12520_v23 = vpop.f32.mrf.mxu0  ;;  %v15378_v36 = vpop.f32.mrf.mxu1 }
 0x221   : > { %vm18910_vm6 = vnez %v18909_v21  ;;  %12541 = vmatmul.mubr.msk.bf16.gmra.mxu1 %vm18911_vm14, %v15350_v46  ;;  %v15367_v28 = vld [vmem:[#allocation3 + $0x42] sm:$0xff]  ;;  %v2852_v16 = vadd.f32 %v18912_v15, %v2513_v45  ;;  %vm18914_vm0 = vmmov %vm18899_vm7  ;;  %v3875_v30 = vmax.f32 %v3843_v47, 0.0  ;;  %v3841_v45 = vadd.f32 %v15085_v7, %v3802_v13  ;;  %v18922_v15 = vld [vmem:[#allocation99_spill] sm:$0xff] }
 0x222   : > { %18907 = vst [vmem:[#allocation48_spill] sm:$0xff] %v15355_v22  ;;  %v4003_v0 = vsel %vm18910_vm6, %v15341_v6, 0.0  ;;  %v18913_v3 = vld [vmem:[#allocation124_spill] sm:$0xff]  ;;  %12575 = vmatmul.mubr.msk.bf16.gmra.mxu0 %vm18914_vm0, %v4029_v43  ;;  %vm18915_vm7 = vmmov %vm18914_vm0  ;;  %v15375_v20 = vpack.c.bf16 %v5496_v12, %v15367_v28  ;;  %v3807_v2 = vadd.f32 %v12520_v23, %v3482_v34  ;;  %v15385_v29 = vld [vmem:[#allocation3 + $0x6a] sm:$0xff]  ;;  %v2517_v54 = vadd.f32 %v18922_v15, %v15116_v8  ;;  %v3738_v47 = vpop.f32.mrf.mxu0 }
 0x223   : > { %v4030_v32 = vpack.c.bf16 %v15357_v52, %v4003_v0  ;;  %v3182_v40 = vadd.f32 %v18913_v3, %v2853_v18  ;;  %12544 = vmatprep.mubr.msk.bf16.mxu1 %vm18915_vm7, %v15355_v22  ;;  %vm18917_vm14 = vmmov %vm18914_vm0  ;;  %v15383_v18 = vld [vmem:[#allocation3 + $0x70] sm:$0xff]  ;;  %v18920_v43 = vld [vmem:[#allocation93_spill] sm:$0xff]  ;;  %3946 = vst.msk [vmem:[#allocation3 + $0xa9] sm:$0xff] %vm18914_vm0, %v3875_v30  ;;  %v3805_v23 = vadd.f32 %v3738_v47, %v3480_v39  ;;  %v5500_v39 = vsel %vm18710_vm4, %v15385_v29, 0.0 }
 0x224   : > { %18916 = vst [vmem:[#allocation57_spill] sm:$0xff] %v15375_v20  ;;  %3943 = vst.msk [vmem:[#allocation3 + $0x91] sm:$0xff] %vm18917_vm14, %v3872_v56  ;;  %v18921_v0 = vld [vmem:[#allocation94_spill] sm:$0xff]  ;;  %v3481_v56 = vadd.f32 %v15244_v58, %v3177_v4  ;;  %v3846_v3 = vadd.f32 %v15085_v7, %v3807_v2  ;;  %v18924_v8 = vld [vmem:[#allocation127_spill] sm:$0xff]  ;;  %v12521_v24 = vpop.f32.mrf.mxu0  ;;  %v12494_v2 = vpop.f32.mrf.mxu1 }
 0x225   : > { %vm18918_vm1 = vmmov %vm18914_vm0  ;;  %18919 = vst [vmem:[#allocation58_spill] sm:$0xff] %v15383_v18  ;;  %v2857_v12 = vadd.f32 %v18921_v0, %v18920_v43  ;;  %v18923_v13 = vld [vmem:[#allocation126_spill] sm:$0xff]  ;;  %v3486_v43 = vadd.f32 %v15280_v49, %v3182_v40  ;;  %v3183_v0 = vadd.f32 %v18924_v8, %v15325_v33  ;;  %v4055_v1 = vld [vmem:[#allocation3 + $0x79] sm:$0xff]  ;;  %v3844_v33 = vadd.f32 %v15085_v7, %v3805_v23 }
 0x226   : > { %12578 = vmatprep.mubr.msk.bf16.mxu0 %vm18918_vm1, %v4030_v32  ;;  %v3180_v34 = vadd.f32 %v18923_v13, %v15305_v25  ;;  %v3873_v32 = vmax.f32 %v3841_v45, 0.0  ;;  %v4054_v22 = vld [vmem:[#allocation3 + $0x71] sm:$0xff]  ;;  %v4057_v46 = vld [vmem:[#allocation3 + $0x89] sm:$0xff]  ;;  %v18926_v4 = vld [vmem:[#allocation28_spill] sm:$0xff]  ;;  %v3878_v49 = vmax.f32 %v3846_v3, 0.0  ;;  %v3808_v40 = vadd.f32 %v12521_v24, %v3483_v31  ;;  %v3741_v20 = vpop.f32.mrf.mxu0 }
 0x227   : > { %v15400_v58 = vld [vmem:[#allocation3 + $0x78] sm:$0xff]  ;;  %vm18927_vm1 = vnez %v18926_v4  ;;  %v15405_v30 = vld [vmem:[#allocation3 + $0x80] sm:$0xff]  ;;  %v18928_v45 = vld [vmem:[#allocation66_spill] sm:$0xff]  ;;  %v15412_v15 = vpack.c.bf16 %v4055_v1, %v4054_v22  ;;  %v3876_v3 = vmax.f32 %v3844_v33, 0.0  ;;  %v3806_v31 = vadd.f32 %v3741_v20, %v3481_v56  ;;  %v3445_v56 = vpop.f32.mrf.mxu1 }
 0x228   : > { %18925 = vst [vmem:[#allocation61_spill] sm:$0xff] %v15400_v58  ;;  %v4005_v25 = vsel %vm18927_vm1, %v15383_v18, 0.0  ;;  %vm18929_vm7 = vmmov %vm18914_vm0  ;;  %v4056_v47 = vld [vmem:[#allocation3 + $0x81] sm:$0xff]  ;;  %v3847_v22 = vadd.f32 %v15085_v7, %v3808_v40  ;;  %v12524_v1 = vpop.f32.mrf.mxu0  ;;  %v3484_v20 = vadd.f32 %v15312_v59, %v3180_v34  ;;  %v4885_v21 = vsel %vm18927_vm1, %v15405_v30, 0.0 }
 0x229   : > { %3944 = vst.msk [vmem:[#allocation3 + $0x99] sm:$0xff] %vm18929_vm7, %v3873_v32  ;;  %18930 = vst [vmem:[#allocation60_spill] sm:$0xff] %v15412_v15  ;;  %v18931_v13 = vld [vmem:[#allocation129_spill] sm:$0xff]  ;;  %v4031_v62 = vpack.c.bf16 %v15400_v58, %v4005_v25  ;;  %v15416_v57 = vpack.c.bf16 %v4057_v46, %v4056_v47  ;;  %v18937_v46 = vld [vmem:[#allocation130_spill] sm:$0xff]  ;;  %v3845_v33 = vadd.f32 %v15085_v7, %v3806_v31 }
 0x22a   : > { %v3181_v8 = vadd.f32 %v18931_v13, %v2852_v16  ;;  %v15418_v61 = vld [vmem:[#allocation3 + $0x88] sm:$0xff]  ;;  %3949 = vst.msk [vmem:[#allocation3 + $0xc1] sm:$0xff] %vm18914_vm0, %v3878_v49  ;;  %vm18935_vm7 = vmmov %vm18914_vm0  ;;  %v3186_v24 = vadd.f32 %v18937_v46, %v2857_v12  ;;  %v3879_v49 = vmax.f32 %v3847_v22, 0.0  ;;  %v3811_v40 = vadd.f32 %v12524_v1, %v3486_v43  ;;  %v18943_v47 = vld [vmem:[#allocation95_spill] sm:$0xff]  ;;  %v3754_v22 = vpop.f32.mrf.mxu0 }
 0x22b   : > { %18932 = vst [vmem:[#allocation26_spill] sm:$0xff] %v15416_v57  ;;  %v18933_v18 = vld [vmem:[#allocation29_spill] sm:$0xff]  ;;  %12545 = vmatmul.mubr.msk.bf16.gmra.mxu1 %vm18935_vm7, %v15412_v15  ;;  %vm18938_vm4 = vmmov %vm18914_vm0  ;;  %v15441_v12 = vld [vmem:[#allocation3 + $0x90] sm:$0xff]  ;;  %v3877_v43 = vmax.f32 %v3845_v33, 0.0  ;;  %v3809_v1 = vadd.f32 %v3754_v22, %v3484_v20  ;;  %v12495_v20 = vpop.f32.mrf.mxu1 }
 0x22c   : > { %vm18934_vm14 = vnez %v18933_v18  ;;  %v15428_v23 = vld [vmem:[#allocation3 + $0x62] sm:$0xff]  ;;  %12579 = vmatmul.mubr.msk.bf16.gmra.mxu0 %vm18938_vm4, %v4031_v62  ;;  %vm18939_vm15 = vmmov %vm18914_vm0  ;;  %3947 = vst.msk [vmem:[#allocation3 + $0xb1] sm:$0xff] %vm18914_vm0, %v3876_v3  ;;  %v15443_v62 = vld [vmem:[#allocation3 + $0x8a] sm:$0xff]  ;;  %v3487_v3 = vadd.f32 %v15346_v26, %v3183_v0  ;;  %v3485_v31 = vadd.f32 %v15378_v36, %v3181_v8 }
 0x22d   : > { %v4007_v32 = vsel %vm18934_vm14, %v15405_v30, 0.0  ;;  %18936 = vst [vmem:[#allocation101_spill] sm:$0xff] %v15428_v23  ;;  %12548 = vmatprep.mubr.msk.bf16.mxu1 %vm18939_vm15, %v15416_v57  ;;  %v15435_v25 = vpack.c.bf16 %v5500_v39, %v15428_v23  ;;  %vm18941_vm7 = vmmov %vm18914_vm0  ;;  %v18944_v13 = vld [vmem:[#allocation96_spill] sm:$0xff]  ;;  %v18945_v39 = vld [vmem:[#allocation97_spill] sm:$0xff]  ;;  %v12525_v23 = vpop.f32.mrf.mxu0  ;;  %v5504_v8 = vsel %vm18712_vm2, %v15443_v62, 0.0 }
 0x22e   : > { %v4032_v16 = vpack.c.bf16 %v15418_v61, %v4007_v32  ;;  %18942 = vst [vmem:[#allocation18_spill] sm:$0xff] %v15443_v62  ;;  %v2855_v32 = vadd.f32 %v18944_v13, %v18943_v47  ;;  %v18946_v46 = vld [vmem:[#allocation98_spill] sm:$0xff]  ;;  %v18947_v59 = vld [vmem:[#allocation100_spill] sm:$0xff]  ;;  %vm18948_vm4 = vmmov %vm18914_vm0  ;;  %v3490_v13 = vadd.f32 %v12494_v2, %v3186_v24  ;;  %v3812_v2 = vadd.f32 %v12525_v23, %v3487_v3 }
 0x22f   : > { %18940 = vst [vmem:[#allocation105_spill] sm:$0xff] %v15435_v25  ;;  %v2858_v57 = vadd.f32 %v18946_v46, %v18945_v39  ;;  %v2856_v34 = vadd.f32 %v18947_v59, %v2517_v54  ;;  %3950 = vst.msk [vmem:[#allocation3 + $0xc9] sm:$0xff] %vm18948_vm4, %v3879_v49  ;;  %v4058_v15 = vld [vmem:[#allocation3 + $0x91] sm:$0xff]  ;;  %v4061_v25 = vld [vmem:[#allocation3 + $0xa9] sm:$0xff] }
 0x230   : > { %12582 = vmatprep.mubr.msk.bf16.mxu0 %vm18941_vm7, %v4032_v16  ;;  %v3850_v16 = vadd.f32 %v15085_v7, %v3811_v40  ;;  %v18949_v58 = vld [vmem:[#allocation131_spill] sm:$0xff]  ;;  %v18950_v26 = vld [vmem:[#allocation33_spill] sm:$0xff]  ;;  %v15460_v36 = vld [vmem:[#allocation3 + $0xa0] sm:$0xff]  ;;  %3948 = vst.msk [vmem:[#allocation3 + $0xb9] sm:$0xff] %vm18914_vm0, %v3877_v43 }
 0x231   : > { %v3184_v47 = vadd.f32 %v18949_v58, %v2855_v32  ;;  %v4059_v39 = vld [vmem:[#allocation3 + $0x99] sm:$0xff]  ;;  %vm18951_vm15 = vnez %v18950_v26  ;;  %v3848_v58 = vadd.f32 %v15085_v7, %v3809_v1  ;;  %v4060_v33 = vld [vmem:[#allocation3 + $0xa1] sm:$0xff]  ;;  %v3187_v40 = vadd.f32 %v15058_v10, %v2858_v57  ;;  %v3757_v32 = vpop.f32.mrf.mxu0  ;;  %vm18957_vm4 = vmmov %vm18914_vm0 }
 0x232   : > { %v15455_v46 = vld [vmem:[#allocation3 + $0x98] sm:$0xff]  ;;  %v4009_v54 = vsel %vm18951_vm15, %v15441_v12, 0.0  ;;  %v3882_v49 = vmax.f32 %v3850_v16, 0.0  ;;  %v15467_v24 = vpack.c.bf16 %v4059_v39, %v4058_v15  ;;  %v15471_v22 = vpack.c.bf16 %v4061_v25, %v4060_v33  ;;  %v15473_v52 = vld [vmem:[#allocation3 + $0xa8] sm:$0xff]  ;;  %vm18958_vm2 = vmmov %vm18914_vm0 }
 0x233   : > { %v18952_v0 = vld [vmem:[#allocation67_spill] sm:$0xff]  ;;  %v4033_v59 = vpack.c.bf16 %v15455_v46, %v4009_v54  ;;  %v3880_v16 = vmax.f32 %v3848_v58, 0.0  ;;  %v3851_v15 = vadd.f32 %v15085_v7, %v3812_v2  ;;  %v3810_v23 = vadd.f32 %v3757_v32, %v3485_v31  ;;  %v15483_v57 = vld [vmem:[#allocation3 + $0x82] sm:$0xff]  ;;  %v12528_v3 = vpop.f32.mrf.mxu0  ;;  %v3448_v31 = vpop.f32.mrf.mxu1 }
 0x234   : > { %18953 = vst [vmem:[#allocation20_spill] sm:$0xff] %v15467_v24  ;;  %18954 = vst [vmem:[#allocation22_spill] sm:$0xff] %v15471_v22  ;;  %v18955_v62 = vld [vmem:[#allocation35_spill] sm:$0xff]  ;;  %12549 = vmatmul.mubr.msk.bf16.gmra.mxu1 %vm18914_vm0, %v15467_v24  ;;  %v3185_v25 = vadd.f32 %v15070_v11, %v2856_v34  ;;  %v15490_v1 = vpack.c.bf16 %v5504_v8, %v15483_v57  ;;  %v3488_v39 = vadd.f32 %v3445_v56, %v3184_v47  ;;  %v15495_v11 = vld [vmem:[#allocation3 + $0xb0] sm:$0xff] }
 0x235   : > { %vm18956_vm7 = vnez %v18955_v62  ;;  %3953 = vst.msk [vmem:[#allocation3 + $0xe1] sm:$0xff] %vm18957_vm4, %v3882_v49  ;;  %12583 = vmatmul.mubr.msk.bf16.gmra.mxu0 %vm18958_vm2, %v4033_v59  ;;  %vm18961_vm4 = vmmov %vm18914_vm0  ;;  %v3883_v54 = vmax.f32 %v3851_v15, 0.0  ;;  %v3849_v49 = vadd.f32 %v15085_v7, %v3810_v23  ;;  %v3815_v58 = vadd.f32 %v12528_v3, %v3490_v13  ;;  %v15497_v34 = vld [vmem:[#allocation3 + $0xaa] sm:$0xff]  ;;  %v3770_v2 = vpop.f32.mrf.mxu0  ;;  %v15773_v4 = vld [vmem:[#allocation3 + $0x9a] sm:$0xff] }
 0x236   : > { %v4011_v43 = vsel %vm18956_vm7, %v15460_v36, 0.0  ;;  %vm18959_vm7 = vmmov %vm18914_vm0  ;;  %18960 = vst [vmem:[#allocation23_spill] sm:$0xff] %v15490_v1  ;;  %v3491_v33 = vadd.f32 %v12495_v20, %v3187_v40  ;;  %v3813_v47 = vadd.f32 %v3770_v2, %v3488_v39  ;;  %v4062_v32 = vld [vmem:[#allocation3 + $0xb1] sm:$0xff]  ;;  %v4065_v59 = vld [vmem:[#allocation3 + $0xc9] sm:$0xff]  ;;  %v5508_v40 = vsel %vm18715_vm11, %v15497_v34, 0.0 }
 0x237   : > { %v4034_v10 = vpack.c.bf16 %v15473_v52, %v4011_v43  ;;  %12552 = vmatprep.mubr.msk.bf16.mxu1 %vm18959_vm7, %v15471_v22  ;;  %3951 = vst.msk [vmem:[#allocation3 + $0xd1] sm:$0xff] %vm18961_vm4, %v3880_v16  ;;  %vm18962_vm2 = vmmov %vm18914_vm0  ;;  %v3881_v8 = vmax.f32 %v3849_v49, 0.0  ;;  %v3854_v56 = vadd.f32 %v15085_v7, %v3815_v58  ;;  %v3489_v43 = vadd.f32 %v3448_v31, %v3185_v25  ;;  %v12529_v16 = vpop.f32.mrf.mxu0  ;;  %v4063_v15 = vld [vmem:[#allocation3 + $0xb9] sm:$0xff]  ;;  %v18963_v23 = vld [vmem:[#allocation42_spill] sm:$0xff] }
 0x238   : > { %3954 = vst.msk [vmem:[#allocation3 + $0xe9] sm:$0xff] %vm18962_vm2, %v3883_v54  ;;  %v15501_v13 = vld [vmem:[#allocation3 + $0xb8] sm:$0xff]  ;;  %vm18964_vm7 = vnez %v18963_v23  ;;  %v15506_v3 = vld [vmem:[#allocation3 + $0xc0] sm:$0xff]  ;;  %v18965_v20 = vld [vmem:[#allocation70_spill] sm:$0xff]  ;;  %v3852_v54 = vadd.f32 %v15085_v7, %v3813_v47  ;;  %v3816_v25 = vadd.f32 %v12529_v16, %v3491_v33  ;;  %v15513_v31 = vpack.c.bf16 %v4063_v15, %v4062_v32 }
 0x239   : > { %12586 = vmatprep.mubr.msk.bf16.mxu0 %vm18914_vm0, %v4034_v10  ;;  %v4013_v10 = vsel %vm18964_vm7, %v15495_v11, 0.0  ;;  %vm18966_vm4 = vmmov %vm18914_vm0  ;;  %v3886_v39 = vmax.f32 %v3854_v56, 0.0  ;;  %v4064_v49 = vld [vmem:[#allocation3 + $0xc1] sm:$0xff]  ;;  %v3773_v58 = vpop.f32.mrf.mxu0  ;;  %v4889_v18 = vsel %vm18951_vm15, %v15460_v36, 0.0 }
 0x23a   : > { %3952 = vst.msk [vmem:[#allocation3 + $0xd9] sm:$0xff] %vm18966_vm4, %v3881_v8  ;;  %18967 = vst [vmem:[#allocation108_spill] sm:$0xff] %v15513_v31  ;;  %v4035_v2 = vpack.c.bf16 %v15501_v13, %v4013_v10  ;;  %v15516_v22 = vpack.c.bf16 %v4065_v59, %v4064_v49  ;;  %v15518_v24 = vld [vmem:[#allocation3 + $0xc8] sm:$0xff]  ;;  %v18969_v1 = vld [vmem:[#allocation44_spill] sm:$0xff]  ;;  %v3884_v8 = vmax.f32 %v3852_v54, 0.0  ;;  %v3855_v56 = vadd.f32 %v15085_v7, %v3816_v25 }
 0x23b   : > { %vm18970_vm0 = vnez %v18969_v1  ;;  %3957 = vst.msk [vmem:[#allocation3 + $0x101] sm:$0xff] %vm18962_vm2, %v3886_v39  ;;  %v3814_v33 = vadd.f32 %v3773_v58, %v3489_v43  ;;  %vm18971_vm4 = vmmov %vm18962_vm2  ;;  %v15528_v32 = vld [vmem:[#allocation3 + $0xa2] sm:$0xff]  ;;  %v4871_v1 = vsel %vm18657_vm13, %v15181_v35, 0.0  ;;  %v15797_v26 = vld [vmem:[#allocation3 + $0xba] sm:$0xff] }
 0x23c   : > { %18968 = vst [vmem:[#allocation69_spill] sm:$0xff] %v15516_v22  ;;  %v4015_v23 = vsel %vm18970_vm0, %v15506_v3, 0.0  ;;  %12553 = vmatmul.mubr.msk.bf16.gmra.mxu1 %vm18971_vm4, %v15513_v31  ;;  %vm18972_vm7 = vmmov %vm18962_vm2  ;;  %v15536_v16 = vpack.c.bf16 %v5508_v40, %v15528_v32  ;;  %v3887_v43 = vmax.f32 %v3855_v56, 0.0  ;;  %v15543_v10 = vld [vmem:[#allocation3 + $0xc2] sm:$0xff] }
 0x23d   : > { %v4036_v47 = vpack.c.bf16 %v15518_v24, %v4015_v23  ;;  %12587 = vmatmul.mubr.msk.bf16.gmra.mxu0 %vm18972_vm7, %v4035_v2  ;;  %vm18973_vm11 = vmmov %vm18962_vm2  ;;  %3955 = vst.msk [vmem:[#allocation3 + $0xf1] sm:$0xff] %vm18962_vm2, %v3884_v8  ;;  %v3853_v15 = vadd.f32 %v15085_v7, %v3814_v33  ;;  %v18977_v39 = vld [vmem:[#allocation73_spill] sm:$0xff] }
 0x23e   : > { %12556 = vmatprep.mubr.msk.bf16.mxu1 %vm18973_vm11, %v15516_v22  ;;  %v15533_v59 = vld [vmem:[#allocation3 + $0xca] sm:$0xff]  ;;  %18974 = vst [vmem:[#allocation103_spill] sm:$0xff] %v15536_v16  ;;  %vm18975_vm4 = vmmov %vm18962_vm2 }
 0x23f   : > { %12590 = vmatprep.mubr.msk.bf16.mxu0 %vm18975_vm4, %v4036_v47  ;;  %v15541_v23 = vld [vmem:[#allocation3 + $0xd0] sm:$0xff]  ;;  %v5512_v54 = vsel %vm18717_vm8, %v15533_v59, 0.0  ;;  %vm18978_vm11 = vmmov %vm18962_vm2  ;;  %v3885_v25 = vmax.f32 %v3853_v15, 0.0  ;;  %v4068_v15 = vld [vmem:[#allocation3 + $0xe1] sm:$0xff] }
 0x240   : > { %18976 = vst [vmem:[#allocation27_spill] sm:$0xff] %v15541_v23  ;;  %3958 = vst.msk [vmem:[#allocation3 + $0x109] sm:$0xff] %vm18978_vm11, %v3887_v43  ;;  %v4066_v40 = vld [vmem:[#allocation3 + $0xd1] sm:$0xff]  ;;  %v4069_v49 = vld [vmem:[#allocation3 + $0xe9] sm:$0xff]  ;;  %v15550_v58 = vpack.c.bf16 %v5512_v54, %v15543_v10  ;;  %v4017_v56 = vsel %vm18691_vm3, %v15541_v23, 0.0 }
 0x241   : > { %v4067_v2 = vld [vmem:[#allocation3 + $0xd9] sm:$0xff]  ;;  %vm18983_vm7 = vmmov %vm18962_vm2  ;;  %v15563_v22 = vld [vmem:[#allocation3 + $0xe8] sm:$0xff]  ;;  %v15568_v31 = vpack.c.bf16 %v4069_v49, %v4068_v15 }
 0x242   : > { %18979 = vst [vmem:[#allocation77_spill] sm:$0xff] %v15550_v58  ;;  %v15552_v7 = vld [vmem:[#allocation3 + $0xd8] sm:$0xff]  ;;  %v15557_v33 = vld [vmem:[#allocation3 + $0xe0] sm:$0xff]  ;;  %3956 = vst.msk [vmem:[#allocation3 + $0xf9] sm:$0xff] %vm18983_vm7, %v3885_v25  ;;  %v15560_v47 = vpack.c.bf16 %v4067_v2, %v4066_v40  ;;  %v5826_v2 = vsel %vm18910_vm6, %v15405_v30, 0.0 }
 0x243   : > { %18980 = vst [vmem:[#allocation111_spill] sm:$0xff] %v15552_v7  ;;  %18982 = vst [vmem:[#allocation104_spill] sm:$0xff] %v15557_v33  ;;  %v4037_v43 = vpack.c.bf16 %v15552_v7, %v4017_v56  ;;  %v18986_v54 = vld [vmem:[#allocation50_spill] sm:$0xff]  ;;  %v4019_v58 = vsel %vm18693_vm12, %v15557_v33, 0.0 }
 0x244   : > { %18984 = vst [vmem:[#allocation106_spill] sm:$0xff] %v15560_v47  ;;  %18985 = vst [vmem:[#allocation72_spill] sm:$0xff] %v15563_v22  ;;  %v4038_v16 = vpack.c.bf16 %v15563_v22, %v4019_v58  ;;  %12557 = vmatmul.mubr.msk.bf16.gmra.mxu1 %vm18962_vm2, %v15560_v47  ;;  %v4515_v25 = vld [vmem:[#allocation3 + $0xa] sm:$0xff]  ;;  %v15584_v58 = vld [vmem:[#allocation3 + $0xe2] sm:$0xff]  ;;  %v5828_v47 = vsel %vm18927_vm1, %v15441_v12, 0.0 }
 0x245   : > { %18987 = vst [vmem:[#allocation31_spill] sm:$0xff] %v15568_v31  ;;  %vm18988_vm4 = vmmov %vm18962_vm2  ;;  %v15576_v40 = vld [vmem:[#allocation3 + $0xea] sm:$0xff]  ;;  %v4514_v22 = vld [vmem:[#allocation3 + $0x2] sm:$0xff]  ;;  %v4547_v8 = vsel %vm18607_vm9, %v4515_v25, 0.0  ;;  %v15601_v33 = vpack.c.bf16 %v15455_v46, %v5828_v47  ;;  %v5832_v25 = vsel %vm18951_vm15, %v15495_v11, 0.0 }
 0x246   : > { %12591 = vmatmul.mubr.msk.bf16.gmra.mxu0 %vm18988_vm4, %v4037_v43  ;;  %vm18989_vm11 = vmmov %vm18962_vm2  ;;  %18990 = vst [vmem:[#allocation32_spill] sm:$0xff] %v15576_v40  ;;  %v15582_v49 = vld [vmem:[#allocation3 + $0xf0] sm:$0xff]  ;;  %v5516_v43 = vsel %vm18719_vm10, %v15576_v40, 0.0  ;;  %v5830_v40 = vsel %vm18934_vm14, %v15460_v36, 0.0  ;;  %v15624_v23 = vpack.c.bf16 %v15501_v13, %v5832_v25  ;;  %vm19003_vm4 = vnez %v18955_v62 }
 0x247   : > { %12560 = vmatprep.mubr.msk.bf16.mxu1 %vm18989_vm11, %v15568_v31  ;;  %vm18991_vm7 = vmmov %vm18962_vm2  ;;  %18992 = vst [vmem:[#allocation74_spill] sm:$0xff] %v15584_v58  ;;  %v15590_v15 = vpack.c.bf16 %v5516_v43, %v15584_v58  ;;  %v15593_v31 = vpack.c.bf16 %v15418_v61, %v5826_v2  ;;  %v4070_v43 = vld [vmem:[#allocation3 + $0xf1] sm:$0xff]  ;;  %v18998_v2 = vld [vmem:[#allocation52_spill] sm:$0xff]  ;;  %v15612_v56 = vpack.c.bf16 %v15473_v52, %v5830_v40 }
 0x248   : > { %12594 = vmatprep.mubr.msk.bf16.mxu0 %vm18991_vm7, %v4038_v16  ;;  %18997 = vst [vmem:[#allocation107_spill] sm:$0xff] %v15601_v33  ;;  %v4579_v33 = vpack.c.bf16 %v4547_v8, %v4514_v22  ;;  %19002 = vst [vmem:[#allocation83_spill] sm:$0xff] %v15624_v23  ;;  %v4904_v40 = vpack.c.bf16 %v15197_v63, %v4871_v1  ;;  %v5834_v22 = vsel %vm19003_vm4, %v15506_v3, 0.0  ;;  %v15642_v8 = vld [vmem:[#allocation3 + $0x2a] sm:$0xff]  ;;  %v15644_v63 = vld [vmem:[#allocation3 + $0x12] sm:$0xff] }
 0x249   : > { %18994 = vst [vmem:[#allocation38_spill] sm:$0xff] %v15590_v15  ;;  %18995 = vst [vmem:[#allocation39_spill] sm:$0xff] %v15593_v31  ;;  %v4071_v15 = vld [vmem:[#allocation3 + $0xf9] sm:$0xff]  ;;  %v4021_v31 = vsel %vm18606_vm5, %v15582_v49, 0.0  ;;  %v15639_v35 = vpack.c.bf16 %v15518_v24, %v5834_v22  ;;  %v15649_v25 = vld [vmem:[#allocation3 + $0x108] sm:$0xff]  ;;  %vm19025_vm5 = vnez %v18878_v27 }
 0x24a   : > { %v15606_v58 = vld [vmem:[#allocation3 + $0xf8] sm:$0xff]  ;;  %18999 = vst [vmem:[#allocation114_spill] sm:$0xff] %v15612_v56  ;;  %v15614_v16 = vpack.c.bf16 %v4071_v15, %v4070_v43  ;;  %vm19004_vm11 = vmmov %vm18962_vm2  ;;  %v19008_v1 = vld [vmem:[#allocation64_spill] sm:$0xff] }
 0x24b   : > { %v4039_v47 = vpack.c.bf16 %v15606_v58, %v4021_v31  ;;  %v15629_v15 = vld [vmem:[#allocation3 + $0x1a] sm:$0xff]  ;;  %vm19005_vm7 = vmmov %vm18962_vm2  ;;  %19006 = vst [vmem:[#allocation117_spill] sm:$0xff] %v15639_v35  ;;  %v19012_v22 = vld [vmem:[#allocation65_spill] sm:$0xff] }
 0x24c   : > { %19000 = vst [vmem:[#allocation51_spill] sm:$0xff] %v15614_v16  ;;  %12561 = vmatmul.mubr.msk.bf16.gmra.mxu1 %vm18962_vm2, %v15614_v16  ;;  %v15631_v31 = vld [vmem:[#allocation3 + $0x100] sm:$0xff]  ;;  %vm19007_vm13 = vmmov %vm18962_vm2  ;;  %vm19009_vm2 = vnez %v19008_v1  ;;  %v15778_v30 = vld [vmem:[#allocation3 + $0x92] sm:$0xff] }
 0x24d   : > { %12600 = vmatprep.mubr.msk.bf16.mxu1 %vm19005_vm7, %v4579_v33  ;;  %v4549_v43 = vsel %vm19009_vm2, %v15629_v15, 0.0  ;;  %vm19014_vm7 = vcmask 1043456   ;;  %v15667_v16 = vld [vmem:[#allocation3 + $0x22] sm:$0xff]  ;;  %vm19015_vm2 = vnez %v18857_v38  ;;  %v15725_v27 = vld [vmem:[#allocation3 + $0x5a] sm:$0xff]  ;;  %v15802_v36 = vld [vmem:[#allocation3 + $0xb2] sm:$0xff] }
 0x24e   : > { %12595 = vmatmul.mubr.msk.bf16.gmra.mxu0 %vm19004_vm11, %v4039_v47  ;;  %v5842_v47 = vsel %vm18693_vm12, %v15631_v31, 0.0  ;;  %vm19010_vm11 = vnez %v18852_v5  ;;  %v4580_v23 = vpack.c.bf16 %v4549_v43, %v15644_v63  ;;  %v5262_v56 = vsel %vm19014_vm7, %v15227_v51, 0  ;;  %v15675_v5 = vld [vmem:[#allocation3 + $0x3a] sm:$0xff]  ;;  %v15684_v51 = vld [vmem:[#allocation3 + $0x10a] sm:$0xff] }
 0x24f   : > { %12634 = vmatprep.mubr.msk.bf16.mxu0 %vm19007_vm13, %v4904_v40  ;;  %v4873_v33 = vsel %vm19010_vm11, %v15202_v53, 0.0  ;;  %v15658_v40 = vpack.c.bf16 %v15649_v25, %v5842_v47  ;;  %vm19013_vm13 = vnez %v19012_v22  ;;  %v4875_v53 = vsel %vm19015_vm2, %v15251_v37, 0.0  ;;  %v15687_v37 = vld [vmem:[#allocation3 + $0x102] sm:$0xff]  ;;  %v19060_v62 = vld [vmem:[#allocation42_spill] sm:$0xff] }
 0x250   : > { %v4551_v35 = vsel %vm19013_vm13, %v15642_v8, 0.0  ;;  %v4905_v7 = vpack.c.bf16 %v15214_v42, %v4873_v33  ;;  %vm19016_vm11 = vcmask 64512   ;;  %vm19017_vm13 = vmmov %vm19014_vm7  ;;  %v15682_v42 = vld [vmem:[%s18713_s21 + $0x18] sm:$0xf]  ;;  %vm19021_vm2 = vnez %v18903_v41  ;;  %v19026_v33 = vld [vmem:[#allocation80_spill] sm:$0xff] }
 0x251   : > { %19011 = vst [vmem:[#allocation102_spill] sm:$0xff] %v15658_v40  ;;  %v4581_v47 = vpack.c.bf16 %v4551_v35, %v15667_v16  ;;  %v4906_v40 = vpack.c.bf16 %v15273_v19, %v4875_v53  ;;  %v5587_v43 = vsel %vm19017_vm13, %v15241_v44, 0  ;;  %vm19018_vm7 = vmmov %vm19016_vm11  ;;  %v15692_v19 = vld [vmem:[%s18713_s21 + $0x1c] sm:$0xf]  ;;  %v4877_v35 = vsel %vm19025_vm5, %v15278_v9, 0.0 }
 0x252   : > { %vm19020_vm13 = vmmov %vm19018_vm7  ;;  %v15696_v44 = vld [vmem:[#allocation3 + $0x32] sm:$0xff]  ;;  %vm19035_vm12 = vnez %v18928_v45  ;;  %v15749_v45 = vld [vmem:[#allocation3 + $0x7a] sm:$0xff] }
 0x254   : > { %12601 = vmatmul.mubr.msk.bf16.vlgmr.msra.gmra.mxu1 %vm19016_vm11, %v4580_v23  ;;  %vm19019_vm11 = vmmov %vm19018_vm7  ;;  %v4553_v23 = vsel %vm19021_vm2, %v15675_v5, 0.0  ;;  %vm19031_vm2 = vcmask 64512  }
 0x255   : > { %12667 = vmatpush3.bf16.msra.mxu1 %v5262_v56  ;;  %12604 = vmatprep.mubr.msk.bf16.mxu1 %vm19019_vm11, %v4581_v47  ;;  %vm19027_vm11 = vnez %v19026_v33  ;;  %v4582_v47 = vpack.c.bf16 %v4553_v23, %v15696_v44  ;;  %vm19033_vm5 = vmmov %vm19031_vm2  ;;  %v15730_v23 = vld [vmem:[#allocation3 + $0x52] sm:$0xff] }
 0x256   : > { %12635 = vmatmul.mubr.msk.bf16.vlgmr.msra.gmra.mxu0 %vm19018_vm7, %v4905_v7  ;;  %vm19022_vm7 = vcmask 1043456   ;;  %v19023_v7 = vld [vmem:[#allocation34_spill] sm:$0xff]  ;;  %vm19051_vm1 = vmmov %vm19033_vm5 }
 0x257   : > { %12638 = vmatprep.mubr.msk.bf16.mxu0 %vm19020_vm13, %v4906_v40  ;;  %12701 = vmatpush3.bf16.msra.mxu0 %v5587_v43  ;;  %vm19024_vm9 = vnez %v19023_v7  ;;  %v4555_v40 = vsel %vm19027_vm11, %v15319_v14, 0.0  ;;  %vm19028_vm13 = vmmov %vm19022_vm7  ;;  %v4907_v43 = vpack.c.bf16 %v15291_v17, %v4877_v35  ;;  %v4557_v17 = vsel %vm19035_vm12, %v15725_v27, 0.0  ;;  %v19039_v35 = vld [vmem:[#allocation56_spill] sm:$0xff]  ;;  %v19139_v7 = vld [vmem:[#allocation13_spill] sm:$0xff] }
 0x258   : > { %13238 = vmatprep.subr.msk.bf16.mxu1 %vm19022_vm7, %v15682_v42  ;;  %v6461_v56 = vsel %vm19024_vm9, %v15684_v51, 0.0  ;;  %13239 = vmatprep.subr.msk.bf16.mxu0 %vm19028_vm13, %v15692_v19  ;;  %v4583_v41 = vpack.c.bf16 %v4555_v40, %v15367_v28  ;;  %vm19030_vm7 = vnez %v18883_v48  ;;  %vm19032_vm13 = vmmov %vm19031_vm2  ;;  %v19040_v40 = vld [vmem:[#allocation101_spill] sm:$0xff] }
 0x259   : > { %v15715_v53 = vpack.c.bf16 %v6461_v56, %v15687_v37  ;;  %v4879_v9 = vsel %vm19030_vm7, %v15317_v60, 0.0  ;;  %vm19034_vm11 = vmmov %vm19031_vm2  ;;  %vm19036_vm7 = vnez %v18901_v50  ;;  %v4584_v56 = vpack.c.bf16 %v4557_v17, %v15730_v23  ;;  %v19047_v17 = vld [vmem:[#allocation18_spill] sm:$0xff] }
 0x25a   : > { %v4908_v14 = vpack.c.bf16 %v15336_v55, %v4879_v9  ;;  %v4881_v60 = vsel %vm19036_vm7, %v15341_v6, 0.0  ;;  %v19037_v55 = vld [vmem:[#allocation81_spill] sm:$0xff]  ;;  %vm19045_vm12 = vmmov %vm19033_vm5  ;;  %v15754_v6 = vld [vmem:[#allocation3 + $0x72] sm:$0xff]  ;;  %vm19046_vm7 = vnez %v18952_v0 }
 0x25b   : > { %19029 = vst [vmem:[#allocation109_spill] sm:$0xff] %v15715_v53  ;;  %vm19058_vm15 = vmmov %vm19051_vm1 }
 0x25c   : > { %12605 = vmatmul.mubr.msk.bf16.gmra.mxu1 %vm19031_vm2, %v4582_v47  ;;  %vm19038_vm2 = vnez %v19037_v55  ;;  %v6415_v55 = vld [vmem:[#allocation3 + $0x9a] sm:$0xff] }
 0x25d   : > { %12608 = vmatprep.mubr.msk.bf16.mxu1 %vm19033_vm5, %v4583_v41  ;;  %v4559_v28 = vsel %vm19038_vm2, %v15385_v29, 0.0  ;;  %v4909_v41 = vpack.c.bf16 %v19039_v35, %v4881_v60  ;;  %v4561_v29 = vsel %vm19046_vm7, %v15749_v45, 0.0  ;;  %v19048_v60 = vld [vmem:[#allocation82_spill] sm:$0xff]  ;;  %v4911_v35 = vpack.c.bf16 %v15418_v61, %v4885_v21 }
 0x25e   : > { %12639 = vmatmul.mubr.msk.bf16.gmra.mxu0 %vm19032_vm13, %v4907_v43  ;;  %v4585_v47 = vpack.c.bf16 %v4559_v28, %v19040_v40  ;;  %v19041_v43 = vld [vmem:[#allocation58_spill] sm:$0xff]  ;;  %vm19044_vm13 = vmmov %vm19033_vm5  ;;  %vm19089_vm7 = vnez %v19008_v1  ;;  %v6407_v1 = vld [vmem:[#allocation3 + $0x5a] sm:$0xff] }
 0x25f   : > { %12642 = vmatprep.mubr.msk.bf16.mxu0 %vm19034_vm11, %v4908_v14  ;;  %v4883_v9 = vsel %vm18910_vm6, %v19041_v43, 0.0  ;;  %v19042_v14 = vld [vmem:[#allocation61_spill] sm:$0xff]  ;;  %vm19043_vm11 = vmmov %vm19033_vm5  ;;  %vm19049_vm6 = vnez %v19048_v60  ;;  %v6419_v60 = vld [vmem:[#allocation3 + $0xba] sm:$0xff] }
 0x260   : > { %v4910_v53 = vpack.c.bf16 %v19042_v14, %v4883_v9  ;;  %v4563_v28 = vsel %vm19049_vm6, %v19047_v17, 0.0  ;;  %v4891_v9 = vsel %vm19003_vm4, %v15495_v11, 0.0  ;;  %vm19061_vm4 = vnez %v19060_v62  ;;  %v19064_v17 = vld [vmem:[#allocation27_spill] sm:$0xff] }
 0x261   : > { %v4914_v14 = vpack.c.bf16 %v15501_v13, %v4891_v9  ;;  %v4893_v11 = vsel %vm19061_vm4, %v15506_v3, 0.0  ;;  %v15826_v3 = vld [vmem:[#allocation3 + $0xd2] sm:$0xff] }
 0x262   : > { %v19075_v9 = vld [vmem:[#allocation74_spill] sm:$0xff] }
 0x264   : > { %12609 = vmatmul.mubr.msk.bf16.gmra.mxu1 %vm19033_vm5, %v4584_v56  ;;  %v4586_v56 = vpack.c.bf16 %v4561_v29, %v15754_v6  ;;  %v4915_v29 = vpack.c.bf16 %v15518_v24, %v4893_v11  ;;  %v19070_v24 = vld [vmem:[#allocation76_spill] sm:$0xff] }
 0x265   : > { %12612 = vmatprep.mubr.msk.bf16.mxu1 %vm19044_vm13, %v4585_v47  ;;  %vm19054_vm13 = vnez %v18965_v20  ;;  %v4913_v47 = vpack.c.bf16 %v15473_v52, %v4889_v18  ;;  %v4569_v52 = vsel %vm18717_vm8, %v15797_v26, 0.0  ;;  %v19073_v18 = vld [vmem:[#allocation32_spill] sm:$0xff] }
 0x266   : > { %12643 = vmatmul.mubr.msk.bf16.gmra.mxu0 %vm19043_vm11, %v4909_v41  ;;  %v4887_v41 = vsel %vm18934_vm14, %v15441_v12, 0.0  ;;  %vm19053_vm11 = vmmov %vm19051_vm1  ;;  %v4565_v61 = vsel %vm19054_vm13, %v15773_v4, 0.0  ;;  %v19055_v12 = vld [vmem:[#allocation30_spill] sm:$0xff] }
 0x267   : > { %12646 = vmatprep.mubr.msk.bf16.mxu0 %vm19045_vm12, %v4910_v53  ;;  %v4587_v53 = vpack.c.bf16 %v4563_v28, %v15483_v57  ;;  %vm19050_vm12 = vmmov %vm19033_vm5  ;;  %v4912_v40 = vpack.c.bf16 %v15455_v46, %v4887_v41  ;;  %vm19056_vm14 = vnez %v19055_v12  ;;  %v4588_v57 = vpack.c.bf16 %v4565_v61, %v15778_v30  ;;  %v15821_v41 = vld [vmem:[#allocation3 + $0xda] sm:$0xff] }
 0x268   : > { %vm19052_vm5 = vmmov %vm19051_vm1  ;;  %v4567_v46 = vsel %vm19056_vm14, %v15497_v34, 0.0  ;;  %v19062_v34 = vld [vmem:[#allocation36_spill] sm:$0xff] }
 0x269   : > { %v4589_v43 = vpack.c.bf16 %v4567_v46, %v15528_v32  ;;  %v4590_v32 = vpack.c.bf16 %v4569_v52, %v15802_v36  ;;  %v4575_v46 = vsel %vm19024_vm9, %v19073_v18, 0.0  ;;  %vm19088_vm13 = vmmov %vm19051_vm1  ;;  %v19096_v18 = vld [vmem:[#allocation46_spill] sm:$0xff]  ;;  %v6423_v12 = vld [vmem:[#allocation3 + $0xda] sm:$0xff] }
 0x26c   : > { %12613 = vmatmul.mubr.msk.bf16.gmra.mxu1 %vm19050_vm12, %v4586_v56  ;;  %vm19057_vm12 = vmmov %vm19051_vm1  ;;  %v4895_v56 = vsel %vm18970_vm0, %v19064_v17, 0.0 }
 0x26d   : > { %12616 = vmatprep.mubr.msk.bf16.mxu1 %vm19052_vm5, %v4587_v53  ;;  %vm19059_vm5 = vmmov %vm19051_vm1 }
 0x26e   : > { %12647 = vmatmul.mubr.msk.bf16.gmra.mxu0 %vm19051_vm1, %v4911_v35  ;;  %v19067_v35 = vld [vmem:[#allocation111_spill] sm:$0xff] }
 0x26f   : > { %12650 = vmatprep.mubr.msk.bf16.mxu0 %vm19053_vm11, %v4912_v40  ;;  %vm19063_vm11 = vnez %v19062_v34  ;;  %v4916_v53 = vpack.c.bf16 %v19067_v35, %v4895_v56  ;;  %v6401_v40 = vld [vmem:[#allocation3 + $0x2a] sm:$0xff] }
 0x270   : > { %v4571_v13 = vsel %vm19063_vm11, %v15533_v59, 0.0  ;;  %v4573_v59 = vsel %vm18719_vm10, %v15821_v41, 0.0  ;;  %vm19079_vm10 = vmmov %vm19051_vm1 }
 0x271   : > { %v4591_v21 = vpack.c.bf16 %v4571_v13, %v15543_v10  ;;  %v19071_v10 = vld [vmem:[#allocation104_spill] sm:$0xff] }
 0x272   : > { %v4897_v61 = vsel %vm18691_vm3, %v19071_v10, 0.0  ;;  %v15845_v13 = vld [vmem:[#allocation3 + $0xfa] sm:$0xff]  ;;  %v19093_v10 = vld [vmem:[#allocation37_spill] sm:$0xff] }
 0x274   : > { %12617 = vmatmul.mubr.msk.bf16.gmra.mxu1 %vm19057_vm12, %v4588_v57  ;;  %vm19066_vm12 = vmmov %vm19051_vm1  ;;  %v4592_v57 = vpack.c.bf16 %v4573_v59, %v15826_v3 }
 0x275   : > { %12620 = vmatprep.mubr.msk.bf16.mxu1 %vm19051_vm1, %v4589_v43 }
 0x276   : > { %12651 = vmatmul.mubr.msk.bf16.gmra.mxu0 %vm19058_vm15, %v4913_v47  ;;  %vm19068_vm15 = vmmov %vm19051_vm1  ;;  %v19074_v47 = vld [vmem:[#allocation72_spill] sm:$0xff] }
 0x277   : > { %12654 = vmatprep.mubr.msk.bf16.mxu0 %vm19059_vm5, %v4914_v14  ;;  %vm19069_vm5 = vmmov %vm19051_vm1  ;;  %v4917_v43 = vpack.c.bf16 %v19074_v47, %v4897_v61  ;;  %v4593_v14 = vpack.c.bf16 %v4575_v46, %v19075_v9  ;;  %v19105_v46 = vld [vmem:[#allocation71_spill] sm:$0xff]  ;;  %v19107_v47 = vld [vmem:[#allocation48_spill] sm:$0xff]  ;;  %v5506_v9 = vsel %vm19049_vm6, %v15773_v4, 0.0 }
 0x27c   : > { %12621 = vmatmul.mubr.msk.bf16.gmra.mxu1 %vm19066_vm12, %v4590_v32  ;;  %vm19076_vm12 = vnez %v18986_v54  ;;  %v4544_v32 = vld [vmem:[#allocation3 + $0xf2] sm:$0xff] }
 0x27d   : > { %12624 = vmatprep.mubr.msk.bf16.mxu1 %vm19051_vm1, %v4591_v21  ;;  %v4899_v52 = vsel %vm19076_vm12, %v15582_v49, 0.0  ;;  %vm19082_vm12 = vnez %v18998_v2  ;;  %v19083_v49 = vld [vmem:[#allocation55_spill] sm:$0xff] }
 0x27e   : > { %12655 = vmatmul.mubr.msk.bf16.gmra.mxu0 %vm19068_vm15, %v4915_v29  ;;  %vm19077_vm15 = vmmov %vm19051_vm1  ;;  %v4918_v11 = vpack.c.bf16 %v15606_v58, %v4899_v52  ;;  %v19080_v29 = vld [vmem:[#allocation68_spill] sm:$0xff]  ;;  %v4901_v54 = vsel %vm19082_vm12, %v15631_v31, 0.0  ;;  %v5492_v31 = vsel %vm19089_vm7, %v15642_v8, 0.0  ;;  %vm3925_vm12 = vcmask 58368   ;;  %v19116_v52 = vld [vmem:[#allocation23_spill] sm:$0xff] }
 0x27f   : > { %12658 = vmatprep.mubr.msk.bf16.mxu0 %vm19069_vm5, %v4916_v53  ;;  %vm19078_vm5 = vmmov %vm19051_vm1  ;;  %vm19081_vm8 = vnez %v19080_v29  ;;  %v4919_v56 = vpack.c.bf16 %v15649_v25, %v4901_v54  ;;  %v19086_v53 = vld [vmem:[#allocation41_spill] sm:$0xff]  ;;  %v19091_v25 = vmov 0.0   ;;  %v5523_v59 = vpack.c.bf16 %v5492_v31, %v15667_v16  ;;  %v19122_v54 = vld [vmem:[#allocation103_spill] sm:$0xff] }
 0x280   : > { %v4577_v21 = vsel %vm19081_vm8, %v15845_v13, 0.0  ;;  %3926 = vst.msk [vmem:[#allocation3 + $0x120] sm:$0x3] %vm3925_vm12, %v19091_v25  ;;  %6838 = vst.msk [vmem:[#allocation5 + $0x50] sm:$0x3] %vm3925_vm12, %v19091_v25  ;;  %v19135_v31 = vld [vmem:[#allocation38_spill] sm:$0xff] }
 0x281   : > { %v4594_v17 = vpack.c.bf16 %v4577_v21, %v4544_v32  ;;  %v19120_v21 = vld [vmem:[#allocation22_spill] sm:$0xff] }
 0x284   : > { %12625 = vmatmul.mubr.msk.bf16.gmra.mxu1 %vm19077_vm15, %v4592_v57  ;;  %vm19084_vm15 = vnez %v19083_v49  ;;  %v5502_v57 = vsel %vm19038_vm2, %v15749_v45, 0.0  ;;  %v5530_v45 = vpack.c.bf16 %v5506_v9, %v15778_v30  ;;  %v19124_v30 = vld [vmem:[#allocation108_spill] sm:$0xff]  ;;  %v6109_v9 = vld [vmem:[#allocation3 + $0x31] sm:$0xff] }
 0x285   : > { %12628 = vmatprep.mubr.msk.bf16.mxu1 %vm19078_vm5, %v4593_v14  ;;  %v5490_v58 = vsel %vm19084_vm15, %v15629_v15, 0.0  ;;  %vm19087_vm5 = vmmov %vm19051_vm1  ;;  %vm19090_vm15 = vnez %v19012_v22  ;;  %v19114_v14 = vld [vmem:[#allocation26_spill] sm:$0xff] }
 0x286   : > { %12659 = vmatmul.mubr.msk.bf16.gmra.mxu0 %vm19051_vm1, %v4917_v43  ;;  %v5522_v35 = vpack.c.bf16 %v5490_v58, %v15644_v63  ;;  %v5494_v15 = vsel %vm19090_vm15, %v15675_v5, 0.0  ;;  %v15885_v5 = vld [vmem:[%s18713_s21 + $0x20] sm:$0xf]  ;;  %vm19097_vm12 = vmmov %vm19087_vm5  ;;  %v19109_v43 = vld [vmem:[#allocation105_spill] sm:$0xff]  ;;  %v5514_v58 = vsel %vm19063_vm11, %v15821_v41, 0.0 }
 0x287   : > { %12662 = vmatprep.mubr.msk.bf16.mxu0 %vm19079_vm10, %v4918_v11  ;;  %vm19085_vm10 = vmmov %vm19051_vm1  ;;  %v5524_v61 = vpack.c.bf16 %v5494_v15, %v15696_v44  ;;  %v19103_v44 = vld [vmem:[#allocation57_spill] sm:$0xff]  ;;  %v5510_v11 = vsel %vm19056_vm14, %v15797_v26, 0.0  ;;  %v5534_v26 = vpack.c.bf16 %v5514_v58, %v15826_v3  ;;  %v19136_v3 = vld [vmem:[#allocation51_spill] sm:$0xff] }
 0x288   : > { %v5532_v4 = vpack.c.bf16 %v5510_v11, %v15802_v36  ;;  %v19130_v36 = vld [vmem:[#allocation106_spill] sm:$0xff]  ;;  %v5782_v15 = vld [vmem:[#allocation3 + $0x20] sm:$0xff] }
 0x28c   : > { %12629 = vmatmul.mubr.msk.bf16.gmra.mxu1 %vm19051_vm1, %v4594_v17  ;;  %vm19092_vm1 = vcmask 1043456   ;;  %v19126_v17 = vld [vmem:[#allocation69_spill] sm:$0xff] }
 0x28d   : > { %12668 = vmatprep.mubr.msk.bf16.mxu1 %vm19087_vm5, %v19086_v53  ;;  %v5912_v63 = vsel %vm19092_vm1, %v15682_v42, 0  ;;  %v19101_v42 = vld [vmem:[#allocation43_spill] sm:$0xff] }
 0x28e   : > { %12663 = vmatmul.mubr.msk.bf16.gmra.mxu0 %vm19085_vm10, %v4919_v56  ;;  %vm19095_vm10 = vmmov %vm19092_vm1  ;;  %v19128_v56 = vld [vmem:[#allocation77_spill] sm:$0xff]  ;;  %v19133_v53 = vld [vmem:[#allocation31_spill] sm:$0xff] }
 0x28f   : > { %12702 = vmatprep.mubr.msk.bf16.mxu0 %vm19088_vm13, %v5522_v35  ;;  %vm19094_vm13 = vmmov %vm19087_vm5  ;;  %v6205_v8 = vsel %vm19095_vm10, %v15692_v19, 0  ;;  %v5518_v35 = vsel %vm19024_vm9, %v15845_v13, 0.0  ;;  %vm19140_vm9 = vnez %v19139_v7 }
 0x290   : > { %vm19098_vm1 = vmmov %vm19087_vm5  ;;  %v5536_v41 = vpack.c.bf16 %v5518_v35, %v4544_v32  ;;  %v5814_v13 = vsel %vm19140_vm9, %v5782_v15, 0.0  ;;  %vm19147_vm9 = vcmask 1043456   ;;  %v19152_v15 = vld [vmem:[#allocation19_spill] sm:$0xff] }
 0x291   : > { %vm19102_vm15 = vmmov %vm19098_vm1 }
 0x294   : > { %12669 = vmatmul.mubr.msk.bf16.vlgmr.msra.gmra.mxu1 %vm19094_vm13, %v19093_v10  ;;  %vm19099_vm13 = vmmov %vm19095_vm10  ;;  %vm19100_vm10 = vnez %v19026_v33  ;;  %v5194_v10 = vld [vmem:[#allocation3 + $0x101] sm:$0xff] }
 0x295   : > { %12735 = vmatpush3.bf16.msra.mxu1 %v5912_v63  ;;  %12672 = vmatprep.mubr.msk.bf16.mxu1 %vm19097_vm12, %v19096_v18  ;;  %v5498_v16 = vsel %vm19100_vm10, %v15725_v27, 0.0  ;;  %vm19106_vm12 = vmmov %vm19098_vm1  ;;  %v5528_v27 = vpack.c.bf16 %v5502_v57, %v15754_v6  ;;  %v19117_v6 = vld [vmem:[#allocation20_spill] sm:$0xff]  ;;  %v5195_v63 = vld [vmem:[#allocation3 + $0x109] sm:$0xff] }
 0x296   : > { %12703 = vmatmul.mubr.msk.bf16.vlgmr.msra.gmra.mxu0 %vm19087_vm5, %v5523_v59  ;;  %13240 = vmatprep.subr.msk.bf16.mxu1 %vm19099_vm13, %v15885_v5  ;;  %v5526_v19 = vpack.c.bf16 %v5498_v16, %v15730_v23  ;;  %vm19104_vm5 = vmmov %vm19098_vm1  ;;  %v19111_v23 = vld [vmem:[#allocation60_spill] sm:$0xff]  ;;  %v5520_v59 = vsel %vm19081_vm8, %v15684_v51, 0.0  ;;  %v15963_v32 = vpack.c.bf16 %v5195_v63, %v5194_v10  ;;  %v5784_v51 = vld [vmem:[#allocation3 + $0x30] sm:$0xff] }
 0x297   : > { %12706 = vmatprep.mubr.msk.bf16.mxu0 %vm19098_vm1, %v5524_v61  ;;  %12769 = vmatpush3.bf16.msra.mxu0 %v6205_v8  ;;  %vm19108_vm13 = vmmov %vm19098_vm1  ;;  %v6108_v61 = vld [vmem:[#allocation3 + $0x29] sm:$0xff]  ;;  %v5537_v18 = vpack.c.bf16 %v5520_v59, %v15687_v37  ;;  %v6110_v57 = vld [vmem:[#allocation3 + $0x39] sm:$0xff] }
 0x298   : > { %vm19112_vm10 = vmmov %vm19098_vm1  ;;  %v5783_v8 = vld [vmem:[#allocation3 + $0x28] sm:$0xff] }
 0x299   : > { %v5847_v16 = vpack.c.bf16 %v5783_v8, %v5814_v13  ;;  %v6116_v59 = vld [vmem:[#allocation3 + $0x69] sm:$0xff] }
 0x29a   : > { %v5791_v8 = vld [vmem:[#allocation3 + $0x68] sm:$0xff] }
 0x29c   : > { %12673 = vmatmul.mubr.msk.bf16.gmra.mxu1 %vm19102_vm15, %v19101_v42  ;;  %vm19110_vm15 = vmmov %vm19098_vm1  ;;  %v6107_v42 = vld [vmem:[#allocation3 + $0x21] sm:$0xff] }
 0x29d   : > { %12676 = vmatprep.mubr.msk.bf16.mxu1 %vm19106_vm12, %v19105_v46  ;;  %vm19115_vm12 = vmmov %vm19098_vm1  ;;  %v5785_v46 = vld [vmem:[#allocation3 + $0x38] sm:$0xff] }
 0x29e   : > { %12707 = vmatmul.mubr.msk.bf16.gmra.mxu0 %vm19104_vm5, %v19103_v44  ;;  %vm19113_vm5 = vmmov %vm19098_vm1  ;;  %v5786_v44 = vld [vmem:[#allocation3 + $0x40] sm:$0xff] }
 0x29f   : > { %12710 = vmatprep.mubr.msk.bf16.mxu0 %vm19098_vm1, %v5526_v19  ;;  %v6140_v19 = vpack.c.bf16 %v6108_v61, %v6107_v42  ;;  %v6113_v61 = vld [vmem:[#allocation3 + $0x51] sm:$0xff] }
 0x2a4   : > { %12677 = vmatmul.mubr.msk.bf16.gmra.mxu1 %vm19108_vm13, %v19107_v47  ;;  %vm19118_vm13 = vmmov %vm19098_vm1  ;;  %v19144_v47 = vld [vmem:[#allocation16_spill] sm:$0xff] }
 0x2a5   : > { %12680 = vmatprep.mubr.msk.bf16.mxu1 %vm19112_vm10, %v19111_v23  ;;  %vm19121_vm10 = vmmov %vm19098_vm1 }
 0x2a6   : > { %12711 = vmatmul.mubr.msk.bf16.gmra.mxu0 %vm19110_vm15, %v19109_v43  ;;  %vm19119_vm15 = vmmov %vm19098_vm1  ;;  %v6112_v43 = vld [vmem:[#allocation3 + $0x49] sm:$0xff] }
 0x2a7   : > { %12714 = vmatprep.mubr.msk.bf16.mxu0 %vm19113_vm5, %v5528_v27  ;;  %vm19123_vm5 = vmmov %vm19098_vm1 }
 0x2ac   : > { %12681 = vmatmul.mubr.msk.bf16.gmra.mxu1 %vm19115_vm12, %v19114_v14  ;;  %vm19125_vm12 = vmmov %vm19098_vm1  ;;  %v6530_v14 = vsel %vm19147_vm9, %v15885_v5, 0 }
 0x2ad   : > { %12684 = vmatprep.mubr.msk.bf16.mxu1 %vm19118_vm13, %v19117_v6  ;;  %vm19127_vm13 = vmmov %vm19098_vm1  ;;  %v6111_v6 = vld [vmem:[#allocation3 + $0x41] sm:$0xff] }
 0x2ae   : > { %12715 = vmatmul.mubr.msk.bf16.gmra.mxu0 %vm19098_vm1, %v19116_v52  ;;  %v5787_v52 = vld [vmem:[#allocation3 + $0x48] sm:$0xff]  ;;  %vm19154_vm9 = vmmov %vm19098_vm1 }
 0x2af   : > { %12718 = vmatprep.mubr.msk.bf16.mxu0 %vm19119_vm15, %v5530_v45  ;;  %vm19129_vm15 = vmmov %vm19098_vm1  ;;  %v6141_v45 = vpack.c.bf16 %v6110_v57, %v6109_v9 }
 0x2b4   : > { %12685 = vmatmul.mubr.msk.bf16.gmra.mxu1 %vm19121_vm10, %v19120_v21  ;;  %vm19131_vm10 = vmmov %vm19098_vm1 }
 0x2b5   : > { %12688 = vmatprep.mubr.msk.bf16.mxu1 %vm19125_vm12, %v19124_v30  ;;  %vm19134_vm12 = vmmov %vm19098_vm1 }
 0x2b6   : > { %12719 = vmatmul.mubr.msk.bf16.gmra.mxu0 %vm19123_vm5, %v19122_v54  ;;  %vm19132_vm5 = vmmov %vm19098_vm1 }
 0x2b7   : > { %12722 = vmatprep.mubr.msk.bf16.mxu0 %vm19098_vm1, %v5532_v4  ;;  %v6142_v4 = vpack.c.bf16 %v6112_v43, %v6111_v6  ;;  %v5793_v43 = vld [vmem:[#allocation3 + $0x78] sm:$0xff]  ;;  %v6120_v6 = vld [vmem:[#allocation3 + $0x89] sm:$0xff] }
 0x2bc   : > { %12689 = vmatmul.mubr.msk.bf16.gmra.mxu1 %vm19127_vm13, %v19126_v17  ;;  %vm19137_vm13 = vmmov %vm19098_vm1 }
 0x2bd   : > { %12692 = vmatprep.mubr.msk.bf16.mxu1 %vm19131_vm10, %v19130_v36  ;;  %vm19141_vm10 = vmmov %vm19098_vm1  ;;  %v5789_v36 = vld [vmem:[#allocation3 + $0x58] sm:$0xff] }
 0x2be   : > { %12723 = vmatmul.mubr.msk.bf16.gmra.mxu0 %vm19129_vm15, %v19128_v56  ;;  %vm19138_vm15 = vmmov %vm19098_vm1 }
 0x2bf   : > { %12726 = vmatprep.mubr.msk.bf16.mxu0 %vm19132_vm5, %v5534_v26  ;;  %vm19142_vm5 = vmmov %vm19098_vm1  ;;  %v5788_v26 = vld [vmem:[#allocation3 + $0x50] sm:$0xff] }
 0x2c4   : > { %12693 = vmatmul.mubr.msk.bf16.gmra.mxu1 %vm19134_vm12, %v19133_v53  ;;  %vm19143_vm12 = vmmov %vm19098_vm1 }
 0x2c5   : > { %12696 = vmatprep.mubr.msk.bf16.mxu1 %vm19137_vm13, %v19136_v3  ;;  %vm19145_vm13 = vnez %v19144_v47 }
 0x2c6   : > { %12727 = vmatmul.mubr.msk.bf16.gmra.mxu0 %vm19098_vm1, %v19135_v31  ;;  %v5816_v27 = vsel %vm19145_vm13, %v5784_v51, 0.0  ;;  %vm19151_vm13 = vnez %v18883_v48 }
 0x2c7   : > { %12730 = vmatprep.mubr.msk.bf16.mxu0 %vm19138_vm15, %v5536_v41  ;;  %vm19146_vm15 = vnez %v18857_v38  ;;  %v5848_v23 = vpack.c.bf16 %v5785_v46, %v5816_v27  ;;  %v5790_v38 = vld [vmem:[#allocation3 + $0x60] sm:$0xff]  ;;  %v5792_v27 = vld [vmem:[#allocation3 + $0x70] sm:$0xff] }
 0x2c8   : > { %v5818_v37 = vsel %vm19146_vm15, %v5786_v44, 0.0  ;;  %v6114_v41 = vld [vmem:[#allocation3 + $0x59] sm:$0xff]  ;;  %v5822_v31 = vsel %vm19151_vm13, %v5790_v38, 0.0  ;;  %vm19153_vm15 = vnez %v19152_v15 }
 0x2c9   : > { %v5849_v21 = vpack.c.bf16 %v5787_v52, %v5818_v37  ;;  %v5820_v63 = vsel %vm19153_vm15, %v5788_v26, 0.0  ;;  %v5851_v42 = vpack.c.bf16 %v5791_v8, %v5822_v31  ;;  %v6119_v26 = vld [vmem:[#allocation3 + $0x81] sm:$0xff] }
 0x2ca   : > { %v5850_v10 = vpack.c.bf16 %v5789_v36, %v5820_v63 }
 0x2cc   : > { %12697 = vmatmul.mubr.msk.bf16.gmra.mxu1 %vm19141_vm10, %v15963_v32  ;;  %vm19148_vm10 = vmmov %vm19098_vm1 }
 0x2cd   : > { %12736 = vmatprep.mubr.msk.bf16.mxu1 %vm19143_vm12, %v5847_v16  ;;  %vm19150_vm12 = vmmov %vm19098_vm1  ;;  %v6143_v16 = vpack.c.bf16 %v6114_v41, %v6113_v61  ;;  %v6124_v61 = vld [vmem:[#allocation3 + $0xa9] sm:$0xff] }
 0x2ce   : > { %12731 = vmatmul.mubr.msk.bf16.gmra.mxu0 %vm19142_vm5, %v5537_v18  ;;  %v12534_v11 = vpop.f32.mrf.mxu1  ;;  %vm19149_vm5 = vmmov %vm19098_vm1 }
 0x2cf   : > { %12770 = vmatprep.mubr.msk.bf16.mxu0 %vm19098_vm1, %v6140_v19  ;;  %v6115_v19 = vld [vmem:[#allocation3 + $0x61] sm:$0xff] }
 0x2d0   : > { %v12568_v54 = vpop.f32.mrf.mxu0  ;;  %v4175_v5 = vpop.f32.mrf.mxu1  ;;  %v6144_v48 = vpack.c.bf16 %v6116_v59, %v6115_v19 }
 0x2d1   : > { %v15979_v58 = vadd.f32 %v12568_v54, %v12534_v11  ;;  %v6117_v54 = vld [vmem:[#allocation3 + $0x71] sm:$0xff] }
 0x2d2   : > { %v4387_v56 = vpop.f32.mrf.mxu0  ;;  %v12535_v53 = vpop.f32.mrf.mxu1 }
 0x2d3   : > { %v15983_v35 = vadd.f32 %v4387_v56, %v4175_v5 }
 0x2d4   : > { %12737 = vmatmul.mubr.msk.bf16.vlgmr.msra.gmra.mxu1 %vm19148_vm10, %v5848_v23  ;;  %v12569_v3 = vpop.f32.mrf.mxu0  ;;  %v4178_v13 = vpop.f32.mrf.mxu1  ;;  %vm19155_vm10 = vmmov %vm19098_vm1 }
 0x2d5   : > { %12803 = vmatpush3.bf16.msra.mxu1 %v6530_v14  ;;  %12740 = vmatprep.mubr.msk.bf16.mxu1 %vm19150_vm12, %v5849_v21  ;;  %v15989_v7 = vadd.f32 %v12569_v3, %v12535_v53  ;;  %vm19157_vm12 = vmmov %vm19098_vm1  ;;  %v6118_v14 = vld [vmem:[#allocation3 + $0x79] sm:$0xff]  ;;  %v6146_v53 = vpack.c.bf16 %v6120_v6, %v6119_v26 }
 0x2d6   : > { %12771 = vmatmul.mubr.msk.bf16.vlgmr.msra.gmra.mxu0 %vm19149_vm5, %v6141_v45  ;;  %v4390_v18 = vpop.f32.mrf.mxu0  ;;  %vm19156_vm5 = vmmov %vm19098_vm1  ;;  %v6145_v5 = vpack.c.bf16 %v6118_v14, %v6117_v54 }
 0x2d7   : > { %12774 = vmatprep.mubr.msk.bf16.mxu0 %vm19098_vm1, %v6142_v4  ;;  %v15991_v51 = vadd.f32 %v4390_v18, %v4178_v13  ;;  %vm19158_vm1 = vnez %v18901_v50  ;;  %vm19159_vm13 = vmmov %vm19156_vm5  ;;  %v19161_v50 = vld [vmem:[#allocation39_spill] sm:$0xff] }
 0x2d8   : > { %v12538_v44 = vpop.f32.mrf.mxu1  ;;  %v5824_v52 = vsel %vm19158_vm1, %v5792_v27, 0.0  ;;  %vm19160_vm15 = vmmov %vm19156_vm5  ;;  %v6122_v13 = vld [vmem:[#allocation3 + $0x99] sm:$0xff] }
 0x2d9   : > { %v5852_v4 = vpack.c.bf16 %v5793_v43, %v5824_v52  ;;  %v19166_v43 = vld [vmem:[#allocation114_spill] sm:$0xff]  ;;  %vm19167_vm1 = vmmov %vm19156_vm5 }
 0x2da   : > { %v12572_v46 = vpop.f32.mrf.mxu0  ;;  %v4191_v47 = vpop.f32.mrf.mxu1 }
 0x2db   : > { %v15996_v57 = vadd.f32 %v12572_v46, %v12538_v44  ;;  %v6123_v44 = vld [vmem:[#allocation3 + $0xa1] sm:$0xff] }
 0x2dc   : > { %12741 = vmatmul.mubr.msk.bf16.gmra.mxu1 %vm19154_vm9, %v5850_v10  ;;  %v4403_v37 = vpop.f32.mrf.mxu0  ;;  %v12539_v9 = vpop.f32.mrf.mxu1  ;;  %vm19162_vm9 = vmmov %vm19156_vm5  ;;  %v6148_v27 = vpack.c.bf16 %v6124_v61, %v6123_v44  ;;  %v6132_v44 = vld [vmem:[#allocation3 + $0xe9] sm:$0xff] }
 0x2dd   : > { %12744 = vmatprep.mubr.msk.bf16.mxu1 %vm19156_vm5, %v5851_v42  ;;  %v15999_v23 = vadd.f32 %v4403_v37, %v4191_v47  ;;  %v19164_v47 = vld [vmem:[#allocation107_spill] sm:$0xff] }
 0x2de   : > { %12775 = vmatmul.mubr.msk.bf16.gmra.mxu0 %vm19155_vm10, %v6143_v16  ;;  %v12573_v45 = vpop.f32.mrf.mxu0  ;;  %v4194_v21 = vpop.f32.mrf.mxu1  ;;  %vm19163_vm10 = vmmov %vm19156_vm5  ;;  %v6121_v16 = vld [vmem:[#allocation3 + $0x91] sm:$0xff] }
 0x2df   : > { %12778 = vmatprep.mubr.msk.bf16.mxu0 %vm19157_vm12, %v6144_v48  ;;  %v16003_v11 = vadd.f32 %v12573_v45, %v12539_v9  ;;  %v6147_v19 = vpack.c.bf16 %v6122_v13, %v6121_v16  ;;  %vm19165_vm12 = vmmov %vm19156_vm5  ;;  %v6130_v16 = vld [vmem:[#allocation3 + $0xd9] sm:$0xff] }
 0x2e0   : > { %v4406_v38 = vpop.f32.mrf.mxu0 }
 0x2e1   : > { %v16005_v56 = vadd.f32 %v4406_v38, %v4194_v21  ;;  %v12542_v36 = vpop.f32.mrf.mxu1 }
 0x2e2   : > { %v12576_v41 = vpop.f32.mrf.mxu0 }
 0x2e3   : > { %v16011_v31 = vadd.f32 %v12576_v41, %v12542_v36  ;;  %v4207_v3 = vpop.f32.mrf.mxu1  ;;  %v19169_v36 = vld [vmem:[#allocation83_spill] sm:$0xff]  ;;  %v19172_v41 = vld [vmem:[#allocation117_spill] sm:$0xff] }
 0x2e4   : > { %12745 = vmatmul.mubr.msk.bf16.gmra.mxu1 %vm19159_vm13, %v5852_v4  ;;  %v4419_v15 = vpop.f32.mrf.mxu0  ;;  %vm19168_vm13 = vmmov %vm19167_vm1 }
 0x2e5   : > { %12748 = vmatprep.mubr.msk.bf16.mxu1 %vm19162_vm9, %v19161_v50  ;;  %v16014_v63 = vadd.f32 %v4419_v15, %v4207_v3  ;;  %v12543_v59 = vpop.f32.mrf.mxu1  ;;  %vm19171_vm9 = vmmov %vm19167_vm1  ;;  %v5806_v50 = vld [vmem:[#allocation3 + $0xe0] sm:$0xff] }
 0x2e6   : > { %12779 = vmatmul.mubr.msk.bf16.gmra.mxu0 %vm19160_vm15, %v6145_v5  ;;  %v12577_v10 = vpop.f32.mrf.mxu0  ;;  %vm19170_vm15 = vmmov %vm19167_vm1 }
 0x2e7   : > { %12782 = vmatprep.mubr.msk.bf16.mxu0 %vm19163_vm10, %v6146_v53  ;;  %v16016_v8 = vadd.f32 %v12577_v10, %v12543_v59  ;;  %v4210_v18 = vpop.f32.mrf.mxu1  ;;  %vm19173_vm10 = vmmov %vm19167_vm1  ;;  %v5804_v59 = vld [vmem:[#allocation3 + $0xd0] sm:$0xff]  ;;  %v5805_v10 = vld [vmem:[#allocation3 + $0xd8] sm:$0xff] }
 0x2e8   : > { %v4422_v42 = vpop.f32.mrf.mxu0 }
 0x2e9   : > { %v16018_v48 = vadd.f32 %v4422_v42, %v4210_v18 }
 0x2eb   : > { %v12546_v46 = vpop.f32.mrf.mxu1 }
 0x2ec   : > { %12749 = vmatmul.mubr.msk.bf16.gmra.mxu1 %vm19156_vm5, %v19164_v47  ;;  %v12580_v37 = vpop.f32.mrf.mxu0  ;;  %vm19174_vm5 = vmmov %vm19167_vm1 }
 0x2ed   : > { %12752 = vmatprep.mubr.msk.bf16.mxu1 %vm19167_vm1, %v19166_v43  ;;  %v16025_v9 = vadd.f32 %v12580_v37, %v12546_v46  ;;  %v4223_v14 = vpop.f32.mrf.mxu1  ;;  %v5807_v37 = vld [vmem:[#allocation3 + $0xe8] sm:$0xff] }
 0x2ee   : > { %12783 = vmatmul.mubr.msk.bf16.gmra.mxu0 %vm19165_vm12, %v6147_v19  ;;  %v4435_v45 = vpop.f32.mrf.mxu0  ;;  %v5836_v19 = vsel %vm19061_vm4, %v5804_v59, 0.0  ;;  %vm19175_vm12 = vmmov %vm19167_vm1 }
 0x2ef   : > { %12786 = vmatprep.mubr.msk.bf16.mxu0 %vm19168_vm13, %v6148_v27  ;;  %v16028_v52 = vadd.f32 %v4435_v45, %v4223_v14  ;;  %v12547_v6 = vpop.f32.mrf.mxu1  ;;  %v6129_v27 = vld [vmem:[#allocation3 + $0xd1] sm:$0xff] }
 0x2f0   : > { %v12581_v21 = vpop.f32.mrf.mxu0  ;;  %v6151_v14 = vpack.c.bf16 %v6130_v16, %v6129_v27 }
 0x2f1   : > { %v16030_v4 = vadd.f32 %v12581_v21, %v12547_v6  ;;  %v4226_v54 = vpop.f32.mrf.mxu1  ;;  %v6131_v6 = vld [vmem:[#allocation3 + $0xe1] sm:$0xff] }
 0x2f2   : > { %v4438_v38 = vpop.f32.mrf.mxu0  ;;  %v6152_v28 = vpack.c.bf16 %v6132_v44, %v6131_v6  ;;  %v6137_v6 = vld [vmem:[#allocation3 + $0x111] sm:$0xff] }
 0x2f3   : > { %v16032_v5 = vadd.f32 %v4438_v38, %v4226_v54 }
 0x2f4   : > { %v12550_v26 = vpop.f32.mrf.mxu1  ;;  %12753 = vmatmul.mubr.msk.bf16.gmra.mxu1 %vm19170_vm15, %v19169_v36 }
 0x2f5   : > { %v12584_v53 = vpop.f32.mrf.mxu0  ;;  %12756 = vmatprep.mubr.msk.bf16.mxu1 %vm19173_vm10, %v19172_v41  ;;  %vm19184_vm10 = vnez %v18998_v2  ;;  %v6403_v2 = vld [vmem:[#allocation3 + $0x3a] sm:$0xff] }
 0x2f6   : > { %12787 = vmatmul.mubr.msk.bf16.gmra.mxu0 %vm19171_vm9, %v19124_v30  ;;  %v16040_v3 = vadd.f32 %v12584_v53, %v12550_v26  ;;  %v4239_v15 = vpop.f32.mrf.mxu1  ;;  %v5838_v30 = vsel %vm18970_vm0, %v5806_v50, 0.0  ;;  %vm19176_vm0 = vmmov %vm19167_vm1  ;;  %v5808_v26 = vld [vmem:[#allocation3 + $0xf0] sm:$0xff]  ;;  %v5809_v53 = vld [vmem:[#allocation3 + $0xf8] sm:$0xff] }
 0x2f7   : > { %12790 = vmatprep.mubr.msk.bf16.mxu0 %vm19174_vm5, %v19126_v17  ;;  %v4451_v13 = vpop.f32.mrf.mxu0  ;;  %v5858_v17 = vpack.c.bf16 %v5805_v10, %v5836_v19  ;;  %v5859_v45 = vpack.c.bf16 %v5807_v37, %v5838_v30  ;;  %vm19177_vm4 = vmmov %vm19176_vm0  ;;  %v6133_v30 = vld [vmem:[#allocation3 + $0xf1] sm:$0xff]  ;;  %vm19185_vm5 = vnez %v19083_v49 }
 0x2f8   : > { %v16044_v61 = vadd.f32 %v4451_v13, %v4239_v15  ;;  %v12551_v18 = vpop.f32.mrf.mxu1  ;;  %vm19178_vm1 = vmmov %vm19176_vm0  ;;  %v6134_v15 = vld [vmem:[#allocation3 + $0xf9] sm:$0xff]  ;;  %v5840_v13 = vsel %vm18691_vm3, %v5808_v26, 0.0  ;;  %v19181_v37 = vld [vmem:[#allocation102_spill] sm:$0xff] }
 0x2f9   : > { %v12585_v42 = vpop.f32.mrf.mxu0  ;;  %v5860_v16 = vpack.c.bf16 %v5809_v53, %v5840_v13  ;;  %v6153_v19 = vpack.c.bf16 %v6134_v15, %v6133_v30  ;;  %vm19179_vm13 = vmmov %vm19176_vm0  ;;  %v6433_v53 = vsel %vm19185_vm5, %v6401_v40, 0.0  ;;  %v6405_v49 = vld [vmem:[#allocation3 + $0x4a] sm:$0xff] }
 0x2fa   : > { %v16050_v46 = vadd.f32 %v12585_v42, %v12551_v18  ;;  %v16052_v47 = vpop.f32.mrf.mxu1  ;;  %vm19180_vm15 = vmmov %vm19176_vm0 }
 0x2fb   : > { %v16054_v43 = vpop.f32.mrf.mxu0  ;;  %vm19182_vm9 = vmmov %vm19176_vm0 }
 0x2fc   : > { %v12554_v21 = vpop.f32.mrf.mxu1  ;;  %12757 = vmatmul.mubr.msk.bf16.gmra.mxu1 %vm19175_vm12, %v5858_v17  ;;  %v5812_v17 = vld [vmem:[#allocation3 + $0x110] sm:$0xff]  ;;  %vm19183_vm3 = vmmov %vm19176_vm0 }
 0x2fd   : > { %v12588_v54 = vpop.f32.mrf.mxu0  ;;  %12760 = vmatprep.mubr.msk.bf16.mxu1 %vm19177_vm4, %v5859_v45  ;;  %vm19186_vm12 = vmmov %vm19176_vm0 }
 0x2fe   : > { %12791 = vmatmul.mubr.msk.bf16.gmra.mxu0 %vm19176_vm0, %v6151_v14  ;;  %v16059_v62 = vadd.f32 %v12588_v54, %v12554_v21  ;;  %v4255_v38 = vpop.f32.mrf.mxu1  ;;  %v6138_v21 = vld [vmem:[#allocation3 + $0x119] sm:$0xff]  ;;  %vm19187_vm4 = vmmov %vm19176_vm0 }
 0x2ff   : > { %12794 = vmatprep.mubr.msk.bf16.mxu0 %vm19178_vm1, %v6152_v28  ;;  %v4467_v36 = vpop.f32.mrf.mxu0  ;;  %v5813_v54 = vld [vmem:[#allocation3 + $0x118] sm:$0xff]  ;;  %v6155_v15 = vpack.c.bf16 %v6138_v21, %v6137_v6  ;;  %v6435_v6 = vsel %vm19089_vm7, %v6403_v2, 0.0  ;;  %vm19188_vm1 = vnez %v19012_v22  ;;  %vm19190_vm7 = vmmov %vm19176_vm0  ;;  %v6409_v22 = vld [vmem:[#allocation3 + $0x6a] sm:$0xff] }
 0x300   : > { %v16062_v41 = vadd.f32 %v4467_v36, %v4255_v38  ;;  %v12555_v50 = vpop.f32.mrf.mxu1  ;;  %v5844_v38 = vsel %vm19184_vm10, %v5812_v17, 0.0  ;;  %vm19195_vm10 = vmmov %vm19176_vm0 }
 0x301   : > { %v12589_v59 = vpop.f32.mrf.mxu0 }
 0x302   : > { %v16066_v10 = vadd.f32 %v12589_v59, %v12555_v50  ;;  %v16068_v18 = vpop.f32.mrf.mxu1 }
 0x303   : > { %v16070_v42 = vpop.f32.mrf.mxu0 }
 0x304   : > { %v12558_v44 = vpop.f32.mrf.mxu1  ;;  %12761 = vmatmul.mubr.msk.bf16.gmra.mxu1 %vm19179_vm13, %v5860_v16  ;;  %v6400_v16 = vld [vmem:[#allocation3 + $0x22] sm:$0xff]  ;;  %vm19189_vm13 = vmmov %vm19176_vm0 }
 0x305   : > { %12764 = vmatprep.mubr.msk.bf16.mxu1 %vm19182_vm9, %v19181_v37  ;;  %vm19193_vm9 = vnez %v19026_v33  ;;  %v6411_v33 = vld [vmem:[#allocation3 + $0x7a] sm:$0xff] }
 0x306   : > { %v12592_v27 = vpop.f32.mrf.mxu0  ;;  %12795 = vmatmul.mubr.msk.bf16.gmra.mxu0 %vm19180_vm15, %v6153_v19  ;;  %v4271_v45 = vpop.f32.mrf.mxu1  ;;  %v6465_v19 = vpack.c.bf16 %v6433_v53, %v6400_v16 }
 0x307   : > { %v16076_v14 = vadd.f32 %v12592_v27, %v12558_v44  ;;  %12798 = vmatprep.mubr.msk.bf16.mxu0 %vm19183_vm3, %v15963_v32  ;;  %v5862_v32 = vpack.c.bf16 %v5813_v54, %v5844_v38  ;;  %v6437_v54 = vsel %vm19188_vm1, %v6405_v49, 0.0  ;;  %vm19194_vm3 = vmmov %vm19176_vm0  ;;  %vm19203_vm1 = vnez %v18965_v20 }
 0x308   : > { %v4483_v28 = vpop.f32.mrf.mxu0  ;;  %v12559_v36 = vpop.f32.mrf.mxu1 }
 0x309   : > { %v16082_v26 = vadd.f32 %v4483_v28, %v4271_v45  ;;  %v6402_v45 = vld [vmem:[#allocation3 + $0x32] sm:$0xff] }
 0x30a   : > { %v12593_v50 = vpop.f32.mrf.mxu0  ;;  %v16088_v13 = vpop.f32.mrf.mxu1 }
 0x30b   : > { %v16086_v59 = vadd.f32 %v12593_v50, %v12559_v36  ;;  %v6466_v50 = vpack.c.bf16 %v6435_v6, %v6402_v45  ;;  %v6406_v45 = vld [vmem:[#allocation3 + $0x52] sm:$0xff] }
 0x30c   : > { %v16090_v30 = vpop.f32.mrf.mxu0  ;;  %v12562_v44 = vpop.f32.mrf.mxu1  ;;  %12765 = vmatmul.mubr.msk.bf16.gmra.mxu1 %vm19186_vm12, %v5862_v32  ;;  %v19191_v6 = vld [vmem:[#allocation59_spill] sm:$0xff]  ;;  %vm19198_vm12 = vmmov %vm19176_vm0 }
 0x30d   : > { %12804 = vmatprep.mubr.msk.bf16.mxu1 %vm19176_vm0, %v6465_v19  ;;  %vm19192_vm15 = vnez %v19191_v6 }
 0x30e   : > { %v12596_v17 = vpop.f32.mrf.mxu0  ;;  %12799 = vmatmul.mubr.msk.bf16.gmra.mxu0 %vm19187_vm4, %v6155_v15  ;;  %v4287_v37 = vpop.f32.mrf.mxu1  ;;  %v6404_v15 = vld [vmem:[#allocation3 + $0x42] sm:$0xff] }
 0x30f   : > { %v16095_v27 = vadd.f32 %v12596_v17, %v12562_v44  ;;  %v6467_v16 = vpack.c.bf16 %v6437_v54, %v6404_v15 }
 0x310   : > { %v4499_v40 = vpop.f32.mrf.mxu0  ;;  %v12563_v28 = vpop.f32.mrf.mxu1 }
 0x311   : > { %v16099_v21 = vadd.f32 %v4499_v40, %v4287_v37 }
 0x312   : > { %v12597_v38 = vpop.f32.mrf.mxu0  ;;  %v16105_v53 = vpop.f32.mrf.mxu1 }
 0x313   : > { %v16103_v36 = vadd.f32 %v12597_v38, %v12563_v28  ;;  %v6439_v28 = vsel %vm19192_vm15, %v6407_v1, 0.0  ;;  %v6441_v38 = vsel %vm19193_vm9, %v6409_v22, 0.0  ;;  %vm19212_vm9 = vnez %v19070_v24 }
 0x314   : > { %v16107_v32 = vpop.f32.mrf.mxu0  ;;  %v12602_v19 = vpop.f32.mrf.mxu1  ;;  %12805 = vmatmul.mubr.msk.bf16.vlgmr.msra.gmra.mxu1 %vm19189_vm13, %v6466_v50 }
 0x315   : > { %v4809_v44 = vadd.f32 %v12602_v19, %v15979_v58  ;;  %12808 = vmatprep.mubr.msk.bf16.mxu1 %vm19190_vm7, %v6467_v16  ;;  %v6468_v19 = vpack.c.bf16 %v6439_v28, %v6406_v45  ;;  %vm19208_vm7 = vnez %v18977_v39 }
 0x316   : > { %v12636_v2 = vpop.f32.mrf.mxu0  ;;  %v4680_v17 = vpop.f32.mrf.mxu1 }
 0x317   : > { %v16112_v49 = vadd.f32 %v12636_v2, %v4809_v44  ;;  %v4807_v37 = vadd.f32 %v4680_v17, %v15983_v35  ;;  %v6408_v44 = vld [vmem:[#allocation3 + $0x62] sm:$0xff] }
 0x318   : > { %v5005_v40 = vpop.f32.mrf.mxu0  ;;  %v12603_v54 = vpop.f32.mrf.mxu1  ;;  %v6469_v1 = vpack.c.bf16 %v6441_v38, %v6408_v44 }
 0x319   : > { %v16119_v50 = vadd.f32 %v5005_v40, %v4807_v37  ;;  %v4810_v58 = vadd.f32 %v12603_v54, %v15989_v7  ;;  %v6413_v7 = vld [vmem:[#allocation3 + $0x8a] sm:$0xff]  ;;  %v6410_v54 = vld [vmem:[#allocation3 + $0x72] sm:$0xff] }
 0x31a   : > { %v12637_v15 = vpop.f32.mrf.mxu0  ;;  %v4683_v16 = vpop.f32.mrf.mxu1 }
 0x31b   : > { %v16122_v2 = vadd.f32 %v12637_v15, %v4810_v58  ;;  %v16125_v35 = vadd.f32 %v4683_v16, %v15991_v51  ;;  %v19196_v58 = vld [vmem:[#allocation66_spill] sm:$0xff]  ;;  %v6445_v16 = vsel %vm19038_vm2, %v6413_v7, 0.0  ;;  %vm19199_vm2 = vmmov %vm19176_vm0  ;;  %vm19200_vm0 = vnez %v18952_v0 }
 0x31c   : > { %v16127_v17 = vpop.f32.mrf.mxu0  ;;  %v12606_v6 = vpop.f32.mrf.mxu1  ;;  %12809 = vmatmul.mubr.msk.bf16.gmra.mxu1 %vm19194_vm3, %v6468_v19  ;;  %vm19197_vm5 = vnez %v19196_v58  ;;  %vm19201_vm4 = vmmov %vm19199_vm2 }
 0x31d   : > { %v4813_v22 = vadd.f32 %v12606_v6, %v15996_v57  ;;  %12812 = vmatprep.mubr.msk.bf16.mxu1 %vm19195_vm10, %v6469_v1  ;;  %v6443_v38 = vsel %vm19197_vm5, %v6411_v33, 0.0  ;;  %vm19206_vm13 = vmmov %vm19199_vm2  ;;  %vm19229_vm5 = vcmask 1043456  }
 0x31e   : > { %v12640_v37 = vpop.f32.mrf.mxu0  ;;  %v4696_v40 = vpop.f32.mrf.mxu1  ;;  %v6470_v6 = vpack.c.bf16 %v6443_v38, %v6410_v54  ;;  %vm19210_vm15 = vmmov %vm19199_vm2 }
 0x31f   : > { %v16132_v45 = vadd.f32 %v12640_v37, %v4813_v22  ;;  %v4811_v28 = vadd.f32 %v4696_v40, %v15999_v23  ;;  %v6412_v22 = vld [vmem:[#allocation3 + $0x82] sm:$0xff]  ;;  %vm19215_vm3 = vmmov %vm19199_vm2 }
 0x320   : > { %v5021_v51 = vpop.f32.mrf.mxu0  ;;  %v12607_v15 = vpop.f32.mrf.mxu1  ;;  %v6471_v33 = vpack.c.bf16 %v6445_v16, %v6412_v22  ;;  %v6447_v16 = vsel %vm19200_vm0, %v6415_v55, 0.0  ;;  %vm19217_vm10 = vmmov %vm19199_vm2 }
 0x321   : > { %v16139_v19 = vadd.f32 %v5021_v51, %v4811_v28  ;;  %v4814_v57 = vadd.f32 %v12607_v15, %v16003_v11  ;;  %v6417_v11 = vld [vmem:[#allocation3 + $0xaa] sm:$0xff]  ;;  %v6414_v15 = vld [vmem:[#allocation3 + $0x92] sm:$0xff] }
 0x322   : > { %v12641_v44 = vpop.f32.mrf.mxu0  ;;  %v4699_v1 = vpop.f32.mrf.mxu1 }
 0x323   : > { %v16142_v37 = vadd.f32 %v12641_v44, %v4814_v57  ;;  %v16145_v23 = vadd.f32 %v4699_v1, %v16005_v56  ;;  %v6449_v44 = vsel %vm19049_vm6, %v6417_v11, 0.0  ;;  %vm19202_vm6 = vmmov %vm19199_vm2 }
 0x324   : > { %v16147_v40 = vpop.f32.mrf.mxu0  ;;  %v12610_v58 = vpop.f32.mrf.mxu1  ;;  %12813 = vmatmul.mubr.msk.bf16.gmra.mxu1 %vm19198_vm12, %v6470_v6  ;;  %vm19230_vm12 = vmmov %vm19229_vm5 }
 0x325   : > { %v4817_v7 = vadd.f32 %v12610_v58, %v16011_v31  ;;  %12816 = vmatprep.mubr.msk.bf16.mxu1 %vm19199_vm2, %v6471_v33  ;;  %v6472_v33 = vpack.c.bf16 %v6447_v16, %v6414_v15  ;;  %v6416_v58 = vld [vmem:[#allocation3 + $0xa2] sm:$0xff]  ;;  %v6418_v16 = vld [vmem:[#allocation3 + $0xb2] sm:$0xff] }
 0x326   : > { %v12644_v28 = vpop.f32.mrf.mxu0  ;;  %v4712_v51 = vpop.f32.mrf.mxu1  ;;  %v6473_v0 = vpack.c.bf16 %v6449_v44, %v6416_v58 }
 0x327   : > { %v16152_v54 = vadd.f32 %v12644_v28, %v4817_v7  ;;  %v4815_v38 = vadd.f32 %v4712_v51, %v16014_v63 }
 0x328   : > { %v5037_v56 = vpop.f32.mrf.mxu0  ;;  %v12611_v57 = vpop.f32.mrf.mxu1 }
 0x329   : > { %v16159_v1 = vadd.f32 %v5037_v56, %v4815_v38  ;;  %v4818_v31 = vadd.f32 %v12611_v57, %v16016_v8  ;;  %v6421_v8 = vld [vmem:[#allocation3 + $0xca] sm:$0xff]  ;;  %v6451_v57 = vsel %vm19203_vm1, %v6419_v60, 0.0  ;;  %vm19302_vm1 = vmmov %vm19215_vm3 }
 0x32a   : > { %v12645_v6 = vpop.f32.mrf.mxu0  ;;  %v4715_v22 = vpop.f32.mrf.mxu1  ;;  %v6474_v58 = vpack.c.bf16 %v6451_v57, %v6418_v16  ;;  %v6422_v16 = vld [vmem:[#allocation3 + $0xd2] sm:$0xff]  ;;  %v6455_v57 = vsel %vm19208_vm7, %v6423_v12, 0.0  ;;  %v6427_v12 = vld [vmem:[#allocation3 + $0xfa] sm:$0xff]  ;;  %vm19308_vm7 = vmmov %vm19302_vm1 }
 0x32b   : > { %v16162_v7 = vadd.f32 %v12645_v6, %v4818_v31  ;;  %v16165_v63 = vadd.f32 %v4715_v22, %v16018_v48  ;;  %v6453_v31 = vsel %vm19056_vm14, %v6421_v8, 0.0  ;;  %vm19207_vm14 = vmmov %vm19199_vm2 }
 0x32c   : > { %v16167_v28 = vpop.f32.mrf.mxu0  ;;  %v12614_v55 = vpop.f32.mrf.mxu1  ;;  %12817 = vmatmul.mubr.msk.bf16.gmra.mxu1 %vm19201_vm4, %v6472_v33 }
 0x32d   : > { %v4821_v11 = vadd.f32 %v12614_v55, %v16025_v9  ;;  %12820 = vmatprep.mubr.msk.bf16.mxu1 %vm19202_vm6, %v6473_v0  ;;  %v6420_v0 = vld [vmem:[#allocation3 + $0xc2] sm:$0xff] }
 0x32e   : > { %v12648_v51 = vpop.f32.mrf.mxu0  ;;  %v4728_v38 = vpop.f32.mrf.mxu1  ;;  %v6475_v20 = vpack.c.bf16 %v6453_v31, %v6420_v0  ;;  %v6424_v0 = vld [vmem:[#allocation3 + $0xe2] sm:$0xff] }
 0x32f   : > { %v16172_v56 = vadd.f32 %v12648_v51, %v4821_v11  ;;  %v4819_v15 = vadd.f32 %v4728_v38, %v16028_v52 }
 0x330   : > { %v5053_v48 = vpop.f32.mrf.mxu0  ;;  %v12615_v44 = vpop.f32.mrf.mxu1 }
 0x331   : > { %v16179_v6 = vadd.f32 %v5053_v48, %v4819_v15  ;;  %v4822_v9 = vadd.f32 %v12615_v44, %v16030_v4  ;;  %v6425_v4 = vld [vmem:[#allocation3 + $0xea] sm:$0xff] }
 0x332   : > { %v12649_v22 = vpop.f32.mrf.mxu0  ;;  %v4731_v33 = vpop.f32.mrf.mxu1  ;;  %v6457_v31 = vsel %vm19063_vm11, %v6425_v4, 0.0  ;;  %vm19211_vm11 = vmmov %vm19199_vm2 }
 0x333   : > { %v16182_v55 = vadd.f32 %v12649_v22, %v4822_v9  ;;  %v16185_v52 = vadd.f32 %v4731_v33, %v16032_v5 }
 0x334   : > { %v16187_v11 = vpop.f32.mrf.mxu0  ;;  %v12618_v60 = vpop.f32.mrf.mxu1  ;;  %12821 = vmatmul.mubr.msk.bf16.gmra.mxu1 %vm19206_vm13, %v6474_v58  ;;  %v6476_v58 = vpack.c.bf16 %v6455_v57, %v6422_v16  ;;  %vm19303_vm13 = vmmov %vm19302_vm1 }
 0x335   : > { %19204 = vst [vmem:[#allocation122_spill] sm:$0xff] %v16185_v52  ;;  %19205 = vst [vmem:[#allocation110_spill] sm:$0xff] %v16187_v11  ;;  %v4825_v51 = vadd.f32 %v12618_v60, %v16040_v3  ;;  %12824 = vmatprep.mubr.msk.bf16.mxu1 %vm19207_vm14, %v6475_v20  ;;  %v6477_v60 = vpack.c.bf16 %v6457_v31, %v6424_v0 }
 0x336   : > { %v12652_v8 = vpop.f32.mrf.mxu0  ;;  %v4744_v38 = vpop.f32.mrf.mxu1  ;;  %vm19304_vm14 = vmmov %vm19302_vm1 }
 0x337   : > { %v16192_v15 = vadd.f32 %v12652_v8, %v4825_v51  ;;  %v4823_v48 = vadd.f32 %v4744_v38, %v16044_v61 }
 0x338   : > { %v5069_v5 = vpop.f32.mrf.mxu0  ;;  %v12619_v44 = vpop.f32.mrf.mxu1 }
 0x339   : > { %v16199_v9 = vadd.f32 %v5069_v5, %v4823_v48  ;;  %v4826_v3 = vadd.f32 %v12619_v44, %v16050_v46  ;;  %v6426_v48 = vld [vmem:[#allocation3 + $0xf2] sm:$0xff]  ;;  %v6459_v5 = vsel %vm19212_vm9, %v6427_v12, 0.0  ;;  %vm19329_vm9 = vmmov %vm19302_vm1 }
 0x33a   : > { %v12653_v22 = vpop.f32.mrf.mxu0  ;;  %v16202_v33 = vpop.f32.mrf.mxu1  ;;  %v6430_v12 = vld [vmem:[#allocation3 + $0x112] sm:$0xff] }
 0x33b   : > { %v16204_v20 = vadd.f32 %v12653_v22, %v4826_v3  ;;  %v6478_v3 = vpack.c.bf16 %v6459_v5, %v6426_v48  ;;  %v6431_v22 = vld [vmem:[#allocation3 + $0x11a] sm:$0xff] }
 0x33c   : > { %v16206_v61 = vpop.f32.mrf.mxu0  ;;  %v12622_v39 = vpop.f32.mrf.mxu1  ;;  %12825 = vmatmul.mubr.msk.bf16.gmra.mxu1 %vm19210_vm15, %v6476_v58  ;;  %vm19315_vm15 = vmmov %vm19302_vm1 }
 0x33d   : > { %19209 = vst [vmem:[#allocation112_spill] sm:$0xff] %v16206_v61  ;;  %v4829_v34 = vadd.f32 %v12622_v39, %v16059_v62  ;;  %12828 = vmatprep.mubr.msk.bf16.mxu1 %vm19211_vm11, %v6477_v60  ;;  %v19216_v39 = vld [vmem:[#allocation109_spill] sm:$0xff]  ;;  %vm19322_vm11 = vmmov %vm19302_vm1 }
 0x33e   : > { %v12656_v51 = vpop.f32.mrf.mxu0  ;;  %v4760_v46 = vpop.f32.mrf.mxu1 }
 0x33f   : > { %v16211_v8 = vadd.f32 %v12656_v51, %v4829_v34  ;;  %v4827_v4 = vadd.f32 %v4760_v46, %v16062_v41 }
 0x340   : > { %v5085_v38 = vpop.f32.mrf.mxu0  ;;  %v12623_v16 = vpop.f32.mrf.mxu1 }
 0x341   : > { %v16216_v57 = vadd.f32 %v5085_v38, %v4827_v4  ;;  %v4830_v44 = vadd.f32 %v12623_v16, %v16066_v10  ;;  %v6463_v10 = vsel %vm19081_vm8, %v6431_v22, 0.0  ;;  %vm19220_vm8 = vmmov %vm19199_vm2 }
 0x342   : > { %v12657_v31 = vpop.f32.mrf.mxu0  ;;  %v16219_v62 = vpop.f32.mrf.mxu1  ;;  %v6480_v48 = vpack.c.bf16 %v6463_v10, %v6430_v12  ;;  %vm19247_vm2 = vmmov %vm19229_vm5 }
 0x343   : > { %19213 = vst [vmem:[#allocation17_spill] sm:$0xff] %v16219_v62  ;;  %v16221_v58 = vadd.f32 %v12657_v31, %v4830_v44  ;;  %vm19248_vm0 = vmmov %vm19247_vm2 }
 0x344   : > { %v16223_v0 = vpop.f32.mrf.mxu0  ;;  %v12626_v41 = vpop.f32.mrf.mxu1  ;;  %12829 = vmatmul.mubr.msk.bf16.gmra.mxu1 %vm19215_vm3, %v6478_v3  ;;  %vm19272_vm4 = vmmov %vm19248_vm0 }
 0x345   : > { %19214 = vst [vmem:[#allocation54_spill] sm:$0xff] %v16223_v0  ;;  %v4833_v24 = vadd.f32 %v12626_v41, %v16076_v14  ;;  %12832 = vmatprep.mubr.msk.bf16.mxu1 %vm19217_vm10, %v19216_v39  ;;  %vm19276_vm6 = vmmov %vm19248_vm0 }
 0x346   : > { %v12660_v60 = vpop.f32.mrf.mxu0  ;;  %v4776_v34 = vpop.f32.mrf.mxu1  ;;  %vm19334_vm3 = vmmov %vm19302_vm1 }
 0x347   : > { %v16231_v51 = vadd.f32 %v12660_v60, %v4833_v24  ;;  %v4831_v46 = vadd.f32 %v4776_v34, %v16082_v26  ;;  %vm19339_vm10 = vmmov %vm19302_vm1 }
 0x348   : > { %v5101_v4 = vpop.f32.mrf.mxu0  ;;  %v12627_v38 = vpop.f32.mrf.mxu1 }
 0x349   : > { %v16234_v5 = vadd.f32 %v5101_v4, %v4831_v46  ;;  %v4834_v14 = vadd.f32 %v12627_v38, %v16086_v59 }
 0x34a   : > { %v12661_v16 = vpop.f32.mrf.mxu0  ;;  %v16237_v44 = vpop.f32.mrf.mxu1 }
 0x34b   : > { %19218 = vst [vmem:[#allocation78_spill] sm:$0xff] %v16237_v44  ;;  %v16239_v31 = vadd.f32 %v12661_v16, %v4834_v14 }
 0x34c   : > { %v16241_v3 = vpop.f32.mrf.mxu0  ;;  %v12630_v29 = vpop.f32.mrf.mxu1  ;;  %12833 = vmatmul.mubr.msk.bf16.gmra.mxu1 %vm19220_vm8, %v6480_v48  ;;  %vm19345_vm8 = vmmov %vm19302_vm1 }
 0x34d   : > { %19219 = vst [vmem:[#allocation62_spill] sm:$0xff] %v16241_v3  ;;  %v4837_v22 = vadd.f32 %v12630_v29, %v16095_v27 }
 0x34e   : > { %v12664_v26 = vpop.f32.mrf.mxu0  ;;  %v4792_v41 = vpop.f32.mrf.mxu1 }
 0x34f   : > { %v16245_v24 = vadd.f32 %v12664_v26, %v4837_v22  ;;  %v4835_v60 = vadd.f32 %v4792_v41, %v16099_v21 }
 0x350   : > { %v5117_v39 = vpop.f32.mrf.mxu0  ;;  %v12631_v59 = vpop.f32.mrf.mxu1 }
 0x351   : > { %v16248_v12 = vadd.f32 %v5117_v39, %v4835_v60  ;;  %v4838_v10 = vadd.f32 %v12631_v59, %v16103_v36 }
 0x352   : > { %v12665_v34 = vpop.f32.mrf.mxu0  ;;  %v16251_v46 = vpop.f32.mrf.mxu1 }
 0x353   : > { %19221 = vst [vmem:[#allocation63_spill] sm:$0xff] %v16251_v46  ;;  %v16253_v4 = vadd.f32 %v12665_v34, %v4838_v10 }
 0x354   : > { %v16255_v38 = vpop.f32.mrf.mxu0  ;;  %v12670_v27 = vpop.f32.mrf.mxu1 }
 0x355   : > { %19222 = vst [vmem:[#allocation113_spill] sm:$0xff] %v16255_v38  ;;  %v16258_v48 = vadd.f32 %v12670_v27, %v16112_v49 }
 0x356   : > { %v16260_v14 = vpop.f32.mrf.mxu0  ;;  %v5298_v21 = vpop.f32.mrf.mxu1 }
 0x357   : > { %v16263_v16 = vadd.f32 %v5298_v21, %v16119_v50 }
 0x358   : > { %v16265_v29 = vpop.f32.mrf.mxu0  ;;  %v12671_v36 = vpop.f32.mrf.mxu1 }
 0x359   : > { %v16268_v22 = vadd.f32 %v12671_v36, %v16122_v2 }
 0x35a   : > { %v16270_v26 = vpop.f32.mrf.mxu0  ;;  %v16272_v41 = vpop.f32.mrf.mxu1 }
 0x35c   : > { %v16274_v60 = vpop.f32.mrf.mxu0  ;;  %v12674_v49 = vpop.f32.mrf.mxu1 }
 0x35d   : > { %v16277_v39 = vadd.f32 %v12674_v49, %v16132_v45 }
 0x35e   : > { %v16279_v59 = vpop.f32.mrf.mxu0  ;;  %v5314_v50 = vpop.f32.mrf.mxu1 }
 0x35f   : > { %v16282_v10 = vadd.f32 %v5314_v50, %v16139_v19 }
 0x360   : > { %v16284_v34 = vpop.f32.mrf.mxu0  ;;  %v12675_v2 = vpop.f32.mrf.mxu1 }
 0x361   : > { %v16287_v27 = vadd.f32 %v12675_v2, %v16142_v37 }
 0x362   : > { %v16289_v21 = vpop.f32.mrf.mxu0  ;;  %v16291_v36 = vpop.f32.mrf.mxu1 }
 0x364   : > { %v16293_v25 = vpop.f32.mrf.mxu0  ;;  %v12678_v45 = vpop.f32.mrf.mxu1 }
 0x365   : > { %v16296_v49 = vadd.f32 %v12678_v45, %v16152_v54 }
 0x366   : > { %v16298_v38 = vpop.f32.mrf.mxu0  ;;  %v5330_v19 = vpop.f32.mrf.mxu1 }
 0x367   : > { %v16301_v50 = vadd.f32 %v5330_v19, %v16159_v1 }
 0x368   : > { %v16303_v46 = vpop.f32.mrf.mxu0  ;;  %v12679_v37 = vpop.f32.mrf.mxu1 }
 0x369   : > { %v16306_v2 = vadd.f32 %v12679_v37, %v16162_v7  ;;  %v6995_v7 = vld [vmem:[%s18078_s5 + $0x4] sm:$0xf] }
 0x36a   : > { %v16308_v3 = vpop.f32.mrf.mxu0  ;;  %v16310_v0 = vpop.f32.mrf.mxu1  ;;  %13241 = vmatprep.subr.msk.bf16.mxu0 %vm19229_vm5, %v6995_v7  ;;  %vm19353_vm5 = vmmov %vm19302_vm1 }
 0x36b   : > { %19223 = vst [vmem:[#allocation125_spill] sm:$0xff] %v16308_v3 }
 0x36c   : > { %v16312_v44 = vpop.f32.mrf.mxu0  ;;  %v12682_v54 = vpop.f32.mrf.mxu1 }
 0x36d   : > { %19224 = vst [vmem:[#allocation79_spill] sm:$0xff] %v16312_v44  ;;  %v16315_v45 = vadd.f32 %v12682_v54, %v16172_v56  ;;  %v7013_v44 = vsel %vm19230_vm12, %v6995_v7, 0  ;;  %vm19354_vm12 = vmmov %vm19302_vm1 }
 0x36e   : > { %v16317_v61 = vpop.f32.mrf.mxu0  ;;  %v5346_v1 = vpop.f32.mrf.mxu1  ;;  %12837 = vmatpush3.bf16.msra.mxu0 %v7013_v44 }
 0x36f   : > { %19225 = vst [vmem:[#allocation75_spill] sm:$0xff] %v16315_v45  ;;  %19226 = vst [vmem:[#allocation84_spill] sm:$0xff] %v16317_v61  ;;  %v16320_v19 = vadd.f32 %v5346_v1, %v16179_v6 }
 0x370   : > { %v16322_v62 = vpop.f32.mrf.mxu0  ;;  %v12683_v37 = vpop.f32.mrf.mxu1 }
 0x371   : > { %19227 = vst [vmem:[#allocation128_spill] sm:$0xff] %v16320_v19  ;;  %19228 = vst [vmem:[#allocation115_spill] sm:$0xff] %v16322_v62  ;;  %v16330_v56 = vadd.f32 %v12683_v37, %v16182_v55 }
 0x372   : > { %v16332_v54 = vpop.f32.mrf.mxu0  ;;  %v16334_v61 = vpop.f32.mrf.mxu1 }
 0x373   : > { %19231 = vst [vmem:[#allocation116_spill] sm:$0xff] %v16330_v56  ;;  %19232 = vst [vmem:[#allocation118_spill] sm:$0xff] %v16332_v54 }
 0x374   : > { %19233 = vst [vmem:[#allocation21_spill] sm:$0xff] %v16334_v61  ;;  %v16336_v6 = vpop.f32.mrf.mxu0  ;;  %v12686_v1 = vpop.f32.mrf.mxu1 }
 0x375   : > { %19234 = vst [vmem:[#allocation85_spill] sm:$0xff] %v16336_v6  ;;  %v16339_v62 = vadd.f32 %v12686_v1, %v16192_v15 }
 0x376   : > { %v16341_v19 = vpop.f32.mrf.mxu0  ;;  %v5362_v45 = vpop.f32.mrf.mxu1 }
 0x377   : > { %19235 = vst [vmem:[#allocation86_spill] sm:$0xff] %v16339_v62  ;;  %19236 = vst [vmem:[#allocation87_spill] sm:$0xff] %v16341_v19  ;;  %v16344_v11 = vadd.f32 %v5362_v45, %v16199_v9 }
 0x378   : > { %v16346_v7 = vpop.f32.mrf.mxu0  ;;  %v12687_v55 = vpop.f32.mrf.mxu1 }
 0x379   : > { %19237 = vst [vmem:[#allocation88_spill] sm:$0xff] %v16344_v11  ;;  %19238 = vst [vmem:[#allocation119_spill] sm:$0xff] %v16346_v7  ;;  %v16349_v37 = vadd.f32 %v12687_v55, %v16204_v20  ;;  %v6982_v20 = vld [vmem:[%s18078_s5] sm:$0xf]  ;;  %v16457_v11 = vld [vmem:[%s18078_s5 + $0xc] sm:$0xf] }
 0x37a   : > { %v16351_v44 = vpop.f32.mrf.mxu0  ;;  %v16353_v54 = vpop.f32.mrf.mxu1  ;;  %13242 = vmatprep.subr.msk.bf16.mxu1 %vm19247_vm2, %v6982_v20  ;;  %19274 = vst [vmem:[#allocation64_spill] sm:$0xff] %v16457_v11  ;;  %vm19358_vm2 = vmmov %vm19302_vm1 }
 0x37b   : > { %19239 = vst [vmem:[#allocation91_spill] sm:$0xff] %v16349_v37  ;;  %19240 = vst [vmem:[#allocation89_spill] sm:$0xff] %v16351_v44 }
 0x37c   : > { %19241 = vst [vmem:[#allocation90_spill] sm:$0xff] %v16353_v54  ;;  %v16355_v6 = vpop.f32.mrf.mxu0  ;;  %v12690_v15 = vpop.f32.mrf.mxu1 }
 0x37d   : > { %19242 = vst [vmem:[#allocation120_spill] sm:$0xff] %v16355_v6  ;;  %v16358_v1 = vadd.f32 %v12690_v15, %v16211_v8  ;;  %v7093_v6 = vsel %vm19248_vm0, %v6982_v20, 0 }
 0x37e   : > { %v16360_v19 = vpop.f32.mrf.mxu0  ;;  %v5378_v9 = vpop.f32.mrf.mxu1  ;;  %12847 = vmatpush3.bf16.msra.mxu1 %v7093_v6 }
 0x37f   : > { %19243 = vst [vmem:[#allocation121_spill] sm:$0xff] %v16358_v1  ;;  %19244 = vst [vmem:[#allocation24_spill] sm:$0xff] %v16360_v19  ;;  %v16363_v45 = vadd.f32 %v5378_v9, %v16216_v57  ;;  %13244 = vmatprep.subr.msk.bf16.mxu1 %vm19276_vm6, %v16457_v11 }
 0x380   : > { %v16365_v7 = vpop.f32.mrf.mxu0  ;;  %v12691_v55 = vpop.f32.mrf.mxu1 }
 0x381   : > { %19245 = vst [vmem:[#allocation123_spill] sm:$0xff] %v16363_v45  ;;  %19246 = vst [vmem:[#allocation25_spill] sm:$0xff] %v16365_v7  ;;  %v16373_v8 = vadd.f32 %v12691_v55, %v16221_v58 }
 0x382   : > { %v16375_v15 = vpop.f32.mrf.mxu0  ;;  %v16377_v19 = vpop.f32.mrf.mxu1 }
 0x383   : > { %19249 = vst [vmem:[#allocation92_spill] sm:$0xff] %v16373_v8  ;;  %19250 = vst [vmem:[#allocation124_spill] sm:$0xff] %v16375_v15 }
 0x384   : > { %19251 = vst [vmem:[#allocation93_spill] sm:$0xff] %v16377_v19  ;;  %v16379_v57 = vpop.f32.mrf.mxu0  ;;  %v12694_v9 = vpop.f32.mrf.mxu1 }
 0x385   : > { %19252 = vst [vmem:[#allocation94_spill] sm:$0xff] %v16379_v57  ;;  %v16382_v7 = vadd.f32 %v12694_v9, %v16231_v51 }
 0x386   : > { %v16384_v45 = vpop.f32.mrf.mxu0  ;;  %v5394_v1 = vpop.f32.mrf.mxu1 }
 0x387   : > { %19253 = vst [vmem:[#allocation99_spill] sm:$0xff] %v16382_v7  ;;  %19254 = vst [vmem:[#allocation126_spill] sm:$0xff] %v16384_v45  ;;  %v16387_v44 = vadd.f32 %v5394_v1, %v16234_v5  ;;  %v16444_v7 = vld [vmem:[%s18078_s5 + $0x8] sm:$0xf] }
 0x388   : > { %v16389_v20 = vpop.f32.mrf.mxu0  ;;  %v12695_v58 = vpop.f32.mrf.mxu1  ;;  %19270 = vst [vmem:[#allocation73_spill] sm:$0xff] %v16444_v7  ;;  %13243 = vmatprep.subr.msk.bf16.mxu0 %vm19272_vm4, %v16444_v7  ;;  %vm19365_vm4 = vmmov %vm19302_vm1 }
 0x389   : > { %19255 = vst [vmem:[#allocation127_spill] sm:$0xff] %v16387_v44  ;;  %19256 = vst [vmem:[#allocation28_spill] sm:$0xff] %v16389_v20  ;;  %v16392_v55 = vadd.f32 %v12695_v58, %v16239_v31 }
 0x38a   : > { %v16394_v6 = vpop.f32.mrf.mxu0  ;;  %v16396_v15 = vpop.f32.mrf.mxu1 }
 0x38b   : > { %19257 = vst [vmem:[#allocation129_spill] sm:$0xff] %v16392_v55  ;;  %19258 = vst [vmem:[#allocation29_spill] sm:$0xff] %v16394_v6 }
 0x38c   : > { %19259 = vst [vmem:[#allocation130_spill] sm:$0xff] %v16396_v15  ;;  %v16398_v57 = vpop.f32.mrf.mxu0  ;;  %v12698_v51 = vpop.f32.mrf.mxu1 }
 0x38d   : > { %19260 = vst [vmem:[#allocation95_spill] sm:$0xff] %v16398_v57  ;;  %v16401_v9 = vadd.f32 %v12698_v51, %v16245_v24 }
 0x38e   : > { %v16403_v45 = vpop.f32.mrf.mxu0  ;;  %v5410_v5 = vpop.f32.mrf.mxu1 }
 0x38f   : > { %19261 = vst [vmem:[#allocation96_spill] sm:$0xff] %v16401_v9  ;;  %19262 = vst [vmem:[#allocation97_spill] sm:$0xff] %v16403_v45  ;;  %v16406_v1 = vadd.f32 %v5410_v5, %v16248_v12 }
 0x390   : > { %v16408_v20 = vpop.f32.mrf.mxu0  ;;  %v12699_v31 = vpop.f32.mrf.mxu1 }
 0x391   : > { %19263 = vst [vmem:[#allocation98_spill] sm:$0xff] %v16406_v1  ;;  %19264 = vst [vmem:[#allocation100_spill] sm:$0xff] %v16408_v20  ;;  %v16411_v58 = vadd.f32 %v12699_v31, %v16253_v4 }
 0x392   : > { %v16413_v6 = vpop.f32.mrf.mxu0  ;;  %v16415_v55 = vpop.f32.mrf.mxu1 }
 0x393   : > { %19265 = vst [vmem:[#allocation131_spill] sm:$0xff] %v16411_v58  ;;  %19266 = vst [vmem:[#allocation33_spill] sm:$0xff] %v16413_v6 }
 0x394   : > { %19267 = vst [vmem:[#allocation67_spill] sm:$0xff] %v16415_v55  ;;  %v16417_v57 = vpop.f32.mrf.mxu0  ;;  %v12738_v24 = vpop.f32.mrf.mxu1 }
 0x395   : > { %19268 = vst [vmem:[#allocation35_spill] sm:$0xff] %v16417_v57 }
 0x396   : > { %v12772_v51 = vpop.f32.mrf.mxu0  ;;  %v5948_v9 = vpop.f32.mrf.mxu1 }
 0x398   : > { %v16419_v45 = vpop.f32.mrf.mxu0  ;;  %v12739_v44 = vpop.f32.mrf.mxu1 }
 0x39a   : > { %v5951_v12 = vpop.f32.mrf.mxu1  ;;  %v16421_v5 = vpop.f32.mrf.mxu0 }
 0x39c   : > { %v16423_v20 = vpop.f32.mrf.mxu1  ;;  %v16427_v4 = vpop.f32.mrf.mxu0 }
 0x39e   : > { %v16425_v1 = vpop.f32.mrf.mxu1  ;;  %v16433_v57 = vpop.f32.mrf.mxu0 }
 0x3a0   : > { %v16429_v31 = vpop.f32.mrf.mxu1  ;;  %v16439_v15 = vpop.f32.mrf.mxu0 }
 0x3a2   : > { %v16431_v6 = vpop.f32.mrf.mxu1  ;;  %v16452_v37 = vpop.f32.mrf.mxu0 }
 0x3a4   : > { %v16435_v58 = vpop.f32.mrf.mxu1  ;;  %v16465_v56 = vpop.f32.mrf.mxu0 }
 0x3a5   : > { %19278 = vst [vmem:[#allocation80_spill] sm:$0xff] %v16465_v56 }
 0x3a6   : > { %v16437_v55 = vpop.f32.mrf.mxu1 }
 0x3a7   : > { %19269 = vst [vmem:[#allocation70_spill] sm:$0xff] %v16437_v55 }
 0x3a8   : > { %v16446_v8 = vpop.f32.mrf.mxu1 }
 0x3a9   : > { %19271 = vst [vmem:[#allocation50_spill] sm:$0xff] %v16446_v8 }
 0x3aa   : > { %v16450_v19 = vpop.f32.mrf.mxu1 }
 0x3ab   : > { %19273 = vst [vmem:[#allocation52_spill] sm:$0xff] %v16450_v19  ;;  %v16471_v19 = vpop.f32.mrf.mxu0 }
 0x3ac   : > { %v16459_v54 = vpop.f32.mrf.mxu1  ;;  %19281 = vst [vmem:[#allocation101_spill] sm:$0xff] %v16471_v19 }
 0x3ad   : > { %19275 = vst [vmem:[#allocation65_spill] sm:$0xff] %v16459_v54  ;;  %v16477_v55 = vpop.f32.mrf.mxu0 }
 0x3ae   : > { %v16463_v62 = vpop.f32.mrf.mxu1  ;;  %19284 = vst [vmem:[#allocation18_spill] sm:$0xff] %v16477_v55 }
 0x3af   : > { %19277 = vst [vmem:[#allocation34_spill] sm:$0xff] %v16463_v62  ;;  %v16483_v11 = vpop.f32.mrf.mxu0 }
 0x3b0   : > { %v16467_v61 = vpop.f32.mrf.mxu1  ;;  %19287 = vst [vmem:[#allocation42_spill] sm:$0xff] %v16483_v11 }
 0x3b1   : > { %19279 = vst [vmem:[#allocation81_spill] sm:$0xff] %v16467_v61  ;;  %v16489_v61 = vpop.f32.mrf.mxu0 }
 0x3b2   : > { %v16469_v7 = vpop.f32.mrf.mxu1 }
 0x3b3   : > { %19280 = vst [vmem:[#allocation56_spill] sm:$0xff] %v16469_v7 }
 0x3b4   : > { %v16473_v8 = vpop.f32.mrf.mxu1 }
 0x3b5   : > { %19282 = vst [vmem:[#allocation58_spill] sm:$0xff] %v16473_v8  ;;  %v16495_v8 = vpop.f32.mrf.mxu0 }
 0x3b6   : > { %v16475_v52 = vpop.f32.mrf.mxu1  ;;  %19292 = vst [vmem:[#allocation76_spill] sm:$0xff] %v16495_v8 }
 0x3b7   : > { %19283 = vst [vmem:[#allocation61_spill] sm:$0xff] %v16475_v52 }
 0x3b8   : > { %v16479_v54 = vpop.f32.mrf.mxu1 }
 0x3b9   : > { %19285 = vst [vmem:[#allocation82_spill] sm:$0xff] %v16479_v54  ;;  %v16501_v54 = vpop.f32.mrf.mxu0 }
 0x3ba   : > { %v16481_v3 = vpop.f32.mrf.mxu1  ;;  %19295 = vst [vmem:[#allocation32_spill] sm:$0xff] %v16501_v54 }
 0x3bb   : > { %19286 = vst [vmem:[#allocation30_spill] sm:$0xff] %v16481_v3 }
 0x3bc   : > { %v16485_v62 = vpop.f32.mrf.mxu1 }
 0x3bd   : > { %19288 = vst [vmem:[#allocation36_spill] sm:$0xff] %v16485_v62  ;;  %v16507_v62 = vpop.f32.mrf.mxu0 }
 0x3be   : > { %v16487_v56 = vpop.f32.mrf.mxu1  ;;  %19298 = vst [vmem:[#allocation68_spill] sm:$0xff] %v16507_v62 }
 0x3bf   : > { %19289 = vst [vmem:[#allocation27_spill] sm:$0xff] %v16487_v56  ;;  %v5133_v56 = vadd.f32 %v16127_v17, %v16125_v35  ;;  %v16520_v54 = vpop.f32.mrf.mxu0  ;;  %v5753_v35 = vadd.f32 %v16270_v26, %v16268_v22  ;;  %v16538_v22 = vld [vmem:[%s18077_s4] ss:$0 sm:$0xff] }
 0x3c0   : > { %v16491_v7 = vpop.f32.mrf.mxu1 }
 0x3c1   : > { %19290 = vst [vmem:[#allocation44_spill] sm:$0xff] %v16491_v7 }
 0x3c2   : > { %v16493_v19 = vpop.f32.mrf.mxu1 }
 0x3c3   : > { %19291 = vst [vmem:[#allocation111_spill] sm:$0xff] %v16493_v19  ;;  %v5752_v19 = vadd.f32 %v16260_v14, %v16258_v48  ;;  %v6078_v14 = vadd.f32 %v12739_v44, %v5753_v35  ;;  %v4455_v35 = vadd.f32 %v16054_v43, %v16052_v47  ;;  %v5141_v47 = vadd.f32 %v16167_v28, %v16165_v63 }
 0x3c4   : > { %v16497_v52 = vpop.f32.mrf.mxu1 }
 0x3c5   : > { %19293 = vst [vmem:[#allocation104_spill] sm:$0xff] %v16497_v52  ;;  %v5426_v52 = vadd.f32 %v16272_v41, %v5133_v56  ;;  %v16529_v41 = vpop.f32.mrf.mxu0  ;;  %v5434_v63 = vadd.f32 %v16310_v0, %v5141_v47  ;;  %v19305_v0 = vld [vmem:[#allocation125_spill] sm:$0xff]  ;;  %v19319_v47 = vld [vmem:[#allocation84_spill] sm:$0xff] }
 0x3c6   : > { %v16499_v55 = vpop.f32.mrf.mxu1 }
 0x3c7   : > { %19294 = vst [vmem:[#allocation49_spill] sm:$0xff] %v16499_v55  ;;  %v5750_v55 = vadd.f32 %v16265_v29, %v16263_v16  ;;  %v5137_v16 = vadd.f32 %v16147_v40, %v16145_v23  ;;  %v5756_v29 = vadd.f32 %v16279_v59, %v16277_v39  ;;  %v5754_v23 = vadd.f32 %v16284_v34, %v16282_v10  ;;  %v16546_v39 = vpop.f32.mrf.mxu0 }
 0x3c8   : > { %v16503_v3 = vpop.f32.mrf.mxu1  ;;  %v6371_v40 = vadd.f32 %v16421_v5, %v6078_v14 }
 0x3c9   : > { %19296 = vst [vmem:[#allocation72_spill] sm:$0xff] %v16503_v3  ;;  %v6077_v3 = vadd.f32 %v12738_v24, %v5752_v19  ;;  %v6075_v17 = vadd.f32 %v5948_v9, %v5750_v55  ;;  %v19300_v55 = vld [vmem:[#allocation12_spill] sm:$0xff] }
 0x3ca   : > { %v16505_v11 = vpop.f32.mrf.mxu1  ;;  %v6936_v9 = vand.u32 7, %v19300_v55 }
 0x3cb   : > { %19297 = vst [vmem:[#allocation74_spill] sm:$0xff] %v16505_v11  ;;  %v6370_v48 = vadd.f32 %v12772_v51, %v6077_v3  ;;  %v5430_v3 = vadd.f32 %v16291_v36, %v5137_v16 }
 0x3cc   : > { %v16511_v7 = vpop.f32.mrf.mxu1 }
 0x3cd   : > { %19299 = vst [vmem:[#allocation55_spill] sm:$0xff] %v16511_v7  ;;  %v5751_v7 = vadd.f32 %v16274_v60, %v5426_v52  ;;  %v6368_v52 = vadd.f32 %v16419_v45, %v6075_v17  ;;  %v6081_v60 = vadd.f32 %v16423_v20, %v5756_v29  ;;  %v5757_v45 = vadd.f32 %v16289_v21, %v16287_v27  ;;  %v16561_v21 = vpop.f32.mrf.mxu0 }
 0x3ce   : > { %v16516_v8 = vpop.f32.mrf.mxu1  ;;  %v6079_v20 = vadd.f32 %v16425_v1, %v5754_v23  ;;  %v5755_v17 = vadd.f32 %v16293_v25, %v5430_v3  ;;  %v4471_v29 = vadd.f32 %v16070_v42, %v16068_v18  ;;  %v5760_v25 = vadd.f32 %v16298_v38, %v16296_v49 }
 0x3cf   : > { %v6076_v19 = vadd.f32 %v5951_v12, %v5751_v7  ;;  %v19301_v12 = vld [vmem:[#allocation47_spill] sm:$0xff]  ;;  %v6082_v27 = vadd.f32 %v16429_v31, %v5757_v45  ;;  %v4487_v18 = vadd.f32 %v16090_v30, %v16088_v13  ;;  %v5758_v42 = vadd.f32 %v16303_v46, %v16301_v50  ;;  %v19306_v50 = vld [vmem:[#allocation80_spill] sm:$0xff]  ;;  %v19310_v45 = vld [vmem:[#allocation110_spill] sm:$0xff] }
 0x3d0   : > { %v16522_v11 = vpop.f32.mrf.mxu1  ;;  %v6937_v5 = vand.u32 7, %v19301_v12  ;;  %v6080_v43 = vadd.f32 %v16431_v6, %v5755_v17  ;;  %v6372_v31 = vadd.f32 %v16439_v15, %v6079_v20  ;;  %v6085_v28 = vadd.f32 %v16435_v58, %v5760_v25  ;;  %v16582_v15 = vpop.f32.mrf.mxu0  ;;  %v19313_v20 = vld [vmem:[#allocation101_spill] sm:$0xff] }
 0x3d1   : > { %v6369_v36 = vadd.f32 %v16427_v4, %v6076_v19  ;;  %v6375_v49 = vadd.f32 %v16452_v37, %v6082_v27  ;;  %v4503_v13 = vadd.f32 %v16107_v32, %v16105_v53  ;;  %v4824_v30 = vadd.f32 %v16202_v33, %v4455_v35  ;;  %v19307_v37 = vld [vmem:[#allocation70_spill] sm:$0xff]  ;;  %v19311_v53 = vld [vmem:[#allocation17_spill] sm:$0xff]  ;;  %v19312_v33 = vld [vmem:[#allocation79_spill] sm:$0xff] }
 0x3d2   : > { %v16527_v62 = vpop.f32.mrf.mxu1  ;;  %v5761_v46 = vadd.f32 %v19305_v0, %v16306_v2  ;;  %v6373_v58 = vadd.f32 %v19306_v50, %v6080_v43  ;;  %v4828_v32 = vadd.f32 %v19311_v53, %v4471_v29  ;;  %v6378_v2 = vadd.f32 %v19313_v20, %v6085_v28  ;;  %v16601_v35 = vpop.f32.mrf.mxu0  ;;  %v19316_v27 = vld [vmem:[#allocation112_spill] sm:$0xff]  ;;  %v19318_v29 = vld [vmem:[#allocation75_spill] sm:$0xff]  ;;  %v19323_v28 = vld [vmem:[#allocation54_spill] sm:$0xff] }
 0x3d3   : > { %v5764_v25 = vadd.f32 %v19319_v47, %v19318_v29  ;;  %v19320_v43 = vld [vmem:[#allocation52_spill] sm:$0xff]  ;;  %v19328_v50 = vld [vmem:[#allocation42_spill] sm:$0xff]  ;;  %v19473_v12 = vmov 0 }
 0x3d4   : > { %v12806_v56 = vpop.f32.mrf.mxu1 }
 0x3d5   : > { %v6695_v26 = vadd.f32 %v12806_v56, %v6370_v48  ;;  %v6374_v48 = vadd.f32 %v16433_v57, %v6081_v60 }
 0x3d6   : > { %v6566_v44 = vpop.f32.mrf.mxu1 }
 0x3d7   : > { %v6734_v59 = vadd.f32 %v16538_v22, %v6695_v26  ;;  %v6693_v7 = vadd.f32 %v6566_v44, %v6368_v52  ;;  %v6083_v44 = vadd.f32 %v19307_v37, %v5758_v42 }
 0x3d8   : > { %v12807_v24 = vpop.f32.mrf.mxu1 }
 0x3d9   : > { %v6766_v51 = vmax.f32 %v6734_v59, 0.0  ;;  %v6732_v10 = vadd.f32 %v16538_v22, %v6693_v7  ;;  %v6696_v34 = vadd.f32 %v12807_v24, %v6371_v40  ;;  %v19309_v7 = vld [vmem:[#allocation122_spill] sm:$0xff]  ;;  %v5759_v24 = vadd.f32 %v19312_v33, %v5434_v63 }
 0x3da   : > { %v6569_v14 = vpop.f32.mrf.mxu1 }
 0x3db   : > { %6798 = vst.msk [vmem:[#allocation4 + $0x10] sm:$0xff] %vm19302_vm1, %v6766_v51  ;;  %v6764_v1 = vmax.f32 %v6732_v10, 0.0  ;;  %v6735_v4 = vadd.f32 %v16538_v22, %v6696_v34  ;;  %v6694_v16 = vadd.f32 %v6569_v14, %v6369_v36  ;;  %v5145_v36 = vadd.f32 %v19310_v45, %v19309_v7  ;;  %v19314_v10 = vld [vmem:[#allocation50_spill] sm:$0xff]  ;;  %v19331_v7 = vld [vmem:[#allocation116_spill] sm:$0xff] }
 0x3dc   : > { %v12810_v57 = vpop.f32.mrf.mxu1  ;;  %v6086_v34 = vadd.f32 %v19314_v10, %v5761_v46  ;;  %v19332_v45 = vld [vmem:[#allocation118_spill] sm:$0xff] }
 0x3dd   : > { %6796 = vst.msk [vmem:[#allocation4] sm:$0xff] %vm19303_vm13, %v6764_v1  ;;  %v6767_v19 = vmax.f32 %v6735_v4, 0.0  ;;  %v6733_v56 = vadd.f32 %v16538_v22, %v6694_v16  ;;  %v6699_v52 = vadd.f32 %v12810_v57, %v6374_v48  ;;  %v5149_v1 = vadd.f32 %v19316_v27, %v4824_v30  ;;  %v19317_v4 = vld [vmem:[#allocation78_spill] sm:$0xff]  ;;  %v19327_v30 = vld [vmem:[#allocation65_spill] sm:$0xff]  ;;  %vm19374_vm13 = vmmov %vm19302_vm1 }
 0x3de   : > { %v6582_v38 = vpop.f32.mrf.mxu1  ;;  %v4832_v16 = vadd.f32 %v19317_v4, %v4487_v18  ;;  %v6084_v57 = vadd.f32 %v19320_v43, %v5759_v24  ;;  %v6089_v0 = vadd.f32 %v19327_v30, %v5764_v25  ;;  %v5765_v53 = vadd.f32 %v19332_v45, %v19331_v7  ;;  %v19336_v27 = vld [vmem:[#allocation85_spill] sm:$0xff]  ;;  %v19348_v7 = vld [vmem:[#allocation91_spill] sm:$0xff] }
 0x3df   : > { %6799 = vst.msk [vmem:[#allocation4 + $0x18] sm:$0xff] %vm19304_vm14, %v6767_v19  ;;  %v6765_v6 = vmax.f32 %v6733_v56, 0.0  ;;  %v6738_v26 = vadd.f32 %v16538_v22, %v6699_v52  ;;  %v6697_v3 = vadd.f32 %v6582_v38, %v6372_v31  ;;  %v19321_v19 = vld [vmem:[#allocation18_spill] sm:$0xff]  ;;  %v16614_v38 = vadd.f32 %v19323_v28, %v4828_v32  ;;  %v19349_v45 = vld [vmem:[#allocation89_spill] sm:$0xff]  ;;  %vm19375_vm14 = vmmov %vm19302_vm1 }
 0x3e0   : > { %v12811_v60 = vpop.f32.mrf.mxu1  ;;  %v6376_v56 = vadd.f32 %v19321_v19, %v6083_v44  ;;  %v19333_v32 = vld [vmem:[#allocation34_spill] sm:$0xff] }
 0x3e1   : > { %6797 = vst.msk [vmem:[#allocation4 + $0x8] sm:$0xff] %vm19308_vm7, %v6765_v6  ;;  %v6770_v23 = vmax.f32 %v6738_v26, 0.0  ;;  %v6736_v40 = vadd.f32 %v16538_v22, %v6697_v3  ;;  %v6700_v59 = vadd.f32 %v12811_v60, %v6375_v49  ;;  %v19324_v49 = vld [vmem:[#allocation128_spill] sm:$0xff]  ;;  %v19325_v6 = vld [vmem:[#allocation115_spill] sm:$0xff]  ;;  %v19326_v26 = vld [vmem:[#allocation21_spill] sm:$0xff]  ;;  %v16621_v60 = vpop.f32.mrf.mxu0 }
 0x3e2   : > { %v6585_v51 = vpop.f32.mrf.mxu1  ;;  %v5762_v18 = vadd.f32 %v19325_v6, %v19324_v49  ;;  %v5438_v3 = vadd.f32 %v19326_v26, %v5145_v36  ;;  %v6377_v36 = vadd.f32 %v16489_v61, %v6084_v57  ;;  %v19338_v61 = vld [vmem:[#allocation81_spill] sm:$0xff]  ;;  %v19342_v28 = vld [vmem:[#allocation90_spill] sm:$0xff]  ;;  %v19343_v6 = vld [vmem:[#allocation32_spill] sm:$0xff] }
 0x3e3   : > { %6802 = vst.msk [vmem:[#allocation4 + $0x30] sm:$0xff] %vm19315_vm15, %v6770_v23  ;;  %v6768_v17 = vmax.f32 %v6736_v40, 0.0  ;;  %v6739_v48 = vadd.f32 %v16538_v22, %v6700_v59  ;;  %v6698_v14 = vadd.f32 %v6585_v51, %v6373_v58  ;;  %v6379_v58 = vadd.f32 %v19328_v50, %v6086_v34  ;;  %v19330_v40 = vld [vmem:[#allocation62_spill] sm:$0xff]  ;;  %v16640_v57 = vpop.f32.mrf.mxu0  ;;  %v19344_v26 = vld [vmem:[#allocation56_spill] sm:$0xff]  ;;  %vm19379_vm7 = vmmov %vm19302_vm1 }
 0x3e4   : > { %v12814_v31 = vpop.f32.mrf.mxu1  ;;  %v16626_v59 = vadd.f32 %v19330_v40, %v4832_v16  ;;  %v6087_v33 = vadd.f32 %v19333_v32, %v5762_v18  ;;  %v5763_v4 = vadd.f32 %v19336_v27, %v5438_v3  ;;  %v19337_v16 = vld [vmem:[#allocation76_spill] sm:$0xff]  ;;  %v6090_v47 = vadd.f32 %v19338_v61, %v5765_v53  ;;  %vm19380_vm15 = vmmov %vm19302_vm1 }
 0x3e5   : > { %6800 = vst.msk [vmem:[#allocation4 + $0x20] sm:$0xff] %vm19322_vm11, %v6768_v17  ;;  %v6771_v52 = vmax.f32 %v6739_v48, 0.0  ;;  %v6737_v42 = vadd.f32 %v16538_v22, %v6698_v14  ;;  %v6703_v63 = vadd.f32 %v12814_v31, %v6378_v2  ;;  %v19335_v48 = vld [vmem:[#allocation63_spill] sm:$0xff]  ;;  %v6382_v29 = vadd.f32 %v19337_v16, %v6089_v0  ;;  %v19356_v16 = vld [vmem:[#allocation61_spill] sm:$0xff]  ;;  %vm19383_vm11 = vmmov %vm19302_vm1 }
 0x3e6   : > { %v6598_v46 = vpop.f32.mrf.mxu1  ;;  %v16635_v14 = vadd.f32 %v19335_v48, %v4503_v13  ;;  %v6844_v25 = vld [vmem:[#allocation4 + $0x10] ss:$2 sm:$0xff]  ;;  %v5442_v49 = vadd.f32 %v19342_v28, %v5149_v1  ;;  %v6380_v18 = vadd.f32 %v19343_v6, %v6087_v33  ;;  %v6088_v3 = vadd.f32 %v19344_v26, %v5763_v4  ;;  %v6847_v30 = vld [vmem:[#allocation4 + $0x11] ss:$2 sm:$0xff]  ;;  %v19350_v1 = vld [vmem:[#allocation58_spill] sm:$0xff] }
 0x3e7   : > { %6803 = vst.msk [vmem:[#allocation4 + $0x38] sm:$0xff] %vm19329_vm9, %v6771_v52  ;;  %v6769_v37 = vmax.f32 %v6737_v42, 0.0  ;;  %v6742_v44 = vadd.f32 %v16538_v22, %v6703_v63  ;;  %v6701_v23 = vadd.f32 %v6598_v46, %v6376_v56  ;;  %v19340_v42 = vld [vmem:[#allocation86_spill] sm:$0xff]  ;;  %v19341_v13 = vld [vmem:[#allocation87_spill] sm:$0xff]  ;;  %v5769_v53 = vadd.f32 %v19349_v45, %v19348_v7  ;;  %v19355_v48 = vld [vmem:[#allocation120_spill] sm:$0xff] }
 0x3e8   : > { %v6839_v24 = vld [vmem:[#allocation4] ss:$2 sm:$0xff]  ;;  %v6841_v20 = vld [vmem:[#allocation4 + $0x1] ss:$2 sm:$0xff]  ;;  %v12815_v2 = vpop.f32.mrf.mxu1  ;;  %v5768_v63 = vadd.f32 %v19341_v13, %v19340_v42  ;;  %v19351_v33 = vld [vmem:[#allocation11_spill] sm:$0xff]  ;;  %v5767_v27 = vadd.f32 %v19355_v48, %v5442_v49  ;;  %v6381_v4 = vadd.f32 %v16520_v54, %v6088_v3  ;;  %v19362_v3 = vmov 0 }
 0x3e9   : > { %v6842_v51 = vmax.f32 %v6839_v24, %v6841_v20  ;;  %6801 = vst.msk [vmem:[#allocation4 + $0x28] sm:$0xff] %vm19334_vm3, %v6769_v37  ;;  %v6774_v10 = vmax.f32 %v6742_v44, 0.0  ;;  %v6740_v34 = vadd.f32 %v16538_v22, %v6701_v23  ;;  %v6704_v17 = vadd.f32 %v12815_v2, %v6379_v58  ;;  %v19346_v44 = vld [vmem:[#allocation88_spill] sm:$0xff]  ;;  %v19347_v23 = vld [vmem:[#allocation119_spill] sm:$0xff]  ;;  %v19359_v13 = vld [vmem:[#allocation121_spill] sm:$0xff] }
 0x3ea   : > { %v6601_v43 = vpop.f32.mrf.mxu1  ;;  %v5766_v40 = vadd.f32 %v19347_v23, %v19346_v44  ;;  %v6934_v24 = vand.u32 7, %v19351_v33  ;;  %v19352_v20 = vld [vmem:[#allocation68_spill] sm:$0xff]  ;;  %v19361_v54 = vld [vmem:[#allocation82_spill] sm:$0xff]  ;;  %v19367_v44 = vld [vmem:[#allocation25_spill] sm:$0xff]  ;;  %vm16737_vm3 = vcmp.ge.s32.totalorder %v6936_v9, 1 }
 0x3eb   : > { %v6845_v31 = vmax.f32 %v6842_v51, %v6844_v25  ;;  %6806 = vst.msk [vmem:[#allocation4 + $0x50] sm:$0xff] %vm19339_vm10, %v6774_v10  ;;  %v6772_v19 = vmax.f32 %v6740_v34, 0.0  ;;  %v6743_v56 = vadd.f32 %v16538_v22, %v6704_v17  ;;  %v6702_v52 = vadd.f32 %v6601_v43, %v6377_v36  ;;  %v16658_v51 = vpop.f32.mrf.mxu0  ;;  %v19368_v7 = vld [vmem:[#allocation30_spill] sm:$0xff]  ;;  %vm19388_vm9 = vmmov %vm19302_vm1 }
 0x3ec   : > { %v12818_v0 = vpop.f32.mrf.mxu1  ;;  %v6093_v36 = vadd.f32 %v19350_v1, %v5768_v63  ;;  %v6383_v2 = vadd.f32 %v19352_v20, %v6090_v47  ;;  %v19357_v47 = vld [vmem:[#allocation40_spill] sm:$0xff]  ;;  %v6094_v6 = vadd.f32 %v19361_v54, %v5769_v53  ;;  %vm16675_vm0 = vcmp.ge.s32.totalorder %v6934_v24, 1  ;;  %vm19392_vm10 = vmmov %vm19302_vm1 }
 0x3ed   : > { %v6848_v46 = vmax.f32 %v6845_v31, %v6847_v30  ;;  %6804 = vst.msk [vmem:[#allocation4 + $0x40] sm:$0xff] %vm19345_vm8, %v6772_v19  ;;  %v6775_v50 = vmax.f32 %v6743_v56, 0.0  ;;  %v6741_v58 = vadd.f32 %v16538_v22, %v6702_v52  ;;  %v6707_v37 = vadd.f32 %v12818_v0, %v6382_v29  ;;  %v19360_v63 = vld [vmem:[#allocation24_spill] sm:$0xff]  ;;  %v16679_v30 = vpop.f32.mrf.mxu0  ;;  %vm19399_vm8 = vmmov %vm19302_vm1 }
 0x3ee   : > { %v6614_v32 = vpop.f32.mrf.mxu1  ;;  %v6091_v29 = vadd.f32 %v19356_v16, %v5766_v40  ;;  %v6935_v31 = vand.u32 7, %v19357_v47  ;;  %v5772_v28 = vadd.f32 %v19360_v63, %v19359_v13  ;;  %v6386_v49 = vadd.f32 %v16529_v41, %v6093_v36  ;;  %v6942_v41 = vld [vmem:[#allocation5] sm:$0xff]  ;;  %v6859_v53 = vld [vmem:[#allocation4 + $0x31] ss:$2 sm:$0xff] }
 0x3ef   : > { %6849 = vst.msk [vmem:[#allocation5 + $0x9] sm:$0xff] %vm19353_vm5, %v6848_v46  ;;  %v6773_v10 = vmax.f32 %v6741_v58, 0.0  ;;  %v6746_v34 = vadd.f32 %v16538_v22, %v6707_v37  ;;  %v6705_v17 = vadd.f32 %v6614_v32, %v6380_v18  ;;  %v6856_v18 = vld [vmem:[#allocation4 + $0x30] ss:$2 sm:$0xff]  ;;  %v19363_v3 = vsel %vm16675_vm0, 4294967295, %v19362_v3  ;;  %v6987_v36 = vld [vmem:[#allocation5 + $0x1] sm:$0xff]  ;;  %vm19400_vm5 = vmmov %vm19302_vm1 }
 0x3f0   : > { %6807 = vst.msk [vmem:[#allocation4 + $0x58] sm:$0xff] %vm19354_vm12, %v6775_v50  ;;  %v6851_v61 = vld [vmem:[#allocation4 + $0x20] ss:$2 sm:$0xff]  ;;  %v6853_v25 = vld [vmem:[#allocation4 + $0x21] ss:$2 sm:$0xff]  ;;  %v12819_v43 = vpop.f32.mrf.mxu1  ;;  %19364 = vst [vmem:[#allocation41_spill] sm:$0xff] %v19363_v3  ;;  %v6384_v40 = vadd.f32 %v16546_v39, %v6091_v29  ;;  %v6092_v45 = vadd.f32 %v19368_v7, %v5767_v27  ;;  %v6387_v48 = vadd.f32 %v16561_v21, %v6094_v6 }
 0x3f1   : > { %v6854_v19 = vmax.f32 %v6851_v61, %v6853_v25  ;;  %6805 = vst.msk [vmem:[#allocation4 + $0x48] sm:$0xff] %vm19358_vm2, %v6773_v10  ;;  %v6778_v56 = vmax.f32 %v6746_v34, 0.0  ;;  %v6744_v52 = vadd.f32 %v16538_v22, %v6705_v17  ;;  %v6708_v42 = vadd.f32 %v12819_v43, %v6383_v2  ;;  %v19366_v37 = vld [vmem:[#allocation123_spill] sm:$0xff]  ;;  %v19372_v39 = vld [vmem:[#allocation93_spill] sm:$0xff]  ;;  %v19373_v27 = vld [vmem:[#allocation36_spill] sm:$0xff]  ;;  %v16703_v25 = vpop.f32.mrf.mxu0 }
 0x3f2   : > { %v6617_v26 = vpop.f32.mrf.mxu1  ;;  %v5770_v23 = vadd.f32 %v19367_v44, %v19366_v37  ;;  %vm16689_vm6 = vcmp.ge.s32.totalorder %v6935_v31, 1  ;;  %v19369_v32 = vmov 0  ;;  %v5446_v17 = vadd.f32 %v19372_v39, %v16614_v38  ;;  %v19382_v44 = vld [vmem:[#allocation44_spill] sm:$0xff]  ;;  %vm19405_vm12 = vmmov %vm19302_vm1 }
 0x3f3   : > { %v6857_v0 = vmax.f32 %v6854_v19, %v6856_v18  ;;  %6810 = vst.msk [vmem:[#allocation4 + $0x70] sm:$0xff] %vm19365_vm4, %v6778_v56  ;;  %v6776_v46 = vmax.f32 %v6744_v52, 0.0  ;;  %v6747_v50 = vadd.f32 %v16538_v22, %v6708_v42  ;;  %v6706_v58 = vadd.f32 %v6617_v26, %v6381_v4  ;;  %v19376_v52 = vld [vmem:[#allocation92_spill] sm:$0xff]  ;;  %vm19410_vm2 = vmmov %vm19302_vm1 }
 0x3f4   : > { %v12822_v1 = vpop.f32.mrf.mxu1  ;;  %v19370_v32 = vsel %vm16689_vm6, 4294967295, %v19369_v32  ;;  %v6097_v4 = vadd.f32 %v19373_v27, %v5772_v28  ;;  %v6974_v61 = vsel %vm16675_vm0, %v6942_v41, 0.0  ;;  %v19377_v42 = vld [vmem:[#allocation124_spill] sm:$0xff]  ;;  %v6385_v63 = vadd.f32 %v16582_v15, %v6092_v45  ;;  %v19378_v28 = vld [vmem:[#allocation27_spill] sm:$0xff]  ;;  %v19381_v41 = vld [vmem:[#allocation94_spill] sm:$0xff] }
 0x3f5   : > { %19371 = vst [vmem:[#allocation37_spill] sm:$0xff] %v19370_v32  ;;  %v6860_v20 = vmax.f32 %v6857_v0, %v6859_v53  ;;  %6808 = vst.msk [vmem:[#allocation4 + $0x60] sm:$0xff] %vm19302_vm1, %v6776_v46  ;;  %v6779_v2 = vmax.f32 %v6747_v50, 0.0  ;;  %v6745_v10 = vadd.f32 %v16538_v22, %v6706_v58  ;;  %v6711_v34 = vadd.f32 %v12822_v1, %v6386_v49  ;;  %v16724_v53 = vpop.f32.mrf.mxu0  ;;  %v19387_v27 = vld [vmem:[#allocation111_spill] sm:$0xff] }
 0x3f6   : > { %v6630_v16 = vpop.f32.mrf.mxu1  ;;  %v16699_v29 = vld [vmem:[#allocation5 + $0x9] sm:$0xff]  ;;  %v5773_v13 = vadd.f32 %v19377_v42, %v19376_v52  ;;  %v6095_v49 = vadd.f32 %v19378_v28, %v5770_v23  ;;  %v5771_v15 = vadd.f32 %v19381_v41, %v5446_v17  ;;  %v6390_v37 = vadd.f32 %v16601_v35, %v6097_v4  ;;  %v19396_v28 = vld [vmem:[#allocation129_spill] sm:$0xff] }
 0x3f7   : > { %6861 = vst.msk [vmem:[#allocation5 + $0x11] sm:$0xff] %vm19374_vm13, %v6860_v20  ;;  %v6777_v43 = vmax.f32 %v6745_v10, 0.0  ;;  %v6750_v19 = vadd.f32 %v16538_v22, %v6711_v34  ;;  %v6709_v38 = vadd.f32 %v6630_v16, %v6384_v40  ;;  %v6996_v21 = vpack.c.bf16 %v16699_v29, %v6987_v36  ;;  %v16709_v56 = vld [vmem:[#allocation5 + $0x8] sm:$0xff]  ;;  %v6868_v40 = vld [vmem:[#allocation4 + $0x50] ss:$2 sm:$0xff] }
 0x3f8   : > { %6811 = vst.msk [vmem:[#allocation4 + $0x78] sm:$0xff] %vm19375_vm14, %v6779_v2  ;;  %v6863_v54 = vld [vmem:[#allocation4 + $0x40] ss:$2 sm:$0xff]  ;;  %v6865_v6 = vld [vmem:[#allocation4 + $0x41] ss:$2 sm:$0xff]  ;;  %v12823_v18 = vpop.f32.mrf.mxu1  ;;  %v6975_v26 = vsel %vm16689_vm6, %v16709_v56, 0.0  ;;  %v6098_v23 = vadd.f32 %v19382_v44, %v5773_v13  ;;  %v6096_v4 = vadd.f32 %v19387_v27, %v5771_v15  ;;  %vm19421_vm14 = vmmov %vm19302_vm1 }
 0x3f9   : > { %v6866_v0 = vmax.f32 %v6863_v54, %v6865_v6  ;;  %6809 = vst.msk [vmem:[#allocation4 + $0x68] sm:$0xff] %vm19379_vm7, %v6777_v43  ;;  %v6782_v46 = vmax.f32 %v6750_v19, 0.0  ;;  %v6748_v50 = vadd.f32 %v16538_v22, %v6709_v38  ;;  %v6712_v58 = vadd.f32 %v12823_v18, %v6387_v48  ;;  %12838 = vmatprep.mubr.msk.bf16.mxu0 %vm19380_vm15, %v6996_v21  ;;  %v19384_v10 = vld [vmem:[#allocation99_spill] sm:$0xff]  ;;  %v19385_v34 = vld [vmem:[#allocation126_spill] sm:$0xff]  ;;  %v19395_v13 = vld [vmem:[#allocation28_spill] sm:$0xff] }
 0x3fa   : > { %v6633_v7 = vpop.f32.mrf.mxu1  ;;  %v6983_v45 = vpack.c.bf16 %v6975_v26, %v6974_v61  ;;  %v5776_v39 = vadd.f32 %v19385_v34, %v19384_v10  ;;  %v19386_v17 = vld [vmem:[#allocation130_spill] sm:$0xff]  ;;  %v6388_v48 = vadd.f32 %v16621_v60, %v6095_v49  ;;  %v6871_v16 = vld [vmem:[#allocation4 + $0x51] ss:$2 sm:$0xff]  ;;  %v19389_v43 = vmov 0  ;;  %v19393_v60 = vld [vmem:[#allocation113_spill] sm:$0xff] }
 0x3fb   : > { %v6869_v1 = vmax.f32 %v6866_v0, %v6868_v40  ;;  %6814 = vst.msk [vmem:[#allocation4 + $0x90] sm:$0xff] %vm19383_vm11, %v6782_v46  ;;  %v6780_v36 = vmax.f32 %v6748_v50, 0.0  ;;  %v6751_v20 = vadd.f32 %v16538_v22, %v6712_v58  ;;  %v6710_v2 = vadd.f32 %v6633_v7, %v6385_v63  ;;  %v19394_v42 = vld [vmem:[#allocation127_spill] sm:$0xff]  ;;  %v19397_v49 = vld [vmem:[#allocation29_spill] sm:$0xff]  ;;  %v19398_v6 = vld [vmem:[#allocation104_spill] sm:$0xff]  ;;  %v6340_v46 = vpop.f32.mrf.mxu0 }
 0x3fc   : > { %v5450_v35 = vadd.f32 %v19386_v17, %v16626_v59  ;;  %12848 = vmatprep.mubr.msk.bf16.mxu1 %vm19388_vm9, %v6983_v45  ;;  %v12826_v61 = vpop.f32.mrf.mxu1  ;;  %v19390_v43 = vsel %vm16737_vm3, 4294967295, %v19389_v43  ;;  %v5161_v52 = vadd.f32 %v19393_v60, %v16635_v14  ;;  %v5774_v63 = vadd.f32 %v19395_v13, %v19394_v42  ;;  %v19401_v41 = vld [vmem:[#allocation95_spill] sm:$0xff]  ;;  %v19403_v44 = vld [vmem:[#allocation97_spill] sm:$0xff]  ;;  %v19406_v17 = vld [vmem:[#allocation98_spill] sm:$0xff] }
 0x3fd   : > { %19391 = vst [vmem:[#allocation46_spill] sm:$0xff] %v19390_v43  ;;  %v6872_v19 = vmax.f32 %v6869_v1, %v6871_v16  ;;  %6812 = vst.msk [vmem:[#allocation4 + $0x80] sm:$0xff] %vm19392_vm10, %v6780_v36  ;;  %v6783_v38 = vmax.f32 %v6751_v20, 0.0  ;;  %v6749_v59 = vadd.f32 %v16538_v22, %v6710_v2  ;;  %v6715_v21 = vadd.f32 %v12826_v61, %v6390_v37  ;;  %v19402_v37 = vld [vmem:[#allocation96_spill] sm:$0xff]  ;;  %v19404_v45 = vld [vmem:[#allocation49_spill] sm:$0xff]  ;;  %v12800_v20 = vpop.f32.mrf.mxu0 }
 0x3fe   : > { %v5777_v54 = vadd.f32 %v19397_v49, %v19396_v28  ;;  %v6101_v18 = vadd.f32 %v19398_v6, %v5776_v39  ;;  %v6646_v26 = vpop.f32.mrf.mxu1  ;;  %v6391_v0 = vadd.f32 %v16640_v57, %v6098_v23  ;;  %v5775_v15 = vadd.f32 %v19401_v41, %v5450_v35  ;;  %v19407_v35 = vld [vmem:[#allocation100_spill] sm:$0xff]  ;;  %v19408_v27 = vld [vmem:[#allocation67_spill] sm:$0xff]  ;;  %v19413_v6 = vld [vmem:[#allocation74_spill] sm:$0xff] }
 0x3ff   : > { %6873 = vst.msk [vmem:[#allocation5 + $0x19] sm:$0xff] %vm19399_vm8, %v6872_v19  ;;  %v6781_v50 = vmax.f32 %v6749_v59, 0.0  ;;  %v6754_v58 = vadd.f32 %v16538_v22, %v6715_v21  ;;  %v6713_v14 = vadd.f32 %v6646_v26, %v6388_v48  ;;  %v5780_v40 = vadd.f32 %v19403_v44, %v19402_v37  ;;  %v6880_v19 = vld [vmem:[#allocation4 + $0x70] ss:$2 sm:$0xff]  ;;  %v6883_v26 = vld [vmem:[#allocation4 + $0x71] ss:$2 sm:$0xff]  ;;  %vm19422_vm7 = vmmov %vm19302_vm1 }
 0x400   : > { %6815 = vst.msk [vmem:[#allocation4 + $0x98] sm:$0xff] %vm19400_vm5, %v6783_v38  ;;  %v6389_v7 = vadd.f32 %v16658_v51, %v6096_v4  ;;  %v6099_v1 = vadd.f32 %v19404_v45, %v5774_v63  ;;  %v6875_v36 = vld [vmem:[#allocation4 + $0x60] ss:$2 sm:$0xff]  ;;  %v6877_v57 = vld [vmem:[#allocation4 + $0x61] ss:$2 sm:$0xff]  ;;  %v12827_v23 = vpop.f32.mrf.mxu1  ;;  %v5778_v48 = vadd.f32 %v19407_v35, %v19406_v17  ;;  %v5454_v16 = vadd.f32 %v19408_v27, %v5161_v52  ;;  %v19409_v4 = vld [vmem:[#allocation72_spill] sm:$0xff] }
 0x401   : > { %v6878_v2 = vmax.f32 %v6875_v36, %v6877_v57  ;;  %6813 = vst.msk [vmem:[#allocation4 + $0x88] sm:$0xff] %vm19405_vm12, %v6781_v50  ;;  %v6786_v10 = vmax.f32 %v6754_v58, 0.0  ;;  %v6752_v34 = vadd.f32 %v16538_v22, %v6713_v14  ;;  %v6716_v39 = vadd.f32 %v12827_v23, %v6391_v0  ;;  %v19411_v13 = vld [vmem:[#allocation131_spill] sm:$0xff]  ;;  %v19412_v63 = vld [vmem:[#allocation33_spill] sm:$0xff]  ;;  %vm19423_vm15 = vmmov %vm19302_vm1 }
 0x402   : > { %v6394_v51 = vadd.f32 %v16679_v30, %v6101_v18  ;;  %v6102_v61 = vadd.f32 %v19409_v4, %v5777_v54  ;;  %v6649_v38 = vpop.f32.mrf.mxu1  ;;  %v5781_v28 = vadd.f32 %v19412_v63, %v19411_v13  ;;  %v6392_v49 = vadd.f32 %v16703_v25, %v6099_v1  ;;  %v6353_v18 = vpop.f32.mrf.mxu0  ;;  %v16780_v41 = vld [vmem:[#allocation5 + $0x10] sm:$0xff]  ;;  %v19419_v57 = vld [vmem:[#allocation73_spill] sm:$0xff]  ;;  %vm19424_vm11 = vmmov %vm19302_vm1 }
 0x403   : > { %v6881_v59 = vmax.f32 %v6878_v2, %v6880_v19  ;;  %6818 = vst.msk [vmem:[#allocation4 + $0xb0] sm:$0xff] %vm19410_vm2, %v6786_v10  ;;  %v6784_v21 = vmax.f32 %v6752_v34, 0.0  ;;  %v6755_v60 = vadd.f32 %v16538_v22, %v6716_v39  ;;  %v6714_v42 = vadd.f32 %v6649_v38, %v6389_v7  ;;  %v19417_v25 = vld [vmem:[#allocation35_spill] sm:$0xff]  ;;  %v16803_v39 = vld [vmem:[%s18078_s5 + $0x10] sm:$0xf]  ;;  %v19425_v63 = vld [vmem:[#allocation64_spill] sm:$0xff] }
 0x404   : > { %v6100_v52 = vadd.f32 %v19413_v6, %v5775_v15  ;;  %v12830_v30 = vpop.f32.mrf.mxu1  ;;  %vm16774_vm4 = vcmp.ge.s32.totalorder %v6937_v5, 1  ;;  %v19414_v54 = vmov 0  ;;  %v5779_v15 = vadd.f32 %v19417_v25, %v5454_v16  ;;  %v19418_v44 = vld [vmem:[#allocation55_spill] sm:$0xff]  ;;  %v12801_v19 = vpop.f32.mrf.mxu0  ;;  %vm19427_vm10 = vmmov %vm19302_vm1 }
 0x405   : > { %v19415_v54 = vsel %vm16774_vm4, 4294967295, %v19414_v54  ;;  %v6884_v0 = vmax.f32 %v6881_v59, %v6883_v26  ;;  %6816 = vst.msk [vmem:[#allocation4 + $0xa0] sm:$0xff] %vm19302_vm1, %v6784_v21  ;;  %v6787_v50 = vmax.f32 %v6755_v60, 0.0  ;;  %v6753_v58 = vadd.f32 %v16538_v22, %v6714_v42  ;;  %v16785_v1 = vld [vmem:[#allocation5 + $0x11] sm:$0xff]  ;;  %vm19429_vm5 = vmmov %vm19302_vm1 }
 0x406   : > { %19416 = vst [vmem:[#allocation43_spill] sm:$0xff] %v19415_v54  ;;  %v6719_v14 = vadd.f32 %v12830_v30, %v6394_v51  ;;  %v6395_v37 = vadd.f32 %v16724_v53, %v6102_v61  ;;  %v6105_v7 = vadd.f32 %v19418_v44, %v5780_v40  ;;  %v6662_v45 = vpop.f32.mrf.mxu1  ;;  %v16787_v36 = vld [vmem:[#allocation5 + $0x19] sm:$0xff]  ;;  %vm19420_vm13 = vcmask 1043456   ;;  %vm19430_vm12 = vmmov %vm19302_vm1 }
 0x407   : > { %v7218_v23 = vsel %vm19420_vm13, %v19419_v57, 0  ;;  %6885 = vst.msk [vmem:[#allocation5 + $0x21] sm:$0xff] %vm19421_vm14, %v6884_v0  ;;  %v6785_v2 = vmax.f32 %v6753_v58, 0.0  ;;  %v6717_v34 = vadd.f32 %v6662_v45, %v6392_v49  ;;  %v16796_v53 = vpack.c.bf16 %v16787_v36, %v16785_v1  ;;  %v16798_v40 = vld [vmem:[#allocation5 + $0x18] sm:$0xff]  ;;  %vm19426_vm9 = vmmov %vm19420_vm13  ;;  %v6356_v58 = vpop.f32.mrf.mxu0 }
 0x408   : > { %6819 = vst.msk [vmem:[#allocation4 + $0xb8] sm:$0xff] %vm19422_vm7, %v6787_v50  ;;  %v6758_v10 = vadd.f32 %v16538_v22, %v6719_v14  ;;  %v6393_v17 = vadd.f32 %v6340_v46, %v6100_v52  ;;  %v6103_v35 = vadd.f32 %v16516_v8, %v5778_v48  ;;  %v6887_v27 = vld [vmem:[#allocation4 + $0x80] ss:$2 sm:$0xff]  ;;  %v6889_v16 = vld [vmem:[#allocation4 + $0x81] ss:$2 sm:$0xff]  ;;  %v12831_v51 = vpop.f32.mrf.mxu1  ;;  %v6976_v4 = vsel %vm16737_vm3, %v16780_v41, 0.0  ;;  %vm19428_vm8 = vmmov %vm19426_vm9 }
 0x409   : > { %v6977_v61 = vsel %vm16774_vm4, %v16798_v40, 0.0  ;;  %v6890_v38 = vmax.f32 %v6887_v27, %v6889_v16  ;;  %6817 = vst.msk [vmem:[#allocation4 + $0xa8] sm:$0xff] %vm19423_vm15, %v6785_v2  ;;  %v6756_v46 = vadd.f32 %v16538_v22, %v6717_v34  ;;  %v6720_v21 = vadd.f32 %v12831_v51, %v6395_v37  ;;  %12839 = vmatmul.mubr.msk.bf16.vlgmr.msra.gmra.mxu0 %vm19424_vm11, %v16796_v53  ;;  %v6892_v60 = vld [vmem:[#allocation4 + $0x90] ss:$2 sm:$0xff]  ;;  %v6895_v0 = vld [vmem:[#allocation4 + $0x91] ss:$2 sm:$0xff]  ;;  %vm19431_vm2 = vmmov %vm19428_vm8 }
 0x40a   : > { %v6790_v59 = vmax.f32 %v6758_v10, 0.0  ;;  %v6398_v8 = vadd.f32 %v12800_v20, %v6105_v7  ;;  %v6106_v48 = vadd.f32 %v16522_v11, %v5781_v28  ;;  %v6665_v42 = vpop.f32.mrf.mxu1  ;;  %v6984_v13 = vpack.c.bf16 %v6977_v61, %v6976_v4  ;;  %12857 = vmatpush3.bf16.msra.mxu0 %v7218_v23  ;;  %v16826_v11 = vld [vmem:[%s18078_s5 + $0x14] sm:$0xf]  ;;  %vm19432_vm13 = vmmov %vm19302_vm1  ;;  %v19433_v34 = vld [vmem:[#allocation14_spill] sm:$0xff] }
 0x40b   : > { %v7327_v49 = vsel %vm19426_vm9, %v19425_v63, 0  ;;  %v6893_v6 = vmax.f32 %v6890_v38, %v6892_v60  ;;  %v6788_v52 = vmax.f32 %v6756_v46, 0.0  ;;  %v6759_v26 = vadd.f32 %v16538_v22, %v6720_v21  ;;  %13245 = vmatprep.subr.msk.bf16.mxu0 %vm19428_vm8, %v16803_v39  ;;  %vm19435_vm14 = vmmov %vm19302_vm1 }
 0x40c   : > { %6822 = vst.msk [vmem:[#allocation4 + $0xd0] sm:$0xff] %vm19427_vm10, %v6790_v59  ;;  %v6718_v30 = vadd.f32 %v6665_v42, %v6393_v17  ;;  %v6396_v20 = vadd.f32 %v6353_v18, %v6103_v35  ;;  %v6104_v28 = vadd.f32 %v16527_v62, %v5779_v15  ;;  %12849 = vmatmul.mubr.msk.bf16.vlgmr.msra.gmra.mxu1 %vm19429_vm5, %v6984_v13  ;;  %v12834_v50 = vpop.f32.mrf.mxu1  ;;  %v6938_v17 = vand.u32 7, %v19433_v34  ;;  %v19434_v35 = vld [vmem:[#allocation53_spill] sm:$0xff]  ;;  %vm19436_vm7 = vmmov %vm19302_vm1 }
 0x40d   : > { %v6896_v14 = vmax.f32 %v6893_v6, %v6895_v0  ;;  %6820 = vst.msk [vmem:[#allocation4 + $0xc0] sm:$0xff] %vm19430_vm12, %v6788_v52  ;;  %v6791_v25 = vmax.f32 %v6759_v26, 0.0  ;;  %v6723_v44 = vadd.f32 %v12834_v50, %v6398_v8  ;;  %12867 = vmatpush3.bf16.msra.mxu1 %v7327_v49  ;;  %v6399_v18 = vadd.f32 %v12801_v19, %v6106_v48  ;;  %vm19440_vm11 = vmmov %vm19302_vm1 }
 0x40e   : > { %v6757_v37 = vadd.f32 %v16538_v22, %v6718_v30  ;;  %v6678_v7 = vpop.f32.mrf.mxu1  ;;  %13246 = vmatprep.subr.msk.bf16.mxu1 %vm19431_vm2, %v16826_v11  ;;  %v6397_v57 = vadd.f32 %v6356_v58, %v6104_v28  ;;  %v6939_v27 = vand.u32 7, %v19434_v35  ;;  %vm16845_vm15 = vcmp.ge.s32.totalorder %v6938_v17, 1  ;;  %v16851_v49 = vld [vmem:[#allocation5 + $0x20] sm:$0xff]  ;;  %vm19444_vm10 = vmmov %vm19302_vm1 }
 0x40f   : > { %6897 = vst.msk [vmem:[#allocation5 + $0x29] sm:$0xff] %vm19302_vm1, %v6896_v14  ;;  %v6762_v15 = vadd.f32 %v16538_v22, %v6723_v44  ;;  %v6721_v45 = vadd.f32 %v6678_v7, %v6396_v20  ;;  %v6904_v19 = vld [vmem:[#allocation4 + $0xb0] ss:$2 sm:$0xff]  ;;  %v6907_v48 = vld [vmem:[#allocation4 + $0xb1] ss:$2 sm:$0xff]  ;;  %v19437_v60 = vmov 0  ;;  %vm19445_vm8 = vmmov %vm19302_vm1 }
 0x410   : > { %6823 = vst.msk [vmem:[#allocation4 + $0xd8] sm:$0xff] %vm19432_vm13, %v6791_v25  ;;  %v6789_v62 = vmax.f32 %v6757_v37, 0.0  ;;  %v6899_v23 = vld [vmem:[#allocation4 + $0xa0] ss:$2 sm:$0xff]  ;;  %v6901_v2 = vld [vmem:[#allocation4 + $0xa1] ss:$2 sm:$0xff]  ;;  %v12835_v10 = vpop.f32.mrf.mxu1  ;;  %vm19446_vm5 = vmmov %vm19302_vm1 }
 0x411   : > { %v6902_v16 = vmax.f32 %v6899_v23, %v6901_v2  ;;  %v6794_v51 = vmax.f32 %v6762_v15, 0.0  ;;  %v6760_v4 = vadd.f32 %v16538_v22, %v6721_v45  ;;  %v6724_v61 = vadd.f32 %v12835_v10, %v6399_v18  ;;  %v16859_v52 = vld [vmem:[#allocation5 + $0x21] sm:$0xff]  ;;  %vm19447_vm12 = vmmov %vm19302_vm1 }
 0x412   : > { %6821 = vst.msk [vmem:[#allocation4 + $0xc8] sm:$0xff] %vm19435_vm14, %v6789_v62  ;;  %v6681_v38 = vpop.f32.mrf.mxu1  ;;  %v19438_v60 = vsel %vm16845_vm15, 4294967295, %v19437_v60  ;;  %vm16855_vm9 = vcmp.ge.s32.totalorder %v6939_v27, 1  ;;  %v19441_v6 = vmov 0  ;;  %v6978_v50 = vsel %vm16845_vm15, %v16851_v49, 0.0  ;;  %vm19448_vm2 = vmmov %vm19302_vm1  ;;  %v19449_v62 = vld [vmem:[#allocation15_spill] sm:$0xff] }
 0x413   : > { %v6905_v59 = vmax.f32 %v6902_v16, %v6904_v19  ;;  %6826 = vst.msk [vmem:[#allocation4 + $0xf0] sm:$0xff] %vm19436_vm7, %v6794_v51  ;;  %v6792_v46 = vmax.f32 %v6760_v4, 0.0  ;;  %v6763_v21 = vadd.f32 %v16538_v22, %v6724_v61  ;;  %v6722_v8 = vadd.f32 %v6681_v38, %v6397_v57  ;;  %19439 = vst [vmem:[#allocation57_spill] sm:$0xff] %v19438_v60  ;;  %v19450_v45 = vld [vmem:[#allocation45_spill] sm:$0xff]  ;;  %v16884_v51 = vld [vmem:[#allocation5 + $0xa] sm:$0xff] }
 0x414   : > { %v19442_v6 = vsel %vm16855_vm9, 4294967295, %v19441_v6  ;;  %v6940_v15 = vand.u32 7, %v19449_v62  ;;  %v6941_v57 = vand.u32 7, %v19450_v45  ;;  %vm16888_vm13 = vcmp.le.s32.totalorder %v6935_v31, 6 }
 0x415   : > { %v6908_v42 = vmax.f32 %v6905_v59, %v6907_v48  ;;  %6824 = vst.msk [vmem:[#allocation4 + $0xe0] sm:$0xff] %vm19440_vm11, %v6792_v46  ;;  %v6795_v13 = vmax.f32 %v6763_v21, 0.0  ;;  %v6761_v63 = vadd.f32 %v16538_v22, %v6722_v8  ;;  %19443 = vst [vmem:[#allocation71_spill] sm:$0xff] %v19442_v6  ;;  %v19451_v4 = vmov 0  ;;  %v7160_v21 = vld [vmem:[#allocation5 + $0x2] sm:$0xff] }
 0x416   : > { %v16861_v26 = vld [vmem:[#allocation5 + $0x29] sm:$0xff]  ;;  %v19452_v4 = vsel %vm16888_vm13, 4294967295, %v19451_v4  ;;  %vm16894_vm14 = vcmp.ge.s32.totalorder %v6940_v15, 1  ;;  %v19454_v19 = vmov 0  ;;  %vm16900_vm7 = vcmp.ge.s32.totalorder %v6941_v57, 1 }
 0x417   : > { %6909 = vst.msk [vmem:[#allocation5 + $0x31] sm:$0xff] %vm19444_vm10, %v6908_v42  ;;  %v6793_v30 = vmax.f32 %v6761_v63, 0.0  ;;  %v16867_v22 = vpack.c.bf16 %v16861_v26, %v16859_v52  ;;  %v16869_v20 = vld [vmem:[#allocation5 + $0x28] sm:$0xff]  ;;  %v6916_v37 = vld [vmem:[#allocation4 + $0xd0] ss:$2 sm:$0xff]  ;;  %19453 = vst [vmem:[#allocation48_spill] sm:$0xff] %v19452_v4 }
 0x418   : > { %6827 = vst.msk [vmem:[#allocation4 + $0xf8] sm:$0xff] %vm19445_vm8, %v6795_v13  ;;  %v6979_v58 = vsel %vm16855_vm9, %v16869_v20, 0.0  ;;  %v6919_v7 = vld [vmem:[#allocation4 + $0xd1] ss:$2 sm:$0xff]  ;;  %v19455_v19 = vsel %vm16894_vm14, 4294967295, %v19454_v19  ;;  %v19457_v46 = vmov 0  ;;  %vm19463_vm10 = vmmov %vm19302_vm1 }
 0x419   : > { %v6911_v28 = vld [vmem:[#allocation4 + $0xc0] ss:$2 sm:$0xff]  ;;  %v6913_v0 = vld [vmem:[#allocation4 + $0xc1] ss:$2 sm:$0xff]  ;;  %6825 = vst.msk [vmem:[#allocation4 + $0xe8] sm:$0xff] %vm19446_vm5, %v6793_v30  ;;  %12842 = vmatprep.mubr.msk.bf16.mxu0 %vm19447_vm12, %v16867_v22  ;;  %v6985_v25 = vpack.c.bf16 %v6979_v58, %v6978_v50  ;;  %19456 = vst [vmem:[#allocation105_spill] sm:$0xff] %v19455_v19 }
 0x41a   : > { %v6914_v14 = vmax.f32 %v6911_v28, %v6913_v0  ;;  %v19458_v46 = vsel %vm16900_vm7, 4294967295, %v19457_v46  ;;  %vm16906_vm11 = vcmp.le.s32.totalorder %v6934_v24, 6  ;;  %v19460_v31 = vmov 0  ;;  %vm19464_vm8 = vmmov %vm19302_vm1 }
 0x41b   : > { %12852 = vmatprep.mubr.msk.bf16.mxu1 %vm19448_vm2, %v6985_v25  ;;  %19459 = vst [vmem:[#allocation60_spill] sm:$0xff] %v19458_v46  ;;  %v19461_v31 = vsel %vm16906_vm11, 4294967295, %v19460_v31  ;;  %v7193_v48 = vsel %vm16888_vm13, %v16884_v51, 0.0  ;;  %v7302_v30 = vsel %vm16689_vm6, %v16780_v41, 0.0  ;;  %v7192_v50 = vsel %vm16906_vm11, %v7160_v21, 0.0  ;;  %vm19468_vm12 = vmmov %vm19302_vm1 }
 0x41c   : > { %v6917_v44 = vmax.f32 %v6914_v14, %v6916_v37  ;;  %19462 = vst [vmem:[#allocation26_spill] sm:$0xff] %v19461_v31  ;;  %v7201_v14 = vpack.c.bf16 %v7193_v48, %v7192_v50  ;;  %v7301_v25 = vsel %vm16675_vm0, %v16709_v56, 0.0  ;;  %vm16944_vm5 = vcmp.le.s32.totalorder %v6937_v5, 6  ;;  %vm19469_vm2 = vmmov %vm19302_vm1  ;;  %v16965_v5 = vld [vmem:[#allocation5 + $0x12] sm:$0xff] }
 0x41d   : > { %v7310_v37 = vpack.c.bf16 %v7302_v30, %v7301_v25  ;;  %v19470_v56 = vmov 0  ;;  %v19477_v35 = vmov 0  ;;  %v7305_v21 = vsel %vm16845_vm15, %v16869_v20, 0.0 }
 0x41e   : > { %v6920_v18 = vmax.f32 %v6917_v44, %v6919_v7  ;;  %v16898_v59 = vld [vmem:[#allocation5 + $0x30] sm:$0xff]  ;;  %v16940_v44 = vld [vmem:[#allocation5 + $0x1a] sm:$0xff]  ;;  %v19465_v7 = vmov 0  ;;  %v19481_v48 = vmov 0  ;;  %vm17022_vm15 = vcmp.le.s32.totalorder %v6940_v15, 6 }
 0x41f   : > { %v6928_v16 = vld [vmem:[#allocation4 + $0xf0] ss:$2 sm:$0xff]  ;;  %v6931_v38 = vld [vmem:[#allocation4 + $0xf1] ss:$2 sm:$0xff]  ;;  %v6980_v28 = vsel %vm16894_vm14, %v16898_v59, 0.0  ;;  %v19466_v7 = vsel %vm16944_vm5, 4294967295, %v19465_v7 }
 0x420   : > { %6921 = vst.msk [vmem:[#allocation5 + $0x39] sm:$0xff] %vm19302_vm1, %v6920_v18  ;;  %v6923_v23 = vld [vmem:[#allocation4 + $0xe0] ss:$2 sm:$0xff]  ;;  %v6925_v2 = vld [vmem:[#allocation4 + $0xe1] ss:$2 sm:$0xff]  ;;  %v16913_v42 = vld [vmem:[#allocation5 + $0x31] sm:$0xff] }
 0x421   : > { %v6926_v10 = vmax.f32 %v6923_v23, %v6925_v2  ;;  %19467 = vst [vmem:[#allocation23_spill] sm:$0xff] %v19466_v7  ;;  %v16950_v18 = vld [vmem:[#allocation5 + $0x2a] sm:$0xff]  ;;  %vm16954_vm1 = vcmp.le.s32.totalorder %v6939_v27, 6  ;;  %v7195_v45 = vsel %vm16944_vm5, %v16940_v44, 0.0  ;;  %v16970_v23 = vld [vmem:[#allocation5 + $0x22] sm:$0xff]  ;;  %v7304_v27 = vsel %vm16774_vm4, %v16851_v49, 0.0 }
 0x422   : > { %v19471_v56 = vsel %vm16954_vm1, 4294967295, %v19470_v56  ;;  %v7197_v55 = vsel %vm16954_vm1, %v16950_v18, 0.0  ;;  %v7512_v25 = vsel %vm16888_vm13, %v16965_v5, 0.0 }
 0x423   : > { %v6929_v61 = vmax.f32 %v6926_v10, %v6928_v16  ;;  %19472 = vst [vmem:[#allocation20_spill] sm:$0xff] %v19471_v56  ;;  %v7306_v10 = vsel %vm16855_vm9, %v16898_v59, 0.0  ;;  %vm19484_vm9 = vcmask 1043456  }
 0x424   : > { %v7537_v30 = vsel %vm19484_vm9, %v16826_v11, 0 }
 0x425   : > { %v6932_v8 = vmax.f32 %v6929_v61, %v6931_v38  ;;  %v7303_v61 = vsel %vm16737_vm3, %v16798_v40, 0.0  ;;  %v7628_v38 = vld [vmem:[%s18078_s5 + $0x18] sm:$0xf] }
 0x427   : > { %v16915_v13 = vld [vmem:[#allocation5 + $0x39] sm:$0xff]  ;;  %6933 = vst.msk [vmem:[#allocation5 + $0x41] sm:$0xff] %vm19463_vm10, %v6932_v8  ;;  %vm16960_vm10 = vcmp.le.s32.totalorder %v6936_v9, 6 }
 0x428   : > { %v16917_v63 = vld [vmem:[#allocation5 + $0x38] sm:$0xff]  ;;  %v16925_v24 = vpack.c.bf16 %v16915_v13, %v16913_v42  ;;  %v19474_v12 = vsel %vm16960_vm10, 4294967295, %v19473_v12  ;;  %v7194_v9 = vsel %vm16960_vm10, %v16965_v5, 0.0 }
 0x429   : > { %v6981_v0 = vsel %vm16900_vm7, %v16917_v63, 0.0  ;;  %19475 = vst [vmem:[#allocation22_spill] sm:$0xff] %v19474_v12  ;;  %v7202_v2 = vpack.c.bf16 %v7195_v45, %v7194_v9  ;;  %v17018_v50 = vld [vmem:[#allocation5 + $0x32] sm:$0xff]  ;;  %v7411_v45 = vpack.c.bf16 %v16785_v1, %v16699_v29  ;;  %v7511_v9 = vsel %vm16906_vm11, %v16884_v51, 0.0 }
 0x42a   : > { %v6986_v58 = vpack.c.bf16 %v6981_v0, %v6980_v28  ;;  %12843 = vmatmul.mubr.msk.bf16.gmra.mxu0 %vm19464_vm8, %v16925_v24  ;;  %vm19476_vm8 = vmmov %vm19469_vm2  ;;  %v7312_v28 = vpack.c.bf16 %v7306_v10, %v7305_v21  ;;  %v7729_v0 = vld [vmem:[%s18078_s5 + $0x1c] sm:$0xf]  ;;  %v7198_v62 = vsel %vm17022_vm15, %v17018_v50, 0.0  ;;  %v7412_v29 = vpack.c.bf16 %v16859_v52, %v16787_v36  ;;  %v7838_v10 = vld [vmem:[%s18078_s5 + $0x20] sm:$0xf] }
 0x42b   : > { %12858 = vmatprep.mubr.msk.bf16.mxu0 %vm19469_vm2, %v7201_v14  ;;  %vm19480_vm2 = vcmask 1043456   ;;  %vm19485_vm3 = vmmov %vm19476_vm8  ;;  %v7516_v51 = vsel %vm16954_vm1, %v17018_v50, 0.0 }
 0x42c   : > { %12853 = vmatmul.mubr.msk.bf16.gmra.mxu1 %vm19468_vm12, %v6986_v58  ;;  %vm16974_vm12 = vcmp.le.s32.totalorder %v6938_v17, 6  ;;  %v7428_v34 = vsel %vm19480_vm2, %v16803_v39, 0  ;;  %v7311_v39 = vpack.c.bf16 %v7304_v27, %v7303_v61  ;;  %vm17007_vm2 = vcmp.le.s32.totalorder %v6941_v57, 6  ;;  %vm19493_vm13 = vmmov %vm19485_vm3 }
 0x42d   : > { %12868 = vmatprep.mubr.msk.bf16.mxu1 %vm19476_vm8, %v7310_v37  ;;  %v19478_v35 = vsel %vm16974_vm12, 4294967295, %v19477_v35  ;;  %v7196_v17 = vsel %vm16974_vm12, %v16970_v23, 0.0  ;;  %v19482_v48 = vsel %vm17007_vm2, 4294967295, %v19481_v48  ;;  %v19487_v57 = vmov 0 }
 0x42e   : > { %19479 = vst [vmem:[#allocation103_spill] sm:$0xff] %v19478_v35  ;;  %v7203_v16 = vpack.c.bf16 %v7197_v55, %v7196_v17  ;;  %v17005_v8 = vld [vmem:[#allocation5 + $0x3a] sm:$0xff]  ;;  %19483 = vst [vmem:[#allocation108_spill] sm:$0xff] %v19482_v48  ;;  %v19488_v57 = vsel %vm17022_vm15, 4294967295, %v19487_v57  ;;  %v7307_v37 = vsel %vm16894_vm14, %v16917_v63, 0.0  ;;  %v7520_v27 = vpack.c.bf16 %v7512_v25, %v7511_v9 }
 0x42f   : > { %19489 = vst [vmem:[#allocation69_spill] sm:$0xff] %v19488_v57  ;;  %v17026_v58 = vld [vmem:[#allocation5 + $0x40] sm:$0xff]  ;;  %v7199_v11 = vsel %vm17007_vm2, %v17005_v8, 0.0  ;;  %v7513_v17 = vsel %vm16960_vm10, %v16940_v44, 0.0  ;;  %v7515_v52 = vsel %vm16974_vm12, %v16950_v18, 0.0  ;;  %v7517_v21 = vsel %vm17022_vm15, %v17005_v8, 0.0 }
 0x430   : > { %v7308_v15 = vsel %vm16900_vm7, %v17026_v58, 0.0  ;;  %v7204_v14 = vpack.c.bf16 %v7199_v11, %v7198_v62  ;;  %v7409_v61 = vld [vmem:[#allocation5 + $0x41] sm:$0xff] }
 0x431   : > { %v7313_v55 = vpack.c.bf16 %v7308_v15, %v7307_v37  ;;  %v7619_v37 = vld [vmem:[#allocation5 + $0x48] sm:$0xff] }
 0x432   : > { %12859 = vmatmul.mubr.msk.bf16.vlgmr.msra.gmra.mxu0 %vm19476_vm8, %v7202_v2  ;;  %vm19486_vm8 = vmmov %vm19485_vm3  ;;  %v7514_v2 = vsel %vm16944_vm5, %v16970_v23, 0.0 }
 0x433   : > { %12877 = vmatpush3.bf16.msra.mxu0 %v7428_v34  ;;  %12862 = vmatprep.mubr.msk.bf16.mxu0 %vm19485_vm3, %v7203_v16  ;;  %v7413_v34 = vpack.c.bf16 %v16913_v42, %v16861_v26  ;;  %v7521_v36 = vpack.c.bf16 %v7514_v2, %v7513_v17  ;;  %v7522_v26 = vpack.c.bf16 %v7516_v51, %v7515_v52  ;;  %v7510_v42 = vld [vmem:[#allocation5 + $0x42] sm:$0xff] }
 0x434   : > { %12869 = vmatmul.mubr.msk.bf16.vlgmr.msra.gmra.mxu1 %vm19486_vm8, %v7311_v39  ;;  %13247 = vmatprep.subr.msk.bf16.mxu0 %vm19484_vm9, %v7628_v38  ;;  %vm19490_vm8 = vmmov %vm19484_vm9  ;;  %v19500_v39 = vmov 0.0  }
 0x435   : > { %12872 = vmatprep.mubr.msk.bf16.mxu1 %vm19485_vm3, %v7312_v28  ;;  %12887 = vmatpush3.bf16.msra.mxu1 %v7537_v30  ;;  %vm19491_vm9 = vmmov %vm19485_vm3  ;;  %v7518_v30 = vsel %vm17007_vm2, %v7510_v42, 0.0  ;;  %v7414_v28 = vpack.c.bf16 %v7409_v61, %v16915_v13 }
 0x436   : > { %13248 = vmatprep.subr.msk.bf16.mxu1 %vm19490_vm8, %v7729_v0  ;;  %vm19492_vm8 = vmmov %vm19485_vm3  ;;  %v7523_v62 = vpack.c.bf16 %v7518_v30, %v7517_v21 }
 0x437   : > { %vm19499_vm1 = vmmov %vm19492_vm8 }
 0x43a   : > { %12863 = vmatmul.mubr.msk.bf16.gmra.mxu0 %vm19491_vm9, %v7204_v14  ;;  %vm19494_vm9 = vcmask 1043456  }
 0x43b   : > { %12878 = vmatprep.mubr.msk.bf16.mxu0 %vm19485_vm3, %v7411_v45  ;;  %v7646_v1 = vsel %vm19494_vm9, %v7628_v38, 0  ;;  %v7621_v38 = vsel %vm16689_vm6, %v16798_v40, 0.0  ;;  %v7623_v40 = vsel %vm16774_vm4, %v16869_v20, 0.0  ;;  %v7627_v20 = vsel %vm16900_vm7, %v7619_v37, 0.0 }
 0x43c   : > { %12873 = vmatmul.mubr.msk.bf16.gmra.mxu1 %vm19492_vm8, %v7313_v55  ;;  %vm19516_vm7 = vnez %v19474_v12 }
 0x43d   : > { %12888 = vmatprep.mubr.msk.bf16.mxu1 %vm19493_vm13, %v7520_v27  ;;  %vm19495_vm13 = vmmov %vm19485_vm3  ;;  %v7834_v27 = vsel %vm16974_vm12, %v17018_v50, 0.0  ;;  %v13269_v50 = vld [vmem:[%s18080_s7 + $0x10] sm:$0xff]  }
 0x43e   : > { %vm19496_vm3 = vmmov %vm19494_vm9 }
 0x43f   : > { %v7747_v16 = vsel %vm19496_vm3, %v7729_v0, 0  ;;  %vm19497_vm9 = vmmov %vm19492_vm8  ;;  %v7620_v0 = vsel %vm16675_vm0, %v16780_v41, 0.0 }
 0x440   : > { %vm19498_vm10 = vmmov %vm19496_vm3  ;;  %v7629_v11 = vpack.c.bf16 %v7621_v38, %v7620_v0 }
 0x441   : > { %vm19503_vm3 = vmmov %vm19499_vm1 }
 0x442   : > { %12879 = vmatmul.mubr.msk.bf16.vlgmr.msra.gmra.mxu0 %vm19495_vm13, %v7412_v29  ;;  %vm19502_vm13 = vmmov %vm19499_vm1  ;;  %v7829_v29 = vld [vmem:[#allocation5 + $0x4a] sm:$0xff] }
 0x443   : > { %12897 = vmatpush3.bf16.msra.mxu0 %v7646_v1  ;;  %12882 = vmatprep.mubr.msk.bf16.mxu0 %vm19492_vm8, %v7413_v34  ;;  %vm19504_vm8 = vnez %v19442_v6  ;;  %vm19510_vm4 = vmmov %vm19503_vm3 }
 0x444   : > { %12889 = vmatmul.mubr.msk.bf16.vlgmr.msra.gmra.mxu1 %vm19497_vm9, %v7521_v36  ;;  %13249 = vmatprep.subr.msk.bf16.mxu0 %vm19498_vm10, %v7838_v10  ;;  %vm19501_vm10 = vmmov %vm19499_vm1  ;;  %v7625_v13 = vsel %vm19504_vm8, %v16917_v63, 0.0  ;;  %vm19505_vm9 = vnez %v19390_v43  ;;  %v7728_v63 = vld [vmem:[#allocation5 + $0x49] sm:$0xff] }
 0x445   : > { %12892 = vmatprep.mubr.msk.bf16.mxu1 %vm19499_vm1, %v7522_v26  ;;  %12907 = vmatpush3.bf16.msra.mxu1 %v7747_v16  ;;  %v7622_v41 = vsel %vm19505_vm9, %v16851_v49, 0.0  ;;  %vm19509_vm8 = vmmov %vm19503_vm3  ;;  %v7626_v49 = vsel %vm16894_vm14, %v17026_v58, 0.0  ;;  %v7833_v58 = vsel %vm16944_vm5, %v16950_v18, 0.0  ;;  %v7836_v18 = vsel %vm17022_vm15, %v7510_v42, 0.0 }
 0x446   : > { %12926 = vmatprep.subr.bf16.mxu1 %v19500_v39  ;;  %v7630_v15 = vpack.c.bf16 %v7623_v40, %v7622_v41  ;;  %v7632_v45 = vpack.c.bf16 %v7627_v20, %v7626_v49  ;;  %vm18389_vm5 = vcmask 130048  }
 0x447   : > { %7958 = vst.msk [vmem:[#allocation6 + $0x18] sm:$0xff] %vm18389_vm5, %v19500_v39  ;;  %7959 = vst.msk [vmem:[#allocation6 + $0x20] sm:$0xff] %vm18389_vm5, %v19500_v39 }
 0x448   : > { %7955 = vst.msk [vmem:[#allocation6] sm:$0xff] %vm18389_vm5, %v19500_v39  ;;  %7956 = vst.msk [vmem:[#allocation6 + $0x8] sm:$0xff] %vm18389_vm5, %v19500_v39 }
 0x449   : > { %7957 = vst.msk [vmem:[#allocation6 + $0x10] sm:$0xff] %vm18389_vm5, %v19500_v39  ;;  %7960 = vst.msk [vmem:[#allocation6 + $0x28] sm:$0xff] %vm18389_vm5, %v19500_v39 }
 0x44a   : > { %12883 = vmatmul.mubr.msk.bf16.gmra.mxu0 %vm19499_vm1, %v7414_v28  ;;  %vm19506_vm1 = vcmask 1043456   ;;  %7961 = vst.msk [vmem:[#allocation6 + $0x30] sm:$0xff] %vm18389_vm5, %v19500_v39  ;;  %7962 = vst.msk [vmem:[#allocation6 + $0x38] sm:$0xff] %vm18389_vm5, %v19500_v39 }
 0x44b   : > { %12898 = vmatprep.mubr.msk.bf16.mxu0 %vm19501_vm10, %v7629_v11  ;;  %v7856_v14 = vsel %vm19506_vm1, %v7838_v10, 0  ;;  %vm19507_vm10 = vnez %v19438_v60  ;;  %vm19511_vm1 = vnez %v19452_v4  ;;  %7963 = vst.msk [vmem:[#allocation6 + $0x40] sm:$0xff] %vm18389_vm5, %v19500_v39  ;;  %7964 = vst.msk [vmem:[#allocation6 + $0x48] sm:$0xff] %vm18389_vm5, %v19500_v39 }
 0x44c   : > { %12893 = vmatmul.mubr.msk.bf16.gmra.mxu1 %vm19502_vm13, %v7523_v62  ;;  %v7624_v25 = vsel %vm19507_vm10, %v16898_v59, 0.0  ;;  %vm19508_vm13 = vmmov %vm19503_vm3  ;;  %v7831_v59 = vsel %vm19511_vm1, %v16940_v44, 0.0  ;;  %7975 = vst.msk [vmem:[#allocation7] sm:$0xff] %vm18389_vm5, %v19500_v39 }
 0x44d   : > { %12908 = vmatprep.mubr.msk.bf16.mxu1 %vm19503_vm3, %v16796_v53  ;;  %v7631_v53 = vpack.c.bf16 %v7625_v13, %v7624_v25  ;;  %7976 = vst.msk [vmem:[#allocation7 + $0x8] sm:$0xff] %vm18389_vm5, %v19500_v39  ;;  %7977 = vst.msk [vmem:[#allocation7 + $0x10] sm:$0xff] %vm18389_vm5, %v19500_v39 }
 0x44e   : > { %8574 = vst.msk [vmem:[#allocation8] sm:$0xff] %vm18389_vm5, %v19500_v39  ;;  %8575 = vst.msk [vmem:[#allocation8 + $0x8] sm:$0xff] %vm18389_vm5, %v19500_v39 }
 0x44f   : > { %8576 = vst.msk [vmem:[#allocation8 + $0x10] sm:$0xff] %vm18389_vm5, %v19500_v39  ;;  %9114 = vst.msk [vmem:[#allocation10] sm:$0xff] %vm18389_vm5, %v19500_v39 }
 0x452   : > { %12899 = vmatmul.mubr.msk.bf16.vlgmr.msra.gmra.mxu0 %vm19508_vm13, %v7630_v15  ;;  %vm19514_vm13 = vmmov %vm19503_vm3 }
 0x453   : > { %12917 = vmatpush3.bf16.msra.mxu0 %v7856_v14  ;;  %12902 = vmatprep.mubr.msk.bf16.mxu0 %vm19503_vm3, %v7631_v53 }
 0x454   : > { %12909 = vmatmul.mubr.msk.bf16.vlgmr.msra.gmra.mxu1 %vm19509_vm8, %v16867_v22  ;;  %12938 = vmatprep.subr.bf16.mxu0 %v19500_v39  ;;  %v7830_v22 = vsel %vm16906_vm11, %v16965_v5, 0.0  ;;  %vm19512_vm8 = vmmov %vm19503_vm3  ;;  %v7832_v5 = vsel %vm19516_vm7, %v16970_v23, 0.0  ;;  %v13268_v23 = vld [vmem:[%s18080_s7 + $0x8] sm:$0xff]  }
 0x455   : > { %12912 = vmatprep.mubr.msk.bf16.mxu1 %vm19510_vm4, %v16925_v24  ;;  %v7839_v55 = vpack.c.bf16 %v7831_v59, %v7830_v22  ;;  %v7733_v24 = vpack.c.bf16 %v7728_v63, %v7409_v61  ;;  %vm19513_vm4 = vmmov %vm19503_vm3  ;;  %vm19515_vm3 = vnez %v19471_v56  ;;  %v7840_v9 = vpack.c.bf16 %v7833_v58, %v7832_v5  ;;  %12927 = vmatpush3.bf16.msra.mxu1 %v13268_v23 }
 0x456   : > { %v7835_v44 = vsel %vm19515_vm3, %v17005_v8, 0.0  ;;  %v7837_v8 = vsel %vm17007_vm2, %v7829_v29, 0.0  ;;  %12932 = vmatprep.subr.bf16.mxu1 %v19500_v39  ;;  %vm19532_vm2 = vmmov 0  }
 0x457   : > { %v7841_v2 = vpack.c.bf16 %v7835_v44, %v7834_v27  ;;  %v7842_v1 = vpack.c.bf16 %v7837_v8, %v7836_v18 }
 0x45a   : > { %12903 = vmatmul.mubr.msk.bf16.gmra.mxu0 %vm19512_vm8, %v7632_v45  ;;  %vm19517_vm8 = vmmov %vm19513_vm4 }
 0x45b   : > { %12918 = vmatprep.mubr.msk.bf16.mxu0 %vm19513_vm4, %v7839_v55 }
 0x45c   : > { %12913 = vmatmul.mubr.msk.bf16.gmra.mxu1 %vm19514_vm13, %v7733_v24  ;;  %vm19518_vm13 = vmmov %vm19513_vm4 }
 0x462   : > { %12919 = vmatmul.mubr.msk.bf16.vlgmr.msra.gmra.mxu0 %vm19517_vm8, %v7840_v9  ;;  %vm18382_vm8 = vmmov 0  }
 0x463   : > { %12922 = vmatprep.mubr.msk.bf16.mxu0 %vm19513_vm4, %v7841_v2  ;;  %12928 = vmatprep.mubr.msk.bf16.mxu1 %vm18382_vm8, %v19500_v39  ;;  %vm7965_vm4 = vcmask 123904  }
 0x464   : > { %12939 = vmatpush3.bf16.msra.mxu0 %v13269_v50  ;;  %7978 = vst.msk [vmem:[#allocation7 + $0x18] sm:$0x3] %vm7965_vm4, %v19500_v39  ;;  %7966 = vst.msk [vmem:[#allocation6 + $0x50] sm:$0x3] %vm7965_vm4, %v19500_v39 }
 0x465   : > { %12950 = vmatprep.subr.bf16.mxu0 %v19500_v39  ;;  %8577 = vst.msk [vmem:[#allocation8 + $0x18] sm:$0x3] %vm7965_vm4, %v19500_v39  ;;  %9115 = vst.msk [vmem:[#allocation10 + $0x8] sm:$0x3] %vm7965_vm4, %v19500_v39 }
 0x46a   : > { %12923 = vmatmul.mubr.msk.bf16.gmra.mxu0 %vm19518_vm13, %v7842_v1  ;;  %vm7990_vm13 = vcmask 125952  }
 0x46b   : > { %12940 = vmatprep.mubr.msk.bf16.mxu0 %vm18382_vm8, %v19500_v39 }
 0x4c9   : > { %v12840_v51 = vpop.f32.mrf.mxu0 }
 0x4cb   : > { %v7049_v17 = vpop.f32.mrf.mxu0 }
 0x4cc   : > { %v12850_v34 = vpop.f32.mrf.mxu1 }
 0x4cd   : > { %v12841_v36 = vpop.f32.mrf.mxu0  ;;  %v7138_v48 = vadd.f32 %v12850_v34, %v12840_v51 }
 0x4ce   : > { %v7129_v10 = vpop.f32.mrf.mxu1 }
 0x4cf   : > { %v7052_v16 = vpop.f32.mrf.mxu0  ;;  %v7130_v7 = vadd.f32 %v7129_v10, %v7049_v17 }
 0x4d0   : > { %v12851_v52 = vpop.f32.mrf.mxu1 }
 0x4d1   : > { %v7141_v19 = vadd.f32 %v12851_v52, %v12841_v36 }
 0x4d2   : > { %v7132_v26 = vpop.f32.mrf.mxu1 }
 0x4d3   : > { %v7133_v6 = vadd.f32 %v7132_v26, %v7052_v16 }
 0x4ea   : > { %v12844_v42 = vpop.f32.mrf.mxu0 }
 0x4ec   : > { %v12854_v61 = vpop.f32.mrf.mxu1  ;;  %v7065_v38 = vpop.f32.mrf.mxu0 }
 0x4ed   : > { %v7154_v32 = vadd.f32 %v12854_v61, %v12844_v42 }
 0x4ee   : > { %v7145_v21 = vpop.f32.mrf.mxu1  ;;  %v12845_v30 = vpop.f32.mrf.mxu0 }
 0x4ef   : > { %v7146_v33 = vadd.f32 %v7145_v21, %v7065_v38 }
 0x4f0   : > { %v12855_v28 = vpop.f32.mrf.mxu1  ;;  %v17202_v0 = vpop.f32.mrf.mxu0 }
 0x4f2   : > { %v7148_v11 = vpop.f32.mrf.mxu1  ;;  %v12860_v62 = vpop.f32.mrf.mxu0 }
 0x4f3   : > { %v7287_v56 = vadd.f32 %v12860_v62, %v7138_v48 }
 0x4f4   : > { %v12870_v40 = vpop.f32.mrf.mxu1  ;;  %v7254_v13 = vpop.f32.mrf.mxu0 }
 0x4f5   : > { %v7285_v31 = vadd.f32 %v7254_v13, %v7130_v7  ;;  %v7396_v54 = vadd.f32 %v12870_v40, %v7287_v56 }
 0x4f6   : > { %v7363_v41 = vpop.f32.mrf.mxu1  ;;  %v12861_v15 = vpop.f32.mrf.mxu0 }
 0x4f7   : > { %v7288_v43 = vadd.f32 %v12861_v15, %v7141_v19  ;;  %v7394_v47 = vadd.f32 %v7363_v41, %v7285_v31  ;;  %v7149_v19 = vadd.f32 %v7148_v11, %v17202_v0 }
 0x4f8   : > { %v12871_v14 = vpop.f32.mrf.mxu1  ;;  %v7257_v25 = vpop.f32.mrf.mxu0 }
 0x4f9   : > { %v7286_v51 = vadd.f32 %v7257_v25, %v7133_v6  ;;  %v7397_v10 = vadd.f32 %v12871_v14, %v7288_v43 }
 0x4fa   : > { %v7366_v53 = vpop.f32.mrf.mxu1  ;;  %v12864_v37 = vpop.f32.mrf.mxu0 }
 0x4fb   : > { %v7395_v52 = vadd.f32 %v7366_v53, %v7286_v51 }
 0x4fc   : > { %v12874_v49 = vpop.f32.mrf.mxu1  ;;  %v7270_v20 = vpop.f32.mrf.mxu0 }
 0x4fd   : > { %v7289_v36 = vadd.f32 %v7270_v20, %v7146_v33 }
 0x4fe   : > { %v7379_v59 = vpop.f32.mrf.mxu1  ;;  %v12865_v63 = vpop.f32.mrf.mxu0 }
 0x500   : > { %v12875_v45 = vpop.f32.mrf.mxu1  ;;  %v7273_v22 = vpop.f32.mrf.mxu0 }
 0x501   : > { %v7290_v38 = vadd.f32 %v7273_v22, %v7149_v19 }
 0x502   : > { %v17204_v55 = vpop.f32.mrf.mxu1  ;;  %v12880_v24 = vpop.f32.mrf.mxu0 }
 0x503   : > { %v7497_v34 = vadd.f32 %v12880_v24, %v7396_v54 }
 0x504   : > { %v12890_v58 = vpop.f32.mrf.mxu1  ;;  %v7464_v44 = vpop.f32.mrf.mxu0 }
 0x505   : > { %v7495_v62 = vadd.f32 %v7464_v44, %v7394_v47  ;;  %v7606_v13 = vadd.f32 %v12890_v58, %v7497_v34 }
 0x506   : > { %v7573_v5 = vpop.f32.mrf.mxu1  ;;  %v12881_v9 = vpop.f32.mrf.mxu0 }
 0x507   : > { %v7498_v16 = vadd.f32 %v12881_v9, %v7397_v10  ;;  %v7604_v6 = vadd.f32 %v7573_v5, %v7495_v62 }
 0x508   : > { %v12891_v27 = vpop.f32.mrf.mxu1  ;;  %v7467_v2 = vpop.f32.mrf.mxu0 }
 0x509   : > { %v7496_v54 = vadd.f32 %v7467_v2, %v7395_v52  ;;  %v7607_v47 = vadd.f32 %v12891_v27, %v7498_v16 }
 0x50a   : > { %v7576_v29 = vpop.f32.mrf.mxu1  ;;  %v12884_v18 = vpop.f32.mrf.mxu0 }
 0x50b   : > { %v7605_v15 = vadd.f32 %v7576_v29, %v7496_v54 }
 0x50c   : > { %v12894_v8 = vpop.f32.mrf.mxu1  ;;  %v7480_v1 = vpop.f32.mrf.mxu0 }
 0x50e   : > { %v17206_v23 = vpop.f32.mrf.mxu1  ;;  %v12885_v50 = vpop.f32.mrf.mxu0 }
 0x510   : > { %v17208_v57 = vpop.f32.mrf.mxu1  ;;  %v7483_v35 = vpop.f32.mrf.mxu0 }
 0x511   : > { %19519 = vst [vmem:[#allocation77_spill] sm:$0xff] %v17208_v57  ;;  %v7291_v57 = vadd.f32 %v12864_v37, %v7154_v32  ;;  %v7398_v32 = vadd.f32 %v7379_v59, %v7289_v36 }
 0x512   : > { %v17210_v12 = vpop.f32.mrf.mxu1  ;;  %v12900_v46 = vpop.f32.mrf.mxu0 }
 0x513   : > { %19520 = vst [vmem:[#allocation106_spill] sm:$0xff] %v17210_v12  ;;  %v7157_v12 = vadd.f32 %v12855_v28, %v12845_v30  ;;  %v7400_v56 = vadd.f32 %v12874_v49, %v7291_v57  ;;  %v7715_v61 = vadd.f32 %v12900_v46, %v7606_v13  ;;  %v7499_v28 = vadd.f32 %v7480_v1, %v7398_v32  ;;  %v11628_v46 = vld [vmem:[%s18079_s6] ss:$0 sm:$0xff] }
 0x514   : > { %v12910_v60 = vpop.f32.mrf.mxu1  ;;  %v7682_v4 = vpop.f32.mrf.mxu0 }
 0x515   : > { %v7292_v26 = vadd.f32 %v12865_v63, %v7157_v12  ;;  %v7501_v21 = vadd.f32 %v12884_v18, %v7400_v56  ;;  %v7713_v30 = vadd.f32 %v7682_v4, %v7604_v6  ;;  %v7816_v14 = vadd.f32 %v12910_v60, %v7715_v61 }
 0x516   : > { %v7783_v3 = vpop.f32.mrf.mxu1  ;;  %v12901_v39 = vpop.f32.mrf.mxu0  ;;  %v7399_v12 = vadd.f32 %v17204_v55, %v7290_v38  ;;  %v7608_v4 = vadd.f32 %v17206_v23, %v7499_v28 }
 0x517   : > { %v7401_v33 = vadd.f32 %v12875_v45, %v7292_v26  ;;  %v7716_v0 = vadd.f32 %v12901_v39, %v7607_v47  ;;  %v7610_v57 = vadd.f32 %v12894_v8, %v7501_v21  ;;  %v7814_v53 = vadd.f32 %v7783_v3, %v7713_v30 }
 0x518   : > { %v12911_v17 = vpop.f32.mrf.mxu1  ;;  %v7685_v48 = vpop.f32.mrf.mxu0  ;;  %v7500_v20 = vadd.f32 %v7483_v35, %v7399_v12  ;;  %v19521_v55 = vld [vmem:[#allocation77_spill] sm:$0xff] }
 0x519   : > { %v7502_v11 = vadd.f32 %v12885_v50, %v7401_v33  ;;  %v7714_v37 = vadd.f32 %v7685_v48, %v7605_v15  ;;  %v7817_v60 = vadd.f32 %v12911_v17, %v7716_v0 }
 0x51a   : > { %v12904_v7 = vpop.f32.mrf.mxu0  ;;  %v7786_v42 = vpop.f32.mrf.mxu1  ;;  %v19522_v3 = vld [vmem:[#allocation106_spill] sm:$0xff] }
 0x51b   : > { %v7719_v59 = vadd.f32 %v12904_v7, %v7610_v57  ;;  %v7611_v24 = vadd.f32 %v19521_v55, %v7502_v11  ;;  %v7815_v5 = vadd.f32 %v7786_v42, %v7714_v37  ;;  %v7609_v29 = vadd.f32 %v19522_v3, %v7500_v20 }
 0x51c   : > { %v7698_v31 = vpop.f32.mrf.mxu0  ;;  %v12914_v40 = vpop.f32.mrf.mxu1 }
 0x51d   : > { %v7717_v58 = vadd.f32 %v7698_v31, %v7608_v4  ;;  %v7820_v18 = vadd.f32 %v12914_v40, %v7719_v59 }
 0x51e   : > { %v12905_v43 = vpop.f32.mrf.mxu0  ;;  %v7799_v63 = vpop.f32.mrf.mxu1 }
 0x51f   : > { %v7720_v35 = vadd.f32 %v12905_v43, %v7611_v24  ;;  %v7818_v34 = vadd.f32 %v7799_v63, %v7717_v58 }
 0x520   : > { %v7701_v41 = vpop.f32.mrf.mxu0  ;;  %v12915_v8 = vpop.f32.mrf.mxu1 }
 0x521   : > { %v7718_v48 = vadd.f32 %v7701_v41, %v7609_v29  ;;  %v7821_v13 = vadd.f32 %v12915_v8, %v7720_v35  ;;  %v13270_v8 = vld [vmem:[%s18080_s7] sm:$0xff]  }
 0x522   : > { %v12920_v25 = vpop.f32.mrf.mxu0  ;;  %v7802_v7 = vpop.f32.mrf.mxu1 }
 0x523   : > { %v7925_v49 = vadd.f32 %v12920_v25, %v7816_v14  ;;  %v7819_v42 = vadd.f32 %v7802_v7, %v7718_v48  ;;  %v13271_v48 = vld [vmem:[%s18080_s7 + $0x20] sm:$0xff]   ;;  %v19531_v7 = vmov 0.0  }
 0x524   : > { %v7892_v45 = vpop.f32.mrf.mxu0 }
 0x525   : > { %v7940_v39 = vadd.f32 %v11628_v46, %v7925_v49  ;;  %v7923_v22 = vadd.f32 %v7892_v45, %v7814_v53 }
 0x526   : > { %v12921_v44 = vpop.f32.mrf.mxu0 }
 0x527   : > { %v7948_v9 = vmax.f32 %v7940_v39, 0.0  ;;  %v7938_v27 = vadd.f32 %v11628_v46, %v7923_v22  ;;  %v7926_v2 = vadd.f32 %v12921_v44, %v7817_v60 }
 0x528   : > { %v7895_v1 = vpop.f32.mrf.mxu0 }
 0x529   : > { %7969 = vst.msk [vmem:[#allocation6 + $0x19] sm:$0xff] %vm18389_vm5, %v7948_v9  ;;  %v7946_v23 = vmax.f32 %v7938_v27, 0.0  ;;  %v7941_v50 = vadd.f32 %v11628_v46, %v7926_v2  ;;  %v7924_v51 = vadd.f32 %v7895_v1, %v7815_v5  ;;  %v19523_v9 = vld [vmem:[#allocation11_spill] sm:$0xff]  ;;  %v19524_v2 = vld [vmem:[#allocation40_spill] sm:$0xff] }
 0x52a   : > { %v12924_v17 = vpop.f32.mrf.mxu0  ;;  %v8028_v27 = vand.u32 3, %v19523_v9  ;;  %v8029_v3 = vand.u32 3, %v19524_v2 }
 0x52b   : > { %7967 = vst.msk [vmem:[#allocation6 + $0x9] sm:$0xff] %vm18389_vm5, %v7946_v23  ;;  %v7949_v10 = vmax.f32 %v7941_v50, 0.0  ;;  %v7939_v62 = vadd.f32 %v11628_v46, %v7924_v51  ;;  %v7929_v36 = vadd.f32 %v12924_v17, %v7820_v18 }
 0x52c   : > { %v7908_v52 = vpop.f32.mrf.mxu0  ;;  %vm17234_vm4 = vcmp.le.s32.totalorder %v8028_v27, 2  ;;  %vm17241_vm8 = vcmp.le.s32.totalorder %v8029_v3, 2  ;;  %vm17266_vm15 = vcmp.ge.s32.totalorder %v8028_v27, 1 }
 0x52d   : > { %7970 = vst.msk [vmem:[#allocation6 + $0x21] sm:$0xff] %vm18389_vm5, %v7949_v10  ;;  %v7947_v16 = vmax.f32 %v7939_v62, 0.0  ;;  %v7944_v19 = vadd.f32 %v11628_v46, %v7929_v36  ;;  %v7927_v56 = vadd.f32 %v7908_v52, %v7818_v34  ;;  %v13287_v62 = vld [vmem:[%s18084_s11] sm:$0xff]  }
 0x52e   : > { %v12925_v26 = vpop.f32.mrf.mxu0 }
 0x52f   : > { %7968 = vst.msk [vmem:[#allocation6 + $0x11] sm:$0xff] %vm18389_vm5, %v7947_v16  ;;  %v7952_v31 = vmax.f32 %v7944_v19, 0.0  ;;  %v7942_v6 = vadd.f32 %v11628_v46, %v7927_v56  ;;  %v7930_v54 = vadd.f32 %v12925_v26, %v7821_v13  ;;  %v13272_v26 = vld [vmem:[%s18080_s7 + $0x18] sm:$0xff]  }
 0x530   : > { %v7993_v61 = vld [vmem:[#allocation6 + $0x19] ss:$2 sm:$0xf]  ;;  %v7995_v32 = vld [vmem:[#allocation6 + $0x1a] ss:$2 sm:$0xf]  ;;  %v7911_v38 = vpop.f32.mrf.mxu0 }
 0x531   : > { %7973 = vst.msk [vmem:[#allocation6 + $0x39] sm:$0xff] %vm18389_vm5, %v7952_v31  ;;  %v7950_v21 = vmax.f32 %v7942_v6, 0.0  ;;  %v7945_v43 = vadd.f32 %v11628_v46, %v7930_v54  ;;  %v7928_v47 = vadd.f32 %v7911_v38, %v7819_v42  ;;  %v7996_v28 = vmax.f32 %v7993_v61, %v7995_v32  ;;  %v13273_v6 = vld [vmem:[%s18080_s7 + $0x30] sm:$0xff]   ;;  %v17476_v18 = vld [vmem:[#allocation6 + $0x19] sm:$0xff] }
 0x532   : > { %v7980_v30 = vld [vmem:[#allocation6 + $0x9] ss:$2 sm:$0xf]  ;;  %v7982_v33 = vld [vmem:[#allocation6 + $0xa] ss:$2 sm:$0xf] }
 0x533   : > { %7971 = vst.msk [vmem:[#allocation6 + $0x29] sm:$0xff] %vm18389_vm5, %v7950_v21  ;;  %v7953_v40 = vmax.f32 %v7945_v43, 0.0  ;;  %v7943_v41 = vadd.f32 %v11628_v46, %v7928_v47  ;;  %v7983_v14 = vmax.f32 %v7980_v30, %v7982_v33  ;;  %v13274_v33 = vld [vmem:[%s18080_s7 + $0x28] sm:$0xff]  }
 0x534   : > { %v7998_v15 = vld [vmem:[#allocation6 + $0x21] ss:$2 sm:$0xf]  ;;  %v8001_v57 = vld [vmem:[#allocation6 + $0x22] ss:$2 sm:$0xf] }
 0x535   : > { %v7999_v0 = vmax.f32 %v7996_v28, %v7998_v15  ;;  %7974 = vst.msk [vmem:[#allocation6 + $0x41] sm:$0xff] %vm18389_vm5, %v7953_v40  ;;  %v7951_v12 = vmax.f32 %v7943_v41, 0.0  ;;  %v13275_v40 = vld [vmem:[%s18080_s7 + $0x40] sm:$0xff]  }
 0x536   : > { %v7985_v11 = vld [vmem:[#allocation6 + $0x11] ss:$2 sm:$0xf]  ;;  %v7988_v37 = vld [vmem:[#allocation6 + $0x12] ss:$2 sm:$0xf] }
 0x537   : > { %v8002_v25 = vmax.f32 %v7999_v0, %v8001_v57  ;;  %v7986_v53 = vmax.f32 %v7983_v14, %v7985_v11  ;;  %7972 = vst.msk [vmem:[#allocation6 + $0x31] sm:$0xff] %vm18389_vm5, %v7951_v12 }
 0x538   : > { %v8017_v49 = vld [vmem:[#allocation6 + $0x39] ss:$2 sm:$0xf]  ;;  %v8019_v4 = vld [vmem:[#allocation6 + $0x3a] ss:$2 sm:$0xf] }
 0x539   : > { %8003 = vst.msk [vmem:[#allocation7 + $0x9] sm:$0xf] %vm7990_vm13, %v8002_v25  ;;  %v7989_v20 = vmax.f32 %v7986_v53, %v7988_v37  ;;  %v8020_v63 = vmax.f32 %v8017_v49, %v8019_v4  ;;  %v13276_v25 = vld [vmem:[%s18080_s7 + $0x38] sm:$0xff]  }
 0x53a   : > { %v8005_v46 = vld [vmem:[#allocation6 + $0x29] ss:$2 sm:$0xf]  ;;  %v8007_v59 = vld [vmem:[#allocation6 + $0x2a] ss:$2 sm:$0xf] }
 0x53b   : > { %7991 = vst.msk [vmem:[#allocation7 + $0x5] sm:$0xf] %vm7990_vm13, %v7989_v20  ;;  %v8008_v60 = vmax.f32 %v8005_v46, %v8007_v59  ;;  %v13277_v46 = vld [vmem:[%s18082_s9 + $0x8] sm:$0xff]   ;;  %v13278_v59 = vld [vmem:[%s18082_s9] sm:$0xff]  }
 0x53c   : > { %v8022_v45 = vld [vmem:[#allocation6 + $0x41] ss:$2 sm:$0xf]  ;;  %v8025_v22 = vld [vmem:[#allocation6 + $0x42] ss:$2 sm:$0xf] }
 0x53d   : > { %v8023_v39 = vmax.f32 %v8020_v63, %v8022_v45 }
 0x53e   : > { %v8010_v55 = vld [vmem:[#allocation6 + $0x31] ss:$2 sm:$0xf]  ;;  %v8013_v44 = vld [vmem:[#allocation6 + $0x32] ss:$2 sm:$0xf] }
 0x53f   : > { %v8026_v24 = vmax.f32 %v8023_v39, %v8025_v22  ;;  %v8011_v58 = vmax.f32 %v8008_v60, %v8010_v55 }
 0x541   : > { %8027 = vst.msk [vmem:[#allocation7 + $0x11] sm:$0xf] %vm7990_vm13, %v8026_v24  ;;  %v8014_v5 = vmax.f32 %v8011_v58, %v8013_v44 }
 0x542   : > { %v8148_v29 = vld [vmem:[#allocation7 + $0x2] sm:$0xff] }
 0x543   : > { %8015 = vst.msk [vmem:[#allocation7 + $0xd] sm:$0xf] %vm7990_vm13, %v8014_v5  ;;  %v8043_v35 = vld [vmem:[#allocation7 + $0x1] sm:$0xff]  ;;  %v8156_v34 = vsel %vm17234_vm4, %v8148_v29, 0.0  ;;  %vm17258_vm13 = vcmp.ge.s32.totalorder %v8029_v3, 1 }
 0x544   : > { %v8030_v52 = vld [vmem:[#allocation7] sm:$0xff] }
 0x545   : > { %v8038_v56 = vsel %vm17266_vm15, %v8030_v52, 0.0  ;;  %v8272_v31 = vld [vmem:[#allocation7 + $0x5] sm:$0xff] }
 0x546   : > { %v8213_v38 = vld [vmem:[#allocation7 + $0x4] sm:$0xff] }
 0x547   : > { %v8215_v30 = vsel %vm17266_vm15, %v8213_v38, 0.0 }
 0x548   : > { %v8505_v57 = vld [vmem:[#allocation7 + $0x12] sm:$0xff] }
 0x549   : > { %v8507_v37 = vsel %vm17241_vm8, %v8505_v57, 0.0  ;;  %v8448_v4 = vld [vmem:[#allocation7 + $0x11] sm:$0xff] }
 0x54a   : > { %v17245_v23 = vld [vmem:[#allocation7 + $0x9] sm:$0xff] }
 0x54b   : > { %v17247_v50 = vld [vmem:[#allocation7 + $0xa] sm:$0xff]  ;;  %v8047_v51 = vpack.c.bf16 %v17245_v23, %v8043_v35  ;;  %v8451_v20 = vpack.c.bf16 %v8448_v4, %v17245_v23 }
 0x54c   : > { %v8157_v17 = vsel %vm17241_vm8, %v17247_v50, 0.0  ;;  %v8031_v36 = vld [vmem:[#allocation7 + $0x8] sm:$0xff]  ;;  %v8389_v32 = vld [vmem:[#allocation7 + $0x10] sm:$0xff]  ;;  %v8506_v11 = vsel %vm17234_vm4, %v17247_v50, 0.0 }
 0x54d   : > { %v8160_v10 = vpack.c.bf16 %v8157_v17, %v8156_v34  ;;  %12929 = vmatmul.mubr.msk.bf16.vlgmr.msra.gmra.mxu1 %vm18389_vm5, %v8047_v51  ;;  %v8039_v16 = vsel %vm17258_vm13, %v8031_v36, 0.0  ;;  %v8273_v19 = vld [vmem:[#allocation7 + $0xd] sm:$0xff]  ;;  %v8390_v43 = vsel %vm17266_vm15, %v8031_v36, 0.0  ;;  %v8391_v47 = vsel %vm17258_vm13, %v8389_v32, 0.0 }
 0x54e   : > { %12933 = vmatpush3.bf16.msra.mxu1 %v13270_v8  ;;  %12934 = vmatprep.mubr.msk.bf16.mxu1 %vm19532_vm2, %v19531_v7  ;;  %v8042_v42 = vpack.c.bf16 %v8039_v16, %v8038_v56  ;;  %v8276_v54 = vpack.c.bf16 %v8273_v19, %v8272_v31  ;;  %v8214_v61 = vld [vmem:[#allocation7 + $0xc] sm:$0xff]  ;;  %v8394_v41 = vpack.c.bf16 %v8391_v47, %v8390_v43 }
 0x54f   : > { %12941 = vmatmul.mubr.msk.bf16.vlgmr.msra.gmra.mxu0 %vm18389_vm5, %v8160_v10  ;;  %12944 = vmatprep.subr.bf16.mxu1 %v19531_v7  ;;  %v8216_v21 = vsel %vm17258_vm13, %v8214_v61, 0.0  ;;  %v8329_v15 = vld [vmem:[#allocation7 + $0x6] sm:$0xff]  ;;  %v8330_v14 = vld [vmem:[#allocation7 + $0xe] sm:$0xff]  ;;  %v8510_v49 = vpack.c.bf16 %v8507_v37, %v8506_v11 }
 0x550   : > { %12951 = vmatpush3.bf16.msra.mxu0 %v13271_v48  ;;  %12952 = vmatprep.mubr.msk.bf16.mxu0 %vm19532_vm2, %v19531_v7  ;;  %v8219_v28 = vpack.c.bf16 %v8216_v21, %v8215_v30  ;;  %v8331_v0 = vsel %vm17234_vm4, %v8329_v15, 0.0  ;;  %v8332_v12 = vsel %vm17241_vm8, %v8330_v14, 0.0  ;;  %v11647_v14 = vld [vmem:[%s18081_s8] ss:$0 sm:$0xff] }
 0x551   : > { %12962 = vmatprep.subr.bf16.mxu0 %v19531_v7  ;;  %v8335_v53 = vpack.c.bf16 %v8332_v12, %v8331_v0 }
 0x555   : > { %12935 = vmatmul.mubr.msk.bf16.vlgmr.msra.gmra.mxu1 %vm18389_vm5, %v8042_v42 }
 0x556   : > { %12945 = vmatpush3.bf16.msra.mxu1 %v13272_v26  ;;  %12946 = vmatprep.mubr.msk.bf16.mxu1 %vm19532_vm2, %v19531_v7 }
 0x557   : > { %12953 = vmatmul.mubr.msk.bf16.vlgmr.msra.gmra.mxu0 %vm18389_vm5, %v8276_v54  ;;  %12956 = vmatprep.subr.bf16.mxu1 %v19531_v7 }
 0x558   : > { %12963 = vmatpush3.bf16.msra.mxu0 %v13273_v6  ;;  %12964 = vmatprep.mubr.msk.bf16.mxu0 %vm19532_vm2, %v19531_v7 }
 0x559   : > { %12974 = vmatprep.subr.bf16.mxu0 %v19531_v7 }
 0x55d   : > { %12947 = vmatmul.mubr.msk.bf16.vlgmr.msra.gmra.mxu1 %vm18389_vm5, %v8219_v28 }
 0x55e   : > { %12957 = vmatpush3.bf16.msra.mxu1 %v13274_v33  ;;  %12958 = vmatprep.mubr.msk.bf16.mxu1 %vm19532_vm2, %v19531_v7 }
 0x55f   : > { %12965 = vmatmul.mubr.msk.bf16.vlgmr.msra.gmra.mxu0 %vm18389_vm5, %v8394_v41  ;;  %12968 = vmatprep.subr.bf16.mxu1 %v19531_v7 }
 0x560   : > { %12975 = vmatpush3.bf16.msra.mxu0 %v13275_v40  ;;  %12976 = vmatprep.mubr.msk.bf16.mxu0 %vm19532_vm2, %v19531_v7 }
 0x561   : > { %12986 = vmatprep.subr.bf16.mxu0 %v19531_v7 }
 0x565   : > { %12959 = vmatmul.mubr.msk.bf16.vlgmr.msra.gmra.mxu1 %vm18389_vm5, %v8335_v53 }
 0x566   : > { %12969 = vmatpush3.bf16.msra.mxu1 %v13276_v25  ;;  %12970 = vmatprep.mubr.msk.bf16.mxu1 %vm19532_vm2, %v19531_v7 }
 0x567   : > { %12977 = vmatmul.mubr.msk.bf16.vlgmr.msra.gmra.mxu0 %vm18389_vm5, %v8510_v49  ;;  %12980 = vmatprep.subr.bf16.mxu1 %v19531_v7 }
 0x568   : > { %12988 = vmatprep.mubr.msk.bf16.mxu0 %vm19532_vm2, %v19531_v7  ;;  %12987 = vmatpush3.bf16.msra.mxu0 %v13278_v59 }
 0x569   : > { %12998 = vmatprep.subr.bf16.mxu0 %v19531_v7 }
 0x56d   : > { %12971 = vmatmul.mubr.msk.bf16.vlgmr.msra.gmra.mxu1 %vm18389_vm5, %v8451_v20 }
 0x56e   : > { %12982 = vmatprep.mubr.msk.bf16.mxu1 %vm19532_vm2, %v19531_v7  ;;  %12981 = vmatpush3.bf16.msra.mxu1 %v13277_v46 }
 0x56f   : > { %12992 = vmatprep.subr.bf16.mxu1 %v19531_v7 }
 0x60d   : > { %v8091_v63 = vpop.f32.mrf.mxu1 }
 0x60f   : > { %v8204_v45 = vpop.f32.mrf.mxu0  ;;  %v12930_v60 = vpop.f32.mrf.mxu1 }
 0x611   : > { %v12942_v39 = vpop.f32.mrf.mxu0  ;;  %v8094_v22 = vpop.f32.mrf.mxu1 }
 0x613   : > { %v8207_v55 = vpop.f32.mrf.mxu0  ;;  %v12931_v24 = vpop.f32.mrf.mxu1 }
 0x615   : > { %v12943_v58 = vpop.f32.mrf.mxu0  ;;  %v8141_v44 = vpop.f32.mrf.mxu1 }
 0x616   : > { %v8142_v35 = vadd.f32 %v8141_v44, %v8091_v63  ;;  %v13279_v63 = vld [vmem:[%s18082_s9 + $0x10] sm:$0xff]   ;;  %v13280_v58 = vld [vmem:[%s18082_s9 + $0x18] sm:$0xff]  }
 0x617   : > { %v8320_v5 = vpop.f32.mrf.mxu0  ;;  %v12936_v27 = vpop.f32.mrf.mxu1 }
 0x618   : > { %v8211_v48 = vadd.f32 %v8204_v45, %v8142_v35 }
 0x619   : > { %v12954_v2 = vpop.f32.mrf.mxu0  ;;  %v8144_v3 = vpop.f32.mrf.mxu1 }
 0x61a   : > { %v8145_v17 = vadd.f32 %v8144_v3, %v8094_v22 }
 0x61b   : > { %v8323_v29 = vpop.f32.mrf.mxu0  ;;  %v12937_v8 = vpop.f32.mrf.mxu1 }
 0x61c   : > { %v8212_v56 = vadd.f32 %v8207_v55, %v8145_v17 }
 0x61d   : > { %v12955_v23 = vpop.f32.mrf.mxu0  ;;  %v8263_v50 = vpop.f32.mrf.mxu1 }
 0x61e   : > { %v8270_v52 = vadd.f32 %v8263_v50, %v8211_v48  ;;  %v13281_v23 = vld [vmem:[%s18082_s9 + $0x20] sm:$0xff]  }
 0x61f   : > { %v8438_v51 = vpop.f32.mrf.mxu0  ;;  %v12948_v34 = vpop.f32.mrf.mxu1 }
 0x620   : > { %v8327_v6 = vadd.f32 %v8320_v5, %v8270_v52  ;;  %v13282_v34 = vld [vmem:[%s18082_s9 + $0x28] sm:$0xff]  }
 0x621   : > { %v12966_v10 = vpop.f32.mrf.mxu0  ;;  %v8266_v36 = vpop.f32.mrf.mxu1 }
 0x622   : > { %v8271_v31 = vadd.f32 %v8266_v36, %v8212_v56  ;;  %v13283_v56 = vld [vmem:[%s18082_s9 + $0x30] sm:$0xff]  }
 0x623   : > { %v8441_v16 = vpop.f32.mrf.mxu0  ;;  %v12949_v19 = vpop.f32.mrf.mxu1 }
 0x624   : > { %v8328_v43 = vadd.f32 %v8323_v29, %v8271_v31 }
 0x625   : > { %v12967_v26 = vpop.f32.mrf.mxu0  ;;  %v8379_v42 = vpop.f32.mrf.mxu1 }
 0x626   : > { %v8386_v32 = vadd.f32 %v8379_v42, %v8327_v6  ;;  %v13284_v42 = vld [vmem:[%s18082_s9 + $0x38] sm:$0xff]  }
 0x627   : > { %v8554_v54 = vpop.f32.mrf.mxu0  ;;  %v12960_v61 = vpop.f32.mrf.mxu1 }
 0x628   : > { %v8445_v40 = vadd.f32 %v8438_v51, %v8386_v32 }
 0x629   : > { %v12978_v38 = vpop.f32.mrf.mxu0  ;;  %v8382_v21 = vpop.f32.mrf.mxu1 }
 0x62a   : > { %v8387_v33 = vadd.f32 %v8382_v21, %v8328_v43  ;;  %v13285_v21 = vld [vmem:[%s18082_s9 + $0x40] sm:$0xff]   ;;  %v9147_v43 = vld [vmem:[#allocation6 + $0x1] sm:$0xff] }
 0x62b   : > { %v8557_v47 = vpop.f32.mrf.mxu0  ;;  %v12961_v30 = vpop.f32.mrf.mxu1 }
 0x62c   : > { %v8446_v57 = vadd.f32 %v8441_v16, %v8387_v33 }
 0x62d   : > { %v12979_v28 = vpop.f32.mrf.mxu0  ;;  %v8495_v41 = vpop.f32.mrf.mxu1 }
 0x62e   : > { %v8502_v15 = vadd.f32 %v8495_v41, %v8445_v40  ;;  %v13288_v40 = vld [vmem:[%s18084_s11 + $0x10] sm:$0xff]   ;;  %v9125_v41 = vld [vmem:[#allocation6] sm:$0xff] }
 0x62f   : > { %v12972_v0 = vpop.f32.mrf.mxu1 }
 0x630   : > { %v8561_v12 = vadd.f32 %v8554_v54, %v8502_v15  ;;  %v13286_v54 = vld [vmem:[%s18084_s11 + $0x8] sm:$0xff]   ;;  %v17455_v15 = vld [vmem:[#allocation6 + $0x8] sm:$0xff] }
 0x631   : > { %v8498_v11 = vpop.f32.mrf.mxu1 }
 0x632   : > { %v8570_v25 = vadd.f32 %v11647_v14, %v8561_v12  ;;  %v8503_v53 = vadd.f32 %v8498_v11, %v8446_v57  ;;  %v17465_v12 = vld [vmem:[#allocation6 + $0x11] sm:$0xff]  ;;  %v9133_v11 = vsel %vm16675_vm0, %v9125_v41, 0.0 }
 0x633   : > { %v12973_v37 = vpop.f32.mrf.mxu1  ;;  %v17480_v1 = vpack.c.bf16 %v17476_v18, %v17465_v12 }
 0x634   : > { %v8572_v49 = vmax.f32 %v8570_v25, 0.0  ;;  %v8562_v4 = vadd.f32 %v8557_v47, %v8503_v53  ;;  %v17438_v47 = vld [vmem:[#allocation6 + $0x9] sm:$0xff]  ;;  %v9134_v53 = vsel %vm16689_vm6, %v17455_v15, 0.0 }
 0x635   : > { %v9157_v13 = vpack.c.bf16 %v17438_v47, %v9147_v43  ;;  %v17472_v37 = vld [vmem:[#allocation6 + $0x29] sm:$0xff] }
 0x636   : > { %8578 = vst.msk [vmem:[#allocation8 + $0x5] sm:$0xff] %vm18389_vm5, %v8572_v49  ;;  %v8571_v20 = vadd.f32 %v11647_v14, %v8562_v4  ;;  %v9143_v4 = vpack.c.bf16 %v9134_v53, %v9133_v11  ;;  %v13296_v11 = vld [vmem:[%s18086_s13] sm:$0xff]  }
 0x638   : > { %v8573_v46 = vmax.f32 %v8571_v20, 0.0  ;;  %v17482_v20 = vld [vmem:[#allocation6 + $0x21] sm:$0xff] }
 0x63a   : > { %8579 = vst.msk [vmem:[#allocation8 + $0xd] sm:$0xff] %vm18389_vm5, %v8573_v46  ;;  %v13289_v46 = vld [vmem:[%s18084_s11 + $0x18] sm:$0xff]  }
 0x63d   : > { %v8580_v59 = vld [vmem:[#allocation8] sm:$0xff] }
 0x63e   : > { %v8587_v45 = vld [vmem:[#allocation8 + $0x1] sm:$0xff]  ;;  %v8582_v55 = vsel %vm17266_vm15, %v8580_v59, 0.0  ;;  %v17491_v59 = vpack.c.bf16 %v17472_v37, %v17482_v20 }
 0x63f   : > { %v8692_v2 = vld [vmem:[#allocation8 + $0x2] sm:$0xff] }
 0x640   : > { %v8751_v29 = vld [vmem:[#allocation8 + $0x4] sm:$0xff]  ;;  %v8694_v35 = vsel %vm17234_vm4, %v8692_v2, 0.0 }
 0x641   : > { %v8588_v60 = vld [vmem:[#allocation8 + $0x9] sm:$0xff]  ;;  %v8753_v51 = vsel %vm17266_vm15, %v8751_v29, 0.0  ;;  %v8986_v38 = vld [vmem:[#allocation8 + $0x11] sm:$0xff]  ;;  %v19540_v29 = vld [vmem:[#allocation71_spill] sm:$0xff] }
 0x642   : > { %v8581_v39 = vld [vmem:[#allocation8 + $0x8] sm:$0xff]  ;;  %v17353_v22 = vpack.c.bf16 %v8588_v60, %v8587_v45  ;;  %v8927_v6 = vld [vmem:[#allocation8 + $0x10] sm:$0xff]  ;;  %v17442_v33 = vpack.c.bf16 %v8986_v38, %v8588_v60  ;;  %v17495_v45 = vld [vmem:[#allocation6 + $0x18] sm:$0xff] }
 0x643   : > { %v8583_v24 = vsel %vm17258_vm13, %v8581_v39, 0.0  ;;  %v17366_v5 = vld [vmem:[#allocation8 + $0xa] sm:$0xff]  ;;  %v8928_v61 = vsel %vm17266_vm15, %v8581_v39, 0.0  ;;  %v8929_v32 = vsel %vm17258_vm13, %v8927_v6, 0.0  ;;  %v9043_v28 = vld [vmem:[#allocation8 + $0x12] sm:$0xff]  ;;  %v13290_v60 = vld [vmem:[%s18084_s11 + $0x20] sm:$0xff]  }
 0x644   : > { %v17362_v44 = vpack.c.bf16 %v8583_v24, %v8582_v55  ;;  %12983 = vmatmul.mubr.msk.bf16.vlgmr.msra.gmra.mxu1 %vm18389_vm5, %v17353_v22  ;;  %v8752_v27 = vld [vmem:[#allocation8 + $0xc] sm:$0xff]  ;;  %v8695_v3 = vsel %vm17241_vm8, %v17366_v5, 0.0  ;;  %v17440_v30 = vpack.c.bf16 %v8929_v32, %v8928_v61  ;;  %v9044_v14 = vsel %vm17234_vm4, %v17366_v5, 0.0  ;;  %v19537_v24 = vld [vmem:[#allocation46_spill] sm:$0xff]  ;;  %v19538_v5 = vld [vmem:[#allocation43_spill] sm:$0xff] }
 0x645   : > { %12993 = vmatpush3.bf16.msra.mxu1 %v13279_v63  ;;  %12994 = vmatprep.mubr.msk.bf16.mxu1 %vm19532_vm2, %v19531_v7  ;;  %v8754_v8 = vsel %vm17258_vm13, %v8752_v27, 0.0  ;;  %v17386_v50 = vpack.c.bf16 %v8695_v3, %v8694_v35  ;;  %v8867_v48 = vld [vmem:[#allocation8 + $0x6] sm:$0xff]  ;;  %v8868_v10 = vld [vmem:[#allocation8 + $0xe] sm:$0xff]  ;;  %v9045_v0 = vsel %vm17241_vm8, %v9043_v28, 0.0  ;;  %v17493_v63 = vld [vmem:[#allocation6 + $0x10] sm:$0xff]  ;;  %vm19539_vm15 = vnez %v19538_v5 }
 0x646   : > { %12989 = vmatmul.mubr.msk.bf16.vlgmr.msra.gmra.mxu0 %vm18389_vm5, %v17362_v44  ;;  %13004 = vmatprep.subr.bf16.mxu1 %v19531_v7  ;;  %v17393_v17 = vpack.c.bf16 %v8754_v8, %v8753_v51  ;;  %v8811_v36 = vld [vmem:[#allocation8 + $0xd] sm:$0xff]  ;;  %v8869_v52 = vsel %vm17234_vm4, %v8867_v48, 0.0  ;;  %v8870_v16 = vsel %vm17241_vm8, %v8868_v10, 0.0  ;;  %v8810_v19 = vld [vmem:[#allocation8 + $0x5] sm:$0xff]  ;;  %v17474_v49 = vpack.c.bf16 %v9045_v0, %v9044_v14  ;;  %v17517_v3 = vld [vmem:[#allocation6 + $0x31] sm:$0xff] }
 0x647   : > { %12999 = vmatpush3.bf16.msra.mxu0 %v13280_v58  ;;  %13000 = vmatprep.mubr.msk.bf16.mxu0 %vm19532_vm2, %v19531_v7  ;;  %v17412_v26 = vpack.c.bf16 %v8811_v36, %v8810_v19  ;;  %v17417_v31 = vpack.c.bf16 %v8870_v16, %v8869_v52  ;;  %v17503_v39 = vld [vmem:[#allocation6 + $0x28] sm:$0xff]  ;;  %v9135_v58 = vsel %vm19505_vm9, %v17493_v63, 0.0  ;;  %v9136_v27 = vsel %vm19539_vm15, %v17495_v45, 0.0  ;;  %v17515_v2 = vld [vmem:[#allocation6 + $0x20] sm:$0xff]  ;;  %v17542_v61 = vld [vmem:[#allocation6 + $0x38] sm:$0xff] }
 0x648   : > { %13010 = vmatprep.subr.bf16.mxu0 %v19531_v7  ;;  %v17507_v55 = vld [vmem:[#allocation6 + $0xa] sm:$0xff]  ;;  %vm19541_vm8 = vnez %v19540_v29  ;;  %v9327_v35 = vld [vmem:[#allocation6 + $0x2] sm:$0xff]  ;;  %v17525_v48 = vld [vmem:[#allocation6 + $0x39] sm:$0xff]  ;;  %v9137_v36 = vsel %vm19507_vm10, %v17515_v2, 0.0  ;;  %v9449_v14 = vsel %vm16689_vm6, %v17493_v63, 0.0 }
 0x649   : > { %v9138_v8 = vsel %vm19541_vm8, %v17503_v39, 0.0  ;;  %v9336_v51 = vsel %vm19511_vm1, %v17507_v55, 0.0  ;;  %v17532_v52 = vpack.c.bf16 %v17525_v48, %v17517_v3  ;;  %v17547_v32 = vld [vmem:[#allocation6 + $0x12] sm:$0xff]  ;;  %v17550_v38 = vld [vmem:[#allocation6 + $0x2a] sm:$0xff]  ;;  %v17558_v28 = vld [vmem:[#allocation6 + $0x1a] sm:$0xff] }
 0x64a   : > { %v9145_v16 = vpack.c.bf16 %v9138_v8, %v9137_v36  ;;  %v9337_v41 = vsel %vm19516_vm7, %v17547_v32, 0.0  ;;  %v17566_v0 = vld [vmem:[#allocation6 + $0x22] sm:$0xff]  ;;  %v9340_v53 = vsel %vm19515_vm3, %v17550_v38, 0.0  ;;  %v9998_v10 = vsel %vm19511_vm1, %v17558_v28, 0.0 }
 0x64b   : > { %v13292_v36 = vld [vmem:[%s18084_s11 + $0x30] sm:$0xff]  }
 0x64c   : > { %12995 = vmatmul.mubr.msk.bf16.vlgmr.msra.gmra.mxu1 %vm18389_vm5, %v17386_v50  ;;  %v9891_v19 = vld [vmem:[#allocation6 + $0x49] sm:$0xff] }
 0x64d   : > { %13005 = vmatpush3.bf16.msra.mxu1 %v13281_v23  ;;  %13006 = vmatprep.mubr.msk.bf16.mxu1 %vm19532_vm2, %v19531_v7 }
 0x64e   : > { %13001 = vmatmul.mubr.msk.bf16.vlgmr.msra.gmra.mxu0 %vm18389_vm5, %v17393_v17  ;;  %13016 = vmatprep.subr.bf16.mxu1 %v19531_v7 }
 0x64f   : > { %13011 = vmatpush3.bf16.msra.mxu0 %v13282_v34  ;;  %13012 = vmatprep.mubr.msk.bf16.mxu0 %vm19532_vm2, %v19531_v7  ;;  %v9144_v34 = vpack.c.bf16 %v9136_v27, %v9135_v58  ;;  %v9448_v27 = vsel %vm16675_vm0, %v17455_v15, 0.0  ;;  %v9450_v15 = vsel %vm19505_vm9, %v17495_v45, 0.0  ;;  %vm19557_vm9 = vcmask 130048  }
 0x650   : > { %13022 = vmatprep.subr.bf16.mxu0 %v19531_v7 }
 0x654   : > { %13007 = vmatmul.mubr.msk.bf16.vlgmr.msra.gmra.mxu1 %vm18389_vm5, %v17412_v26 }
 0x655   : > { %13017 = vmatpush3.bf16.msra.mxu1 %v13283_v56  ;;  %13018 = vmatprep.mubr.msk.bf16.mxu1 %vm19532_vm2, %v19531_v7  ;;  %v9335_v56 = vsel %vm16906_vm11, %v9327_v35, 0.0  ;;  %v9458_v35 = vpack.c.bf16 %v9449_v14, %v9448_v27  ;;  %v9451_v14 = vsel %vm19539_vm15, %v17515_v2, 0.0 }
 0x656   : > { %13013 = vmatmul.mubr.msk.bf16.vlgmr.msra.gmra.mxu0 %vm18389_vm5, %v17417_v31  ;;  %13028 = vmatprep.subr.bf16.mxu1 %v19531_v7  ;;  %v9345_v6 = vpack.c.bf16 %v9336_v51, %v9335_v56  ;;  %v17586_v56 = vld [vmem:[#allocation6 + $0x32] sm:$0xff] }
 0x657   : > { %13023 = vmatpush3.bf16.msra.mxu0 %v13284_v42  ;;  %13024 = vmatprep.mubr.msk.bf16.mxu0 %vm19532_vm2, %v19531_v7  ;;  %v13291_v42 = vld [vmem:[%s18084_s11 + $0x28] sm:$0xff]   ;;  %v13298_v51 = vld [vmem:[%s18086_s13 + $0x18] sm:$0xff]  }
 0x658   : > { %13034 = vmatprep.subr.bf16.mxu0 %v13286_v54 }
 0x65c   : > { %13019 = vmatmul.mubr.msk.bf16.vlgmr.msra.gmra.mxu1 %vm18389_vm5, %v17440_v30 }
 0x65d   : > { %13029 = vmatpush3.bf16.msra.mxu1 %v13285_v21  ;;  %13030 = vmatprep.mubr.msk.bf16.mxu1 %vm19532_vm2, %v19531_v7 }
 0x65e   : > { %13025 = vmatmul.mubr.msk.bf16.vlgmr.msra.gmra.mxu0 %vm18389_vm5, %v17442_v33  ;;  %13044 = vmatprep.subr.bf16.mxu1 %v13287_v62 }
 0x65f   : > { %13036 = vmatprep.mubr.msk.bf16.mxu0 %vm18389_vm5, %v9157_v13  ;;  %13035 = vmatpush3.bf16.msra.mxu0 %v13286_v54  ;;  %v17540_v54 = vld [vmem:[#allocation6 + $0x30] sm:$0xff] }
 0x660   : > { %13054 = vmatprep.subr.bf16.mxu0 %v13288_v40  ;;  %v9139_v43 = vsel %vm16894_vm14, %v17540_v54, 0.0 }
 0x664   : > { %13031 = vmatmul.mubr.msk.bf16.vlgmr.msra.gmra.mxu1 %vm18389_vm5, %v17474_v49 }
 0x665   : > { %13046 = vmatprep.mubr.msk.bf16.mxu1 %vm18389_vm5, %v9143_v4  ;;  %13045 = vmatpush3.bf16.msra.mxu1 %v13287_v62  ;;  %v19546_v62 = vld [vmem:[#allocation60_spill] sm:$0xff] }
 0x666   : > { %13037 = vmatmul.mubr.msk.bf16.vlgmr.msra.gmra.mxu0 %vm18389_vm5, %v17480_v1  ;;  %13064 = vmatprep.subr.bf16.mxu1 %v13289_v46  ;;  %vm19547_vm4 = vnez %v19546_v62 }
 0x667   : > { %13040 = vmatprep.mubr.msk.bf16.mxu0 %vm18389_vm5, %v17491_v59  ;;  %13055 = vmatpush3.bf16.msra.mxu0 %v13288_v40  ;;  %v9140_v13 = vsel %vm19547_vm4, %v17542_v61, 0.0 }
 0x668   : > { %13074 = vmatprep.subr.bf16.mxu0 %v13290_v60  ;;  %v9146_v4 = vpack.c.bf16 %v9140_v13, %v9139_v43  ;;  %v19553_v43 = vld [vmem:[#allocation69_spill] sm:$0xff] }
 0x669   : > { %vm19554_vm2 = vnez %v19553_v43 }
 0x66a   : > { %v9341_v13 = vsel %vm19554_vm2, %v17586_v56, 0.0 }
 0x66c   : > { %13047 = vmatmul.mubr.msk.bf16.vlgmr.msra.gmra.mxu1 %vm18389_vm5, %v9144_v34  ;;  %v9339_v34 = vsel %vm16974_vm12, %v17566_v0, 0.0 }
 0x66d   : > { %13050 = vmatprep.mubr.msk.bf16.mxu1 %vm18389_vm5, %v9145_v16  ;;  %13065 = vmatpush3.bf16.msra.mxu1 %v13289_v46  ;;  %v19550_v46 = vld [vmem:[#allocation23_spill] sm:$0xff]  ;;  %v9347_v16 = vpack.c.bf16 %v9340_v53, %v9339_v34  ;;  %v19555_v53 = vld [vmem:[#allocation108_spill] sm:$0xff]  ;;  %v9563_v34 = vpack.c.bf16 %v17465_v12, %v17438_v47  ;;  %v9667_v47 = vsel %vm19511_vm1, %v17547_v32, 0.0 }
 0x66e   : > { %13041 = vmatmul.mubr.msk.bf16.gmra.mxu0 %vm18389_vm5, %v17532_v52  ;;  %13084 = vmatprep.subr.bf16.mxu1 %v13291_v42  ;;  %vm19551_vm13 = vnez %v19550_v46 }
 0x66f   : > { %13056 = vmatprep.mubr.msk.bf16.mxu0 %vm18389_vm5, %v9345_v6  ;;  %v9338_v58 = vsel %vm19551_vm13, %v17558_v28, 0.0  ;;  %v17592_v6 = vld [vmem:[#allocation6 + $0x3a] sm:$0xff]  ;;  %v10000_v23 = vsel %vm19551_vm13, %v17550_v38, 0.0 }
 0x670   : > { %v9346_v8 = vpack.c.bf16 %v9338_v58, %v9337_v41  ;;  %v9453_v41 = vsel %vm19541_vm8, %v17540_v54, 0.0  ;;  %v9452_v58 = vsel %vm19507_vm10, %v17503_v39, 0.0  ;;  %vm19558_vm8 = vmmov %vm19557_vm9  ;;  %v9672_v57 = vsel %vm19554_vm2, %v17592_v6, 0.0 }
 0x671   : > { %vm19559_vm15 = vmmov %vm19558_vm8  ;;  %v10002_v62 = vsel %vm19515_vm3, %v17592_v6, 0.0 }
 0x674   : > { %13051 = vmatmul.mubr.msk.bf16.gmra.mxu1 %vm18389_vm5, %v9146_v4 }
 0x675   : > { %13066 = vmatprep.mubr.msk.bf16.mxu1 %vm18389_vm5, %v9458_v35  ;;  %v13293_v35 = vld [vmem:[%s18084_s11 + $0x38] sm:$0xff]  }
 0x676   : > { %13057 = vmatmul.mubr.msk.bf16.vlgmr.msra.gmra.mxu0 %vm18389_vm5, %v9346_v8  ;;  %v9460_v8 = vpack.c.bf16 %v9453_v41, %v9452_v58  ;;  %v9780_v58 = vsel %vm16689_vm6, %v17495_v45, 0.0  ;;  %vm19568_vm6 = vnez %v19538_v5  ;;  %v9783_v45 = vsel %vm19507_vm10, %v17540_v54, 0.0 }
 0x677   : > { %13060 = vmatprep.mubr.msk.bf16.mxu0 %vm18389_vm5, %v9347_v16  ;;  %13075 = vmatpush3.bf16.msra.mxu0 %v13290_v60  ;;  %v9459_v60 = vpack.c.bf16 %v9451_v14, %v9450_v15  ;;  %vm19556_vm5 = vnez %v19555_v53  ;;  %v9447_v16 = vld [vmem:[#allocation6 + $0x40] sm:$0xff]  ;;  %v9454_v15 = vsel %vm16894_vm14, %v17542_v61, 0.0 }
 0x678   : > { %13094 = vmatprep.subr.bf16.mxu0 %v13292_v36  ;;  %v9342_v4 = vsel %vm19556_vm5, %v17592_v6, 0.0  ;;  %vm19560_vm5 = vmmov %vm19558_vm8  ;;  %v9455_v12 = vsel %vm19547_vm4, %v9447_v16, 0.0  ;;  %v9785_v5 = vsel %vm16894_vm14, %v9447_v16, 0.0 }
 0x679   : > { %v9348_v27 = vpack.c.bf16 %v9342_v4, %v9341_v13  ;;  %v9666_v13 = vsel %vm16906_vm11, %v17507_v55, 0.0  ;;  %v9461_v41 = vpack.c.bf16 %v9455_v12, %v9454_v15  ;;  %v9565_v55 = vpack.c.bf16 %v17517_v3, %v17472_v37 }
 0x67a   : > { %v9676_v14 = vpack.c.bf16 %v9667_v47, %v9666_v13  ;;  %v9670_v4 = vsel %vm16974_vm12, %v17550_v38, 0.0  ;;  %v9671_v37 = vsel %vm19515_vm3, %v17586_v56, 0.0  ;;  %v9668_v3 = vsel %vm19516_vm7, %v17558_v28, 0.0  ;;  %v9665_v13 = vld [vmem:[#allocation6 + $0x42] sm:$0xff]  ;;  %v9996_v28 = vld [vmem:[#allocation6 + $0x4a] sm:$0xff] }
 0x67b   : > { %v10003_v40 = vsel %vm19554_vm2, %v9665_v13, 0.0 }
 0x67c   : > { %13067 = vmatmul.mubr.msk.bf16.vlgmr.msra.gmra.mxu1 %vm19557_vm9, %v9459_v60  ;;  %v13294_v60 = vld [vmem:[%s18084_s11 + $0x40] sm:$0xff]   ;;  %vm19561_vm9 = vmmov %vm19560_vm5 }
 0x67d   : > { %13070 = vmatprep.mubr.msk.bf16.mxu1 %vm19559_vm15, %v9460_v8  ;;  %13085 = vmatpush3.bf16.msra.mxu1 %v13291_v42  ;;  %v9564_v42 = vpack.c.bf16 %v17482_v20, %v17476_v18  ;;  %vm19562_vm15 = vmmov %vm19560_vm5  ;;  %v9669_v18 = vsel %vm19551_vm13, %v17566_v0, 0.0  ;;  %v9560_v20 = vld [vmem:[#allocation6 + $0x41] sm:$0xff] }
 0x67e   : > { %13061 = vmatmul.mubr.msk.bf16.gmra.mxu0 %vm19558_vm8, %v9348_v27  ;;  %13104 = vmatprep.subr.bf16.mxu1 %v13293_v35  ;;  %vm19563_vm8 = vmmov %vm19560_vm5  ;;  %v9677_v27 = vpack.c.bf16 %v9669_v18, %v9668_v3  ;;  %v9566_v8 = vpack.c.bf16 %v9560_v20, %v17525_v48 }
 0x67f   : > { %13076 = vmatprep.mubr.msk.bf16.mxu0 %vm19560_vm5, %v9563_v34  ;;  %v9678_v34 = vpack.c.bf16 %v9671_v37, %v9670_v4 }
 0x684   : > { %13071 = vmatmul.mubr.msk.bf16.gmra.mxu1 %vm19560_vm5, %v9461_v41 }
 0x685   : > { %13086 = vmatprep.mubr.msk.bf16.mxu1 %vm19562_vm15, %v9676_v14  ;;  %vm19565_vm15 = vmmov %vm19560_vm5 }
 0x686   : > { %13077 = vmatmul.mubr.msk.bf16.vlgmr.msra.gmra.mxu0 %vm19561_vm9, %v9564_v42  ;;  %vm19564_vm9 = vmmov %vm19560_vm5 }
 0x687   : > { %13080 = vmatprep.mubr.msk.bf16.mxu0 %vm19563_vm8, %v9565_v55  ;;  %13095 = vmatpush3.bf16.msra.mxu0 %v13292_v36  ;;  %v9779_v36 = vsel %vm16675_vm0, %v17493_v63, 0.0  ;;  %vm19566_vm8 = vmmov %vm19560_vm5  ;;  %vm19567_vm0 = vnez %v19555_v53  ;;  %v9782_v63 = vsel %vm19568_vm6, %v17503_v39, 0.0  ;;  %v9778_v39 = vld [vmem:[#allocation6 + $0x48] sm:$0xff] }
 0x688   : > { %13114 = vmatprep.subr.bf16.mxu0 %v13294_v60  ;;  %v9789_v15 = vpack.c.bf16 %v9780_v58, %v9779_v36  ;;  %v9673_v25 = vsel %vm19567_vm0, %v9665_v13, 0.0  ;;  %vm19572_vm6 = vmmov %vm19566_vm8 }
 0x689   : > { %vm19573_vm10 = vmmov %vm19572_vm6 }
 0x68c   : > { %13087 = vmatmul.mubr.msk.bf16.vlgmr.msra.gmra.mxu1 %vm19560_vm5, %v9677_v27  ;;  %vm19569_vm5 = vnez %v19540_v29 }
 0x68d   : > { %13090 = vmatprep.mubr.msk.bf16.mxu1 %vm19565_vm15, %v9678_v34  ;;  %13105 = vmatpush3.bf16.msra.mxu1 %v13293_v35  ;;  %v9784_v48 = vsel %vm19569_vm5, %v17542_v61, 0.0  ;;  %v9679_v35 = vpack.c.bf16 %v9673_v25, %v9672_v57  ;;  %vm19571_vm15 = vmmov %vm19566_vm8  ;;  %v9897_v61 = vpack.c.bf16 %v9891_v19, %v9560_v20 }
 0x68e   : > { %13081 = vmatmul.mubr.msk.bf16.gmra.mxu0 %vm19564_vm9, %v9566_v8  ;;  %13124 = vmatprep.subr.bf16.mxu1 %v19531_v7  ;;  %vm19570_vm9 = vnez %v19537_v24  ;;  %v9791_v41 = vpack.c.bf16 %v9784_v48, %v9783_v45  ;;  %v9786_v24 = vsel %vm19547_vm4, %v9778_v39, 0.0  ;;  %vm19574_vm5 = vmmov %vm19572_vm6 }
 0x68f   : > { %13096 = vmatprep.mubr.msk.bf16.mxu0 %vm19566_vm8, %v9789_v15  ;;  %v9781_v47 = vsel %vm19570_vm9, %v17515_v2, 0.0  ;;  %v9997_v2 = vsel %vm16906_vm11, %v17547_v32, 0.0  ;;  %v9792_v29 = vpack.c.bf16 %v9786_v24, %v9785_v5  ;;  %vm19575_vm14 = vmmov %vm19574_vm5  ;;  %v9999_v32 = vsel %vm19516_vm7, %v17566_v0, 0.0 }
 0x690   : > { %v9790_v12 = vpack.c.bf16 %v9782_v63, %v9781_v47  ;;  %v10007_v54 = vpack.c.bf16 %v9998_v10, %v9997_v2  ;;  %vm19576_vm4 = vmmov %vm19574_vm5  ;;  %v10008_v21 = vpack.c.bf16 %v10000_v23, %v9999_v32  ;;  %v10004_v0 = vsel %vm19567_vm0, %v9996_v28, 0.0 }
 0x691   : > { %vm19577_vm9 = vmmov %vm19576_vm4  ;;  %v10010_v46 = vpack.c.bf16 %v10004_v0, %v10003_v40 }
 0x692   : > { %vm19578_vm11 = vmmov %vm19576_vm4 }
 0x693   : > { %vm19579_vm1 = vmmov %vm19576_vm4 }
 0x694   : > { %13091 = vmatmul.mubr.msk.bf16.gmra.mxu1 %vm19571_vm15, %v9679_v35  ;;  %vm19581_vm13 = vmmov %vm19579_vm1 }
 0x695   : > { %13106 = vmatprep.mubr.msk.bf16.mxu1 %vm19572_vm6, %v17480_v1  ;;  %v13295_v1 = vld [vmem:[%s18086_s13 + $0x8] sm:$0xff]   ;;  %vm19582_vm7 = vmmov %vm19579_vm1 }
 0x696   : > { %13097 = vmatmul.mubr.msk.bf16.vlgmr.msra.gmra.mxu0 %vm19566_vm8, %v9790_v12  ;;  %vm19583_vm3 = vmmov %vm19579_vm1 }
 0x697   : > { %13100 = vmatprep.mubr.msk.bf16.mxu0 %vm19573_vm10, %v9791_v41  ;;  %13115 = vmatpush3.bf16.msra.mxu0 %v13294_v60  ;;  %vm19584_vm2 = vmmov %vm19579_vm1 }
 0x698   : > { %13136 = vmatprep.subr.bf16.mxu0 %v19531_v7  ;;  %vm19585_vm0 = vmmov %vm19579_vm1 }
 0x699   : > { %vm19586_vm15 = vmmov %vm19585_vm0 }
 0x69a   : > { %vm19587_vm8 = vmmov %vm19585_vm0 }
 0x69b   : > { %vm19588_vm6 = vmmov %vm19585_vm0 }
 0x69c   : > { %13107 = vmatmul.mubr.msk.bf16.vlgmr.msra.gmra.mxu1 %vm19574_vm5, %v17491_v59  ;;  %v10001_v59 = vsel %vm16974_vm12, %v17586_v56, 0.0  ;;  %vm19580_vm12 = vmmov 0   ;;  %v13299_v56 = vld [vmem:[%s18086_s13 + $0x20] sm:$0xff]   ;;  %vm19589_vm10 = vmmov %vm19585_vm0 }
 0x69d   : > { %13110 = vmatprep.mubr.msk.bf16.mxu1 %vm19576_vm4, %v17532_v52  ;;  %13125 = vmatpush3.bf16.msra.mxu1 %v13295_v1  ;;  %v13297_v52 = vld [vmem:[%s18086_s13 + $0x10] sm:$0xff]   ;;  %v10009_v38 = vpack.c.bf16 %v10002_v62, %v10001_v59  ;;  %vm19590_vm5 = vmmov %vm19585_vm0 }
 0x69e   : > { %13101 = vmatmul.mubr.msk.bf16.gmra.mxu0 %vm19575_vm14, %v9792_v29  ;;  %13130 = vmatprep.subr.bf16.mxu1 %v19531_v7  ;;  %vm19591_vm14 = vmmov %vm19585_vm0 }
 0x69f   : > { %13116 = vmatprep.mubr.msk.bf16.mxu0 %vm19577_vm9, %v10007_v54  ;;  %vm19592_vm4 = vmmov %vm19585_vm0 }
 0x6a0   : > { %vm19593_vm9 = vmmov %vm19585_vm0 }
 0x6a4   : > { %13111 = vmatmul.mubr.msk.bf16.gmra.mxu1 %vm19578_vm11, %v9897_v61  ;;  %vm9117_vm11 = vcmask 122880  }
 0x6a5   : > { %13126 = vmatprep.mubr.msk.bf16.mxu1 %vm19580_vm12, %v19531_v7 }
 0x6a6   : > { %13117 = vmatmul.mubr.msk.bf16.vlgmr.msra.gmra.mxu0 %vm19579_vm1, %v10008_v21  ;;  %v11666_v21 = vld [vmem:[%s18083_s10] ss:$0 sm:$0xff] }
 0x6a7   : > { %13120 = vmatprep.mubr.msk.bf16.mxu0 %vm19581_vm13, %v10009_v38  ;;  %13137 = vmatpush3.bf16.msra.mxu0 %v13297_v52  ;;  %vm19596_vm13 = vmmov %vm19585_vm0 }
 0x6a8   : > { %13148 = vmatprep.subr.bf16.mxu0 %v19531_v7 }
 0x6ac   : > { %13127 = vmatmul.mubr.msk.bf16.vlgmr.msra.gmra.mxu1 %vm19582_vm7, %v17353_v22  ;;  %v13300_v22 = vld [vmem:[%s18086_s13 + $0x28] sm:$0xff]  }
 0x6ad   : > { %13131 = vmatpush3.bf16.msra.mxu1 %v13296_v11  ;;  %13132 = vmatprep.mubr.msk.bf16.mxu1 %vm19580_vm12, %v19531_v7 }
 0x6ae   : > { %13121 = vmatmul.mubr.msk.bf16.gmra.mxu0 %vm19583_vm3, %v10010_v46  ;;  %13142 = vmatprep.subr.bf16.mxu1 %v19531_v7  ;;  %vm19599_vm3 = vmmov %vm19585_vm0 }
 0x6af   : > { %13138 = vmatprep.mubr.msk.bf16.mxu0 %vm19580_vm12, %v19531_v7 }
 0x6b4   : > { %13133 = vmatmul.mubr.msk.bf16.vlgmr.msra.gmra.mxu1 %vm19584_vm2, %v17362_v44  ;;  %v13301_v44 = vld [vmem:[%s18086_s13 + $0x30] sm:$0xff]   ;;  %vm19600_vm2 = vmmov %vm19585_vm0 }
 0x6b5   : > { %13143 = vmatpush3.bf16.msra.mxu1 %v13298_v51  ;;  %13144 = vmatprep.mubr.msk.bf16.mxu1 %vm19580_vm12, %v19531_v7 }
 0x6b6   : > { %13139 = vmatmul.mubr.msk.bf16.vlgmr.msra.gmra.mxu0 %vm19585_vm0, %v17386_v50  ;;  %13154 = vmatprep.subr.bf16.mxu1 %v19531_v7  ;;  %v13302_v50 = vld [vmem:[%s18086_s13 + $0x38] sm:$0xff]  }
 0x6b7   : > { %13149 = vmatpush3.bf16.msra.mxu0 %v13299_v56  ;;  %13150 = vmatprep.mubr.msk.bf16.mxu0 %vm19580_vm12, %v19531_v7 }
 0x6b8   : > { %13160 = vmatprep.subr.bf16.mxu0 %v19531_v7 }
 0x6bc   : > { %13145 = vmatmul.mubr.msk.bf16.vlgmr.msra.gmra.mxu1 %vm19586_vm15, %v17393_v17  ;;  %v13303_v17 = vld [vmem:[%s18086_s13 + $0x40] sm:$0xff]   ;;  %vm19601_vm15 = vmmov %vm19585_vm0 }
 0x6bd   : > { %13155 = vmatpush3.bf16.msra.mxu1 %v13300_v22  ;;  %13156 = vmatprep.mubr.msk.bf16.mxu1 %vm19580_vm12, %v19531_v7 }
 0x6be   : > { %13151 = vmatmul.mubr.msk.bf16.vlgmr.msra.gmra.mxu0 %vm19587_vm8, %v17412_v26  ;;  %13166 = vmatprep.subr.bf16.mxu1 %v19531_v7  ;;  %v13304_v26 = vld [vmem:[%s18088_s15 + $0x8] sm:$0xff]   ;;  %vm19602_vm8 = vmmov %vm19585_vm0 }
 0x6bf   : > { %13161 = vmatpush3.bf16.msra.mxu0 %v13301_v44  ;;  %13162 = vmatprep.mubr.msk.bf16.mxu0 %vm19580_vm12, %v19531_v7 }
 0x6c0   : > { %13172 = vmatprep.subr.bf16.mxu0 %v19531_v7 }
 0x6c4   : > { %13157 = vmatmul.mubr.msk.bf16.vlgmr.msra.gmra.mxu1 %vm19588_vm6, %v17417_v31  ;;  %v13305_v31 = vld [vmem:[%s18088_s15] sm:$0xff]   ;;  %vm19603_vm6 = vmmov %vm19585_vm0 }
 0x6c5   : > { %13167 = vmatpush3.bf16.msra.mxu1 %v13302_v50  ;;  %13168 = vmatprep.mubr.msk.bf16.mxu1 %vm19580_vm12, %v19531_v7 }
 0x6c6   : > { %13163 = vmatmul.mubr.msk.bf16.vlgmr.msra.gmra.mxu0 %vm19589_vm10, %v17440_v30  ;;  %13178 = vmatprep.subr.bf16.mxu1 %v19531_v7  ;;  %vm19604_vm10 = vmmov %vm19585_vm0 }
 0x6c7   : > { %13173 = vmatpush3.bf16.msra.mxu0 %v13303_v17  ;;  %13174 = vmatprep.mubr.msk.bf16.mxu0 %vm19580_vm12, %v19531_v7 }
 0x6c8   : > { %13184 = vmatprep.subr.bf16.mxu0 %v19531_v7 }
 0x6cc   : > { %13169 = vmatmul.mubr.msk.bf16.vlgmr.msra.gmra.mxu1 %vm19590_vm5, %v17442_v33  ;;  %vm10117_vm5 = vcmask 326656  }
 0x6cd   : > { %13179 = vmatpush3.bf16.msra.mxu1 %v13304_v26  ;;  %13180 = vmatprep.mubr.msk.bf16.mxu1 %vm19580_vm12, %v19531_v7 }
 0x6ce   : > { %13175 = vmatmul.mubr.msk.bf16.vlgmr.msra.gmra.mxu0 %vm19591_vm14, %v17474_v49  ;;  %13190 = vmatprep.subr.bf16.mxu1 %v19531_v7  ;;  %vm10656_vm14 = vcmask 490496  }
 0x6cf   : > { %13185 = vmatpush3.bf16.msra.mxu0 %v13305_v31  ;;  %13186 = vmatprep.mubr.msk.bf16.mxu0 %vm19580_vm12, %v19531_v7 }
 0x6d0   : > { %13196 = vmatprep.subr.bf16.mxu0 %v19531_v7 }
 0x704   : > { %v8635_v30 = vpop.f32.mrf.mxu1 }
 0x706   : > { %v8685_v6 = vpop.f32.mrf.mxu0  ;;  %v12984_v43 = vpop.f32.mrf.mxu1 }
 0x707   : > { %v8686_v4 = vadd.f32 %v8685_v6, %v8635_v30 }
 0x708   : > { %v12990_v53 = vpop.f32.mrf.mxu0  ;;  %v8638_v33 = vpop.f32.mrf.mxu1 }
 0x70a   : > { %v8688_v16 = vpop.f32.mrf.mxu0  ;;  %v12985_v42 = vpop.f32.mrf.mxu1 }
 0x70b   : > { %v8689_v8 = vadd.f32 %v8688_v16, %v8638_v33 }
 0x70c   : > { %v12991_v49 = vpop.f32.mrf.mxu0  ;;  %v8742_v14 = vpop.f32.mrf.mxu1 }
 0x70d   : > { %v8749_v36 = vadd.f32 %v8742_v14, %v8686_v4 }
 0x70e   : > { %v8801_v60 = vpop.f32.mrf.mxu0  ;;  %v12996_v55 = vpop.f32.mrf.mxu1 }
 0x70f   : > { %v8808_v13 = vadd.f32 %v8801_v60, %v8749_v36  ;;  %v10659_v55 = vand.u32 1, %v19523_v9 }
 0x710   : > { %v13002_v18 = vpop.f32.mrf.mxu0  ;;  %v8745_v20 = vpop.f32.mrf.mxu1 }
 0x711   : > { %v8750_v57 = vadd.f32 %v8745_v20, %v8689_v8  ;;  %vm17851_vm1 = vcmp.ge.s32.totalorder %v10659_v55, 1  ;;  %vm17874_vm7 = vcmp.le.s32.totalorder %v10659_v55, 0 }
 0x712   : > { %v8804_v37 = vpop.f32.mrf.mxu0  ;;  %v12997_v3 = vpop.f32.mrf.mxu1 }
 0x713   : > { %v8809_v47 = vadd.f32 %v8804_v37, %v8750_v57 }
 0x714   : > { %v13003_v58 = vpop.f32.mrf.mxu0  ;;  %v8858_v27 = vpop.f32.mrf.mxu1 }
 0x715   : > { %v8865_v45 = vadd.f32 %v8858_v27, %v8808_v13 }
 0x716   : > { %v8917_v34 = vpop.f32.mrf.mxu0  ;;  %v13008_v15 = vpop.f32.mrf.mxu1 }
 0x717   : > { %v8924_v39 = vadd.f32 %v8917_v34, %v8865_v45  ;;  %v13306_v34 = vld [vmem:[%s18088_s15 + $0x10] sm:$0xff]  }
 0x718   : > { %v13014_v25 = vpop.f32.mrf.mxu0  ;;  %v8861_v63 = vpop.f32.mrf.mxu1 }
 0x719   : > { %v8866_v5 = vadd.f32 %v8861_v63, %v8809_v47  ;;  %v13307_v63 = vld [vmem:[%s18088_s15 + $0x18] sm:$0xff]  }
 0x71a   : > { %v8920_v48 = vpop.f32.mrf.mxu0  ;;  %v13009_v35 = vpop.f32.mrf.mxu1 }
 0x71b   : > { %v8925_v54 = vadd.f32 %v8920_v48, %v8866_v5 }
 0x71c   : > { %v13015_v12 = vpop.f32.mrf.mxu0  ;;  %v8976_v41 = vpop.f32.mrf.mxu1 }
 0x71d   : > { %v8983_v1 = vadd.f32 %v8976_v41, %v8924_v39 }
 0x71e   : > { %v9033_v24 = vpop.f32.mrf.mxu0  ;;  %v13020_v2 = vpop.f32.mrf.mxu1 }
 0x71f   : > { %v9040_v59 = vadd.f32 %v9033_v24, %v8983_v1 }
 0x720   : > { %v13026_v29 = vpop.f32.mrf.mxu0  ;;  %v8979_v10 = vpop.f32.mrf.mxu1 }
 0x721   : > { %v8984_v61 = vadd.f32 %v8979_v10, %v8925_v54  ;;  %v13308_v10 = vld [vmem:[%s18088_s15 + $0x20] sm:$0xff]  }
 0x722   : > { %v9036_v19 = vpop.f32.mrf.mxu0  ;;  %v13021_v23 = vpop.f32.mrf.mxu1 }
 0x723   : > { %v9041_v40 = vadd.f32 %v9036_v19, %v8984_v61  ;;  %v13309_v23 = vld [vmem:[%s18088_s15 + $0x28] sm:$0xff]  }
 0x724   : > { %v13027_v32 = vpop.f32.mrf.mxu0  ;;  %v9092_v52 = vpop.f32.mrf.mxu1 }
 0x725   : > { %v9099_v62 = vadd.f32 %v9092_v52, %v9040_v59 }
 0x726   : > { %v17810_v38 = vpop.f32.mrf.mxu0  ;;  %v13032_v28 = vpop.f32.mrf.mxu1 }
 0x727   : > { %v9108_v0 = vadd.f32 %v11666_v21, %v9099_v62 }
 0x728   : > { %v17812_v11 = vpop.f32.mrf.mxu0  ;;  %v9095_v46 = vpop.f32.mrf.mxu1 }
 0x729   : > { %v9110_v51 = vmax.f32 %v9108_v0, 0.0  ;;  %v9100_v56 = vadd.f32 %v9095_v46, %v9041_v40 }
 0x72a   : > { %v17814_v22 = vpop.f32.mrf.mxu0  ;;  %v13033_v44 = vpop.f32.mrf.mxu1 }
 0x72b   : > { %9112 = vst.msk [vmem:[#allocation9] sm:$0xff] %vm19592_vm4, %v9110_v51  ;;  %v9109_v50 = vadd.f32 %v11666_v21, %v9100_v56  ;;  %v13310_v56 = vld [vmem:[%s18088_s15 + $0x30] sm:$0xff]   ;;  %vm11162_vm4 = vcmask 322560  }
 0x72c   : > { %v17817_v17 = vpop.f32.mrf.mxu0  ;;  %v17819_v26 = vpop.f32.mrf.mxu1 }
 0x72d   : > { %v9111_v31 = vmax.f32 %v9109_v50, 0.0 }
 0x72e   : > { %v17821_v30 = vpop.f32.mrf.mxu0  ;;  %v17823_v6 = vpop.f32.mrf.mxu1 }
 0x72f   : > { %9113 = vst.msk [vmem:[#allocation9 + $0x8] sm:$0xff] %vm19593_vm9, %v9111_v31  ;;  %v13311_v31 = vld [vmem:[%s18088_s15 + $0x38] sm:$0xff]  }
 0x730   : > { %v17826_v43 = vpop.f32.mrf.mxu0  ;;  %v17828_v53 = vpop.f32.mrf.mxu1 }
 0x732   : > { %v17830_v33 = vpop.f32.mrf.mxu0  ;;  %v9116_v16 = vld [vmem:[#allocation9] sm:$0x1]  ;;  %v9119_v42 = vld [vmem:[#allocation9 + $0x2] sm:$0x1]  ;;  %v17832_v49 = vpop.f32.mrf.mxu1 }
 0x733   : > { %9118 = vst.msk [vmem:[#allocation10 + $0x3] sm:$0x1] %vm9117_vm11, %v9116_v16  ;;  %9120 = vst.msk [vmem:[#allocation10 + $0x4] sm:$0x1] %vm9117_vm11, %v9119_v42 }
 0x734   : > { %v17836_v14 = vpop.f32.mrf.mxu0  ;;  %v17838_v60 = vpop.f32.mrf.mxu1 }
 0x736   : > { %v17841_v18 = vpop.f32.mrf.mxu0  ;;  %v9121_v20 = vld [vmem:[#allocation9 + $0x8] sm:$0x1]  ;;  %v9123_v4 = vld [vmem:[#allocation9 + $0xa] sm:$0x1]  ;;  %v17843_v37 = vpop.f32.mrf.mxu1 }
 0x737   : > { %9122 = vst.msk [vmem:[#allocation10 + $0x5] sm:$0x1] %vm9117_vm11, %v9121_v20  ;;  %9124 = vst.msk [vmem:[#allocation10 + $0x6] sm:$0x1] %vm9117_vm11, %v9123_v4 }
 0x738   : > { %v17847_v3 = vpop.f32.mrf.mxu0  ;;  %v17849_v36 = vpop.f32.mrf.mxu1 }
 0x73a   : > { %v17855_v27 = vpop.f32.mrf.mxu0  ;;  %v17857_v9 = vpop.f32.mrf.mxu1  ;;  %v10668_v8 = vld [vmem:[#allocation10 + $0x1] sm:$0xf] }
 0x73b   : > { %v10660_v15 = vld [vmem:[#allocation10] sm:$0xf]  ;;  %v10671_v57 = vpack.c.bf16 %v10668_v8, %v10668_v8 }
 0x73c   : > { %v17862_v13 = vpop.f32.mrf.mxu0  ;;  %v10664_v25 = vsel %vm17851_vm1, %v10660_v15, 0.0  ;;  %v17869_v45 = vpop.f32.mrf.mxu1 }
 0x73d   : > { %v10667_v48 = vpack.c.bf16 %v10664_v25, %v10664_v25  ;;  %13181 = vmatmul.mubr.msk.bf16.vlgmr.msra.gmra.mxu1 %vm19596_vm13, %v10671_v57 }
 0x73e   : > { %v17871_v35 = vpop.f32.mrf.mxu0  ;;  %13191 = vmatpush3.bf16.msra.mxu1 %v13306_v34  ;;  %v17878_v12 = vpop.f32.mrf.mxu1  ;;  %v10770_v41 = vld [vmem:[#allocation10 + $0x2] sm:$0xf]  ;;  %13192 = vmatprep.mubr.msk.bf16.mxu1 %vm19580_vm12, %v19531_v7 }
 0x73f   : > { %13187 = vmatmul.mubr.msk.bf16.vlgmr.msra.gmra.mxu0 %vm19599_vm3, %v10667_v48  ;;  %13202 = vmatprep.subr.bf16.mxu1 %v19531_v7  ;;  %v10774_v24 = vsel %vm17874_vm7, %v10770_v41, 0.0  ;;  %v10828_v1 = vsel %vm17851_vm1, %v10770_v41, 0.0  ;;  %v10936_v21 = vld [vmem:[#allocation10 + $0x4] sm:$0xf] }
 0x740   : > { %v17881_v39 = vpop.f32.mrf.mxu0  ;;  %13197 = vmatpush3.bf16.msra.mxu0 %v13307_v63  ;;  %v17885_v5 = vpop.f32.mrf.mxu1  ;;  %13198 = vmatprep.mubr.msk.bf16.mxu0 %vm19580_vm12, %v19531_v7  ;;  %v10777_v19 = vpack.c.bf16 %v10774_v24, %v10774_v24  ;;  %v10831_v61 = vpack.c.bf16 %v10828_v1, %v10828_v1  ;;  %v10882_v40 = vld [vmem:[#allocation10 + $0x3] sm:$0xf]  ;;  %v10937_v46 = vsel %vm17874_vm7, %v10936_v21, 0.0  ;;  %v10991_v34 = vsel %vm17851_vm1, %v10936_v21, 0.0  ;;  %v13312_v63 = vld [vmem:[%s18088_s15 + $0x40] sm:$0xff]  }
 0x741   : > { %13208 = vmatprep.subr.bf16.mxu0 %v19531_v7  ;;  %v10885_v50 = vpack.c.bf16 %v10882_v40, %v10882_v40  ;;  %v10940_v42 = vpack.c.bf16 %v10937_v46, %v10937_v46  ;;  %v11045_v57 = vld [vmem:[#allocation10 + $0x5] sm:$0xf]  ;;  %v10994_v41 = vpack.c.bf16 %v10991_v34, %v10991_v34 }
 0x742   : > { %v17892_v2 = vpop.f32.mrf.mxu0  ;;  %v17897_v29 = vpop.f32.mrf.mxu1  ;;  %v11048_v1 = vpack.c.bf16 %v11045_v57, %v11045_v57 }
 0x744   : > { %v17902_v54 = vpop.f32.mrf.mxu0  ;;  %v17907_v59 = vpop.f32.mrf.mxu1 }
 0x745   : > { %13193 = vmatmul.mubr.msk.bf16.vlgmr.msra.gmra.mxu1 %vm19600_vm2, %v10777_v19 }
 0x746   : > { %v17909_v32 = vpop.f32.mrf.mxu0  ;;  %13203 = vmatpush3.bf16.msra.mxu1 %v13308_v10  ;;  %v17912_v52 = vpop.f32.mrf.mxu1  ;;  %13204 = vmatprep.mubr.msk.bf16.mxu1 %vm19580_vm12, %v19531_v7  ;;  %v11099_v10 = vld [vmem:[#allocation10 + $0x6] sm:$0xf] }
 0x747   : > { %13199 = vmatmul.mubr.msk.bf16.vlgmr.msra.gmra.mxu0 %vm19585_vm0, %v10831_v61  ;;  %13214 = vmatprep.subr.bf16.mxu1 %v19531_v7  ;;  %v9305_v61 = vadd.f32 %v17819_v26, %v17810_v38  ;;  %v11100_v40 = vsel %vm17874_vm7, %v11099_v10, 0.0 }
 0x748   : > { %v17915_v62 = vpop.f32.mrf.mxu0  ;;  %13209 = vmatpush3.bf16.msra.mxu0 %v13309_v23  ;;  %v17919_v28 = vpop.f32.mrf.mxu1  ;;  %13210 = vmatprep.mubr.msk.bf16.mxu0 %vm19580_vm12, %v19531_v7  ;;  %v11103_v34 = vpack.c.bf16 %v11100_v40, %v11100_v40 }
 0x749   : > { %13220 = vmatprep.subr.bf16.mxu0 %v19531_v7 }
 0x74a   : > { %v17924_v0 = vpop.f32.mrf.mxu0  ;;  %v17929_v51 = vpop.f32.mrf.mxu1 }
 0x74c   : > { %v17934_v44 = vpop.f32.mrf.mxu0  ;;  %v13088_v16 = vpop.f32.mrf.mxu1 }
 0x74d   : > { %13205 = vmatmul.mubr.msk.bf16.vlgmr.msra.gmra.mxu1 %vm19601_vm15, %v10885_v50  ;;  %v9434_v50 = vadd.f32 %v17841_v18, %v9305_v61 }
 0x74e   : > { %v17939_v55 = vpop.f32.mrf.mxu0  ;;  %13215 = vmatpush3.bf16.msra.mxu1 %v13310_v56  ;;  %v9732_v20 = vpop.f32.mrf.mxu1  ;;  %13216 = vmatprep.mubr.msk.bf16.mxu1 %vm19580_vm12, %v19531_v7  ;;  %v9297_v56 = vadd.f32 %v17823_v6, %v17812_v11  ;;  %v9300_v11 = vadd.f32 %v17832_v49, %v17817_v17  ;;  %v9313_v17 = vadd.f32 %v17843_v37, %v17826_v43 }
 0x74f   : > { %13211 = vmatmul.mubr.msk.bf16.vlgmr.msra.gmra.mxu0 %vm19602_vm8, %v10940_v42  ;;  %13226 = vmatprep.subr.bf16.mxu1 %v19531_v7  ;;  %v9547_v26 = vadd.f32 %v17869_v45, %v9434_v50 }
 0x750   : > { %v17943_v4 = vpop.f32.mrf.mxu0  ;;  %13221 = vmatpush3.bf16.msra.mxu0 %v13311_v31  ;;  %v13089_v8 = vpop.f32.mrf.mxu1  ;;  %13222 = vmatprep.mubr.msk.bf16.mxu0 %vm19580_vm12, %v19531_v7  ;;  %v9432_v38 = vadd.f32 %v17847_v3, %v9297_v56  ;;  %v9433_v3 = vadd.f32 %v17862_v13, %v9300_v11 }
 0x752   : > { %v17952_v15 = vpop.f32.mrf.mxu0  ;;  %v17954_v25 = vpop.f32.mrf.mxu1  ;;  %v9545_v18 = vadd.f32 %v17878_v12, %v9432_v38  ;;  %v9546_v12 = vadd.f32 %v17897_v29, %v9433_v3 }
 0x754   : > { %v17959_v48 = vpop.f32.mrf.mxu0  ;;  %v17961_v24 = vpop.f32.mrf.mxu1  ;;  %v9651_v43 = vadd.f32 %v17934_v44, %v9546_v12 }
 0x755   : > { %13217 = vmatmul.mubr.msk.bf16.vlgmr.msra.gmra.mxu1 %vm19603_vm6, %v10994_v41 }
 0x756   : > { %v13098_v58 = vpop.f32.mrf.mxu0  ;;  %13227 = vmatpush3.bf16.msra.mxu1 %v13312_v63  ;;  %v17964_v19 = vpop.f32.mrf.mxu1  ;;  %13228 = vmatprep.mubr.msk.bf16.mxu1 %vm19580_vm12, %v19531_v7  ;;  %v9308_v7 = vadd.f32 %v17828_v53, %v17814_v22  ;;  %vm19605_vm12 = vmmov %vm19585_vm0  ;;  %v9652_v63 = vadd.f32 %v17909_v32, %v9547_v26  ;;  %v9321_v22 = vadd.f32 %v17838_v60, %v17821_v30 }
 0x757   : > { %13223 = vmatmul.mubr.msk.bf16.vlgmr.msra.gmra.mxu0 %vm19604_vm10, %v11048_v1  ;;  %v9650_v1 = vadd.f32 %v17915_v62, %v9545_v18  ;;  %v9436_v62 = vadd.f32 %v17881_v39, %v9313_v17  ;;  %v9764_v44 = vadd.f32 %v17954_v25, %v9651_v43 }
 0x758   : > { %v9845_v23 = vpop.f32.mrf.mxu0  ;;  %v17971_v21 = vpop.f32.mrf.mxu1  ;;  %v9435_v6 = vadd.f32 %v17855_v27, %v9308_v7  ;;  %v9765_v10 = vadd.f32 %v13088_v16, %v9652_v63  ;;  %v9438_v49 = vadd.f32 %v17871_v35, %v9321_v22 }
 0x759   : > { %v9763_v60 = vadd.f32 %v9732_v20, %v9650_v1 }
 0x75a   : > { %v13099_v46 = vpop.f32.mrf.mxu0  ;;  %v17978_v31 = vpop.f32.mrf.mxu1  ;;  %v9548_v45 = vadd.f32 %v17885_v5, %v9435_v6  ;;  %v9878_v32 = vadd.f32 %v13098_v58, %v9765_v10  ;;  %v9324_v5 = vadd.f32 %v17849_v36, %v17830_v33  ;;  %v9551_v16 = vadd.f32 %v17907_v59, %v9438_v49  ;;  %v18014_v59 = vld [vmem:[%s18085_s12] ss:$0 sm:$0xff] }
 0x75b   : > { %v9876_v35 = vadd.f32 %v9845_v23, %v9763_v60  ;;  %v9549_v33 = vadd.f32 %v17912_v52, %v9436_v62 }
 0x75c   : > { %v9848_v42 = vpop.f32.mrf.mxu0  ;;  %v13108_v57 = vpop.f32.mrf.mxu1  ;;  %v9653_v30 = vadd.f32 %v17924_v0, %v9548_v45  ;;  %v9316_v0 = vadd.f32 %v17857_v9, %v17836_v14  ;;  %v9439_v20 = vadd.f32 %v17892_v2, %v9324_v5  ;;  %v9656_v36 = vadd.f32 %v17939_v55, %v9551_v16 }
 0x75d   : > { %13229 = vmatmul.mubr.msk.bf16.vlgmr.msra.gmra.mxu1 %vm19605_vm12, %v11103_v34  ;;  %v9983_v56 = vadd.f32 %v13108_v57, %v9878_v32  ;;  %v9654_v2 = vadd.f32 %v17943_v4, %v9549_v33  ;;  %v9877_v25 = vadd.f32 %v9848_v42, %v9764_v44 }
 0x75e   : > { %v13102_v47 = vpop.f32.mrf.mxu0  ;;  %v9950_v41 = vpop.f32.mrf.mxu1  ;;  %v9766_v37 = vadd.f32 %v13089_v8, %v9653_v30  ;;  %v9437_v14 = vadd.f32 %v17902_v54, %v9316_v0  ;;  %v9552_v9 = vadd.f32 %v17919_v28, %v9439_v20  ;;  %v9769_v52 = vadd.f32 %v17961_v24, %v9656_v36 }
 0x75f   : > { %v9981_v58 = vadd.f32 %v9950_v41, %v9876_v35  ;;  %v9767_v4 = vadd.f32 %v17964_v19, %v9654_v2 }
 0x760   : > { %v9861_v53 = vpop.f32.mrf.mxu0  ;;  %v13109_v61 = vpop.f32.mrf.mxu1  ;;  %v9879_v8 = vadd.f32 %v13099_v46, %v9766_v37  ;;  %v9550_v54 = vadd.f32 %v17929_v51, %v9437_v14  ;;  %v9657_v28 = vadd.f32 %v17952_v15, %v9552_v9  ;;  %v9882_v26 = vadd.f32 %v13102_v47, %v9769_v52 }
 0x761   : > { %v9880_v51 = vadd.f32 %v9861_v53, %v9767_v4 }
 0x762   : > { %v13103_v27 = vpop.f32.mrf.mxu0  ;;  %v9953_v13 = vpop.f32.mrf.mxu1  ;;  %v9984_v46 = vadd.f32 %v13109_v61, %v9879_v8  ;;  %v9655_v18 = vadd.f32 %v17959_v48, %v9550_v54  ;;  %v9770_v63 = vadd.f32 %v17971_v21, %v9657_v28 }
 0x763   : > { %v9982_v57 = vadd.f32 %v9953_v13, %v9877_v25 }
 0x764   : > { %v9864_v40 = vpop.f32.mrf.mxu0  ;;  %v13112_v29 = vpop.f32.mrf.mxu1  ;;  %v9768_v3 = vadd.f32 %v17978_v31, %v9655_v18  ;;  %v9883_v1 = vadd.f32 %v13103_v27, %v9770_v63 }
 0x765   : > { %v9987_v22 = vadd.f32 %v13112_v29, %v9882_v26 }
 0x766   : > { %v13118_v39 = vpop.f32.mrf.mxu0  ;;  %v9966_v50 = vpop.f32.mrf.mxu1  ;;  %v9881_v17 = vadd.f32 %v9864_v40, %v9768_v3 }
 0x767   : > { %v10096_v23 = vadd.f32 %v13118_v39, %v9983_v56  ;;  %v9985_v10 = vadd.f32 %v9966_v50, %v9880_v51 }
 0x768   : > { %v10063_v55 = vpop.f32.mrf.mxu0  ;;  %v13113_v38 = vpop.f32.mrf.mxu1 }
 0x769   : > { %v10111_v34 = vadd.f32 %v18014_v59, %v10096_v23  ;;  %v10094_v7 = vadd.f32 %v10063_v55, %v9981_v58  ;;  %v9988_v49 = vadd.f32 %v13113_v38, %v9883_v1 }
 0x76a   : > { %v13119_v24 = vpop.f32.mrf.mxu0  ;;  %v9969_v6 = vpop.f32.mrf.mxu1 }
 0x76b   : > { %10120 = vst.msk [vmem:[%s18024_s28 + $0x10] sm:$0xff] %vm10117_vm5, %v10111_v34  ;;  %v10109_v11 = vadd.f32 %v18014_v59, %v10094_v7  ;;  %v10097_v42 = vadd.f32 %v13119_v24, %v9984_v46  ;;  %v9986_v27 = vadd.f32 %v9969_v6, %v9881_v17 }
 0x76c   : > { %v10066_v41 = vpop.f32.mrf.mxu0  ;;  %v10181_v47 = vpop.f32.mrf.mxu1 }
 0x76d   : > { %10118 = vst.msk [vmem:[%s18024_s28] sm:$0xff] %vm10117_vm5, %v10109_v11  ;;  %v10112_v15 = vadd.f32 %v18014_v59, %v10097_v42  ;;  %v10095_v19 = vadd.f32 %v10066_v41, %v9982_v57 }
 0x76e   : > { %v13122_v45 = vpop.f32.mrf.mxu0  ;;  %v13128_v53 = vpop.f32.mrf.mxu1 }
 0x76f   : > { %10121 = vst.msk [vmem:[%s18024_s28 + $0x18] sm:$0xff] %vm10117_vm5, %v10112_v15  ;;  %v10110_v48 = vadd.f32 %v18014_v59, %v10095_v19  ;;  %v10100_v21 = vadd.f32 %v13122_v45, %v9987_v22  ;;  %v11731_v22 = vld [vmem:[%s18087_s14] ss:$0 sm:$0xff] }
 0x770   : > { %v10079_v61 = vpop.f32.mrf.mxu0  ;;  %v10184_v30 = vpop.f32.mrf.mxu1 }
 0x771   : > { %10119 = vst.msk [vmem:[%s18024_s28 + $0x8] sm:$0xff] %vm10117_vm5, %v10110_v48  ;;  %v10115_v12 = vadd.f32 %v18014_v59, %v10100_v21  ;;  %v10098_v31 = vadd.f32 %v10079_v61, %v9985_v10 }
 0x772   : > { %v13123_v60 = vpop.f32.mrf.mxu0  ;;  %v13129_v5 = vpop.f32.mrf.mxu1 }
 0x773   : > { %10124 = vst.msk [vmem:[%s18024_s28 + $0x30] sm:$0xff] %vm10117_vm5, %v10115_v12  ;;  %v10113_v32 = vadd.f32 %v18014_v59, %v10098_v31  ;;  %v10101_v13 = vadd.f32 %v13123_v60, %v9988_v49 }
 0x774   : > { %v10082_v62 = vpop.f32.mrf.mxu0  ;;  %v10231_v43 = vpop.f32.mrf.mxu1 }
 0x775   : > { %10122 = vst.msk [vmem:[%s18024_s28 + $0x20] sm:$0xff] %vm10117_vm5, %v10113_v32  ;;  %v10116_v16 = vadd.f32 %v18014_v59, %v10101_v13  ;;  %v10099_v40 = vadd.f32 %v10082_v62, %v9986_v27  ;;  %v10232_v36 = vadd.f32 %v10231_v43, %v10181_v47 }
 0x776   : > { %v10288_v37 = vpop.f32.mrf.mxu0  ;;  %v13134_v56 = vpop.f32.mrf.mxu1 }
 0x777   : > { %10125 = vst.msk [vmem:[%s18024_s28 + $0x38] sm:$0xff] %vm10117_vm5, %v10116_v16  ;;  %v10114_v35 = vadd.f32 %v18014_v59, %v10099_v40  ;;  %v10295_v23 = vadd.f32 %v10288_v37, %v10232_v36 }
 0x778   : > { %v13140_v29 = vpop.f32.mrf.mxu0  ;;  %v10234_v0 = vpop.f32.mrf.mxu1 }
 0x779   : > { %10123 = vst.msk [vmem:[%s18024_s28 + $0x28] sm:$0xff] %vm10117_vm5, %v10114_v35  ;;  %v10235_v50 = vadd.f32 %v10234_v0, %v10184_v30 }
 0x77a   : > { %v10291_v20 = vpop.f32.mrf.mxu0  ;;  %v13135_v33 = vpop.f32.mrf.mxu1 }
 0x77b   : > { %v10296_v59 = vadd.f32 %v10291_v20, %v10235_v50 }
 0x77c   : > { %v13141_v39 = vpop.f32.mrf.mxu0  ;;  %v10347_v44 = vpop.f32.mrf.mxu1 }
 0x77d   : > { %v10354_v2 = vadd.f32 %v10347_v44, %v10295_v23 }
 0x77e   : > { %v10404_v8 = vpop.f32.mrf.mxu0  ;;  %v13146_v58 = vpop.f32.mrf.mxu1 }
 0x77f   : > { %v10411_v34 = vadd.f32 %v10404_v8, %v10354_v2 }
 0x780   : > { %v13152_v14 = vpop.f32.mrf.mxu0  ;;  %v10350_v9 = vpop.f32.mrf.mxu1 }
 0x781   : > { %v10355_v7 = vadd.f32 %v10350_v9, %v10296_v59 }
 0x782   : > { %v10407_v52 = vpop.f32.mrf.mxu0  ;;  %v13147_v55 = vpop.f32.mrf.mxu1 }
 0x783   : > { %v10412_v26 = vadd.f32 %v10407_v52, %v10355_v7 }
 0x784   : > { %v13153_v25 = vpop.f32.mrf.mxu0  ;;  %v10463_v46 = vpop.f32.mrf.mxu1 }
 0x785   : > { %v10470_v28 = vadd.f32 %v10463_v46, %v10411_v34 }
 0x786   : > { %v10522_v38 = vpop.f32.mrf.mxu0  ;;  %v13158_v54 = vpop.f32.mrf.mxu1 }
 0x787   : > { %v10529_v42 = vadd.f32 %v10522_v38, %v10470_v28 }
 0x788   : > { %v13164_v4 = vpop.f32.mrf.mxu0  ;;  %v10466_v24 = vpop.f32.mrf.mxu1 }
 0x789   : > { %v10471_v6 = vadd.f32 %v10466_v24, %v10412_v26  ;;  %v11750_v4 = vld [vmem:[%s18089_s16] ss:$0 sm:$0xff] }
 0x78a   : > { %v10525_v57 = vpop.f32.mrf.mxu0  ;;  %v13159_v11 = vpop.f32.mrf.mxu1 }
 0x78b   : > { %v10530_v19 = vadd.f32 %v10525_v57, %v10471_v6 }
 0x78c   : > { %v13165_v18 = vpop.f32.mrf.mxu0  ;;  %v10579_v63 = vpop.f32.mrf.mxu1 }
 0x78d   : > { %v10586_v41 = vadd.f32 %v10579_v63, %v10529_v42 }
 0x78e   : > { %v10638_v51 = vpop.f32.mrf.mxu0  ;;  %v13170_v15 = vpop.f32.mrf.mxu1 }
 0x78f   : > { %v10645_v47 = vadd.f32 %v10638_v51, %v10586_v41 }
 0x790   : > { %v13176_v3 = vpop.f32.mrf.mxu0  ;;  %v10582_v45 = vpop.f32.mrf.mxu1 }
 0x791   : > { %v10654_v1 = vadd.f32 %v11731_v22, %v10645_v47  ;;  %v10587_v10 = vadd.f32 %v10582_v45, %v10530_v19 }
 0x792   : > { %v10641_v48 = vpop.f32.mrf.mxu0  ;;  %v13171_v21 = vpop.f32.mrf.mxu1 }
 0x793   : > { %10657 = vst.msk [vmem:[%s621_s24] sm:$0xff] %vm10656_vm14, %v10654_v1  ;;  %v10646_v53 = vadd.f32 %v10641_v48, %v10587_v10 }
 0x794   : > { %v13177_v61 = vpop.f32.mrf.mxu0 }
 0x795   : > { %v10655_v17 = vadd.f32 %v11731_v22, %v10646_v53 }
 0x797   : > { %10658 = vst.msk [vmem:[%s621_s24 + $0x8] sm:$0xff] %vm10656_vm14, %v10655_v17 }
 0x7fd   : > { %v10715_v49 = vpop.f32.mrf.mxu1 }
 0x7ff   : > { %v10764_v12 = vpop.f32.mrf.mxu0  ;;  %v13182_v31 = vpop.f32.mrf.mxu1 }
 0x800   : > { %v10765_v37 = vadd.f32 %v10764_v12, %v10715_v49 }
 0x801   : > { %v13188_v30 = vpop.f32.mrf.mxu0  ;;  %v10718_v60 = vpop.f32.mrf.mxu1 }
 0x803   : > { %v10767_v27 = vpop.f32.mrf.mxu0  ;;  %v13183_v32 = vpop.f32.mrf.mxu1 }
 0x805   : > { %v13189_v13 = vpop.f32.mrf.mxu0  ;;  %v10821_v5 = vpop.f32.mrf.mxu1 }
 0x806   : > { %v10827_v29 = vadd.f32 %v10821_v5, %v10765_v37 }
 0x807   : > { %v10875_v62 = vpop.f32.mrf.mxu0  ;;  %v13194_v16 = vpop.f32.mrf.mxu1 }
 0x808   : > { %v10881_v39 = vadd.f32 %v10875_v62, %v10827_v29 }
 0x809   : > { %v13200_v40 = vpop.f32.mrf.mxu0  ;;  %v10824_v43 = vpop.f32.mrf.mxu1 }
 0x80b   : > { %v10878_v35 = vpop.f32.mrf.mxu0  ;;  %v13195_v56 = vpop.f32.mrf.mxu1 }
 0x80d   : > { %v13201_v0 = vpop.f32.mrf.mxu0  ;;  %v10929_v20 = vpop.f32.mrf.mxu1 }
 0x80e   : > { %v10935_v58 = vadd.f32 %v10929_v20, %v10881_v39 }
 0x80f   : > { %v10984_v33 = vpop.f32.mrf.mxu0  ;;  %v13206_v36 = vpop.f32.mrf.mxu1 }
 0x810   : > { %v10990_v2 = vadd.f32 %v10984_v33, %v10935_v58 }
 0x811   : > { %v13212_v44 = vpop.f32.mrf.mxu0  ;;  %v10932_v8 = vpop.f32.mrf.mxu1 }
 0x813   : > { %v10987_v23 = vpop.f32.mrf.mxu0  ;;  %v13207_v50 = vpop.f32.mrf.mxu1 }
 0x815   : > { %v13213_v14 = vpop.f32.mrf.mxu0  ;;  %v11038_v9 = vpop.f32.mrf.mxu1 }
 0x816   : > { %v11044_v59 = vadd.f32 %v11038_v9, %v10990_v2 }
 0x817   : > { %v11092_v52 = vpop.f32.mrf.mxu0  ;;  %v13218_v55 = vpop.f32.mrf.mxu1 }
 0x818   : > { %v11098_v38 = vadd.f32 %v11092_v52, %v11044_v59 }
 0x819   : > { %v13224_v25 = vpop.f32.mrf.mxu0  ;;  %v11041_v46 = vpop.f32.mrf.mxu1 }
 0x81b   : > { %v11095_v34 = vpop.f32.mrf.mxu0  ;;  %v13219_v7 = vpop.f32.mrf.mxu1 }
 0x81d   : > { %v13225_v54 = vpop.f32.mrf.mxu0  ;;  %v11147_v28 = vpop.f32.mrf.mxu1 }
 0x81e   : > { %v11153_v24 = vadd.f32 %v11147_v28, %v11098_v38 }
 0x81f   : > { %v13230_v26 = vpop.f32.mrf.mxu1 }
 0x820   : > { %v11161_v57 = vadd.f32 %v11750_v4, %v11153_v24 }
 0x821   : > { %v11150_v11 = vpop.f32.mrf.mxu1 }
 0x822   : > { %11163 = vst.msk [vmem:[%s625_s29] sm:$0xf] %vm11162_vm4, %v11161_v57 }
 0x823   : > { %v13231_v42 = vpop.f32.mrf.mxu1 }
 0x824 PF: > { %s30_s0 = sadd.s32 1, %s13319_s0  }
 0x825   : > { %p27_p4 = scmp.ge.s32.totalorder %s30_s0, 4  }
 0x827   :  { %29 = sbr.rel (!%p27_p4) target bundleno = 5 (0x5), region = 189 }

</bundles_post_ra>
